<compile_context>
chip_gen: v6e
topology: v6e:2x2x1
jax: 0.10.0
libtpu: 0.0.40
codegen_flags: <defaults>
</compile_context>

<pallas_src>
import numpy as np
import jax
import jax.numpy as jnp
from jax.experimental import pallas as pl
from jax.experimental.pallas import tpu as pltpu

# ----------------------- configuration (small shapes) -----------------------
B = 2              # batch (query/support pairs)
S = 1              # support shots (forward's .squeeze(1) implies s == 1)
C = 3              # image channels
H = W = 16         # image spatial size
PATCH = 4          # patch size
D = 32             # embed dim
NHEADS = 4
DHEAD = D // NHEADS
MLP = 2 * D
DEPTH = 2
GH, GW = H // PATCH, W // PATCH
NTOK = GH * GW          # patch tokens per image
T = NTOK + 1            # + 1 extra (cls) token appended at the END
NB = 2 * B              # total images: queries + masked supports
CP2 = C * PATCH * PATCH
CP2PAD = 128            # patch feature dim padded to one full lane group
SLAB_W = 256            # packed parameter slab lane width (multiple of 128)


# --------------------------- packed parameter slab ---------------------------
def _slab_layout():
    entries = [("patch_w", CP2PAD, D), ("tok_bias", NB * T, D), ("misc", 8, D)]
    for l in range(DEPTH):
        entries += [(f"blk{l}_vec", 8, 3 * D), (f"blk{l}_qkv_w", D, 3 * D),
                    (f"blk{l}_proj_w", D, D), (f"blk{l}_fc1_w", D, MLP),
                    (f"blk{l}_fc2_w", MLP, D)]
    entries += [("dec_q_w", D, D), ("dec_p_w", D, D), ("ut", NTOK, H * W)]
    off, shapes, r = {}, {}, 0
    for name, h, w in entries:
        off[name] = r
        shapes[name] = (h, w)
        r += h + ((-h) % 8)          # keep every block 8-row aligned
    return off, shapes, r


SLAB_OFF, SLAB_SHAPES, SLAB_ROWS = _slab_layout()


def build_slab(params):
    slab = np.zeros((SLAB_ROWS, SLAB_W), np.float32)
    for name, (h, w) in SLAB_SHAPES.items():
        slab[SLAB_OFF[name]:SLAB_OFF[name] + h, :w] = np.asarray(params[name],
                                                                 np.float32)
    return jnp.asarray(slab)


# ------------------------------ fused kernel --------------------------------
def make_kernel(pps):
    """pps = query/support pairs handled per grid step."""
    NIMG = 2 * pps          # images per step (interleaved: q0, s0, q1, s1, ...)
    NT = NIMG * T           # tokens per step
    NHNT = NHEADS * NT      # block-diagonal attention width
    off = SLAB_OFF

    def kernel(patches_ref, slab_ref, o_ref):
        f32 = jnp.float32
        inv_sqrt_dh = 1.0 / float(np.sqrt(DHEAD))
        inv_sqrt_d = 1.0 / float(np.sqrt(D))

        def ln(x, g, b):  # timm ViT LayerNorm (eps=1e-6)
            mu = jnp.mean(x, axis=-1, keepdims=True)
            var = jnp.mean((x - mu) * (x - mu), axis=-1, keepdims=True)
            return (x - mu) * jax.lax.rsqrt(var + 1e-6) * g + b

        def gelu(x):
            # TODO(synk): tanh-approx GELU; nn.GELU default is the exact erf form.
            return 0.5 * x * (1.0 + jnp.tanh(0.7978845608028654 *
                                             (x + 0.044715 * x * x * x)))

        def iota(shape, axis):
            return jax.lax.broadcasted_iota(jnp.int32, shape, axis)

        def seg_id(idx, seg, nseg):
            # block id of `idx` w.r.t. segments of length `seg`, via thresholds
            # (avoids non-power-of-two integer division).
            out = jnp.zeros_like(idx)
            for k in range(1, nseg):
                out = out + (idx >= k * seg).astype(jnp.int32)
            return out

        # ---- constant masks for block-diagonal (per-head, per-image) attention ----
        hd = seg_id(iota((D, NHNT), 0), DHEAD, NHEADS)
        hc = seg_id(iota((D, NHNT), 1), NT, NHEADS)
        mask_k = (hd == hc).astype(f32)                        # (D, NHNT)
        hr = seg_id(iota((NHNT, D), 0), NT, NHEADS)
        hd2 = seg_id(iota((NHNT, D), 1), DHEAD, NHEADS)
        mask_v = (hr == hd2).astype(f32)                       # (NHNT, D)
        qi = seg_id(iota((NT, NHNT), 0), T, NIMG)              # image of query tok
        kc = iota((NT, NHNT), 1)
        kt = kc - seg_id(kc, NT, NHEADS) * NT                  # key token within head blk
        ki = seg_id(kt, T, NIMG)                               # image of key token
        img_mask = (qi == ki).astype(f32)                      # (NT, NHNT)
        ones_seg = (seg_id(iota((NHNT, NHEADS), 0), NT, NHEADS)
                    == iota((NHNT, NHEADS), 1)).astype(f32)    # (NHNT, NHEADS)
        head_expand = (iota((NHEADS, D), 0)
                       == seg_id(iota((NHEADS, D), 1), DHEAD, NHEADS)).astype(f32)

        # ---- patch embed: x = patches @ W_patch + (pos + patch_b | pos + cls) ----
        patch_w = slab_ref[off["patch_w"]:off["patch_w"] + CP2PAD, 0:D]
        tok_bias = slab_ref[off["tok_bias"]:off["tok_bias"] + NT, 0:D]
        px = patches_ref[0]                                    # (NT, 128)
        x = jnp.dot(px, patch_w, preferred_element_type=f32) + tok_bias  # (NT, D)

        # ---- transformer blocks (batched over every image in the step) ----
        for l in range(DEPTH):
            vo = off[f"blk{l}_vec"]
            ln1_g = slab_ref[vo + 0:vo + 1, 0:D]
            ln1_b = slab_ref[vo + 1:vo + 2, 0:D]
            ln2_g = slab_ref[vo + 2:vo + 3, 0:D]
            ln2_b = slab_ref[vo + 3:vo + 4, 0:D]
            proj_b = slab_ref[vo + 4:vo + 5, 0:D]
            fc2_b = slab_ref[vo + 5:vo + 6, 0:D]
            qkv_b = slab_ref[vo + 6:vo + 7, 0:3 * D]
            fc1_b = slab_ref[vo + 7:vo + 8, 0:MLP]
            qo, po = off[f"blk{l}_qkv_w"], off[f"blk{l}_proj_w"]
            f1, f2 = off[f"blk{l}_fc1_w"], off[f"blk{l}_fc2_w"]
            qkv_w = slab_ref[qo:qo + D, 0:3 * D]
            proj_w = slab_ref[po:po + D, 0:D]
            fc1_w = slab_ref[f1:f1 + D, 0:MLP]
            fc2_w = slab_ref[f2:f2 + MLP, 0:D]

            # --- MHSA: one QKV matmul, block-diagonal K/V over heads, image mask ---
            h = ln(x, ln1_g, ln1_b)
            qkv = jnp.dot(h, qkv_w, preferred_element_type=f32) + qkv_b   # (NT, 3D)
            q = qkv[:, 0:D]
            k = qkv[:, D:2 * D]
            v = qkv[:, 2 * D:3 * D]
            k_bd = jnp.concatenate([k.T] * NHEADS, axis=1) * mask_k       # (D, NHNT)
            v_bd = jnp.concatenate([v] * NHEADS, axis=0) * mask_v         # (NHNT, D)
            s = jnp.dot(q, k_bd, preferred_element_type=f32) * inv_sqrt_dh
            # global row max is a valid per-block softmax stabilizer (same constant
            # appears in numerator and denominator of every head block).
            m = jnp.max(s, axis=-1, keepdims=True)
            p = jnp.exp(s - m) * img_mask                                 # (NT, NHNT)
            denom = jnp.dot(p, ones_seg, preferred_element_type=f32)      # (NT, NHEADS)
            av = jnp.dot(p, v_bd, preferred_element_type=f32)             # (NT, D)
            inv = pl.reciprocal(
                jnp.dot(denom, head_expand, preferred_element_type=f32), approx=True)
            av = av * inv
            x = x + jnp.dot(av, proj_w, preferred_element_type=f32) + proj_b

            # --- MLP + residual ---
            h2 = ln(x, ln2_g, ln2_b)
            h2 = gelu(jnp.dot(h2, fc1_w, preferred_element_type=f32) + fc1_b)
            x = x + jnp.dot(h2, fc2_w, preferred_element_type=f32) + fc2_b

        # ---- final LN ----
        mo = off["misc"]
        lnf_g = slab_ref[mo + 0:mo + 1, 0:D]
        lnf_b = slab_ref[mo + 1:mo + 2, 0:D]
        dln_g = slab_ref[mo + 2:mo + 3, 0:D]
        dln_b = slab_ref[mo + 3:mo + 4, 0:D]
        dq_b = slab_ref[mo + 4:mo + 5, 0:D]
        dp_b = slab_ref[mo + 5:mo + 6, 0:D]
        feats = ln(x, lnf_g, lnf_b)                                       # (NT, D)

        # ---- decoder (prototype correlation), batched over pairs ----
        dec_q_w = slab_ref[off["dec_q_w"]:off["dec_q_w"] + D, 0:D]
        dec_p_w = slab_ref[off["dec_p_w"]:off["dec_p_w"] + D, 0:D]
        # image 2j = query of pair j, image 2j+1 = its masked support; drop cls row.
        qf_list = [feats[(2 * j) * T:(2 * j) * T + NTOK, :] for j in range(pps)]
        sf_list = [feats[(2 * j + 1) * T:(2 * j + 1) * T + NTOK, :] for j in range(pps)]
        qf_all = qf_list[0] if pps == 1 else jnp.concatenate(qf_list, axis=0)
        protos = (jnp.mean(sf_list[0], axis=0, keepdims=True) if pps == 1 else
                  jnp.concatenate([jnp.mean(sf, axis=0, keepdims=True)
                                   for sf in sf_list], axis=0))           # (pps, D)
        qp = jnp.dot(ln(qf_all, dln_g, dln_b), dec_q_w,
                     preferred_element_type=f32) + dq_b                   # (pps*NTOK, D)
        pp = jnp.dot(ln(protos, dln_g, dln_b), dec_p_w,
                     preferred_element_type=f32) + dp_b                   # (pps, D)
        sc_list = []
        for j in range(pps):
            sc_list.append(jax.lax.dot_general(
                pp[j:j + 1, :], qp[j * NTOK:(j + 1) * NTOK, :],
                (((1,), (1,)), ((), ())), preferred_element_type=f32))    # (1, NTOK)
        scores = (sc_list[0] if pps == 1 else
                  jnp.concatenate(sc_list, axis=0)) * inv_sqrt_d          # (pps, NTOK)

        # ---- bilinear upsample as one matmul + sigmoid; lane-dense (pps, 256) store ----
        ut = slab_ref[off["ut"]:off["ut"] + NTOK, 0:H * W]                # (NTOK, H*W)
        y = jnp.dot(scores, ut, preferred_element_type=f32)               # (pps, H*W)
        o_ref[0] = 0.5 * (1.0 + jnp.tanh(0.5 * y))   # == sigmoid, EUP slot, in [0,1]

    return kernel


# ------------------------------ glue / model --------------------------------
def bilinear_matrix(out_size, in_size):
    # F.interpolate(mode='bilinear', align_corners=False) as a (out, in) matrix
    scale = in_size / out_size
    a = np.zeros((out_size, in_size), dtype=np.float32)
    for i in range(out_size):
        src = (i + 0.5) * scale - 0.5
        src = max(src, 0.0)
        i0 = min(int(np.floor(src)), in_size - 1)
        i1 = min(i0 + 1, in_size - 1)
        frac = src - i0
        a[i, i0] += 1.0 - frac
        a[i, i1] += frac
    return a


def init_params(key):
    keys = jax.random.split(key, 64)
    kit = iter(keys)

    def nrm(shape, scale=0.02):
        return (scale * jax.random.normal(next(kit), shape)).astype(jnp.float32)

    params = {}
    params["patch_w"] = jnp.zeros((CP2PAD, D), jnp.float32).at[:CP2].set(nrm((CP2, D)))
    patch_b = nrm((D,))
    cls_token = nrm((D,))
    pos_embed = nrm((T, D))
    # fold patch bias / cls token into one additive (T, D) table, tiled per image:
    #   rows [0, NTOK): pos + patch_b ; row NTOK (appended cls slot): pos + cls
    # TODO(synk): pretrained timm ViTs place cls first; row ordering would need a permute.
    tok = pos_embed + jnp.concatenate(
        [jnp.broadcast_to(patch_b, (NTOK, D)), cls_token[None, :]], axis=0)
    params["tok_bias"] = jnp.tile(tok, (NB, 1))                          # (NB*T, D)

    ones = jnp.ones((D,), jnp.float32)
    zeros = jnp.zeros((D,), jnp.float32)
    params["misc"] = jnp.stack(
        [ones, zeros, ones, zeros, nrm((D,)), nrm((D,)), zeros, zeros], 0)

    def pad_row(v, w=3 * D):
        return jnp.pad(v, (0, w - v.shape[0]))

    for l in range(DEPTH):
        qkv_b, proj_b = nrm((3 * D,)), nrm((D,))
        fc1_b, fc2_b = nrm((MLP,)), nrm((D,))
        params[f"blk{l}_vec"] = jnp.stack(
            [pad_row(ones), pad_row(zeros), pad_row(ones), pad_row(zeros),
             pad_row(proj_b), pad_row(fc2_b), qkv_b, pad_row(fc1_b)], 0)
        params[f"blk{l}_qkv_w"] = nrm((D, 3 * D))
        params[f"blk{l}_proj_w"] = nrm((D, D))
        params[f"blk{l}_fc1_w"] = nrm((D, MLP))
        params[f"blk{l}_fc2_w"] = nrm((MLP, D))

    params["dec_q_w"] = nrm((D, D))
    params["dec_p_w"] = nrm((D, D))

    # combined bilinear-upsample matrix U^T with U[h*W+w, gh*GW+gw] = Ah[h,gh]*Aw[w,gw]
    ah = bilinear_matrix(H, GH)
    aw = bilinear_matrix(W, GW)
    params["ut"] = jnp.asarray(np.kron(ah, aw).T)                        # (NTOK, H*W)
    return params


def patchify(imgs):
    # (n, C, H, W) NCHW -> (n, NTOK, C*PATCH*PATCH), matching conv(stride=PATCH)
    n = imgs.shape[0]
    x = imgs.reshape(n, C, GH, PATCH, GW, PATCH)
    x = x.transpose(0, 2, 4, 1, 3, 5).reshape(n, NTOK, CP2)
    return x


def pick_pairs_per_step(batch):
    # v7x has 2 TensorCores per chip -> one pair per (parallel) grid step;
    # single-TC v5e/v6e keep all pairs in one step (bigger matmuls, no step overhead).
    try:
        kind = jax.devices()[0].device_kind.lower()
    except Exception:
        kind = ""
    return 1 if "v7" in kind else batch


def fssegmenter_forward(query_img, support_imgs, support_masks, slab, *,
                        pairs_per_step):
    b = query_img.shape[0]
    pps = pairs_per_step
    num_steps = b // pps
    nimg = 2 * pps
    nt = nimg * T

    # support masking + interleaved stacking [q0, s0, q1, s1, ...] (layout glue)
    masked_sup = jnp.squeeze(support_imgs * support_masks[:, :, None, :, :], axis=1)
    imgs = jnp.stack([query_img, masked_sup], axis=1).reshape(2 * b, C, H, W)
    patches = patchify(imgs)                                             # (2b, NTOK, CP2)
    # append the all-zero cls slot row and pad features to 128 lanes (lane-dense DMA)
    patches = jnp.pad(patches, ((0, 0), (0, 1), (0, CP2PAD - CP2)))      # (2b, T, 128)
    patches = patches.reshape(num_steps, nt, CP2PAD)

    out = pl.pallas_call(
        make_kernel(pps),
        out_shape=jax.ShapeDtypeStruct((num_steps, pps, H * W), jnp.float32),
        grid=(num_steps,),
        in_specs=[pl.BlockSpec((1, nt, CP2PAD), lambda i: (i, 0, 0)),
                  pl.BlockSpec((SLAB_ROWS, SLAB_W), lambda i: (0, 0))],
        out_specs=pl.BlockSpec((1, pps, H * W), lambda i: (i, 0, 0)),
        compiler_params=pltpu.CompilerParams(dimension_semantics=("parallel",)),
        cost_estimate=pl.CostEstimate(flops=8_000_000, transcendentals=50_000,
                                      bytes_accessed=800_000),
    )(patches, slab)
    return out.reshape(b, H, W)


# TODO(synk): the original uses a pretrained timm backbone and an externally
# supplied decoder module; both are replaced by deterministic synthetic params.

if __name__ == "__main__":
    key = jax.random.PRNGKey(0)
    kp, k1, k2, k3 = jax.random.split(key, 4)
    params = init_params(kp)
    slab = build_slab(params)

    query_img = jax.random.normal(k1, (B, C, H, W), jnp.float32)
    support_imgs = jax.random.normal(k2, (B, S, C, H, W), jnp.float32)
    support_masks = (jax.random.uniform(k3, (B, S, H, W)) > 0.5).astype(jnp.float32)

    pps = pick_pairs_per_step(B)
    fwd = jax.jit(fssegmenter_forward, static_argnames=("pairs_per_step",))
    out = fwd(query_img, support_imgs, support_masks, slab, pairs_per_step=pps)
    out = jax.block_until_ready(out)

    assert out.shape == (B, H, W) and out.dtype == jnp.float32
    assert bool(jnp.all(jnp.isfinite(out)))
    assert bool(jnp.all((out >= 0) & (out <= 1)))
    print("KERNEL_OK")
</pallas_src>

<mosaic_0001>
module attributes {stable_mosaic.version = 11 : i64} {
  func.func @kernel(%arg0: i32, %arg1: memref<1x68x128xf32, #tpu.memory_space<vmem>>, %arg2: memref<624x256xf32, #tpu.memory_space<vmem>>, %arg3: memref<1x2x256xf32, #tpu.memory_space<vmem>>) attributes {dimension_semantics = [#tpu.dimension_semantics<parallel>], iteration_bounds = array<i64: 1>, scalar_prefetch = 0 : i64, scratch_operands = 0 : i64, tpu.core_type = #tpu.core_type<tc>, window_params = [{transform_indices = @transform_0, window_bounds = array<i64: 1, 68, 128>}, {pipeline_mode = #tpu.pipeline_mode<synchronous>, transform_indices = @transform_1, window_bounds = array<i64: 624, 256>}, {transform_indices = @transform_2, window_bounds = array<i64: 1, 2, 256>}]} {
    %0 = tpu.iota {dimensions = array<i32: 0>} : vector<32x272xi32>
    %c0_i32 = arith.constant 0 : i32
    %1 = vector.broadcast %c0_i32 : i32 to vector<32x272xi32>
    %c8_i32 = arith.constant 8 : i32
    %2 = vector.broadcast %c8_i32 : i32 to vector<32x272xi32>
    %3 = arith.cmpi sge, %0, %2 : vector<32x272xi32>
    %4 = arith.extui %3 : vector<32x272xi1> to vector<32x272xi32>
    %5 = arith.addi %1, %4 : vector<32x272xi32>
    %c16_i32 = arith.constant 16 : i32
    %6 = vector.broadcast %c16_i32 : i32 to vector<32x272xi32>
    %7 = arith.cmpi sge, %0, %6 : vector<32x272xi32>
    %8 = arith.extui %7 : vector<32x272xi1> to vector<32x272xi32>
    %9 = arith.addi %5, %8 : vector<32x272xi32>
    %c24_i32 = arith.constant 24 : i32
    %10 = vector.broadcast %c24_i32 : i32 to vector<32x272xi32>
    %11 = arith.cmpi sge, %0, %10 : vector<32x272xi32>
    %12 = arith.extui %11 : vector<32x272xi1> to vector<32x272xi32>
    %13 = arith.addi %9, %12 : vector<32x272xi32>
    %14 = tpu.iota {dimensions = array<i32: 1>} : vector<32x272xi32>
    %c0_i32_0 = arith.constant 0 : i32
    %15 = vector.broadcast %c0_i32_0 : i32 to vector<32x272xi32>
    %c68_i32 = arith.constant 68 : i32
    %16 = vector.broadcast %c68_i32 : i32 to vector<32x272xi32>
    %17 = arith.cmpi sge, %14, %16 : vector<32x272xi32>
    %18 = arith.extui %17 : vector<32x272xi1> to vector<32x272xi32>
    %19 = arith.addi %15, %18 : vector<32x272xi32>
    %c136_i32 = arith.constant 136 : i32
    %20 = vector.broadcast %c136_i32 : i32 to vector<32x272xi32>
    %21 = arith.cmpi sge, %14, %20 : vector<32x272xi32>
    %22 = arith.extui %21 : vector<32x272xi1> to vector<32x272xi32>
    %23 = arith.addi %19, %22 : vector<32x272xi32>
    %c204_i32 = arith.constant 204 : i32
    %24 = vector.broadcast %c204_i32 : i32 to vector<32x272xi32>
    %25 = arith.cmpi sge, %14, %24 : vector<32x272xi32>
    %26 = arith.extui %25 : vector<32x272xi1> to vector<32x272xi32>
    %27 = arith.addi %23, %26 : vector<32x272xi32>
    %28 = arith.cmpi eq, %13, %27 : vector<32x272xi32>
    %29 = arith.extui %28 : vector<32x272xi1> to vector<32x272xi32>
    %30 = arith.sitofp %29 : vector<32x272xi32> to vector<32x272xf32>
    %31 = tpu.iota {dimensions = array<i32: 0>} : vector<272x32xi32>
    %c0_i32_1 = arith.constant 0 : i32
    %32 = vector.broadcast %c0_i32_1 : i32 to vector<272x32xi32>
    %c68_i32_2 = arith.constant 68 : i32
    %33 = vector.broadcast %c68_i32_2 : i32 to vector<272x32xi32>
    %34 = arith.cmpi sge, %31, %33 : vector<272x32xi32>
    %35 = arith.extui %34 : vector<272x32xi1> to vector<272x32xi32>
    %36 = arith.addi %32, %35 : vector<272x32xi32>
    %c136_i32_3 = arith.constant 136 : i32
    %37 = vector.broadcast %c136_i32_3 : i32 to vector<272x32xi32>
    %38 = arith.cmpi sge, %31, %37 : vector<272x32xi32>
    %39 = arith.extui %38 : vector<272x32xi1> to vector<272x32xi32>
    %40 = arith.addi %36, %39 : vector<272x32xi32>
    %c204_i32_4 = arith.constant 204 : i32
    %41 = vector.broadcast %c204_i32_4 : i32 to vector<272x32xi32>
    %42 = arith.cmpi sge, %31, %41 : vector<272x32xi32>
    %43 = arith.extui %42 : vector<272x32xi1> to vector<272x32xi32>
    %44 = arith.addi %40, %43 : vector<272x32xi32>
    %45 = tpu.iota {dimensions = array<i32: 1>} : vector<272x32xi32>
    %c0_i32_5 = arith.constant 0 : i32
    %46 = vector.broadcast %c0_i32_5 : i32 to vector<272x32xi32>
    %c8_i32_6 = arith.constant 8 : i32
    %47 = vector.broadcast %c8_i32_6 : i32 to vector<272x32xi32>
    %48 = arith.cmpi sge, %45, %47 : vector<272x32xi32>
    %49 = arith.extui %48 : vector<272x32xi1> to vector<272x32xi32>
    %50 = arith.addi %46, %49 : vector<272x32xi32>
    %c16_i32_7 = arith.constant 16 : i32
    %51 = vector.broadcast %c16_i32_7 : i32 to vector<272x32xi32>
    %52 = arith.cmpi sge, %45, %51 : vector<272x32xi32>
    %53 = arith.extui %52 : vector<272x32xi1> to vector<272x32xi32>
    %54 = arith.addi %50, %53 : vector<272x32xi32>
    %c24_i32_8 = arith.constant 24 : i32
    %55 = vector.broadcast %c24_i32_8 : i32 to vector<272x32xi32>
    %56 = arith.cmpi sge, %45, %55 : vector<272x32xi32>
    %57 = arith.extui %56 : vector<272x32xi1> to vector<272x32xi32>
    %58 = arith.addi %54, %57 : vector<272x32xi32>
    %59 = arith.cmpi eq, %44, %58 : vector<272x32xi32>
    %60 = arith.extui %59 : vector<272x32xi1> to vector<272x32xi32>
    %61 = arith.sitofp %60 : vector<272x32xi32> to vector<272x32xf32>
    %62 = tpu.iota {dimensions = array<i32: 0>} : vector<68x272xi32>
    %c0_i32_9 = arith.constant 0 : i32
    %63 = vector.broadcast %c0_i32_9 : i32 to vector<68x272xi32>
    %c17_i32 = arith.constant 17 : i32
    %64 = vector.broadcast %c17_i32 : i32 to vector<68x272xi32>
    %65 = arith.cmpi sge, %62, %64 : vector<68x272xi32>
    %66 = arith.extui %65 : vector<68x272xi1> to vector<68x272xi32>
    %67 = arith.addi %63, %66 : vector<68x272xi32>
    %c34_i32 = arith.constant 34 : i32
    %68 = vector.broadcast %c34_i32 : i32 to vector<68x272xi32>
    %69 = arith.cmpi sge, %62, %68 : vector<68x272xi32>
    %70 = arith.extui %69 : vector<68x272xi1> to vector<68x272xi32>
    %71 = arith.addi %67, %70 : vector<68x272xi32>
    %c51_i32 = arith.constant 51 : i32
    %72 = vector.broadcast %c51_i32 : i32 to vector<68x272xi32>
    %73 = arith.cmpi sge, %62, %72 : vector<68x272xi32>
    %74 = arith.extui %73 : vector<68x272xi1> to vector<68x272xi32>
    %75 = arith.addi %71, %74 : vector<68x272xi32>
    %76 = tpu.iota {dimensions = array<i32: 1>} : vector<68x272xi32>
    %c0_i32_10 = arith.constant 0 : i32
    %77 = vector.broadcast %c0_i32_10 : i32 to vector<68x272xi32>
    %c68_i32_11 = arith.constant 68 : i32
    %78 = vector.broadcast %c68_i32_11 : i32 to vector<68x272xi32>
    %79 = arith.cmpi sge, %76, %78 : vector<68x272xi32>
    %80 = arith.extui %79 : vector<68x272xi1> to vector<68x272xi32>
    %81 = arith.addi %77, %80 : vector<68x272xi32>
    %c136_i32_12 = arith.constant 136 : i32
    %82 = vector.broadcast %c136_i32_12 : i32 to vector<68x272xi32>
    %83 = arith.cmpi sge, %76, %82 : vector<68x272xi32>
    %84 = arith.extui %83 : vector<68x272xi1> to vector<68x272xi32>
    %85 = arith.addi %81, %84 : vector<68x272xi32>
    %c204_i32_13 = arith.constant 204 : i32
    %86 = vector.broadcast %c204_i32_13 : i32 to vector<68x272xi32>
    %87 = arith.cmpi sge, %76, %86 : vector<68x272xi32>
    %88 = arith.extui %87 : vector<68x272xi1> to vector<68x272xi32>
    %89 = arith.addi %85, %88 : vector<68x272xi32>
    %c68_i32_14 = arith.constant 68 : i32
    %90 = vector.broadcast %c68_i32_14 : i32 to vector<68x272xi32>
    %91 = arith.muli %89, %90 : vector<68x272xi32>
    %92 = arith.subi %76, %91 : vector<68x272xi32>
    %c0_i32_15 = arith.constant 0 : i32
    %93 = vector.broadcast %c0_i32_15 : i32 to vector<68x272xi32>
    %c17_i32_16 = arith.constant 17 : i32
    %94 = vector.broadcast %c17_i32_16 : i32 to vector<68x272xi32>
    %95 = arith.cmpi sge, %92, %94 : vector<68x272xi32>
    %96 = arith.extui %95 : vector<68x272xi1> to vector<68x272xi32>
    %97 = arith.addi %93, %96 : vector<68x272xi32>
    %c34_i32_17 = arith.constant 34 : i32
    %98 = vector.broadcast %c34_i32_17 : i32 to vector<68x272xi32>
    %99 = arith.cmpi sge, %92, %98 : vector<68x272xi32>
    %100 = arith.extui %99 : vector<68x272xi1> to vector<68x272xi32>
    %101 = arith.addi %97, %100 : vector<68x272xi32>
    %c51_i32_18 = arith.constant 51 : i32
    %102 = vector.broadcast %c51_i32_18 : i32 to vector<68x272xi32>
    %103 = arith.cmpi sge, %92, %102 : vector<68x272xi32>
    %104 = arith.extui %103 : vector<68x272xi1> to vector<68x272xi32>
    %105 = arith.addi %101, %104 : vector<68x272xi32>
    %106 = arith.cmpi eq, %75, %105 : vector<68x272xi32>
    %107 = arith.extui %106 : vector<68x272xi1> to vector<68x272xi32>
    %108 = arith.sitofp %107 : vector<68x272xi32> to vector<68x272xf32>
    %109 = tpu.iota {dimensions = array<i32: 0>} : vector<272x4xi32>
    %c0_i32_19 = arith.constant 0 : i32
    %110 = vector.broadcast %c0_i32_19 : i32 to vector<272x4xi32>
    %c68_i32_20 = arith.constant 68 : i32
    %111 = vector.broadcast %c68_i32_20 : i32 to vector<272x4xi32>
    %112 = arith.cmpi sge, %109, %111 : vector<272x4xi32>
    %113 = arith.extui %112 : vector<272x4xi1> to vector<272x4xi32>
    %114 = arith.addi %110, %113 : vector<272x4xi32>
    %c136_i32_21 = arith.constant 136 : i32
    %115 = vector.broadcast %c136_i32_21 : i32 to vector<272x4xi32>
    %116 = arith.cmpi sge, %109, %115 : vector<272x4xi32>
    %117 = arith.extui %116 : vector<272x4xi1> to vector<272x4xi32>
    %118 = arith.addi %114, %117 : vector<272x4xi32>
    %c204_i32_22 = arith.constant 204 : i32
    %119 = vector.broadcast %c204_i32_22 : i32 to vector<272x4xi32>
    %120 = arith.cmpi sge, %109, %119 : vector<272x4xi32>
    %121 = arith.extui %120 : vector<272x4xi1> to vector<272x4xi32>
    %122 = arith.addi %118, %121 : vector<272x4xi32>
    %123 = tpu.iota {dimensions = array<i32: 1>} : vector<272x4xi32>
    %124 = arith.cmpi eq, %122, %123 : vector<272x4xi32>
    %125 = arith.extui %124 : vector<272x4xi1> to vector<272x4xi32>
    %126 = arith.sitofp %125 : vector<272x4xi32> to vector<272x4xf32>
    %127 = tpu.iota {dimensions = array<i32: 0>} : vector<4x32xi32>
    %128 = tpu.iota {dimensions = array<i32: 1>} : vector<4x32xi32>
    %c0_i32_23 = arith.constant 0 : i32
    %129 = vector.broadcast %c0_i32_23 : i32 to vector<4x32xi32>
    %c8_i32_24 = arith.constant 8 : i32
    %130 = vector.broadcast %c8_i32_24 : i32 to vector<4x32xi32>
    %131 = arith.cmpi sge, %128, %130 : vector<4x32xi32>
    %132 = arith.extui %131 : vector<4x32xi1> to vector<4x32xi32>
    %133 = arith.addi %129, %132 : vector<4x32xi32>
    %c16_i32_25 = arith.constant 16 : i32
    %134 = vector.broadcast %c16_i32_25 : i32 to vector<4x32xi32>
    %135 = arith.cmpi sge, %128, %134 : vector<4x32xi32>
    %136 = arith.extui %135 : vector<4x32xi1> to vector<4x32xi32>
    %137 = arith.addi %133, %136 : vector<4x32xi32>
    %c24_i32_26 = arith.constant 24 : i32
    %138 = vector.broadcast %c24_i32_26 : i32 to vector<4x32xi32>
    %139 = arith.cmpi sge, %128, %138 : vector<4x32xi32>
    %140 = arith.extui %139 : vector<4x32xi1> to vector<4x32xi32>
    %141 = arith.addi %137, %140 : vector<4x32xi32>
    %142 = arith.cmpi eq, %127, %141 : vector<4x32xi32>
    %143 = arith.extui %142 : vector<4x32xi1> to vector<4x32xi32>
    %144 = arith.sitofp %143 : vector<4x32xi32> to vector<4x32xf32>
    %c0 = arith.constant 0 : index
    %c0_27 = arith.constant 0 : index
    %145 = vector.load %arg2[%c0, %c0_27] : memref<624x256xf32, #tpu.memory_space<vmem>>, vector<128x32xf32>
    %c128 = arith.constant 128 : index
    %c0_28 = arith.constant 0 : index
    %146 = vector.load %arg2[%c128, %c0_28] : memref<624x256xf32, #tpu.memory_space<vmem>>, vector<68x32xf32>
    %c0_29 = arith.constant 0 : index
    %c0_30 = arith.constant 0 : index
    %c0_31 = arith.constant 0 : index
    %147 = vector.load %arg1[%c0_29, %c0_30, %c0_31] : memref<1x68x128xf32, #tpu.memory_space<vmem>>, vector<1x68x128xf32>
    %148 = vector.shape_cast %147 : vector<1x68x128xf32> to vector<68x128xf32>
    %cst = arith.constant dense<0.000000e+00> : vector<68x32xf32>
    %149 = tpu.matmul %148, %145, %cst {dimension_numbers = #tpu.dot_dimension_numbers<[1], [0], [0], [1], [0, 0, 1, 1], [], []>} : vector<68x128xf32>, vector<128x32xf32>, vector<68x32xf32> -> vector<68x32xf32>
    %150 = arith.addf %149, %146 : vector<68x32xf32>
    %c208 = arith.constant 208 : index
    %c0_32 = arith.constant 0 : index
    %151 = vector.load %arg2[%c208, %c0_32] : memref<624x256xf32, #tpu.memory_space<vmem>>, vector<1x32xf32>
    %c209 = arith.constant 209 : index
    %c0_33 = arith.constant 0 : index
    %152 = vector.load %arg2[%c209, %c0_33] : memref<624x256xf32, #tpu.memory_space<vmem>>, vector<1x32xf32>
    %c210 = arith.constant 210 : index
    %c0_34 = arith.constant 0 : index
    %153 = vector.load %arg2[%c210, %c0_34] : memref<624x256xf32, #tpu.memory_space<vmem>>, vector<1x32xf32>
    %c211 = arith.constant 211 : index
    %c0_35 = arith.constant 0 : index
    %154 = vector.load %arg2[%c211, %c0_35] : memref<624x256xf32, #tpu.memory_space<vmem>>, vector<1x32xf32>
    %c212 = arith.constant 212 : index
    %c0_36 = arith.constant 0 : index
    %155 = vector.load %arg2[%c212, %c0_36] : memref<624x256xf32, #tpu.memory_space<vmem>>, vector<1x32xf32>
    %c213 = arith.constant 213 : index
    %c0_37 = arith.constant 0 : index
    %156 = vector.load %arg2[%c213, %c0_37] : memref<624x256xf32, #tpu.memory_space<vmem>>, vector<1x32xf32>
    %c214 = arith.constant 214 : index
    %c0_38 = arith.constant 0 : index
    %157 = vector.load %arg2[%c214, %c0_38] : memref<624x256xf32, #tpu.memory_space<vmem>>, vector<1x96xf32>
    %c215 = arith.constant 215 : index
    %c0_39 = arith.constant 0 : index
    %158 = vector.load %arg2[%c215, %c0_39] : memref<624x256xf32, #tpu.memory_space<vmem>>, vector<1x64xf32>
    %c216 = arith.constant 216 : index
    %c0_40 = arith.constant 0 : index
    %159 = vector.load %arg2[%c216, %c0_40] : memref<624x256xf32, #tpu.memory_space<vmem>>, vector<32x96xf32>
    %c248 = arith.constant 248 : index
    %c0_41 = arith.constant 0 : index
    %160 = vector.load %arg2[%c248, %c0_41] : memref<624x256xf32, #tpu.memory_space<vmem>>, vector<32x32xf32>
    %c280 = arith.constant 280 : index
    %c0_42 = arith.constant 0 : index
    %161 = vector.load %arg2[%c280, %c0_42] : memref<624x256xf32, #tpu.memory_space<vmem>>, vector<32x64xf32>
    %c312 = arith.constant 312 : index
    %c0_43 = arith.constant 0 : index
    %162 = vector.load %arg2[%c312, %c0_43] : memref<624x256xf32, #tpu.memory_space<vmem>>, vector<64x32xf32>
    %cst_44 = arith.constant dense<0.000000e+00> : vector<68xf32>
    %163 = vector.multi_reduction <add>, %150, %cst_44 [1] : vector<68x32xf32> to vector<68xf32>
    %164 = vector.shape_cast %163 : vector<68xf32> to vector<68x1xf32>
    %cst_45 = arith.constant 3.200000e+01 : f32
    %165 = vector.broadcast %cst_45 : f32 to vector<68x1xf32>
    %166 = arith.divf %164, %165 : vector<68x1xf32>
    %167 = vector.broadcast %166 : vector<68x1xf32> to vector<68x32xf32>
    %168 = arith.subf %150, %167 : vector<68x32xf32>
    %169 = vector.broadcast %166 : vector<68x1xf32> to vector<68x32xf32>
    %170 = arith.subf %150, %169 : vector<68x32xf32>
    %171 = arith.mulf %168, %170 : vector<68x32xf32>
    %cst_46 = arith.constant dense<0.000000e+00> : vector<68xf32>
    %172 = vector.multi_reduction <add>, %171, %cst_46 [1] : vector<68x32xf32> to vector<68xf32>
    %173 = vector.shape_cast %172 : vector<68xf32> to vector<68x1xf32>
    %cst_47 = arith.constant 3.200000e+01 : f32
    %174 = vector.broadcast %cst_47 : f32 to vector<68x1xf32>
    %175 = arith.divf %173, %174 : vector<68x1xf32>
    %176 = vector.broadcast %166 : vector<68x1xf32> to vector<68x32xf32>
    %177 = arith.subf %150, %176 : vector<68x32xf32>
    %cst_48 = arith.constant 9.99999997E-7 : f32
    %178 = vector.broadcast %cst_48 : f32 to vector<68x1xf32>
    %179 = arith.addf %175, %178 : vector<68x1xf32>
    %180 = math.rsqrt %179 : vector<68x1xf32>
    %181 = vector.broadcast %180 : vector<68x1xf32> to vector<68x32xf32>
    %182 = arith.mulf %177, %181 : vector<68x32xf32>
    %183 = vector.broadcast %151 : vector<1x32xf32> to vector<68x32xf32>
    %184 = arith.mulf %182, %183 : vector<68x32xf32>
    %185 = vector.broadcast %152 : vector<1x32xf32> to vector<68x32xf32>
    %186 = arith.addf %184, %185 : vector<68x32xf32>
    %cst_49 = arith.constant dense<0.000000e+00> : vector<68x96xf32>
    %187 = tpu.matmul %186, %159, %cst_49 {dimension_numbers = #tpu.dot_dimension_numbers<[1], [0], [0], [1], [0, 0, 1, 1], [], []>} : vector<68x32xf32>, vector<32x96xf32>, vector<68x96xf32> -> vector<68x96xf32>
    %188 = vector.broadcast %157 : vector<1x96xf32> to vector<68x96xf32>
    %189 = arith.addf %187, %188 : vector<68x96xf32>
    %190 = vector.extract_strided_slice %189 {offsets = [0, 0], sizes = [68, 32], strides = [1, 1]} : vector<68x96xf32> to vector<68x32xf32>
    %191 = vector.extract_strided_slice %189 {offsets = [0, 32], sizes = [68, 32], strides = [1, 1]} : vector<68x96xf32> to vector<68x32xf32>
    %192 = vector.extract_strided_slice %189 {offsets = [0, 64], sizes = [68, 32], strides = [1, 1]} : vector<68x96xf32> to vector<68x32xf32>
    %193 = tpu.transpose %191, [1, 0] : vector<68x32xf32> -> vector<32x68xf32>
    %194 = tpu.concatenate %193, %193, %193, %193 in 1 : vector<32x68xf32>, vector<32x68xf32>, vector<32x68xf32>, vector<32x68xf32> -> vector<32x272xf32>
    %195 = arith.mulf %194, %30 : vector<32x272xf32>
    %196 = tpu.concatenate %192, %192, %192, %192 in 0 : vector<68x32xf32>, vector<68x32xf32>, vector<68x32xf32>, vector<68x32xf32> -> vector<272x32xf32>
    %197 = arith.mulf %196, %61 : vector<272x32xf32>
    %cst_50 = arith.constant dense<0.000000e+00> : vector<68x272xf32>
    %198 = tpu.matmul %190, %195, %cst_50 {dimension_numbers = #tpu.dot_dimension_numbers<[1], [0], [0], [1], [0, 0, 1, 1], [], []>} : vector<68x32xf32>, vector<32x272xf32>, vector<68x272xf32> -> vector<68x272xf32>
    %cst_51 = arith.constant 0.353553385 : f32
    %199 = vector.broadcast %cst_51 : f32 to vector<68x272xf32>
    %200 = arith.mulf %198, %199 : vector<68x272xf32>
    %cst_52 = arith.constant dense<0xFF800000> : vector<68xf32>
    %201 = vector.multi_reduction <maximumf>, %200, %cst_52 [1] : vector<68x272xf32> to vector<68xf32>
    %202 = vector.shape_cast %201 : vector<68xf32> to vector<68x1xf32>
    %203 = vector.broadcast %202 : vector<68x1xf32> to vector<68x272xf32>
    %204 = arith.subf %200, %203 : vector<68x272xf32>
    %205 = math.exp %204 : vector<68x272xf32>
    %206 = arith.mulf %205, %108 : vector<68x272xf32>
    %cst_53 = arith.constant dense<0.000000e+00> : vector<68x4xf32>
    %207 = tpu.matmul %206, %126, %cst_53 {dimension_numbers = #tpu.dot_dimension_numbers<[1], [0], [0], [1], [0, 0, 1, 1], [], []>} : vector<68x272xf32>, vector<272x4xf32>, vector<68x4xf32> -> vector<68x4xf32>
    %cst_54 = arith.constant dense<0.000000e+00> : vector<68x32xf32>
    %208 = tpu.matmul %206, %197, %cst_54 {dimension_numbers = #tpu.dot_dimension_numbers<[1], [0], [0], [1], [0, 0, 1, 1], [], []>} : vector<68x272xf32>, vector<272x32xf32>, vector<68x32xf32> -> vector<68x32xf32>
    %cst_55 = arith.constant dense<0.000000e+00> : vector<68x32xf32>
    %209 = tpu.matmul %207, %144, %cst_55 {dimension_numbers = #tpu.dot_dimension_numbers<[1], [0], [0], [1], [0, 0, 1, 1], [], []>} : vector<68x4xf32>, vector<4x32xf32>, vector<68x32xf32> -> vector<68x32xf32>
    %210 = tpu.reciprocal %209 {approx = true} : vector<68x32xf32> -> vector<68x32xf32>
    %211 = arith.mulf %208, %210 : vector<68x32xf32>
    %cst_56 = arith.constant dense<0.000000e+00> : vector<68x32xf32>
    %212 = tpu.matmul %211, %160, %cst_56 {dimension_numbers = #tpu.dot_dimension_numbers<[1], [0], [0], [1], [0, 0, 1, 1], [], []>} : vector<68x32xf32>, vector<32x32xf32>, vector<68x32xf32> -> vector<68x32xf32>
    %213 = arith.addf %150, %212 : vector<68x32xf32>
    %214 = vector.broadcast %155 : vector<1x32xf32> to vector<68x32xf32>
    %215 = arith.addf %213, %214 : vector<68x32xf32>
    %cst_57 = arith.constant dense<0.000000e+00> : vector<68xf32>
    %216 = vector.multi_reduction <add>, %215, %cst_57 [1] : vector<68x32xf32> to vector<68xf32>
    %217 = vector.shape_cast %216 : vector<68xf32> to vector<68x1xf32>
    %cst_58 = arith.constant 3.200000e+01 : f32
    %218 = vector.broadcast %cst_58 : f32 to vector<68x1xf32>
    %219 = arith.divf %217, %218 : vector<68x1xf32>
    %220 = vector.broadcast %219 : vector<68x1xf32> to vector<68x32xf32>
    %221 = arith.subf %215, %220 : vector<68x32xf32>
    %222 = vector.broadcast %219 : vector<68x1xf32> to vector<68x32xf32>
    %223 = arith.subf %215, %222 : vector<68x32xf32>
    %224 = arith.mulf %221, %223 : vector<68x32xf32>
    %cst_59 = arith.constant dense<0.000000e+00> : vector<68xf32>
    %225 = vector.multi_reduction <add>, %224, %cst_59 [1] : vector<68x32xf32> to vector<68xf32>
    %226 = vector.shape_cast %225 : vector<68xf32> to vector<68x1xf32>
    %cst_60 = arith.constant 3.200000e+01 : f32
    %227 = vector.broadcast %cst_60 : f32 to vector<68x1xf32>
    %228 = arith.divf %226, %227 : vector<68x1xf32>
    %229 = vector.broadcast %219 : vector<68x1xf32> to vector<68x32xf32>
    %230 = arith.subf %215, %229 : vector<68x32xf32>
    %cst_61 = arith.constant 9.99999997E-7 : f32
    %231 = vector.broadcast %cst_61 : f32 to vector<68x1xf32>
    %232 = arith.addf %228, %231 : vector<68x1xf32>
    %233 = math.rsqrt %232 : vector<68x1xf32>
    %234 = vector.broadcast %233 : vector<68x1xf32> to vector<68x32xf32>
    %235 = arith.mulf %230, %234 : vector<68x32xf32>
    %236 = vector.broadcast %153 : vector<1x32xf32> to vector<68x32xf32>
    %237 = arith.mulf %235, %236 : vector<68x32xf32>
    %238 = vector.broadcast %154 : vector<1x32xf32> to vector<68x32xf32>
    %239 = arith.addf %237, %238 : vector<68x32xf32>
    %cst_62 = arith.constant dense<0.000000e+00> : vector<68x64xf32>
    %240 = tpu.matmul %239, %161, %cst_62 {dimension_numbers = #tpu.dot_dimension_numbers<[1], [0], [0], [1], [0, 0, 1, 1], [], []>} : vector<68x32xf32>, vector<32x64xf32>, vector<68x64xf32> -> vector<68x64xf32>
    %241 = vector.broadcast %158 : vector<1x64xf32> to vector<68x64xf32>
    %242 = arith.addf %240, %241 : vector<68x64xf32>
    %cst_63 = arith.constant 5.000000e-01 : f32
    %243 = vector.broadcast %cst_63 : f32 to vector<68x64xf32>
    %244 = arith.mulf %243, %242 : vector<68x64xf32>
    %cst_64 = arith.constant 4.471500e-02 : f32
    %245 = vector.broadcast %cst_64 : f32 to vector<68x64xf32>
    %246 = arith.mulf %245, %242 : vector<68x64xf32>
    %247 = arith.mulf %246, %242 : vector<68x64xf32>
    %248 = arith.mulf %247, %242 : vector<68x64xf32>
    %249 = arith.addf %242, %248 : vector<68x64xf32>
    %cst_65 = arith.constant 0.797884583 : f32
    %250 = vector.broadcast %cst_65 : f32 to vector<68x64xf32>
    %251 = arith.mulf %250, %249 : vector<68x64xf32>
    %252 = math.tanh %251 : vector<68x64xf32>
    %cst_66 = arith.constant 1.000000e+00 : f32
    %253 = vector.broadcast %cst_66 : f32 to vector<68x64xf32>
    %254 = arith.addf %253, %252 : vector<68x64xf32>
    %255 = arith.mulf %244, %254 : vector<68x64xf32>
    %cst_67 = arith.constant dense<0.000000e+00> : vector<68x32xf32>
    %256 = tpu.matmul %255, %162, %cst_67 {dimension_numbers = #tpu.dot_dimension_numbers<[1], [0], [0], [1], [0, 0, 1, 1], [], []>} : vector<68x64xf32>, vector<64x32xf32>, vector<68x32xf32> -> vector<68x32xf32>
    %257 = arith.addf %215, %256 : vector<68x32xf32>
    %258 = vector.broadcast %156 : vector<1x32xf32> to vector<68x32xf32>
    %259 = arith.addf %257, %258 : vector<68x32xf32>
    %c376 = arith.constant 376 : index
    %c0_68 = arith.constant 0 : index
    %260 = vector.load %arg2[%c376, %c0_68] : memref<624x256xf32, #tpu.memory_space<vmem>>, vector<1x32xf32>
    %c377 = arith.constant 377 : index
    %c0_69 = arith.constant 0 : index
    %261 = vector.load %arg2[%c377, %c0_69] : memref<624x256xf32, #tpu.memory_space<vmem>>, vector<1x32xf32>
    %c378 = arith.constant 378 : index
    %c0_70 = arith.constant 0 : index
    %262 = vector.load %arg2[%c378, %c0_70] : memref<624x256xf32, #tpu.memory_space<vmem>>, vector<1x32xf32>
    %c379 = arith.constant 379 : index
    %c0_71 = arith.constant 0 : index
    %263 = vector.load %arg2[%c379, %c0_71] : memref<624x256xf32, #tpu.memory_space<vmem>>, vector<1x32xf32>
    %c380 = arith.constant 380 : index
    %c0_72 = arith.constant 0 : index
    %264 = vector.load %arg2[%c380, %c0_72] : memref<624x256xf32, #tpu.memory_space<vmem>>, vector<1x32xf32>
    %c381 = arith.constant 381 : index
    %c0_73 = arith.constant 0 : index
    %265 = vector.load %arg2[%c381, %c0_73] : memref<624x256xf32, #tpu.memory_space<vmem>>, vector<1x32xf32>
    %c382 = arith.constant 382 : index
    %c0_74 = arith.constant 0 : index
    %266 = vector.load %arg2[%c382, %c0_74] : memref<624x256xf32, #tpu.memory_space<vmem>>, vector<1x96xf32>
    %c383 = arith.constant 383 : index
    %c0_75 = arith.constant 0 : index
    %267 = vector.load %arg2[%c383, %c0_75] : memref<624x256xf32, #tpu.memory_space<vmem>>, vector<1x64xf32>
    %c384 = arith.constant 384 : index
    %c0_76 = arith.constant 0 : index
    %268 = vector.load %arg2[%c384, %c0_76] : memref<624x256xf32, #tpu.memory_space<vmem>>, vector<32x96xf32>
    %c416 = arith.constant 416 : index
    %c0_77 = arith.constant 0 : index
    %269 = vector.load %arg2[%c416, %c0_77] : memref<624x256xf32, #tpu.memory_space<vmem>>, vector<32x32xf32>
    %c448 = arith.constant 448 : index
    %c0_78 = arith.constant 0 : index
    %270 = vector.load %arg2[%c448, %c0_78] : memref<624x256xf32, #tpu.memory_space<vmem>>, vector<32x64xf32>
    %c480 = arith.constant 480 : index
    %c0_79 = arith.constant 0 : index
    %271 = vector.load %arg2[%c480, %c0_79] : memref<624x256xf32, #tpu.memory_space<vmem>>, vector<64x32xf32>
    %cst_80 = arith.constant dense<0.000000e+00> : vector<68xf32>
    %272 = vector.multi_reduction <add>, %259, %cst_80 [1] : vector<68x32xf32> to vector<68xf32>
    %273 = vector.shape_cast %272 : vector<68xf32> to vector<68x1xf32>
    %cst_81 = arith.constant 3.200000e+01 : f32
    %274 = vector.broadcast %cst_81 : f32 to vector<68x1xf32>
    %275 = arith.divf %273, %274 : vector<68x1xf32>
    %276 = vector.broadcast %275 : vector<68x1xf32> to vector<68x32xf32>
    %277 = arith.subf %259, %276 : vector<68x32xf32>
    %278 = vector.broadcast %275 : vector<68x1xf32> to vector<68x32xf32>
    %279 = arith.subf %259, %278 : vector<68x32xf32>
    %280 = arith.mulf %277, %279 : vector<68x32xf32>
    %cst_82 = arith.constant dense<0.000000e+00> : vector<68xf32>
    %281 = vector.multi_reduction <add>, %280, %cst_82 [1] : vector<68x32xf32> to vector<68xf32>
    %282 = vector.shape_cast %281 : vector<68xf32> to vector<68x1xf32>
    %cst_83 = arith.constant 3.200000e+01 : f32
    %283 = vector.broadcast %cst_83 : f32 to vector<68x1xf32>
    %284 = arith.divf %282, %283 : vector<68x1xf32>
    %285 = vector.broadcast %275 : vector<68x1xf32> to vector<68x32xf32>
    %286 = arith.subf %259, %285 : vector<68x32xf32>
    %cst_84 = arith.constant 9.99999997E-7 : f32
    %287 = vector.broadcast %cst_84 : f32 to vector<68x1xf32>
    %288 = arith.addf %284, %287 : vector<68x1xf32>
    %289 = math.rsqrt %288 : vector<68x1xf32>
    %290 = vector.broadcast %289 : vector<68x1xf32> to vector<68x32xf32>
    %291 = arith.mulf %286, %290 : vector<68x32xf32>
    %292 = vector.broadcast %260 : vector<1x32xf32> to vector<68x32xf32>
    %293 = arith.mulf %291, %292 : vector<68x32xf32>
    %294 = vector.broadcast %261 : vector<1x32xf32> to vector<68x32xf32>
    %295 = arith.addf %293, %294 : vector<68x32xf32>
    %cst_85 = arith.constant dense<0.000000e+00> : vector<68x96xf32>
    %296 = tpu.matmul %295, %268, %cst_85 {dimension_numbers = #tpu.dot_dimension_numbers<[1], [0], [0], [1], [0, 0, 1, 1], [], []>} : vector<68x32xf32>, vector<32x96xf32>, vector<68x96xf32> -> vector<68x96xf32>
    %297 = vector.broadcast %266 : vector<1x96xf32> to vector<68x96xf32>
    %298 = arith.addf %296, %297 : vector<68x96xf32>
    %299 = vector.extract_strided_slice %298 {offsets = [0, 0], sizes = [68, 32], strides = [1, 1]} : vector<68x96xf32> to vector<68x32xf32>
    %300 = vector.extract_strided_slice %298 {offsets = [0, 32], sizes = [68, 32], strides = [1, 1]} : vector<68x96xf32> to vector<68x32xf32>
    %301 = vector.extract_strided_slice %298 {offsets = [0, 64], sizes = [68, 32], strides = [1, 1]} : vector<68x96xf32> to vector<68x32xf32>
    %302 = tpu.transpose %300, [1, 0] : vector<68x32xf32> -> vector<32x68xf32>
    %303 = tpu.concatenate %302, %302, %302, %302 in 1 : vector<32x68xf32>, vector<32x68xf32>, vector<32x68xf32>, vector<32x68xf32> -> vector<32x272xf32>
    %304 = arith.mulf %303, %30 : vector<32x272xf32>
    %305 = tpu.concatenate %301, %301, %301, %301 in 0 : vector<68x32xf32>, vector<68x32xf32>, vector<68x32xf32>, vector<68x32xf32> -> vector<272x32xf32>
    %306 = arith.mulf %305, %61 : vector<272x32xf32>
    %cst_86 = arith.constant dense<0.000000e+00> : vector<68x272xf32>
    %307 = tpu.matmul %299, %304, %cst_86 {dimension_numbers = #tpu.dot_dimension_numbers<[1], [0], [0], [1], [0, 0, 1, 1], [], []>} : vector<68x32xf32>, vector<32x272xf32>, vector<68x272xf32> -> vector<68x272xf32>
    %cst_87 = arith.constant 0.353553385 : f32
    %308 = vector.broadcast %cst_87 : f32 to vector<68x272xf32>
    %309 = arith.mulf %307, %308 : vector<68x272xf32>
    %cst_88 = arith.constant dense<0xFF800000> : vector<68xf32>
    %310 = vector.multi_reduction <maximumf>, %309, %cst_88 [1] : vector<68x272xf32> to vector<68xf32>
    %311 = vector.shape_cast %310 : vector<68xf32> to vector<68x1xf32>
    %312 = vector.broadcast %311 : vector<68x1xf32> to vector<68x272xf32>
    %313 = arith.subf %309, %312 : vector<68x272xf32>
    %314 = math.exp %313 : vector<68x272xf32>
    %315 = arith.mulf %314, %108 : vector<68x272xf32>
    %cst_89 = arith.constant dense<0.000000e+00> : vector<68x4xf32>
    %316 = tpu.matmul %315, %126, %cst_89 {dimension_numbers = #tpu.dot_dimension_numbers<[1], [0], [0], [1], [0, 0, 1, 1], [], []>} : vector<68x272xf32>, vector<272x4xf32>, vector<68x4xf32> -> vector<68x4xf32>
    %cst_90 = arith.constant dense<0.000000e+00> : vector<68x32xf32>
    %317 = tpu.matmul %315, %306, %cst_90 {dimension_numbers = #tpu.dot_dimension_numbers<[1], [0], [0], [1], [0, 0, 1, 1], [], []>} : vector<68x272xf32>, vector<272x32xf32>, vector<68x32xf32> -> vector<68x32xf32>
    %cst_91 = arith.constant dense<0.000000e+00> : vector<68x32xf32>
    %318 = tpu.matmul %316, %144, %cst_91 {dimension_numbers = #tpu.dot_dimension_numbers<[1], [0], [0], [1], [0, 0, 1, 1], [], []>} : vector<68x4xf32>, vector<4x32xf32>, vector<68x32xf32> -> vector<68x32xf32>
    %319 = tpu.reciprocal %318 {approx = true} : vector<68x32xf32> -> vector<68x32xf32>
    %320 = arith.mulf %317, %319 : vector<68x32xf32>
    %cst_92 = arith.constant dense<0.000000e+00> : vector<68x32xf32>
    %321 = tpu.matmul %320, %269, %cst_92 {dimension_numbers = #tpu.dot_dimension_numbers<[1], [0], [0], [1], [0, 0, 1, 1], [], []>} : vector<68x32xf32>, vector<32x32xf32>, vector<68x32xf32> -> vector<68x32xf32>
    %322 = arith.addf %259, %321 : vector<68x32xf32>
    %323 = vector.broadcast %264 : vector<1x32xf32> to vector<68x32xf32>
    %324 = arith.addf %322, %323 : vector<68x32xf32>
    %cst_93 = arith.constant dense<0.000000e+00> : vector<68xf32>
    %325 = vector.multi_reduction <add>, %324, %cst_93 [1] : vector<68x32xf32> to vector<68xf32>
    %326 = vector.shape_cast %325 : vector<68xf32> to vector<68x1xf32>
    %cst_94 = arith.constant 3.200000e+01 : f32
    %327 = vector.broadcast %cst_94 : f32 to vector<68x1xf32>
    %328 = arith.divf %326, %327 : vector<68x1xf32>
    %329 = vector.broadcast %328 : vector<68x1xf32> to vector<68x32xf32>
    %330 = arith.subf %324, %329 : vector<68x32xf32>
    %331 = vector.broadcast %328 : vector<68x1xf32> to vector<68x32xf32>
    %332 = arith.subf %324, %331 : vector<68x32xf32>
    %333 = arith.mulf %330, %332 : vector<68x32xf32>
    %cst_95 = arith.constant dense<0.000000e+00> : vector<68xf32>
    %334 = vector.multi_reduction <add>, %333, %cst_95 [1] : vector<68x32xf32> to vector<68xf32>
    %335 = vector.shape_cast %334 : vector<68xf32> to vector<68x1xf32>
    %cst_96 = arith.constant 3.200000e+01 : f32
    %336 = vector.broadcast %cst_96 : f32 to vector<68x1xf32>
    %337 = arith.divf %335, %336 : vector<68x1xf32>
    %338 = vector.broadcast %328 : vector<68x1xf32> to vector<68x32xf32>
    %339 = arith.subf %324, %338 : vector<68x32xf32>
    %cst_97 = arith.constant 9.99999997E-7 : f32
    %340 = vector.broadcast %cst_97 : f32 to vector<68x1xf32>
    %341 = arith.addf %337, %340 : vector<68x1xf32>
    %342 = math.rsqrt %341 : vector<68x1xf32>
    %343 = vector.broadcast %342 : vector<68x1xf32> to vector<68x32xf32>
    %344 = arith.mulf %339, %343 : vector<68x32xf32>
    %345 = vector.broadcast %262 : vector<1x32xf32> to vector<68x32xf32>
    %346 = arith.mulf %344, %345 : vector<68x32xf32>
    %347 = vector.broadcast %263 : vector<1x32xf32> to vector<68x32xf32>
    %348 = arith.addf %346, %347 : vector<68x32xf32>
    %cst_98 = arith.constant dense<0.000000e+00> : vector<68x64xf32>
    %349 = tpu.matmul %348, %270, %cst_98 {dimension_numbers = #tpu.dot_dimension_numbers<[1], [0], [0], [1], [0, 0, 1, 1], [], []>} : vector<68x32xf32>, vector<32x64xf32>, vector<68x64xf32> -> vector<68x64xf32>
    %350 = vector.broadcast %267 : vector<1x64xf32> to vector<68x64xf32>
    %351 = arith.addf %349, %350 : vector<68x64xf32>
    %cst_99 = arith.constant 5.000000e-01 : f32
    %352 = vector.broadcast %cst_99 : f32 to vector<68x64xf32>
    %353 = arith.mulf %352, %351 : vector<68x64xf32>
    %cst_100 = arith.constant 4.471500e-02 : f32
    %354 = vector.broadcast %cst_100 : f32 to vector<68x64xf32>
    %355 = arith.mulf %354, %351 : vector<68x64xf32>
    %356 = arith.mulf %355, %351 : vector<68x64xf32>
    %357 = arith.mulf %356, %351 : vector<68x64xf32>
    %358 = arith.addf %351, %357 : vector<68x64xf32>
    %cst_101 = arith.constant 0.797884583 : f32
    %359 = vector.broadcast %cst_101 : f32 to vector<68x64xf32>
    %360 = arith.mulf %359, %358 : vector<68x64xf32>
    %361 = math.tanh %360 : vector<68x64xf32>
    %cst_102 = arith.constant 1.000000e+00 : f32
    %362 = vector.broadcast %cst_102 : f32 to vector<68x64xf32>
    %363 = arith.addf %362, %361 : vector<68x64xf32>
    %364 = arith.mulf %353, %363 : vector<68x64xf32>
    %cst_103 = arith.constant dense<0.000000e+00> : vector<68x32xf32>
    %365 = tpu.matmul %364, %271, %cst_103 {dimension_numbers = #tpu.dot_dimension_numbers<[1], [0], [0], [1], [0, 0, 1, 1], [], []>} : vector<68x64xf32>, vector<64x32xf32>, vector<68x32xf32> -> vector<68x32xf32>
    %366 = arith.addf %324, %365 : vector<68x32xf32>
    %367 = vector.broadcast %265 : vector<1x32xf32> to vector<68x32xf32>
    %368 = arith.addf %366, %367 : vector<68x32xf32>
    %c200 = arith.constant 200 : index
    %c0_104 = arith.constant 0 : index
    %369 = vector.load %arg2[%c200, %c0_104] : memref<624x256xf32, #tpu.memory_space<vmem>>, vector<1x32xf32>
    %c201 = arith.constant 201 : index
    %c0_105 = arith.constant 0 : index
    %370 = vector.load %arg2[%c201, %c0_105] : memref<624x256xf32, #tpu.memory_space<vmem>>, vector<1x32xf32>
    %c202 = arith.constant 202 : index
    %c0_106 = arith.constant 0 : index
    %371 = vector.load %arg2[%c202, %c0_106] : memref<624x256xf32, #tpu.memory_space<vmem>>, vector<1x32xf32>
    %c203 = arith.constant 203 : index
    %c0_107 = arith.constant 0 : index
    %372 = vector.load %arg2[%c203, %c0_107] : memref<624x256xf32, #tpu.memory_space<vmem>>, vector<1x32xf32>
    %c204 = arith.constant 204 : index
    %c0_108 = arith.constant 0 : index
    %373 = vector.load %arg2[%c204, %c0_108] : memref<624x256xf32, #tpu.memory_space<vmem>>, vector<1x32xf32>
    %c205 = arith.constant 205 : index
    %c0_109 = arith.constant 0 : index
    %374 = vector.load %arg2[%c205, %c0_109] : memref<624x256xf32, #tpu.memory_space<vmem>>, vector<1x32xf32>
    %cst_110 = arith.constant dense<0.000000e+00> : vector<68xf32>
    %375 = vector.multi_reduction <add>, %368, %cst_110 [1] : vector<68x32xf32> to vector<68xf32>
    %376 = vector.shape_cast %375 : vector<68xf32> to vector<68x1xf32>
    %cst_111 = arith.constant 3.200000e+01 : f32
    %377 = vector.broadcast %cst_111 : f32 to vector<68x1xf32>
    %378 = arith.divf %376, %377 : vector<68x1xf32>
    %379 = vector.broadcast %378 : vector<68x1xf32> to vector<68x32xf32>
    %380 = arith.subf %368, %379 : vector<68x32xf32>
    %381 = vector.broadcast %378 : vector<68x1xf32> to vector<68x32xf32>
    %382 = arith.subf %368, %381 : vector<68x32xf32>
    %383 = arith.mulf %380, %382 : vector<68x32xf32>
    %cst_112 = arith.constant dense<0.000000e+00> : vector<68xf32>
    %384 = vector.multi_reduction <add>, %383, %cst_112 [1] : vector<68x32xf32> to vector<68xf32>
    %385 = vector.shape_cast %384 : vector<68xf32> to vector<68x1xf32>
    %cst_113 = arith.constant 3.200000e+01 : f32
    %386 = vector.broadcast %cst_113 : f32 to vector<68x1xf32>
    %387 = arith.divf %385, %386 : vector<68x1xf32>
    %388 = vector.broadcast %378 : vector<68x1xf32> to vector<68x32xf32>
    %389 = arith.subf %368, %388 : vector<68x32xf32>
    %cst_114 = arith.constant 9.99999997E-7 : f32
    %390 = vector.broadcast %cst_114 : f32 to vector<68x1xf32>
    %391 = arith.addf %387, %390 : vector<68x1xf32>
    %392 = math.rsqrt %391 : vector<68x1xf32>
    %393 = vector.broadcast %392 : vector<68x1xf32> to vector<68x32xf32>
    %394 = arith.mulf %389, %393 : vector<68x32xf32>
    %395 = vector.broadcast %369 : vector<1x32xf32> to vector<68x32xf32>
    %396 = arith.mulf %394, %395 : vector<68x32xf32>
    %397 = vector.broadcast %370 : vector<1x32xf32> to vector<68x32xf32>
    %398 = arith.addf %396, %397 : vector<68x32xf32>
    %c544 = arith.constant 544 : index
    %c0_115 = arith.constant 0 : index
    %399 = vector.load %arg2[%c544, %c0_115] : memref<624x256xf32, #tpu.memory_space<vmem>>, vector<32x32xf32>
    %c576 = arith.constant 576 : index
    %c0_116 = arith.constant 0 : index
    %400 = vector.load %arg2[%c576, %c0_116] : memref<624x256xf32, #tpu.memory_space<vmem>>, vector<32x32xf32>
    %401 = vector.extract_strided_slice %398 {offsets = [0, 0], sizes = [16, 32], strides = [1, 1]} : vector<68x32xf32> to vector<16x32xf32>
    %402 = vector.extract_strided_slice %398 {offsets = [34, 0], sizes = [16, 32], strides = [1, 1]} : vector<68x32xf32> to vector<16x32xf32>
    %403 = vector.extract_strided_slice %398 {offsets = [17, 0], sizes = [16, 32], strides = [1, 1]} : vector<68x32xf32> to vector<16x32xf32>
    %404 = vector.extract_strided_slice %398 {offsets = [51, 0], sizes = [16, 32], strides = [1, 1]} : vector<68x32xf32> to vector<16x32xf32>
    %405 = tpu.concatenate %401, %402 in 0 : vector<16x32xf32>, vector<16x32xf32> -> vector<32x32xf32>
    %cst_117 = arith.constant dense<0.000000e+00> : vector<32xf32>
    %406 = vector.multi_reduction <add>, %403, %cst_117 [0] : vector<16x32xf32> to vector<32xf32>
    %407 = vector.shape_cast %406 : vector<32xf32> to vector<1x32xf32>
    %cst_118 = arith.constant 1.600000e+01 : f32
    %408 = vector.broadcast %cst_118 : f32 to vector<1x32xf32>
    %409 = arith.divf %407, %408 : vector<1x32xf32>
    %cst_119 = arith.constant dense<0.000000e+00> : vector<32xf32>
    %410 = vector.multi_reduction <add>, %404, %cst_119 [0] : vector<16x32xf32> to vector<32xf32>
    %411 = vector.shape_cast %410 : vector<32xf32> to vector<1x32xf32>
    %cst_120 = arith.constant 1.600000e+01 : f32
    %412 = vector.broadcast %cst_120 : f32 to vector<1x32xf32>
    %413 = arith.divf %411, %412 : vector<1x32xf32>
    %414 = tpu.concatenate %409, %413 in 0 : vector<1x32xf32>, vector<1x32xf32> -> vector<2x32xf32>
    %cst_121 = arith.constant dense<0.000000e+00> : vector<32xf32>
    %415 = vector.multi_reduction <add>, %405, %cst_121 [1] : vector<32x32xf32> to vector<32xf32>
    %416 = vector.shape_cast %415 : vector<32xf32> to vector<32x1xf32>
    %cst_122 = arith.constant 3.200000e+01 : f32
    %417 = vector.broadcast %cst_122 : f32 to vector<32x1xf32>
    %418 = arith.divf %416, %417 : vector<32x1xf32>
    %419 = vector.broadcast %418 : vector<32x1xf32> to vector<32x32xf32>
    %420 = arith.subf %405, %419 : vector<32x32xf32>
    %421 = vector.broadcast %418 : vector<32x1xf32> to vector<32x32xf32>
    %422 = arith.subf %405, %421 : vector<32x32xf32>
    %423 = arith.mulf %420, %422 : vector<32x32xf32>
    %cst_123 = arith.constant dense<0.000000e+00> : vector<32xf32>
    %424 = vector.multi_reduction <add>, %423, %cst_123 [1] : vector<32x32xf32> to vector<32xf32>
    %425 = vector.shape_cast %424 : vector<32xf32> to vector<32x1xf32>
    %cst_124 = arith.constant 3.200000e+01 : f32
    %426 = vector.broadcast %cst_124 : f32 to vector<32x1xf32>
    %427 = arith.divf %425, %426 : vector<32x1xf32>
    %428 = vector.broadcast %418 : vector<32x1xf32> to vector<32x32xf32>
    %429 = arith.subf %405, %428 : vector<32x32xf32>
    %cst_125 = arith.constant 9.99999997E-7 : f32
    %430 = vector.broadcast %cst_125 : f32 to vector<32x1xf32>
    %431 = arith.addf %427, %430 : vector<32x1xf32>
    %432 = math.rsqrt %431 : vector<32x1xf32>
    %433 = vector.broadcast %432 : vector<32x1xf32> to vector<32x32xf32>
    %434 = arith.mulf %429, %433 : vector<32x32xf32>
    %435 = vector.broadcast %371 : vector<1x32xf32> to vector<32x32xf32>
    %436 = arith.mulf %434, %435 : vector<32x32xf32>
    %437 = vector.broadcast %372 : vector<1x32xf32> to vector<32x32xf32>
    %438 = arith.addf %436, %437 : vector<32x32xf32>
    %cst_126 = arith.constant dense<0.000000e+00> : vector<32x32xf32>
    %439 = tpu.matmul %438, %399, %cst_126 {dimension_numbers = #tpu.dot_dimension_numbers<[1], [0], [0], [1], [0, 0, 1, 1], [], []>} : vector<32x32xf32>, vector<32x32xf32>, vector<32x32xf32> -> vector<32x32xf32>
    %440 = vector.broadcast %373 : vector<1x32xf32> to vector<32x32xf32>
    %441 = arith.addf %439, %440 : vector<32x32xf32>
    %cst_127 = arith.constant dense<0.000000e+00> : vector<2xf32>
    %442 = vector.multi_reduction <add>, %414, %cst_127 [1] : vector<2x32xf32> to vector<2xf32>
    %443 = vector.shape_cast %442 : vector<2xf32> to vector<2x1xf32>
    %cst_128 = arith.constant 3.200000e+01 : f32
    %444 = vector.broadcast %cst_128 : f32 to vector<2x1xf32>
    %445 = arith.divf %443, %444 : vector<2x1xf32>
    %446 = vector.broadcast %445 : vector<2x1xf32> to vector<2x32xf32>
    %447 = arith.subf %414, %446 : vector<2x32xf32>
    %448 = vector.broadcast %445 : vector<2x1xf32> to vector<2x32xf32>
    %449 = arith.subf %414, %448 : vector<2x32xf32>
    %450 = arith.mulf %447, %449 : vector<2x32xf32>
    %cst_129 = arith.constant dense<0.000000e+00> : vector<2xf32>
    %451 = vector.multi_reduction <add>, %450, %cst_129 [1] : vector<2x32xf32> to vector<2xf32>
    %452 = vector.shape_cast %451 : vector<2xf32> to vector<2x1xf32>
    %cst_130 = arith.constant 3.200000e+01 : f32
    %453 = vector.broadcast %cst_130 : f32 to vector<2x1xf32>
    %454 = arith.divf %452, %453 : vector<2x1xf32>
    %455 = vector.broadcast %445 : vector<2x1xf32> to vector<2x32xf32>
    %456 = arith.subf %414, %455 : vector<2x32xf32>
    %cst_131 = arith.constant 9.99999997E-7 : f32
    %457 = vector.broadcast %cst_131 : f32 to vector<2x1xf32>
    %458 = arith.addf %454, %457 : vector<2x1xf32>
    %459 = math.rsqrt %458 : vector<2x1xf32>
    %460 = vector.broadcast %459 : vector<2x1xf32> to vector<2x32xf32>
    %461 = arith.mulf %456, %460 : vector<2x32xf32>
    %462 = vector.broadcast %371 : vector<1x32xf32> to vector<2x32xf32>
    %463 = arith.mulf %461, %462 : vector<2x32xf32>
    %464 = vector.broadcast %372 : vector<1x32xf32> to vector<2x32xf32>
    %465 = arith.addf %463, %464 : vector<2x32xf32>
    %cst_132 = arith.constant dense<0.000000e+00> : vector<2x32xf32>
    %466 = tpu.matmul %465, %400, %cst_132 {dimension_numbers = #tpu.dot_dimension_numbers<[1], [0], [0], [1], [0, 0, 1, 1], [], []>} : vector<2x32xf32>, vector<32x32xf32>, vector<2x32xf32> -> vector<2x32xf32>
    %467 = vector.broadcast %374 : vector<1x32xf32> to vector<2x32xf32>
    %468 = arith.addf %466, %467 : vector<2x32xf32>
    %469 = vector.extract_strided_slice %468 {offsets = [0, 0], sizes = [1, 32], strides = [1, 1]} : vector<2x32xf32> to vector<1x32xf32>
    %470 = vector.extract_strided_slice %441 {offsets = [0, 0], sizes = [16, 32], strides = [1, 1]} : vector<32x32xf32> to vector<16x32xf32>
    %cst_133 = arith.constant dense<0.000000e+00> : vector<1x16xf32>
    %471 = tpu.matmul %469, %470, %cst_133 {dimension_numbers = #tpu.dot_dimension_numbers<[1], [1], [0], [0], [0, 0, 1, 0], [], []>} : vector<1x32xf32>, vector<16x32xf32>, vector<1x16xf32> -> vector<1x16xf32>
    %472 = vector.extract_strided_slice %468 {offsets = [1, 0], sizes = [1, 32], strides = [1, 1]} : vector<2x32xf32> to vector<1x32xf32>
    %473 = vector.extract_strided_slice %441 {offsets = [16, 0], sizes = [16, 32], strides = [1, 1]} : vector<32x32xf32> to vector<16x32xf32>
    %cst_134 = arith.constant dense<0.000000e+00> : vector<1x16xf32>
    %474 = tpu.matmul %472, %473, %cst_134 {dimension_numbers = #tpu.dot_dimension_numbers<[1], [1], [0], [0], [0, 0, 1, 0], [], []>} : vector<1x32xf32>, vector<16x32xf32>, vector<1x16xf32> -> vector<1x16xf32>
    %475 = tpu.concatenate %471, %474 in 0 : vector<1x16xf32>, vector<1x16xf32> -> vector<2x16xf32>
    %cst_135 = arith.constant 0.176776692 : f32
    %476 = vector.broadcast %cst_135 : f32 to vector<2x16xf32>
    %477 = arith.mulf %475, %476 : vector<2x16xf32>
    %c608 = arith.constant 608 : index
    %c0_136 = arith.constant 0 : index
    %478 = vector.load %arg2[%c608, %c0_136] : memref<624x256xf32, #tpu.memory_space<vmem>>, vector<16x256xf32>
    %cst_137 = arith.constant dense<0.000000e+00> : vector<2x256xf32>
    %479 = tpu.matmul %477, %478, %cst_137 {dimension_numbers = #tpu.dot_dimension_numbers<[1], [0], [0], [1], [0, 0, 1, 1], [], []>} : vector<2x16xf32>, vector<16x256xf32>, vector<2x256xf32> -> vector<2x256xf32>
    %cst_138 = arith.constant 5.000000e-01 : f32
    %480 = vector.broadcast %cst_138 : f32 to vector<2x256xf32>
    %481 = arith.mulf %480, %479 : vector<2x256xf32>
    %482 = math.tanh %481 : vector<2x256xf32>
    %cst_139 = arith.constant 1.000000e+00 : f32
    %483 = vector.broadcast %cst_139 : f32 to vector<2x256xf32>
    %484 = arith.addf %483, %482 : vector<2x256xf32>
    %cst_140 = arith.constant 5.000000e-01 : f32
    %485 = vector.broadcast %cst_140 : f32 to vector<2x256xf32>
    %486 = arith.mulf %485, %484 : vector<2x256xf32>
    %c0_141 = arith.constant 0 : index
    %c0_142 = arith.constant 0 : index
    %c0_143 = arith.constant 0 : index
    %487 = vector.load %arg3[%c0_141, %c0_142, %c0_143] : memref<1x2x256xf32, #tpu.memory_space<vmem>>, vector<1x2x256xf32>
    %488 = vector.shape_cast %487 : vector<1x2x256xf32> to vector<2x256xf32>
    %489 = vector.shape_cast %486 : vector<2x256xf32> to vector<1x2x256xf32>
    tpu.vector_store %arg3[%c0_141, %c0_142, %c0_143], %489 {strides = array<i32>} : memref<1x2x256xf32, #tpu.memory_space<vmem>>, vector<1x2x256xf32>,
    return
  }
  func.func @transform_0(%arg0: i32) -> (i32, i32, i32) {
    %c0_i32 = arith.constant 0 : i32
    %c0_i32_0 = arith.constant 0 : i32
    %c0_i32_1 = arith.constant 0 : i32
    return %arg0, %c0_i32, %c0_i32_0 : i32, i32, i32
  }
  func.func @transform_1(%arg0: i32) -> (i32, i32) {
    %c0_i32 = arith.constant 0 : i32
    %c0_i32_0 = arith.constant 0 : i32
    %c0_i32_1 = arith.constant 0 : i32
    return %c0_i32, %c0_i32_0 : i32, i32
  }
  func.func @transform_2(%arg0: i32) -> (i32, i32, i32) {
    %c0_i32 = arith.constant 0 : i32
    %c0_i32_0 = arith.constant 0 : i32
    %c0_i32_1 = arith.constant 0 : i32
    return %arg0, %c0_i32, %c0_i32_0 : i32, i32, i32
  }
}

</mosaic_0001>

<bundles_post_ra>
// kernel: fssegmenter_forward.1
= control target key start
LH: loop header
LB: loop body
LE: loop exit
PB: predicated region body
PF: predicated region fallthrough
CT: control target
= control target key end

     0   :  { %v11678_v0 = vmov 0.0   ;;  %vm8438_vm0 = vmmov 0   ;;  %vm984_vm1 = vcmask 261120   ;;  %vm1009_vm2 = vcmask 257024   ;;  %s8439_s6 = smov 96   ;;  %s8441_s7 = smov 8   ;;  %s11673_s1 = inlined_call_operand.vmem [shape: f32[624,256], index: 1, kind: input, shape index: {}]   ;;  %s11674_s0 = inlined_call_operand.vmem [shape: f32[1,68,128], index: 0, kind: input, shape index: {}]   ;;  %s11675_s2 = inlined_call_operand.vmem [shape: f32[1,2,256], index: 2, kind: output, shape index: {}]  }
   0x1   :  { %7413 = vmatprep.subr.mxu0 %v11678_v0  ;;  %v827_v1 = vld [vmem:[%s11673_s1 + $0xf0] sm:$0xff]  ;;  %v826_v2 = vld [vmem:[%s11673_s1 + $0xe0] sm:$0xff]  ;;  %7445 = vmatprep.mubr.msk.f32.mxu0 %vm8438_vm0, %v11678_v0  ;;  %v838_v18 = vld [vmem:[%s11674_s0 + $0x8] sm:$0xff]  ;;  %s8442_s8 = smov 76   ;;  %vm1367_vm7 = vcmask 556032   ;;  %vm1372_vm8 = vcmask 64512  }
   0x2   :  { %7414 = vmatpush3.msra.mxu0 %v827_v1  ;;  %7472 = vmatprep.subr.mxu1 %v11678_v0  ;;  %v825_v3 = vld [vmem:[%s11673_s1 + $0xd0] sm:$0xff]  ;;  %v824_v4 = vld [vmem:[%s11673_s1 + $0xc0] sm:$0xff]  ;;  %v840_v20 = vld [vmem:[%s11674_s0 + $0x18] sm:$0xff]  ;;  %vm1377_vm9 = vcmask 621568   ;;  %vm1867_vm15 = vcmask 130048   ;;  %s8445_s9 = smov 64  }
   0x3   :  { %7415 = vmatprep.subr.mxu0 %v11678_v0  ;;  %7480 = vmatprep.mubr.msk.f32.mxu1 %vm8438_vm0, %v11678_v0  ;;  %v823_v5 = vld [vmem:[%s11673_s1 + $0xb0] sm:$0xff]  ;;  %v822_v6 = vld [vmem:[%s11673_s1 + $0xa0] sm:$0xff]  ;;  %v842_v22 = vld [vmem:[%s11674_s0 + $0x28] sm:$0xff] }
   0x4   :  { %7416 = vmatpush3.msra.mxu0 %v826_v2  ;;  %v821_v7 = vld [vmem:[%s11673_s1 + $0x90] sm:$0xff]  ;;  %v820_v8 = vld [vmem:[%s11673_s1 + $0x80] sm:$0xff]  ;;  %v844_v24 = vld [vmem:[%s11674_s0 + $0x38] sm:$0xff] }
   0x5   :  { %7417 = vmatprep.subr.mxu0 %v11678_v0  ;;  %v819_v9 = vld [vmem:[%s11673_s1 + $0x70] sm:$0xff]  ;;  %v818_v10 = vld [vmem:[%s11673_s1 + $0x60] sm:$0xff] }
   0x6   :  { %7418 = vmatpush3.msra.mxu0 %v825_v3  ;;  %v817_v11 = vld [vmem:[%s11673_s1 + $0x50] sm:$0xff]  ;;  %v816_v12 = vld [vmem:[%s11673_s1 + $0x40] sm:$0xff] }
   0x7   :  { %7419 = vmatprep.subr.mxu0 %v11678_v0  ;;  %v815_v13 = vld [vmem:[%s11673_s1 + $0x30] sm:$0xff]  ;;  %v814_v14 = vld [vmem:[%s11673_s1 + $0x20] sm:$0xff] }
   0x8   :  { %7420 = vmatpush3.msra.mxu0 %v824_v4  ;;  %v813_v15 = vld [vmem:[%s11673_s1 + $0x10] sm:$0xff]  ;;  %v812_v16 = vld [vmem:[%s11673_s1] sm:$0xff] }
   0x9   :  { %7421 = vmatprep.subr.mxu0 %v11678_v0  ;;  %v837_v17 = vld [vmem:[%s11674_s0] sm:$0xff]  ;;  %v839_v19 = vld [vmem:[%s11674_s0 + $0x10] sm:$0xff] }
   0xa   :  { %7422 = vmatpush3.msra.mxu0 %v823_v5  ;;  %v841_v21 = vld [vmem:[%s11674_s0 + $0x20] sm:$0xff]  ;;  %v843_v23 = vld [vmem:[%s11674_s0 + $0x30] sm:$0xff] }
   0xb   :  { %7423 = vmatprep.subr.mxu0 %v11678_v0  ;;  %v845_v25 = vld [vmem:[%s11674_s0 + $0x40] sm:$0xf]  ;;  %v829_v30 = vld [vmem:[%s11673_s1 + $0x110] sm:$0xff]  ;;  %s8440_s0 = smov 68  }
   0xc   :  { %7424 = vmatpush3.msra.mxu0 %v822_v6  ;;  %v828_v26 = vld [vmem:[%s11673_s1 + $0x100] sm:$0xff]  ;;  %v831_v40 = vld [vmem:[%s11673_s1 + $0x130] sm:$0xff] }
   0xd   :  { %7425 = vmatprep.subr.mxu0 %v11678_v0  ;;  %v830_v35 = vld [vmem:[%s11673_s1 + $0x120] sm:$0xff]  ;;  %v833_v50 = vld [vmem:[%s11673_s1 + $0x150] sm:$0xff] }
   0xe   :  { %7426 = vmatpush3.msra.mxu0 %v821_v7  ;;  %v832_v45 = vld [vmem:[%s11673_s1 + $0x140] sm:$0xff]  ;;  %v835_v60 = vld [vmem:[%s11673_s1 + $0x170] sm:$0xff] }
   0xf   :  { %7427 = vmatprep.subr.mxu0 %v11678_v0  ;;  %v834_v55 = vld [vmem:[%s11673_s1 + $0x160] sm:$0xff] }
  0x10   :  { %7428 = vmatpush3.msra.mxu0 %v820_v8  ;;  %v836_v2 = vld [vmem:[%s11673_s1 + $0x180] sm:$0xf] }
  0x11   :  { %7429 = vmatprep.subr.mxu0 %v11678_v0 }
  0x12   :  { %7430 = vmatpush3.msra.mxu0 %v819_v9 }
  0x13   :  { %7431 = vmatprep.subr.mxu0 %v11678_v0 }
  0x14   :  { %7432 = vmatpush3.msra.mxu0 %v818_v10 }
  0x15   :  { %7433 = vmatprep.subr.mxu0 %v11678_v0 }
  0x16   :  { %7434 = vmatpush3.msra.mxu0 %v817_v11 }
  0x17   :  { %7435 = vmatprep.subr.mxu0 %v11678_v0 }
  0x18   :  { %7436 = vmatpush3.msra.mxu0 %v816_v12 }
  0x19   :  { %7437 = vmatprep.subr.mxu0 %v11678_v0 }
  0x1a   :  { %7438 = vmatpush3.msra.mxu0 %v815_v13 }
  0x1b   :  { %7439 = vmatprep.subr.mxu0 %v11678_v0 }
  0x1c   :  { %7440 = vmatpush3.msra.mxu0 %v814_v14 }
  0x1d   :  { %7441 = vmatprep.subr.mxu0 %v11678_v0 }
  0x1e   :  { %7442 = vmatpush3.msra.mxu0 %v813_v15 }
  0x1f   :  { %7443 = vmatprep.subr.mxu0 %v11678_v0 }
  0x20   :  { %7444 = vmatpush3.msra.mxu0 %v812_v16 }
  0x21   :  { %7446 = vmatmul.mubr.f32.vlgmr.msra.gmra.mxu0 %v837_v17  ;;  %7507 = vmatprep.subr.mxu0 %v11678_v0 }
  0x22   :  { %7448 = vmatprep.mubr.msk.f32.mxu0 %vm8438_vm0, %v11678_v0 }
  0x25   :  { %7449 = vmatmul.mubr.f32.gmra.mxu0 %v838_v18 }
  0x26   :  { %7451 = vmatprep.mubr.msk.f32.mxu0 %vm8438_vm0, %v11678_v0 }
  0x29   :  { %7452 = vmatmul.mubr.f32.gmra.mxu0 %v839_v19 }
  0x2a   :  { %7454 = vmatprep.mubr.msk.f32.mxu0 %vm8438_vm0, %v11678_v0 }
  0x2d   :  { %7455 = vmatmul.mubr.f32.gmra.mxu0 %v840_v20 }
  0x2e   :  { %7457 = vmatprep.mubr.msk.f32.mxu0 %vm8438_vm0, %v11678_v0 }
  0x31   :  { %7458 = vmatmul.mubr.f32.gmra.mxu0 %v841_v21 }
  0x32   :  { %7460 = vmatprep.mubr.msk.f32.mxu0 %vm8438_vm0, %v11678_v0 }
  0x35   :  { %7461 = vmatmul.mubr.f32.gmra.mxu0 %v842_v22 }
  0x36   :  { %7463 = vmatprep.mubr.msk.f32.mxu0 %vm8438_vm0, %v11678_v0 }
  0x39   :  { %7464 = vmatmul.mubr.f32.gmra.mxu0 %v843_v23 }
  0x3a   :  { %7466 = vmatprep.mubr.msk.f32.mxu0 %vm8438_vm0, %v11678_v0 }
  0x3d   :  { %7467 = vmatmul.mubr.f32.gmra.mxu0 %v844_v24 }
  0x3e   :  { %7469 = vmatprep.mubr.msk.f32.mxu0 %vm8438_vm0, %v11678_v0 }
  0x41   :  { %7470 = vmatmul.mubr.f32.gmra.mxu0 %v845_v25 }
  0x42   :  { %7515 = vmatprep.mubr.msk.f32.mxu0 %vm8438_vm0, %v11678_v0 }
  0xe1   :  { %v912_v27 = vpop.f32.mrf.mxu0 }
  0xe2   :  { %v8579_v28 = vadd.f32 %v912_v27, %v828_v26 }
  0xe3   :  { %v7447_v29 = vpop.f32.mrf.mxu0 }
  0xe4   :  { %v985_v31 = vsel %vm984_vm1, %v8579_v28, 0.0 }
  0xe5   :  { %986 = vadd.xlane.f32.xlu0 %v985_v31  ;;  %v917_v32 = vpop.f32.mrf.mxu0 }
  0xe6   :  { %v8586_v33 = vadd.f32 %v917_v32, %v829_v30 }
  0xe7   :  { %v7450_v34 = vpop.f32.mrf.mxu0 }
  0xe8   :  { %v988_v36 = vsel %vm984_vm1, %v8586_v33, 0.0 }
  0xe9   :  { %989 = vadd.xlane.f32.xlu0 %v988_v36  ;;  %v922_v37 = vpop.f32.mrf.mxu0 }
  0xea   :  { %v8593_v38 = vadd.f32 %v922_v37, %v830_v35 }
  0xeb   :  { %v7453_v39 = vpop.f32.mrf.mxu0 }
  0xec   :  { %v991_v41 = vsel %vm984_vm1, %v8593_v38, 0.0 }
  0xed   :  { %992 = vadd.xlane.f32.xlu1 %v991_v41  ;;  %v927_v42 = vpop.f32.mrf.mxu0 }
  0xee   :  { %v8600_v43 = vadd.f32 %v927_v42, %v831_v40 }
  0xef   :  { %v7456_v44 = vpop.f32.mrf.mxu0 }
  0xf0   :  { %v994_v46 = vsel %vm984_vm1, %v8600_v43, 0.0 }
  0xf1   :  { %995 = vadd.xlane.f32.xlu1 %v994_v46  ;;  %v932_v47 = vpop.f32.mrf.mxu0 }
  0xf2   :  { %v8607_v48 = vadd.f32 %v932_v47, %v832_v45 }
  0xf3   :  { %v7459_v49 = vpop.f32.mrf.mxu0 }
  0xf4   :  { %v997_v51 = vsel %vm984_vm1, %v8607_v48, 0.0 }
  0xf5   :  { %998 = vadd.xlane.f32.xlu0 %v997_v51  ;;  %v937_v52 = vpop.f32.mrf.mxu0 }
  0xf6   :  { %v8614_v53 = vadd.f32 %v937_v52, %v833_v50 }
  0xf7   :  { %v7462_v54 = vpop.f32.mrf.mxu0 }
  0xf8   :  { %11773 = vst [vmem:[#allocation2_spill] sm:$0xff] %v8614_v53  ;;  %v1000_v56 = vsel %vm984_vm1, %v8614_v53, 0.0 }
  0xf9   :  { %1001 = vadd.xlane.f32.xlu1 %v1000_v56  ;;  %v942_v57 = vpop.f32.mrf.mxu0 }
  0xfa   :  { %v8621_v58 = vadd.f32 %v942_v57, %v834_v55  ;;  %v967_v55 = vld [vmem:[%s11673_s1 + $0x1e0] sm:$0xff] }
  0xfb   :  { %v7465_v59 = vpop.f32.mrf.mxu0  ;;  %7473 = vmatpush3.msra.mxu1 %v967_v55 }
  0xfc   :  { %11774 = vst [vmem:[#allocation3_spill] sm:$0xff] %v8621_v58  ;;  %v1003_v61 = vsel %vm984_vm1, %v8621_v58, 0.0  ;;  %7474 = vmatprep.subr.mxu1 %v11678_v0  ;;  %v966_v59 = vld [vmem:[%s11673_s1 + $0x1d0] sm:$0xff] }
  0xfd   :  { %1004 = vadd.xlane.f32.xlu0 %v1003_v61  ;;  %v947_v62 = vpop.f32.mrf.mxu0  ;;  %7475 = vmatpush3.msra.mxu1 %v966_v59  ;;  %v965_v61 = vld [vmem:[%s11673_s1 + $0x1c0] sm:$0xff] }
  0xfe   :  { %v8628_v63 = vadd.f32 %v947_v62, %v835_v60  ;;  %7476 = vmatprep.subr.mxu1 %v11678_v0 }
  0xff   :  { %v7468_v1 = vpop.f32.mrf.mxu0  ;;  %7477 = vmatpush3.msra.mxu1 %v965_v61 }
 0x100   :  { %11775 = vst [vmem:[#allocation4_spill] sm:$0xff] %v8628_v63  ;;  %v1006_v3 = vsel %vm984_vm1, %v8628_v63, 0.0  ;;  %7478 = vmatprep.subr.mxu1 %v11678_v0  ;;  %v964_v1 = vld [vmem:[%s11673_s1 + $0x1b0] sm:$0xff] }
 0x101   :  { %1007 = vadd.xlane.f32.xlu1 %v1006_v3  ;;  %v952_v4 = vpop.f32.mrf.mxu0  ;;  %7479 = vmatpush3.msra.mxu1 %v964_v1 }
 0x102   :  { %v8635_v5 = vadd.f32 %v952_v4, %v836_v2 }
 0x103   :  { %v7471_v6 = vpop.f32.mrf.mxu0 }
 0x104   :  { %11776 = vst [vmem:[#allocation5_spill] sm:$0xff] %v8635_v5  ;;  %v1010_v7 = vsel %vm1009_vm2, %v8635_v5, 0.0 }
 0x105   :  { %1011 = vadd.xlane.f32.xlu0 %v1010_v7 }
 0x16e   :  { %v987_v8 = vpop.xlane.xlu0 %986 }
 0x16f   :  { %v1014_v9 = vmul.f32 0.03125, %v987_v8 }
 0x171   :  { %v8640_v10 = vsub.f32 %v8579_v28, %v1014_v9 }
 0x172   :  { %v990_v11 = vpop.xlane.xlu0 %989 }
 0x173   :  { %v1015_v12 = vmul.f32 0.03125, %v990_v11  ;;  %v1032_v13 = vmul.f32 %v8640_v10, %v8640_v10 }
 0x175   :  { %v8645_v14 = vsub.f32 %v8586_v33, %v1015_v12  ;;  %v1041_v15 = vsel %vm984_vm1, %v1032_v13, 0.0 }
 0x176   :  { %v993_v16 = vpop.xlane.xlu1 %992  ;;  %1042 = vadd.xlane.f32.xlu1 %v1041_v15 }
 0x177   :  { %v1016_v17 = vmul.f32 0.03125, %v993_v16  ;;  %v1033_v18 = vmul.f32 %v8645_v14, %v8645_v14 }
 0x179   :  { %v8651_v19 = vsub.f32 %v8593_v38, %v1016_v17  ;;  %v1044_v20 = vsel %vm984_vm1, %v1033_v18, 0.0 }
 0x17a   :  { %v996_v21 = vpop.xlane.xlu1 %995  ;;  %1045 = vadd.xlane.f32.xlu0 %v1044_v20 }
 0x17b   :  { %v1017_v22 = vmul.f32 0.03125, %v996_v21  ;;  %v1034_v23 = vmul.f32 %v8651_v19, %v8651_v19  ;;  %v8711_v21 = vld [vmem:[%s11673_s1 + $0x1a0] ss:$0 sm:$0xff] }
 0x17d   :  { %v8657_v24 = vsub.f32 %v8600_v43, %v1017_v22  ;;  %v1047_v25 = vsel %vm984_vm1, %v1034_v23, 0.0 }
 0x17e   :  { %v999_v26 = vpop.xlane.xlu0 %998  ;;  %1048 = vadd.xlane.f32.xlu1 %v1047_v25 }
 0x17f   :  { %v1018_v27 = vmul.f32 0.03125, %v999_v26  ;;  %v1035_v29 = vmul.f32 %v8657_v24, %v8657_v24  ;;  %v8717_v26 = vld [vmem:[%s11673_s1 + $0x1a1] ss:$0 sm:$0xff] }
 0x181   :  { %v8663_v30 = vsub.f32 %v8607_v48, %v1018_v27  ;;  %v1050_v31 = vsel %vm984_vm1, %v1035_v29, 0.0 }
 0x182   :  { %v1002_v32 = vpop.xlane.xlu1 %1001  ;;  %1051 = vadd.xlane.f32.xlu0 %v1050_v31 }
 0x183   :  { %v1019_v34 = vmul.f32 0.03125, %v1002_v32  ;;  %v1036_v35 = vmul.f32 %v8663_v30, %v8663_v30 }
 0x185   :  { %v8669_v36 = vsub.f32 %v8614_v53, %v1019_v34  ;;  %v1053_v37 = vsel %vm984_vm1, %v1036_v35, 0.0 }
 0x186   :  { %v1005_v39 = vpop.xlane.xlu0 %1004  ;;  %1054 = vadd.xlane.f32.xlu1 %v1053_v37 }
 0x187   :  { %v1020_v40 = vmul.f32 0.03125, %v1005_v39  ;;  %v1037_v41 = vmul.f32 %v8669_v36, %v8669_v36 }
 0x189   :  { %v8675_v42 = vsub.f32 %v8621_v58, %v1020_v40  ;;  %v1056_v44 = vsel %vm984_vm1, %v1037_v41, 0.0 }
 0x18a   :  { %v1008_v45 = vpop.xlane.xlu1 %1007  ;;  %1057 = vadd.xlane.f32.xlu0 %v1056_v44 }
 0x18b   :  { %v1021_v46 = vmul.f32 0.03125, %v1008_v45  ;;  %v1038_v47 = vmul.f32 %v8675_v42, %v8675_v42 }
 0x18d   :  { %v8681_v49 = vsub.f32 %v8628_v63, %v1021_v46  ;;  %v1059_v50 = vsel %vm984_vm1, %v1038_v47, 0.0 }
 0x18e   :  { %1060 = vadd.xlane.f32.xlu1 %v1059_v50  ;;  %v1012_v51 = vpop.xlane.xlu0 %1011 }
 0x18f   :  { %v1022_v52 = vmul.f32 0.03125, %v1012_v51  ;;  %v1039_v54 = vmul.f32 %v8681_v49, %v8681_v49 }
 0x191   :  { %v8690_v56 = vsub.f32 %v8635_v5, %v1022_v52  ;;  %v1062_v57 = vsel %vm984_vm1, %v1039_v54, 0.0 }
 0x192   :  { %1063 = vadd.xlane.f32.xlu0 %v1062_v57 }
 0x193   :  { %v1040_v60 = vmul.f32 %v8690_v56, %v8690_v56 }
 0x195   :  { %v1065_v62 = vsel %vm1009_vm2, %v1040_v60, 0.0 }
 0x196   :  { %1066 = vadd.xlane.f32.xlu1 %v1065_v62 }
 0x1ff   :  { %v1043_v2 = vpop.xlane.xlu1 %1042 }
 0x200   :  { %v1068_v3 = vmul.f32 0.03125, %v1043_v2 }
 0x202   :  { %v1077_v4 = vadd.f32 1e-06, %v1068_v3 }
 0x203   :  { %v1046_v6 = vpop.xlane.xlu0 %1045 }
 0x204   :  { %8153 = vrsqrt.f32 %v1077_v4  ;;  %v1069_v7 = vmul.f32 0.03125, %v1046_v6 }
 0x206   :  { %v1078_v8 = vadd.f32 1e-06, %v1069_v7 }
 0x207   :  { %v1049_v9 = vpop.xlane.xlu1 %1048 }
 0x208   :  { %8155 = vrsqrt.f32 %v1078_v8  ;;  %v1070_v11 = vmul.f32 0.03125, %v1049_v9 }
 0x20a   :  { %v1079_v12 = vadd.f32 1e-06, %v1070_v11 }
 0x20b   :  { %v1052_v13 = vpop.xlane.xlu0 %1051 }
 0x20c   :  { %8157 = vrsqrt.f32 %v1079_v12  ;;  %v1071_v15 = vmul.f32 0.03125, %v1052_v13 }
 0x20e   :  { %v1080_v16 = vadd.f32 1e-06, %v1071_v15 }
 0x20f   :  { %v1055_v17 = vpop.xlane.xlu1 %1054 }
 0x210   :  { %8159 = vrsqrt.f32 %v1080_v16  ;;  %v1072_v18 = vmul.f32 0.03125, %v1055_v17  ;;  %v962_v17 = vld [vmem:[%s11673_s1 + $0x1a6] ss:$0 sm:$0xff] }
 0x211   :  { %v8154_v20 = vpop.eup %8153 }
 0x212   :  { %v1081_v22 = vadd.f32 1e-06, %v1072_v18  ;;  %v1095_v23 = vmul.f32 %v8154_v20, %v8640_v10 }
 0x213   :  { %v1058_v25 = vpop.xlane.xlu0 %1057 }
 0x214   :  { %8161 = vrsqrt.f32 %v1081_v22  ;;  %v1073_v27 = vmul.f32 0.03125, %v1058_v25  ;;  %v1104_v29 = vmul.f32 %v1095_v23, %v8711_v21 }
 0x215   :  { %v8156_v31 = vpop.eup %8155 }
 0x216   :  { %v1082_v32 = vadd.f32 1e-06, %v1073_v27  ;;  %v1113_v34 = vadd.f32 %v1104_v29, %v8717_v26  ;;  %v1096_v35 = vmul.f32 %v8156_v31, %v8645_v14 }
 0x217   :  { %v1061_v37 = vpop.xlane.xlu1 %1060 }
 0x218   :  { %8163 = vrsqrt.f32 %v1082_v32  ;;  %v1074_v39 = vmul.f32 0.03125, %v1061_v37  ;;  %7481 = vmatmul.mubr.msk.f32.vlgmr.msra.gmra.mxu1 %vm984_vm1, %v1113_v34  ;;  %v1105_v10 = vmul.f32 %v1096_v35, %v8711_v21 }
 0x219   :  { %v8158_v40 = vpop.eup %8157  ;;  %7483 = vmatprep.mubr.msk.f32.mxu1 %vm8438_vm0, %v11678_v0 }
 0x21a   :  { %v1083_v41 = vadd.f32 1e-06, %v1074_v39  ;;  %v1114_v44 = vadd.f32 %v1105_v10, %v8717_v26  ;;  %v1097_v45 = vmul.f32 %v8158_v40, %v8651_v19 }
 0x21b   :  { %v1064_v46 = vpop.xlane.xlu0 %1063 }
 0x21c   :  { %8165 = vrsqrt.f32 %v1083_v41  ;;  %v1075_v47 = vmul.f32 0.03125, %v1064_v46  ;;  %7484 = vmatmul.mubr.msk.f32.gmra.mxu1 %vm984_vm1, %v1114_v44  ;;  %v1106_v14 = vmul.f32 %v1097_v45, %v8711_v21 }
 0x21d   :  { %v8160_v50 = vpop.eup %8159  ;;  %7486 = vmatprep.mubr.msk.f32.mxu1 %vm8438_vm0, %v11678_v0 }
 0x21e   :  { %v1084_v51 = vadd.f32 1e-06, %v1075_v47  ;;  %v1115_v52 = vadd.f32 %v1106_v14, %v8717_v26  ;;  %v1098_v54 = vmul.f32 %v8160_v50, %v8657_v24 }
 0x21f   :  { %v1067_v55 = vpop.xlane.xlu1 %1066 }
 0x220   :  { %8167 = vrsqrt.f32 %v1084_v51  ;;  %v1076_v57 = vmul.f32 0.03125, %v1067_v55  ;;  %7487 = vmatmul.mubr.msk.f32.gmra.mxu1 %vm984_vm1, %v1115_v52  ;;  %v1107_v19 = vmul.f32 %v1098_v54, %v8711_v21 }
 0x221   :  { %v8162_v59 = vpop.eup %8161  ;;  %7489 = vmatprep.mubr.msk.f32.mxu1 %vm8438_vm0, %v11678_v0 }
 0x222   :  { %v1085_v60 = vadd.f32 1e-06, %v1076_v57  ;;  %v1116_v61 = vadd.f32 %v1107_v19, %v8717_v26  ;;  %v1099_v62 = vmul.f32 %v8162_v59, %v8663_v30 }
 0x224   :  { %8169 = vrsqrt.f32 %v1085_v60  ;;  %7490 = vmatmul.mubr.msk.f32.gmra.mxu1 %vm984_vm1, %v1116_v61  ;;  %v1108_v24 = vmul.f32 %v1099_v62, %v8711_v21 }
 0x225   :  { %v8164_v1 = vpop.eup %8163  ;;  %7492 = vmatprep.mubr.msk.f32.mxu1 %vm8438_vm0, %v11678_v0 }
 0x226   :  { %v1117_v2 = vadd.f32 %v1108_v24, %v8717_v26  ;;  %v1100_v3 = vmul.f32 %v8164_v1, %v8669_v36 }
 0x228   :  { %7493 = vmatmul.mubr.msk.f32.gmra.mxu1 %vm984_vm1, %v1117_v2  ;;  %v1109_v4 = vmul.f32 %v1100_v3, %v8711_v21  ;;  %v11_v3 = vlaneseq }
 0x229   :  { %v8166_v6 = vpop.eup %8165  ;;  %7495 = vmatprep.mubr.msk.f32.mxu1 %vm8438_vm0, %v11678_v0 }
 0x22a   :  { %v1118_v30 = vadd.f32 %v1109_v4, %v8717_v26  ;;  %v1101_v7 = vmul.f32 %v8166_v6, %v8675_v42  ;;  %v8819_v4 = vand.u32 127, %v11_v3 }
 0x22c   :  { %7496 = vmatmul.mubr.msk.f32.gmra.mxu1 %vm984_vm1, %v1118_v30  ;;  %v1110_v8 = vmul.f32 %v1101_v7, %v8711_v21  ;;  %11777 = vst [vmem:[#allocation6_spill] sm:$0xff] %v8819_v4  ;;  %v50_v6 = vadd.s32 128, %v8819_v4  ;;  %v11676_v7 = vmov 0   ;;  %vm52_vm11 = vcmp.ge.s32.totalorder %v8819_v4, 68 }
 0x22d   :  { %v8168_v9 = vpop.eup %8167  ;;  %7498 = vmatprep.mubr.msk.f32.mxu1 %vm8438_vm0, %v11678_v0  ;;  %vm11686_vm13 = vcmp.eq.s32.totalorder %v8819_v4, 3  ;;  %vm6625_vm14 = vcmp.eq.s32.totalorder %v8819_v4, 1 }
 0x22e   :  { %v1119_v36 = vadd.f32 %v1110_v8, %v8717_v26  ;;  %v1102_v11 = vmul.f32 %v8168_v9, %v8681_v49  ;;  %vm59_vm3 = vcmp.ge.s32.totalorder %v50_v6, 136  ;;  %vm68_vm4 = vcmp.ge.s32.totalorder %v50_v6, 204 }
 0x22f   :  { %v62_v8 = vsel %vm59_vm3, 1, %v11676_v7  ;;  %vm414_vm3 = vcmp.ge.s32.totalorder %v8819_v4, 8 }
 0x230   :  { %7499 = vmatmul.mubr.msk.f32.gmra.mxu1 %vm984_vm1, %v1119_v36  ;;  %v1111_v12 = vmul.f32 %v1102_v11, %v8711_v21  ;;  %v65_v9 = vadd.s32 1, %v62_v8  ;;  %v71_v36 = vsel %vm68_vm4, 1, %v11676_v7  ;;  %vm416_vm4 = vcmp.ge.s32.totalorder %v8819_v4, 16 }
 0x231   :  { %v8170_v13 = vpop.eup %8169  ;;  %7501 = vmatprep.mubr.msk.f32.mxu1 %vm8438_vm0, %v11678_v0 }
 0x232   :  { %v1120_v42 = vadd.f32 %v1111_v12, %v8717_v26  ;;  %v1103_v15 = vmul.f32 %v8170_v13, %v8690_v56  ;;  %v74_v11 = vadd.s32 %v71_v36, %v65_v9 }
 0x234   :  { %7502 = vmatmul.mubr.msk.f32.gmra.mxu1 %vm984_vm1, %v1120_v42  ;;  %v1112_v16 = vmul.f32 %v1103_v15, %v8711_v21  ;;  %v597_v13 = vmul.u32 68, %v74_v11  ;;  %vm6511_vm5 = vcmp.eq.s32.totalorder %v74_v11, 3  ;;  %vm6510_vm6 = vcmp.eq.s32.totalorder %v74_v11, 2 }
 0x235   :  { %7504 = vmatprep.mubr.msk.f32.mxu1 %vm8438_vm0, %v11678_v0  ;;  %vm6509_vm10 = vcmp.eq.s32.totalorder %v74_v11, 1  ;;  %vm6507_vm12 = vcmp.eq.s32.totalorder %v74_v11, 0 }
 0x236   :  { %v1121_v49 = vadd.f32 %v1112_v16, %v8717_v26  ;;  %v8831_v42 = vsub.s32 %v50_v6, %v597_v13 }
 0x238   :  { %7505 = vmatmul.mubr.msk.f32.gmra.mxu1 %vm984_vm1, %v1121_v49 }
 0x239   :  { %1674 = vmatprep.mubr.f32.mxu1 %v11678_v0 }
 0x2d8   :  { %v1215_v18 = vpop.f32.mrf.mxu1 }
 0x2d9   :  { %v8774_v20 = vadd.f32 %v1215_v18, %v962_v17 }
 0x2da   :  { %v7482_v56 = vpop.f32.mrf.mxu1 }
 0x2db   :  { %1268 = vrot.lane.b32.xlu0 %v8774_v20, %s8439_s6 }
 0x2dc   :  { %v1220_v21 = vpop.f32.mrf.mxu1 }
 0x2dd   :  { %v8778_v22 = vadd.f32 %v1220_v21, %v962_v17 }
 0x2de   :  { %v7485_v23 = vpop.f32.mrf.mxu1 }
 0x2df   :  { %1270 = vrot.lane.b32.xlu1 %v8778_v22, %s8439_s6 }
 0x2e0   :  { %v1225_v25 = vpop.f32.mrf.mxu1 }
 0x2e1   :  { %v8782_v26 = vadd.f32 %v1225_v25, %v962_v17 }
 0x2e2   :  { %v7488_v27 = vpop.f32.mrf.mxu1 }
 0x2e3   :  { %1272 = vrot.lane.b32.xlu1 %v8782_v26, %s8439_s6  ;;  %v8841_v27 = vsel %vm6511_vm5, 1.0, %v11678_v0  ;;  %vm419_vm5 = vcmp.ge.s32.totalorder %v8819_v4, 24 }
 0x2e4   :  { %v1230_v29 = vpop.f32.mrf.mxu1  ;;  %11778 = vst [vmem:[#allocation7_spill] sm:$0xff] %v8841_v27 }
 0x2e5   :  { %v8786_v31 = vadd.f32 %v1230_v29, %v962_v17 }
 0x2e6   :  { %v7491_v32 = vpop.f32.mrf.mxu1 }
 0x2e7   :  { %1274 = vrot.lane.b32.xlu1 %v8786_v31, %s8439_s6 }
 0x2e8   :  { %v1235_v34 = vpop.f32.mrf.mxu1 }
 0x2e9   :  { %v8790_v35 = vadd.f32 %v1235_v34, %v962_v17 }
 0x2ea   :  { %v7494_v37 = vpop.f32.mrf.mxu1 }
 0x2eb   :  { %1276 = vrot.lane.b32.xlu0 %v8790_v35, %s8439_s6 }
 0x2ec   :  { %v1240_v39 = vpop.f32.mrf.mxu1 }
 0x2ed   :  { %v8794_v10 = vadd.f32 %v1240_v39, %v962_v17 }
 0x2ee   :  { %v7497_v40 = vpop.f32.mrf.mxu1 }
 0x2ef   :  { %1278 = vrot.lane.b32.xlu1 %v8794_v10, %s8439_s6 }
 0x2f0   :  { %v1245_v41 = vpop.f32.mrf.mxu1 }
 0x2f1   :  { %v8798_v44 = vadd.f32 %v1245_v41, %v962_v17 }
 0x2f2   :  { %v7500_v45 = vpop.f32.mrf.mxu1 }
 0x2f3   :  { %1280 = vrot.lane.b32.xlu0 %v8798_v44, %s8439_s6  ;;  %v8849_v45 = vsel %vm6510_vm6, 1.0, %v11678_v0 }
 0x2f4   :  { %v1250_v46 = vpop.f32.mrf.mxu1  ;;  %11779 = vst [vmem:[#allocation8_spill] sm:$0xff] %v8849_v45 }
 0x2f5   :  { %v8802_v47 = vadd.f32 %v1250_v46, %v962_v17 }
 0x2f6   :  { %v7503_v14 = vpop.f32.mrf.mxu1 }
 0x2f7   :  { %1282 = vrot.lane.b32.xlu1 %v8802_v47, %s8439_s6 }
 0x2f8   :  { %v1255_v50 = vpop.f32.mrf.mxu1 }
 0x2f9   :  { %v8806_v51 = vadd.f32 %v1255_v50, %v962_v17 }
 0x2fa   :  { %v7506_v52 = vpop.f32.mrf.mxu1 }
 0x2fb   :  { %1284 = vrot.lane.b32.xlu0 %v8806_v51, %s8439_s6 }
 0x34d   :  { %v1269_v54 = vpop.permute.xlu0 %1268 }
 0x34e   :  { %1295 = vxpose.xlu1.b32.start [1/9] (short) (narrow) %v1269_v54, 32 }
 0x351   :  { %v1271_v55 = vpop.permute.xlu1 %1270 }
 0x352   :  { %1296 = vxpose.xlu1.b32.cont [2/9] (short) (narrow) %v1271_v55, 32 }
 0x355   :  { %v1273_v57 = vpop.permute.xlu1 %1272 }
 0x356   :  { %1297 = vxpose.xlu1.b32.cont [3/9] (short) (narrow) %v1273_v57, 32  ;;  %v8858_v57 = vsel %vm6509_vm10, 1.0, %v11678_v0 }
 0x357   :  { %11780 = vst [vmem:[#allocation9_spill] sm:$0xff] %v8858_v57 }
 0x359   :  { %v1275_v19 = vpop.permute.xlu1 %1274 }
 0x35a   :  { %1298 = vxpose.xlu1.b32.cont [4/9] (short) (narrow) %v1275_v19, 32  ;;  %v8863_v19 = vsel %vm52_vm11, 1.0, %v11678_v0 }
 0x35b   :  { %11781 = vst [vmem:[#allocation10_spill] sm:$0xff] %v8863_v19 }
 0x35d   :  { %v1277_v59 = vpop.permute.xlu0 %1276 }
 0x35e   :  { %1299 = vxpose.xlu1.b32.cont [5/9] (short) (narrow) %v1277_v59, 32 }
 0x361   :  { %v1279_v60 = vpop.permute.xlu1 %1278 }
 0x362   :  { %1300 = vxpose.xlu1.b32.cont [6/9] (short) (narrow) %v1279_v60, 32 }
 0x365   :  { %v1281_v61 = vpop.permute.xlu0 %1280 }
 0x366   :  { %1301 = vxpose.xlu1.b32.cont [7/9] (short) (narrow) %v1281_v61, 32 }
 0x369   :  { %v1283_v62 = vpop.permute.xlu1 %1282 }
 0x36a   :  { %1302 = vxpose.xlu1.b32.cont [8/9] (short) (narrow) %v1283_v62, 32 }
 0x36d   :  { %v1285_v24 = vpop.permute.xlu0 %1284 }
 0x36e   :  { %1303 = vxpose.xlu1.b32.end [9/9] (short) (narrow) %v1285_v24, 32 }
 0x3ca   :  { %v8810_v1 = vpop.trf.xlu1 }
 0x3cb   :  { %1331 = vrot.lane.b32.xlu0 %v8810_v1, %s8440_s0 }
 0x3ce   :  { %v8814_v2 = vpop.trf.xlu1 }
 0x3cf   :  { %1333 = vrot.lane.b32.xlu0 %v8814_v2, %s8440_s0 }
 0x3d2   :  { %v1313_v30 = vpop.trf.xlu1 }
 0x3d3   :  { %1345 = vrot.lane.b32.xlu0 %v8814_v2, %s8441_s7 }
 0x3d6   :  { %v1314_v12 = vpop.trf.xlu1 }
 0x3d7   :  { %1357 = vrot.lane.b32.xlu0 %v8814_v2, %s8442_s8 }
 0x3db   :  { %1335 = vrot.lane.b32.xlu0 %v1313_v30, %s8440_s0 }
 0x3df   :  { %1347 = vrot.lane.b32.xlu0 %v1313_v30, %s8441_s7 }
 0x3e3   :  { %1359 = vrot.lane.b32.xlu0 %v1313_v30, %s8442_s8 }
 0x3e7   :  { %1337 = vrot.lane.b32.xlu0 %v1314_v12, %s8440_s0 }
 0x3eb   :  { %1349 = vrot.lane.b32.xlu0 %v1314_v12, %s8441_s7 }
 0x3ef   :  { %1361 = vrot.lane.b32.xlu0 %v1314_v12, %s8442_s8 }
 0x3f3   :  { %1343 = vrot.lane.b32.xlu0 %v8810_v1, %s8441_s7 }
 0x3f7   :  { %1355 = vrot.lane.b32.xlu0 %v8810_v1, %s8442_s8 }
 0x43d   :  { %v1332_v15 = vpop.permute.xlu0 %1331 }
 0x43e   :  { %v1368_v9 = vsel %vm1367_vm7, %v8810_v1, %v1332_v15 }
 0x441   :  { %v1334_v16 = vpop.permute.xlu0 %1333 }
 0x442   :  { %v1369_v59 = vsel %vm1367_vm7, %v8814_v2, %v1334_v16  ;;  %v8873_v2 = vsel %vm6507_vm12, 1.0, %v11678_v0 }
 0x443   :  { %v1385_v6 = vmul.f32 %v8863_v19, %v1369_v59  ;;  %11782 = vst [vmem:[#allocation11_spill] sm:$0xff] %v8873_v2 }
 0x445   :  { %v1346_v49 = vpop.permute.xlu0 %1345 }
 0x446   :  { %v1374_v46 = vsel %vm1372_vm8, %v1334_v16, %v1346_v49 }
 0x449   :  { %v1358_v17 = vpop.permute.xlu0 %1357 }
 0x44a   :  { %v1379_v52 = vsel %vm1377_vm9, %v1374_v46, %v1358_v17  ;;  %v1387_v54 = vmul.f32 0.0, %v1358_v17 }
 0x44b   :  { %v1386_v24 = vmul.f32 %v8858_v57, %v1379_v52 }
 0x44d   :  { %v1336_v18 = vpop.permute.xlu0 %1335 }
 0x44e   :  { %v1370_v14 = vsel %vm1367_vm7, %v1313_v30, %v1336_v18  ;;  %v11689_v30 = vmov 1.0  }
 0x44f   :  { %v1388_v62 = vmul.f32 0.0, %v1370_v14  ;;  %v8878_v8 = vsel %vm52_vm11, 0.0, %v11689_v30 }
 0x450   :  { %11783 = vst [vmem:[#allocation12_spill] sm:$0xff] %v8878_v8  ;;  %v1382_v49 = vmul.f32 %v8878_v8, %v1368_v9 }
 0x451   :  { %v1348_v56 = vpop.permute.xlu0 %1347 }
 0x452   :  { %v1375_v29 = vsel %vm1372_vm8, %v1336_v18, %v1348_v56 }
 0x455   :  { %v1360_v21 = vpop.permute.xlu0 %1359 }
 0x456   :  { %v1380_v39 = vsel %vm1377_vm9, %v1375_v29, %v1360_v21  ;;  %v1390_v40 = vmul.f32 0.0, %v1360_v21  ;;  %v9004_v29 = vshrl.u32 %v11_v3, 7 }
 0x457   :  { %v1389_v61 = vmul.f32 %v8849_v45, %v1380_v39  ;;  %v415_v39 = vsel %vm414_vm3, 1, %v11676_v7 }
 0x459   :  { %v1338_v23 = vpop.permute.xlu0 %1337 }
 0x45a   :  { %v1371_v32 = vsel %vm1367_vm7, %v1314_v12, %v1338_v23 }
 0x45b   :  { %v1391_v55 = vmul.f32 0.0, %v1371_v32 }
 0x45d   :  { %v1350_v25 = vpop.permute.xlu0 %1349 }
 0x45e   :  { %v1376_v34 = vsel %vm1372_vm8, %v1338_v23, %v1350_v25 }
 0x461   :  { %v1362_v37 = vpop.permute.xlu0 %1361 }
 0x462   :  { %v1381_v41 = vsel %vm1377_vm9, %v1376_v34, %v1362_v37  ;;  %7508 = vmatpush3.msra.mxu0 %v1362_v37 }
 0x463   :  { %7509 = vmatprep.subr.mxu0 %v11678_v0  ;;  %v1392_v50 = vmul.f32 %v8841_v27, %v1381_v41 }
 0x464   :  { %7510 = vmatpush3.msra.mxu0 %v1390_v40 }
 0x465   :  { %1634 = vmatprep.subr.mxu1 %v1392_v50  ;;  %7511 = vmatprep.subr.mxu0 %v11678_v0  ;;  %v1344_v60 = vpop.permute.xlu0 %1343  ;;  %v417_v50 = vsel %vm416_vm4, 1, %v11676_v7 }
 0x466   :  { %1635 = vmatpush1.msra.mxu1 %v1391_v55  ;;  %7512 = vmatpush3.msra.mxu0 %v1387_v54  ;;  %v1373_v36 = vsel %vm1372_vm8, %v1332_v15, %v1344_v60  ;;  %v133_v55 = vadd.s32 200, %v9004_v29 }
 0x467   :  { %1636 = vmatprep.subr.mxu1 %v1389_v61  ;;  %7513 = vmatprep.subr.mxu0 %v11678_v0 }
 0x468   :  { %1637 = vmatpush1.msra.mxu1 %v1388_v62  ;;  %v418_v62 = vadd.s32 %v417_v50, %v415_v39  ;;  %vm337_vm6 = vcmp.ge.s32.totalorder %v133_v55, 204 }
 0x469   :  { %1638 = vmatprep.subr.mxu1 %v1386_v24  ;;  %v1356_v11 = vpop.permute.xlu0 %1355 }
 0x46a   :  { %v1378_v12 = vsel %vm1377_vm9, %v1373_v36, %v1356_v11  ;;  %v1384_v13 = vmul.f32 0.0, %v1356_v11  ;;  %1639 = vmatpush1.msra.mxu1 %v1385_v6  ;;  %v420_v11 = vsel %vm419_vm5, 1, %v11676_v7  ;;  %vm11693_vm5 = vcmp.eq.s32.totalorder %v8819_v4, 2 }
 0x46b   :  { %v1383_v16 = vmul.f32 %v8873_v2, %v1378_v12 }
 0x46c   :  { %7514 = vmatpush3.msra.mxu0 %v1384_v13 }
 0x46d   :  { %1640 = vmatprep.subr.mxu1 %v1383_v16  ;;  %7516 = vmatmul.mubr.msk.f32.vlgmr.msra.gmra.mxu0 %vm984_vm1, %v8774_v20 }
 0x46e   :  { %1641 = vmatpush1.msra.mxu1 %v1382_v49  ;;  %7518 = vmatprep.mubr.msk.f32.mxu0 %vm8438_vm0, %v11678_v0 }
 0x46f   :  { %6693 = vmatmul.mubr.msk.f32.vlgmr.msra.gmra.mxu1 %vm984_vm1, %v8774_v20  ;;  %7542 = vmatprep.subr.mxu0 %v11678_v0 }
 0x470   :  { %1680 = vmatprep.mubr.f32.mxu1 %v11678_v0  ;;  %6982 = vmatprep.subr.msk.mxu1 %vm11686_vm13, %v11689_v30 }
 0x471   :  { %7519 = vmatmul.mubr.msk.f32.gmra.mxu0 %vm984_vm1, %v8778_v22  ;;  %6983 = vmatpush3.msk.msra.mxu1 %vm6625_vm14, %v11689_v30 }
 0x472   :  { %7521 = vmatprep.mubr.msk.f32.mxu0 %vm8438_vm0, %v11678_v0  ;;  %7543 = vmatpush3.msk.msra.mxu0 %vm11686_vm13, %v11689_v30 }
 0x473   :  { %6694 = vmatmul.mubr.msk.f32.gmra.mxu1 %vm984_vm1, %v8778_v22  ;;  %7544 = vmatprep.subr.mxu0 %v11678_v0 }
 0x474   :  { %1686 = vmatprep.mubr.f32.mxu1 %v11678_v0  ;;  %6984 = vmatprep.subr.msk.mxu1 %vm11686_vm13, %v11689_v30 }
 0x475   :  { %7522 = vmatmul.mubr.msk.f32.gmra.mxu0 %vm984_vm1, %v8782_v26  ;;  %6985 = vmatpush3.msk.msra.mxu1 %vm6625_vm14, %v11689_v30 }
 0x476   :  { %7524 = vmatprep.mubr.msk.f32.mxu0 %vm8438_vm0, %v11678_v0  ;;  %7545 = vmatpush3.msk.msra.mxu0 %vm11686_vm13, %v11689_v30 }
 0x477   :  { %6695 = vmatmul.mubr.msk.f32.gmra.mxu1 %vm984_vm1, %v8782_v26  ;;  %7573 = vmatprep.subr.mxu0 %v11678_v0 }
 0x478   :  { %1692 = vmatprep.mubr.f32.mxu1 %v11678_v0  ;;  %6986 = vmatprep.subr.msk.mxu1 %vm11686_vm13, %v11689_v30 }
 0x479   :  { %7525 = vmatmul.mubr.msk.f32.gmra.mxu0 %vm984_vm1, %v8786_v31  ;;  %6987 = vmatpush3.msk.msra.mxu1 %vm6625_vm14, %v11689_v30 }
 0x47a   :  { %7527 = vmatprep.mubr.msk.f32.mxu0 %vm8438_vm0, %v11678_v0  ;;  %6988 = vmatprep.subr.msk.mxu1 %vm11686_vm13, %v11689_v30 }
 0x47b   :  { %6696 = vmatmul.mubr.msk.f32.gmra.mxu1 %vm984_vm1, %v8786_v31 }
 0x47c   :  { %1698 = vmatprep.mubr.f32.mxu1 %v11678_v0  ;;  %6989 = vmatpush3.msk.msra.mxu1 %vm6625_vm14, %v11689_v30 }
 0x47d   :  { %7528 = vmatmul.mubr.msk.f32.gmra.mxu0 %vm984_vm1, %v8790_v35  ;;  %6990 = vmatprep.subr.msk.mxu1 %vm11686_vm13, %v11689_v30 }
 0x47e   :  { %7530 = vmatprep.mubr.msk.f32.mxu0 %vm8438_vm0, %v11678_v0  ;;  %6991 = vmatpush3.msk.msra.mxu1 %vm6625_vm14, %v11689_v30 }
 0x47f   :  { %6697 = vmatmul.mubr.msk.f32.gmra.mxu1 %vm984_vm1, %v8790_v35  ;;  %6992 = vmatprep.subr.msk.mxu1 %vm11686_vm13, %v11689_v30 }
 0x480   :  { %1704 = vmatprep.mubr.f32.mxu1 %v11678_v0  ;;  %6993 = vmatpush3.msk.msra.mxu1 %vm6625_vm14, %v11689_v30 }
 0x481   :  { %7531 = vmatmul.mubr.msk.f32.gmra.mxu0 %vm984_vm1, %v8794_v10 }
 0x482   :  { %7533 = vmatprep.mubr.msk.f32.mxu0 %vm8438_vm0, %v11678_v0 }
 0x483   :  { %6698 = vmatmul.mubr.msk.f32.gmra.mxu1 %vm984_vm1, %v8794_v10 }
 0x484   :  { %1710 = vmatprep.mubr.f32.mxu1 %v11678_v0 }
 0x485   :  { %7534 = vmatmul.mubr.msk.f32.gmra.mxu0 %vm984_vm1, %v8798_v44 }
 0x486   :  { %7536 = vmatprep.mubr.msk.f32.mxu0 %vm8438_vm0, %v11678_v0 }
 0x487   :  { %6699 = vmatmul.mubr.msk.f32.gmra.mxu1 %vm984_vm1, %v8798_v44 }
 0x488   :  { %1716 = vmatprep.mubr.f32.mxu1 %v11678_v0 }
 0x489   :  { %7537 = vmatmul.mubr.msk.f32.gmra.mxu0 %vm984_vm1, %v8802_v47 }
 0x48a   :  { %7539 = vmatprep.mubr.msk.f32.mxu0 %vm8438_vm0, %v11678_v0 }
 0x48b   :  { %6700 = vmatmul.mubr.msk.f32.gmra.mxu1 %vm984_vm1, %v8802_v47 }
 0x48c   :  { %1722 = vmatprep.mubr.f32.mxu1 %v11678_v0 }
 0x48d   :  { %7540 = vmatmul.mubr.msk.f32.gmra.mxu0 %vm984_vm1, %v8806_v51 }
 0x48e   :  { %7546 = vmatprep.mubr.msk.f32.mxu0 %vm8438_vm0, %v11678_v0 }
 0x48f   :  { %6701 = vmatmul.mubr.msk.f32.gmra.mxu1 %vm984_vm1, %v8806_v51 }
 0x52d   :  { %v1795_v1 = vpop.f32.mrf.mxu0 }
 0x52e   :  { %v8995_v18 = vmul.f32 0.35355338, %v1795_v1 }
 0x52f   :  { %v1676_v15 = vpop.f32.mrf.mxu1  ;;  %v7517_v17 = vpop.f32.mrf.mxu0 }
 0x530   :  { %v8998_v23 = vmul.f32 0.35355338, %v1676_v15  ;;  %v1868_v14 = vsel %vm1867_vm15, %v8995_v18, -inf  ;;  %v9033_v17 = vadd.s32 %v420_v11, %v418_v62 }
 0x531   :  { %v1678_v56 = vpop.f32.mrf.mxu1  ;;  %v1800_v21 = vpop.f32.mrf.mxu0 }
 0x532   :  { %v9000_v25 = vmul.f32 0.35355338, %v1678_v56  ;;  %v9009_v40 = vmul.f32 0.35355338, %v1800_v21  ;;  %vm6526_vm10 = vcmp.eq.s32.totalorder %v9033_v17, 1  ;;  %vm6542_vm12 = vcmp.eq.s32.totalorder %v9033_v17, 3 }
 0x533   :  { %v1682_v32 = vpop.f32.mrf.mxu1  ;;  %v7520_v34 = vpop.f32.mrf.mxu0  ;;  %vm6534_vm13 = vcmp.eq.s32.totalorder %v9033_v17, 2 }
 0x534   :  { %v1866_v37 = vmax.f32 %v8998_v23, %v9000_v25  ;;  %v9015_v3 = vmul.f32 0.35355338, %v1682_v32  ;;  %v1873_v36 = vsel %vm1867_vm15, %v9009_v40, -inf }
 0x535   :  { %v1684_v41 = vpop.f32.mrf.mxu1  ;;  %v1805_v46 = vpop.f32.mrf.mxu0 }
 0x536   :  { %v9017_v52 = vmul.f32 0.35355338, %v1684_v41  ;;  %v1869_v54 = vmax.f32 %v1866_v37, %v1868_v14  ;;  %v9022_v24 = vmul.f32 0.35355338, %v1805_v46  ;;  %v371_v37 = vsel %vm337_vm6, 1, %v11676_v7 }
 0x537   :  { %v1688_v59 = vpop.f32.mrf.mxu1  ;;  %v7523_v60 = vpop.f32.mrf.mxu0  ;;  %v116_v14 = vadd.s32 64, %v9004_v29 }
 0x538   :  { %1870 = vmax.xlane.f32.xlu0 %v1869_v54  ;;  %v1872_v61 = vmax.f32 %v9015_v3, %v9017_v52  ;;  %v9027_v12 = vmul.f32 0.35355338, %v1688_v59  ;;  %v1878_v34 = vsel %vm1867_vm15, %v9022_v24, -inf }
 0x539   :  { %v1690_v6 = vpop.f32.mrf.mxu1  ;;  %v1810_v9 = vpop.f32.mrf.mxu0  ;;  %vm150_vm3 = vcmp.ge.s32.totalorder %v116_v14, 68 }
 0x53a   :  { %v9029_v13 = vmul.f32 0.35355338, %v1690_v6  ;;  %v1874_v16 = vmax.f32 %v1872_v61, %v1873_v36  ;;  %v9035_v56 = vmul.f32 0.35355338, %v1810_v9  ;;  %v9053_v6 = vadd.s32 2, %v371_v37 }
 0x53b   :  { %v1694_v49 = vpop.f32.mrf.mxu1  ;;  %v7526_v1 = vpop.f32.mrf.mxu0  ;;  %v9076_v14 = vsel %vm150_vm3, 1, %v11676_v7  ;;  %vm1394_vm3 = vcmask 1043456  }
 0x53c   :  { %1875 = vmax.xlane.f32.xlu1 %v1874_v16  ;;  %v1877_v15 = vmax.f32 %v9027_v12, %v9029_v13  ;;  %v9040_v39 = vmul.f32 0.35355338, %v1694_v49  ;;  %v1883_v62 = vsel %vm1867_vm15, %v9035_v56, -inf  ;;  %11784 = vst [vmem:[#allocation13_spill] sm:$0xff] %v9053_v6  ;;  %vm11685_vm4 = vcmp.eq.s32.totalorder %v9053_v6, %v8819_v4  ;;  %11785 = vst [vmem:[#allocation14_spill] sm:$0xff] %v9076_v14 }
 0x53d   :  { %v1696_v21 = vpop.f32.mrf.mxu1  ;;  %v1815_v32 = vpop.f32.mrf.mxu0  ;;  %6994 = vmatprep.subr.msk.mxu1 %vm11685_vm4, %v11689_v30  ;;  %vm11684_vm6 = vcmp.eq.s32.totalorder %v9076_v14, %v8819_v4  ;;  %vm6518_vm4 = vcmp.eq.s32.totalorder %v9033_v17, 0 }
 0x53e   :  { %v9042_v41 = vmul.f32 0.35355338, %v1696_v21  ;;  %v1879_v46 = vmax.f32 %v1877_v15, %v1878_v34  ;;  %v9048_v59 = vmul.f32 0.35355338, %v1815_v32  ;;  %v9062_v15 = vsel %vm6526_vm10, 1.0, %v11678_v0  ;;  %6995 = vmatpush3.msk.msra.mxu1 %vm6625_vm14, %v11689_v30 }
 0x53f   :  { %v1700_v50 = vpop.f32.mrf.mxu1  ;;  %v7529_v54 = vpop.f32.mrf.mxu0  ;;  %6996 = vmatprep.subr.msk.mxu1 %vm11693_vm5, %v11689_v30  ;;  %vm11692_vm10 = vcmp.eq.s32.totalorder %v8819_v4, 0 }
 0x540   :  { %1880 = vmax.xlane.f32.xlu0 %v1879_v46  ;;  %v1882_v55 = vmax.f32 %v9040_v39, %v9042_v41  ;;  %v9055_v9 = vmul.f32 0.35355338, %v1700_v50  ;;  %v1888_v37 = vsel %vm1867_vm15, %v9048_v59, -inf  ;;  %v9073_v46 = vsel %vm6542_vm12, 1.0, %v11678_v0  ;;  %6997 = vmatpush3.msk.msra.mxu1 %vm11684_vm6, %v11689_v30 }
 0x541   :  { %v1702_v60 = vpop.f32.mrf.mxu1  ;;  %v1820_v61 = vpop.f32.mrf.mxu0  ;;  %6998 = vmatprep.subr.msk.mxu1 %vm11693_vm5, %v11689_v30  ;;  %vm447_vm12 = vcmp.eq.s32.totalorder %v9053_v6, %v9033_v17  ;;  %vm11691_vm6 = vcmask 125952  }
 0x542   :  { %v9057_v36 = vmul.f32 0.35355338, %v1702_v60  ;;  %v1884_v11 = vmax.f32 %v1882_v55, %v1883_v62  ;;  %v9066_v21 = vmul.f32 0.35355338, %v1820_v61  ;;  %6999 = vmatpush3.msk.msra.mxu1 %vm11692_vm10, %v11689_v30 }
 0x543   :  { %v1706_v16 = vpop.f32.mrf.mxu1  ;;  %v7532_v49 = vpop.f32.mrf.mxu0  ;;  %7000 = vmatprep.subr.msk.mxu1 %vm11693_vm5, %v11689_v30 }
 0x544   :  { %1885 = vmax.xlane.f32.xlu0 %v1884_v11  ;;  %v1887_v1 = vmax.f32 %v9055_v9, %v9057_v36  ;;  %v9082_v50 = vmul.f32 0.35355338, %v1706_v16  ;;  %7001 = vmatpush3.msk.msra.mxu1 %vm11692_vm10, %v11689_v30 }
 0x545   :  { %v1708_v32 = vpop.f32.mrf.mxu1  ;;  %v1825_v34 = vpop.f32.mrf.mxu0  ;;  %7002 = vmatprep.subr.msk.mxu1 %vm11693_vm5, %v11689_v30 }
 0x546   :  { %v9084_v54 = vmul.f32 0.35355338, %v1708_v32  ;;  %v1889_v55 = vmax.f32 %v1887_v1, %v1888_v37  ;;  %v9101_v11 = vmul.f32 0.35355338, %v1825_v34  ;;  %v1893_v1 = vsel %vm1867_vm15, %v9066_v21, -inf  ;;  %7003 = vmatpush3.msk.msra.mxu1 %vm11692_vm10, %v11689_v30 }
 0x547   :  { %v1712_v60 = vpop.f32.mrf.mxu1  ;;  %v7535_v61 = vpop.f32.mrf.mxu0  ;;  %v9107_v32 = vpack.i.bf16 %v9062_v15, %v9073_v46  ;;  %7004 = vmatprep.subr.msk.mxu1 %vm11693_vm5, %v11689_v30 }
 0x548   :  { %1890 = vmax.xlane.f32.xlu0 %v1889_v55  ;;  %v1892_v62 = vmax.f32 %v9082_v50, %v9084_v54  ;;  %v9113_v37 = vmul.f32 0.35355338, %v1712_v60  ;;  %7005 = vmatpush3.msk.msra.mxu1 %vm11692_vm10, %v11689_v30 }
 0x549   :  { %v1714_v16 = vpop.f32.mrf.mxu1  ;;  %v1830_v49 = vpop.f32.mrf.mxu0  ;;  %7006 = vmatprep.subr.msk.mxu1 %vm11693_vm5, %v11689_v30 }
 0x54a   :  { %v9115_v55 = vmul.f32 0.35355338, %v1714_v16  ;;  %v1894_v34 = vmax.f32 %v1892_v62, %v1893_v1  ;;  %v9128_v60 = vmul.f32 0.35355338, %v1830_v49  ;;  %v1898_v1 = vsel %vm1867_vm15, %v9101_v11, -inf  ;;  %7007 = vmatpush3.msk.msra.mxu1 %vm11692_vm10, %v11689_v30 }
 0x54b   :  { %v1718_v61 = vpop.f32.mrf.mxu1  ;;  %v7538_v7 = vpop.f32.mrf.mxu0  ;;  %7008 = vmatprep.subr.msk.mxu1 %vm11693_vm5, %v11689_v30 }
 0x54c   :  { %1895 = vmax.xlane.f32.xlu0 %v1894_v34  ;;  %v1897_v0 = vmax.f32 %v9113_v37, %v9115_v55  ;;  %v9137_v7 = vmul.f32 0.35355338, %v1718_v61  ;;  %7009 = vmatpush3.msk.msra.mxu1 %vm11692_vm10, %v11689_v30 }
 0x54d   :  { %v1720_v62 = vpop.f32.mrf.mxu1  ;;  %v1835_v16 = vpop.f32.mrf.mxu0  ;;  %8074 = vrot.lane.b32.xlu1 %v9107_v32, %s8445_s9  ;;  %7010 = vmatprep.subr.msk.mxu1 %vm11693_vm5, %v11689_v30  ;;  %vm618_vm5 = vcmp.ge.s32.totalorder %v8831_v42, 51 }
 0x54e   :  { %v9139_v34 = vmul.f32 0.35355338, %v1720_v62  ;;  %v1899_v8 = vmax.f32 %v1897_v0, %v1898_v1  ;;  %v9163_v62 = vmul.f32 0.35355338, %v1835_v16  ;;  %7011 = vmatpush3.msk.msra.mxu1 %vm11692_vm10, %v11689_v30 }
 0x54f   :  { %v1724_v49 = vpop.f32.mrf.mxu1  ;;  %v7541_v2 = vpop.f32.mrf.mxu0  ;;  %7012 = vmatprep.subr.msk.mxu1 %vm6625_vm14, %v11689_v30 }
 0x550   :  { %v9149_v19 = vmul.f32 0.35355338, %v1724_v49  ;;  %1900 = vmax.xlane.f32.xlu0 %v1899_v8  ;;  %v1902_v61 = vmax.f32 %v9137_v7, %v9139_v34  ;;  %v1903_v2 = vsel %vm1867_vm15, %v9128_v60, -inf  ;;  %v11786_v49 = vmov 0.0   ;;  %7013 = vmatpush3.msk.msra.mxu1 %vm11692_vm10, %v11689_v30 }
 0x551   :  { %v1726_v0 = vpop.f32.mrf.mxu1  ;;  %8079 = vrot.lane.b32.xlu1 %v9107_v32, %s8445_s9  ;;  %v6575_v6 = vsel %vm447_vm12, 1.0, %v11786_v49  ;;  %v1911_v57 = vsel %vm11691_vm6, %v9163_v62, -inf  ;;  %v6550_v45 = vsel %vm6518_vm4, 1.0, %v11786_v49  ;;  %vm609_vm6 = vcmp.ge.s32.totalorder %v8831_v42, 34 }
 0x552   :  { %v9165_v8 = vmul.f32 0.35355338, %v1726_v0  ;;  %v1904_v1 = vmax.f32 %v1902_v61, %v1903_v2  ;;  %v1907_v16 = vsel %vm1394_vm3, %v9149_v19, -inf  ;;  %v8098_v2 = vpack.i.bf16 %v9062_v15, %v6575_v6 }
 0x554   :  { %v1908_v61 = vsel %vm1394_vm3, %v9165_v8, -inf  ;;  %1905 = vmax.xlane.f32.xlu0 %v1904_v1  ;;  %v6567_v1 = vsel %vm6534_vm13, 1.0, %v11786_v49  ;;  %vm430_vm13 = vcmp.eq.s32.totalorder %v9076_v14, %v9033_v17 }
 0x555   :  { %v1909_v0 = vmax.f32 %v1907_v16, %v1908_v61  ;;  %8089 = vrot.lane.b32.xlu1 %v9107_v32, %s8445_s9  ;;  %v8108_v6 = vpack.i.bf16 %v6550_v45, %v6567_v1 }
 0x557   :  { %v1912_v16 = vmax.f32 %v1909_v0, %v1911_v57  ;;  %v6558_v57 = vsel %vm430_vm13, 1.0, %v11786_v49  ;;  %v8143_v0 = vpack.i.bf16 %v6550_v45, %v9062_v15  ;;  %vm603_vm13 = vcmp.ge.s32.totalorder %v8831_v42, 17 }
 0x558   :  { %v8103_v61 = vpack.i.bf16 %v6558_v57, %v6567_v1 }
 0x559   :  { %1913 = vmax.xlane.f32.xlu0 %v1912_v16  ;;  %8099 = vrot.lane.b32.xlu1 %v8098_v2, %s8445_s9  ;;  %v11787_v2 = vmov 0  }
 0x55a   :  { %v55_v16 = vsel %vm52_vm11, 1, %v11787_v2  ;;  %v606_v15 = vsel %vm603_vm13, 1, %v11787_v2  ;;  %v612_v57 = vsel %vm609_vm6, 1, %v11787_v2  ;;  %v621_v42 = vsel %vm618_vm5, 1, %v11787_v2 }
 0x55b   :  { %v596_v30 = vmul.u32 68, %v55_v16  ;;  %v14_v16 = vadd.s32 16, %v9004_v29  ;;  %v615_v58 = vadd.s32 %v612_v57, %v606_v15 }
 0x55d   :  { %8109 = vrot.lane.b32.xlu1 %v8108_v6, %s8445_s9  ;;  %vm526_vm11 = vcmp.ge.s32.totalorder %v14_v16, 17 }
 0x561   :  { %8119 = vrot.lane.b32.xlu1 %v8108_v6, %s8445_s9 }
 0x565   :  { %8129 = vrot.lane.b32.xlu1 %v8108_v6, %s8445_s9 }
 0x569   :  { %8139 = vrot.lane.b32.xlu1 %v8108_v6, %s8445_s9 }
 0x56f   :  { %8069 = vrot.lane.b32.xlu0 %v9107_v32, %s8445_s9 }
 0x573   :  { %8084 = vrot.lane.b32.xlu0 %v9107_v32, %s8445_s9 }
 0x577   :  { %8094 = vrot.lane.b32.xlu0 %v9107_v32, %s8445_s9  ;;  %v599_v32 = vsub.s32 %v8819_v4, %v596_v30 }
 0x579   :  { %vm602_vm4 = vcmp.ge.s32.totalorder %v599_v32, 17  ;;  %vm608_vm12 = vcmp.ge.s32.totalorder %v599_v32, 34  ;;  %vm617_vm10 = vcmp.ge.s32.totalorder %v599_v32, 51 }
 0x57a   :  { %v605_v1 = vsel %vm602_vm4, 1, %v11787_v2  ;;  %v611_v45 = vsel %vm608_vm12, 1, %v11787_v2  ;;  %v620_v5 = vsel %vm617_vm10, 1, %v11787_v2 }
 0x57b   :  { %8104 = vrot.lane.b32.xlu0 %v8103_v61, %s8445_s9  ;;  %v614_v27 = vadd.s32 %v611_v45, %v605_v1 }
 0x57d   :  { %v9242_v1 = vadd.s32 %v620_v5, %v614_v27  ;;  %v1404_v5 = vrot.slane %v8794_v10, 4 }
 0x57f   :  { %8114 = vrot.lane.b32.xlu0 %v8108_v6, %s8445_s9  ;;  %vm6585_vm6 = vcmp.eq.s32.totalorder %v9242_v1, 0 }
 0x583   :  { %8124 = vrot.lane.b32.xlu0 %v8108_v6, %s8445_s9 }
 0x587   :  { %8134 = vrot.lane.b32.xlu0 %v8108_v6, %s8445_s9 }
 0x58b   :  { %8144 = vrot.lane.b32.xlu0 %v8143_v0, %s8445_s9 }
 0x5c1   :  { %v1871_v6 = vpop.xlane.xlu0 %1870 }
 0x5c2   :  { %v1915_v30 = vsub.f32 %v8998_v23, %v1871_v6  ;;  %v1916_v61 = vsub.f32 %v9000_v25, %v1871_v6  ;;  %v1917_v0 = vsub.f32 %v8995_v18, %v1871_v6 }
 0x5c4   :  { %v1942_v32 = vmul.f32 1.442695, %v1915_v30  ;;  %v1944_v14 = vmul.f32 1.442695, %v1916_v61  ;;  %v1946_v4 = vmul.f32 1.442695, %v1917_v0  ;;  %v9244_v61 = vadd.s32 %v621_v42, %v615_v58 }
 0x5c5   :  { %v1876_v63 = vpop.xlane.xlu1 %1875  ;;  %v1406_v58 = vrot.slane %v8798_v44, 4 }
 0x5c6   :  { %8171 = vpow2.f32 %v1942_v32  ;;  %v1918_v53 = vsub.f32 %v9015_v3, %v1876_v63  ;;  %v1919_v23 = vsub.f32 %v9017_v52, %v1876_v63  ;;  %v1920_v25 = vsub.f32 %v9009_v40, %v1876_v63 }
 0x5c7   :  { %8173 = vpow2.f32 %v1944_v14  ;;  %v112_v52 = vadd.s32 32, %v9004_v29  ;;  %vm6586_vm5 = vcmp.eq.s32.totalorder %v9244_v61, 0  ;;  %v11702_v32 = vrot.slane %v8802_v47, 4 }
 0x5c8   :  { %8175 = vpow2.f32 %v1946_v4  ;;  %v1948_v18 = vmul.f32 1.442695, %v1918_v53  ;;  %v1950_v6 = vmul.f32 1.442695, %v1919_v23  ;;  %v1952_v30 = vmul.f32 1.442695, %v1920_v25 }
 0x5c9   :  { %v1881_v45 = vpop.xlane.xlu0 %1880  ;;  %v535_v53 = vsel %vm526_vm11, 1, %v11787_v2  ;;  %vm546_vm4 = vcmp.ge.s32.totalorder %v112_v52, 34  ;;  %v9262_v16 = vsel %vm6586_vm5, 1.0, %v11786_v49  ;;  %v9268_v25 = vsel %vm6585_vm6, 1.0, %v11786_v49 }
 0x5ca   :  { %8177 = vpow2.f32 %v1948_v18  ;;  %v1921_v3 = vsub.f32 %v9027_v12, %v1881_v45  ;;  %v1922_v63 = vsub.f32 %v9029_v13, %v1881_v45  ;;  %v1923_v4 = vsub.f32 %v9022_v24, %v1881_v45  ;;  %11788 = vst [vmem:[#allocation15_spill] sm:$0xff] %v9262_v16  ;;  %11789 = vst [vmem:[#allocation16_spill] sm:$0xff] %v9268_v25 }
 0x5cb   :  { %8179 = vpow2.f32 %v1950_v6  ;;  %vm633_vm10 = vcmp.eq.s32.totalorder %v535_v53, %v9244_v61  ;;  %vm632_vm12 = vcmp.eq.s32.totalorder %v535_v53, %v9242_v1  ;;  %vm6590_vm13 = vcmp.eq.s32.totalorder %v9244_v61, 1 }
 0x5cc   :  { %8181 = vpow2.f32 %v1952_v30  ;;  %v1954_v27 = vmul.f32 1.442695, %v1921_v3  ;;  %v1956_v40 = vmul.f32 1.442695, %v1922_v63  ;;  %v1958_v14 = vmul.f32 1.442695, %v1923_v4 }
 0x5cd   :  { %v1886_v57 = vpop.xlane.xlu0 %1885  ;;  %v9275_v18 = vsel %vm633_vm10, 1.0, %v11786_v49  ;;  %v9278_v6 = vsel %vm632_vm12, 1.0, %v11786_v49  ;;  %vm6589_vm11 = vcmp.eq.s32.totalorder %v9242_v1, 1  ;;  %vm6592_vm12 = vcmp.eq.s32.totalorder %v9244_v61, 2 }
 0x5ce   :  { %8183 = vpow2.f32 %v1954_v27  ;;  %v1924_v12 = vsub.f32 %v9040_v39, %v1886_v57  ;;  %v1925_v24 = vsub.f32 %v9042_v41, %v1886_v57  ;;  %v1926_v13 = vsub.f32 %v9035_v56, %v1886_v57  ;;  %11790 = vst [vmem:[#allocation17_spill] sm:$0xff] %v9275_v18  ;;  %11791 = vst [vmem:[#allocation18_spill] sm:$0xff] %v9278_v6 }
 0x5cf   :  { %8185 = vpow2.f32 %v1956_v40  ;;  %v555_v41 = vsel %vm546_vm4, 1, %v11787_v2 }
 0x5d0   :  { %8187 = vpow2.f32 %v1958_v14  ;;  %v1960_v0 = vmul.f32 1.442695, %v1924_v12  ;;  %v1962_v42 = vmul.f32 1.442695, %v1925_v24  ;;  %v1964_v23 = vmul.f32 1.442695, %v1926_v13 }
 0x5d1   :  { %v1891_v39 = vpop.xlane.xlu0 %1890  ;;  %v9286_v4 = vadd.s32 1, %v555_v41  ;;  %v114_v12 = vadd.s32 48, %v9004_v29 }
 0x5d2   :  { %8189 = vpow2.f32 %v1960_v0  ;;  %v1927_v56 = vsub.f32 %v9055_v9, %v1891_v39  ;;  %v1928_v45 = vsub.f32 %v9057_v36, %v1891_v39  ;;  %v1929_v3 = vsub.f32 %v9048_v59, %v1891_v39 }
 0x5d3   :  { %v8172_v30 = vpop.eup %8171  ;;  %8191 = vpow2.f32 %v1962_v42  ;;  %v9295_v36 = vsel %vm6590_vm13, 1.0, %v11786_v49  ;;  %vm639_vm5 = vcmp.eq.s32.totalorder %v9286_v4, %v9244_v61  ;;  %vm640_vm6 = vcmp.eq.s32.totalorder %v9286_v4, 3 }
 0x5d4   :  { %v8174_v52 = vpop.eup %8173  ;;  %8193 = vpow2.f32 %v1964_v23  ;;  %v1966_v63 = vmul.f32 1.442695, %v1927_v56  ;;  %v9284_v9 = vmul.f32 %v8172_v30, %v9268_v25  ;;  %v1968_v27 = vmul.f32 1.442695, %v1928_v45  ;;  %11792 = vst [vmem:[#allocation19_spill] sm:$0xff] %v9295_v36 }
 0x5d5   :  { %v8176_v53 = vpop.eup %8175  ;;  %v1970_v40 = vmul.f32 1.442695, %v1929_v3  ;;  %v1896_v14 = vpop.xlane.xlu0 %1895  ;;  %v9289_v57 = vmul.f32 %v8174_v52, %v9262_v16  ;;  %vm638_vm10 = vcmp.eq.s32.totalorder %v9286_v4, %v9242_v1  ;;  %vm575_vm4 = vcmp.ge.s32.totalorder %v114_v12, 51 }
 0x5d6   :  { %v9292_v59 = vmul.f32 0.0, %v8176_v53  ;;  %8195 = vpow2.f32 %v1966_v63  ;;  %v1930_v13 = vsub.f32 %v9082_v50, %v1896_v14  ;;  %v1931_v0 = vsub.f32 %v9084_v54, %v1896_v14 }
 0x5d7   :  { %v8178_v24 = vpop.eup %8177  ;;  %8197 = vpow2.f32 %v1968_v27  ;;  %v1932_v42 = vsub.f32 %v9066_v21, %v1896_v14  ;;  %2114 = vmatprep.mubr.f32.mxu1 %v9289_v57  ;;  %v9311_v50 = vsel %vm6589_vm11, 1.0, %v11786_v49  ;;  %vm6591_vm13 = vcmp.eq.s32.totalorder %v9242_v1, 2 }
 0x5d8   :  { %v8180_v23 = vpop.eup %8179  ;;  %8199 = vpow2.f32 %v1970_v40  ;;  %7547 = vmatmul.mubr.msk.f32.vlgmr.msra.gmra.mxu0 %vm1867_vm15, %v9292_v59  ;;  %2115 = vmatmul.mubr.f32.vlgmr.msra.gmra.mxu1 %v9284_v9  ;;  %v9306_v39 = vmul.f32 %v8178_v24, %v9268_v25  ;;  %11793 = vst [vmem:[#allocation20_spill] sm:$0xff] %v9311_v50  ;;  %v1972_v54 = vmul.f32 1.442695, %v1930_v13  ;;  %v1974_v41 = vmul.f32 1.442695, %v1931_v0 }
 0x5d9   :  { %v8182_v21 = vpop.eup %8181  ;;  %v1976_v56 = vmul.f32 1.442695, %v1932_v42  ;;  %7549 = vmatprep.mubr.msk.f32.mxu0 %vm8438_vm0, %v11786_v49  ;;  %v1901_v30 = vpop.xlane.xlu0 %1900  ;;  %v9318_v45 = vmul.f32 %v8180_v23, %v9262_v16  ;;  %v9342_v42 = vsel %vm639_vm5, 1.0, %v11786_v49 }
 0x5da   :  { %v1933_v3 = vsub.f32 %v9113_v37, %v1901_v30  ;;  %v1934_v52 = vsub.f32 %v9115_v55, %v1901_v30  ;;  %8201 = vpow2.f32 %v1972_v54  ;;  %v1935_v53 = vsub.f32 %v9101_v11, %v1901_v30  ;;  %11794 = vst [vmem:[#allocation21_spill] sm:$0xff] %v9342_v42 }
 0x5db   :  { %v8184_v63 = vpop.eup %8183  ;;  %2119 = vmatprep.mubr.f32.mxu1 %v9318_v45  ;;  %v9327_v27 = vmul.f32 0.0, %v8182_v21  ;;  %8203 = vpow2.f32 %v1974_v41  ;;  %v9350_v21 = vsel %vm640_vm6, 1.0, %v11786_v49  ;;  %v584_v54 = vsel %vm575_vm4, 1, %v11787_v2 }
 0x5dc   :  { %v8186_v40 = vpop.eup %8185  ;;  %v1978_v14 = vmul.f32 1.442695, %v1933_v3  ;;  %v1980_v37 = vmul.f32 1.442695, %v1934_v52  ;;  %2120 = vmatmul.mubr.f32.gmra.mxu1 %v9306_v39  ;;  %v9331_v55 = vmul.f32 %v8184_v63, %v9278_v6  ;;  %8205 = vpow2.f32 %v1976_v56  ;;  %11795 = vst [vmem:[#allocation22_spill] sm:$0xff] %v9350_v21 }
 0x5dd   :  { %v8188_v24 = vpop.eup %8187  ;;  %v1982_v13 = vmul.f32 1.442695, %v1935_v53  ;;  %7550 = vmatmul.mubr.msk.f32.gmra.mxu0 %vm1867_vm15, %v9327_v27  ;;  %v1906_v11 = vpop.xlane.xlu0 %1905  ;;  %v9336_v0 = vmul.f32 %v8186_v40, %v9275_v18  ;;  %v9367_v2 = vsel %vm638_vm10, 1.0, %v11786_v49  ;;  %vm6594_vm10 = vcmp.eq.s32.totalorder %v9244_v61, 3 }
 0x5de   :  { %8207 = vpow2.f32 %v1978_v14  ;;  %7552 = vmatprep.mubr.msk.f32.mxu0 %vm8438_vm0, %v11786_v49  ;;  %v1936_v23 = vsub.f32 %v9137_v7, %v1906_v11  ;;  %v1937_v56 = vsub.f32 %v9139_v34, %v1906_v11  ;;  %v1938_v30 = vsub.f32 %v9128_v60, %v1906_v11  ;;  %11796 = vst [vmem:[#allocation23_spill] sm:$0xff] %v9367_v2 }
 0x5df   :  { %v8190_v41 = vpop.eup %8189  ;;  %8209 = vpow2.f32 %v1980_v37  ;;  %2124 = vmatprep.mubr.f32.mxu1 %v9336_v0  ;;  %v9357_v3 = vmul.f32 0.0, %v8188_v24  ;;  %v593_v14 = vadd.s32 2, %v584_v54  ;;  %vm6593_vm4 = vcmp.eq.s32.totalorder %v9242_v1, 3 }
 0x5e0   :  { %v8192_v52 = vpop.eup %8191  ;;  %8211 = vpow2.f32 %v1982_v13  ;;  %v1984_v7 = vmul.f32 1.442695, %v1936_v23  ;;  %2125 = vmatmul.mubr.f32.gmra.mxu1 %v9331_v55  ;;  %v9361_v63 = vmul.f32 %v8190_v41, %v9311_v50  ;;  %v1986_v60 = vmul.f32 1.442695, %v1937_v56  ;;  %v9389_v56 = vpop.permute.xlu1 %8074 }
 0x5e1   :  { %v8194_v34 = vpop.eup %8193  ;;  %7553 = vmatmul.mubr.msk.f32.gmra.mxu0 %vm1867_vm15, %v9357_v3  ;;  %v9372_v12 = vmul.f32 %v8192_v52, %v9295_v36  ;;  %v1988_v53 = vmul.f32 1.442695, %v1938_v30  ;;  %v1407_v41 = vsel %vm1394_vm3, %v1404_v5, %v1406_v58  ;;  %vm645_vm11 = vcmp.eq.s32.totalorder %v593_v14, %v9244_v61 }
 0x5e2   :  { %8213 = vpow2.f32 %v1984_v7  ;;  %7555 = vmatprep.mubr.msk.f32.mxu0 %vm8438_vm0, %v11786_v49  ;;  %v9378_v4 = vmul.f32 0.0, %v8194_v34  ;;  %v1914_v40 = vpop.xlane.xlu0 %1913  ;;  %vm644_vm5 = vcmp.eq.s32.totalorder %v593_v14, %v9242_v1  ;;  %vm646_vm6 = vcmp.eq.s32.totalorder %v593_v14, 3 }
 0x5e3   :  { %v8196_v37 = vpop.eup %8195  ;;  %8215 = vpow2.f32 %v1986_v60  ;;  %2129 = vmatprep.mubr.f32.mxu1 %v9372_v12  ;;  %v1939_v24 = vsub.f32 %v9149_v19, %v1914_v40  ;;  %v1940_v13 = vsub.f32 %v9165_v8, %v1914_v40  ;;  %v1941_v11 = vsub.f32 %v9163_v62, %v1914_v40 }
 0x5e4   :  { %v8198_v23 = vpop.eup %8197  ;;  %2130 = vmatmul.mubr.f32.gmra.mxu1 %v9361_v63  ;;  %v9393_v54 = vmul.f32 %v8196_v37, %v9367_v2  ;;  %v9398_v19 = vsel %vm6592_vm12, 1.0, %v11786_v49  ;;  %v9405_v62 = vsel %vm1394_vm3, %v1406_v58, %v11702_v32  ;;  %8217 = vpow2.f32 %v1988_v53 }
 0x5e5   :  { %11797 = vst [vmem:[#allocation24_spill] sm:$0xff] %v9398_v19  ;;  %v8200_v8 = vpop.eup %8199  ;;  %7556 = vmatmul.mubr.msk.f32.gmra.mxu0 %vm1867_vm15, %v9378_v4  ;;  %v1990_v30 = vmul.f32 1.442695, %v1939_v24  ;;  %v1992_v52 = vmul.f32 1.442695, %v1940_v13  ;;  %v9410_v34 = vmul.f32 %v8198_v23, %v9342_v42  ;;  %v9422_v58 = vsel %vm6591_vm13, 1.0, %v11786_v49  ;;  %v9443_v13 = vpop.permute.xlu1 %8079 }
 0x5e6   :  { %v1994_v7 = vmul.f32 1.442695, %v1941_v11  ;;  %7558 = vmatprep.mubr.msk.f32.mxu0 %vm8438_vm0, %v11786_v49  ;;  %v9415_v60 = vmul.f32 %v8200_v8, %v9350_v21  ;;  %v9417_v40 = vpop.permute.xlu0 %8069  ;;  %11798 = vst [vmem:[#allocation25_spill] sm:$0xff] %v9422_v58  ;;  %v11714_v42 = vunpack.i.h.bf16 %v9443_v13  ;;  %v11805_v61 = vunpack.i.l.bf16 %v9389_v56 }
 0x5e7   :  { %8219 = vpow2.f32 %v1990_v30  ;;  %2134 = vmatprep.mubr.f32.mxu1 %v9410_v34  ;;  %v11704_v53 = vunpack.i.h.bf16 %v9417_v40  ;;  %v11703_v37 = vunpack.i.l.bf16 %v9417_v40  ;;  %v8202_v24 = vpop.eup %8201  ;;  %vm809_vm12 = vcmp.eq.s32.totalorder %v9004_v29, %v9033_v17 }
 0x5e8   :  { %8221 = vpow2.f32 %v1992_v52  ;;  %2135 = vmatmul.mubr.f32.gmra.mxu1 %v9393_v54  ;;  %v8204_v11 = vpop.eup %8203  ;;  %v9435_v23 = vmul.f32 %v8202_v24, %v9422_v58  ;;  %v9453_v24 = vsel %vm645_vm11, 1.0, %v11786_v49  ;;  %vm2626_vm13 = vcmask 31744  }
 0x5e9   :  { %8223 = vpow2.f32 %v1994_v7  ;;  %7559 = vmatmul.mubr.msk.f32.gmra.mxu0 %vm1867_vm15, %v9415_v60  ;;  %v1573_v8 = vmul.f32 %v11704_v53, %v9405_v62  ;;  %v1589_v30 = vmul.f32 %v11703_v37, %v1407_v41  ;;  %v8206_v52 = vpop.eup %8205  ;;  %v9448_v7 = vmul.f32 %v8204_v11, %v9398_v19  ;;  %11799 = vst [vmem:[#allocation26_spill] sm:$0xff] %v9453_v24 }
 0x5ea   :  { %7561 = vmatprep.mubr.msk.f32.mxu0 %vm8438_vm0, %v11786_v49  ;;  %v9458_v37 = vsel %vm644_vm5, 1.0, %v11786_v49  ;;  %v9460_v32 = vmul.f32 0.0, %v8206_v52  ;;  %v9466_v11 = vsel %vm646_vm6, 1.0, %v11786_v49  ;;  %v11802_v19 = vrot.slane %v8790_v35, 4  ;;  %v9496_v50 = vpop.permute.xlu0 %8084 }
 0x5eb   :  { %11800 = vst [vmem:[#allocation27_spill] sm:$0xff] %v9458_v37  ;;  %v8208_v53 = vpop.eup %8207  ;;  %2334 = vrot.lane.b32.xlu0 %v1573_v8, %s8445_s9  ;;  %2366 = vrot.lane.b32.xlu1 %v1589_v30, %s8445_s9  ;;  %11801 = vst [vmem:[#allocation28_spill] sm:$0xff] %v9466_v11  ;;  %v1400_v52 = vrot.slane %v8786_v31, 4  ;;  %v9479_v8 = vsel %vm6594_vm10, 1.0, %v11786_v49  ;;  %v11804_v30 = vunpack.i.h.bf16 %v9389_v56  ;;  %v11812_v16 = vunpack.i.l.bf16 %v9496_v50 }
 0x5ec   :  { %v8210_v15 = vpop.eup %8209  ;;  %v1405_v58 = vsel %vm1394_vm3, %v11802_v19, %v1404_v5  ;;  %2139 = vmatprep.mubr.f32.mxu1 %v9448_v7  ;;  %11803 = vst [vmem:[#allocation29_spill] sm:$0xff] %v9479_v8  ;;  %v9491_v19 = vmul.f32 %v8208_v53, %v9458_v37  ;;  %11806 = vst [vmem:[#allocation30_spill] sm:$0xff] %v9496_v50  ;;  %vm3293_vm11 = vcmask 523264  }
 0x5ed   :  { %v8212_v14 = vpop.eup %8211  ;;  %v1572_v21 = vmul.f32 %v11804_v30, %v1407_v41  ;;  %7562 = vmatmul.mubr.msk.f32.gmra.mxu0 %vm1867_vm15, %v9460_v32  ;;  %2140 = vmatmul.mubr.f32.gmra.mxu1 %v9435_v23  ;;  %v9488_v5 = vmul.f32 %v8210_v15, %v9453_v24  ;;  %v1588_v2 = vmul.f32 %v11805_v61, %v1405_v58  ;;  %v9506_v15 = vsel %vm6593_vm4, 1.0, %v11786_v49 }
 0x5ee   :  { %7564 = vmatprep.mubr.msk.f32.mxu0 %vm8438_vm0, %v11786_v49  ;;  %v9501_v41 = vmul.f32 %v8212_v14, %v9466_v11  ;;  %11807 = vst [vmem:[#allocation31_spill] sm:$0xff] %v9506_v15  ;;  %v11808_v61 = vrot.slane %v8790_v35, 4  ;;  %v1571_v14 = vmul.f32 %v11714_v42, %v1405_v58  ;;  %v11811_v58 = vunpack.i.h.bf16 %v9496_v50  ;;  %v9552_v25 = vpop.permute.xlu0 %8094 }
 0x5ef   :  { %v8214_v53 = vpop.eup %8213  ;;  %2144 = vmatprep.mubr.f32.mxu1 %v9488_v5  ;;  %2332 = vrot.lane.b32.xlu0 %v1572_v21, %s8445_s9 }
 0x5f0   :  { %v8216_v30 = vpop.eup %8215  ;;  %v1403_v36 = vsel %vm1394_vm3, %v1400_v52, %v11808_v61  ;;  %2364 = vrot.lane.b32.xlu1 %v1588_v2, %s8445_s9  ;;  %v9524_v21 = vmul.f32 %v8214_v53, %v9506_v15  ;;  %v11809_v61 = vunpack.i.l.bf16 %v9443_v13  ;;  %v9528_v2 = vpop.permute.xlu1 %8089 }
 0x5f1   :  { %7565 = vmatmul.mubr.msk.f32.gmra.mxu0 %vm1867_vm15, %v9501_v41  ;;  %2145 = vmatmul.mubr.f32.gmra.mxu1 %v9491_v19  ;;  %v9521_v1 = vmul.f32 %v8216_v30, %v9479_v8  ;;  %11810 = vst [vmem:[#allocation32_spill] sm:$0xff] %v9528_v2  ;;  %v9533_v42 = vpop.eup %8217  ;;  %v1398_v30 = vrot.slane %v8782_v26, 4  ;;  %v1570_v37 = vmul.f32 %v11811_v58, %v1403_v36  ;;  %v1395_v58 = vrot.slane %v8774_v20, 4 }
 0x5f2   :  { %v1587_v24 = vmul.f32 %v11809_v61, %v1403_v36  ;;  %7567 = vmatprep.mubr.msk.f32.mxu0 %vm8438_vm0, %v11786_v49 }
 0x5f3   :  { %2149 = vmatprep.mubr.f32.mxu1 %v9521_v1  ;;  %2330 = vrot.lane.b32.xlu0 %v1571_v14, %s8445_s9  ;;  %v1401_v18 = vsel %vm1394_vm3, %v1398_v30, %v1400_v52  ;;  %v1396_v52 = vrot.slane %v8778_v22, 4 }
 0x5f4   :  { %v8220_v53 = vpop.eup %8219  ;;  %2362 = vrot.lane.b32.xlu1 %v1587_v24, %s8445_s9  ;;  %v1586_v36 = vmul.f32 %v11812_v16, %v1401_v18  ;;  %v9572_v24 = vpop.permute.xlu1 %8099 }
 0x5f5   :  { %v8222_v11 = vpop.eup %8221  ;;  %7568 = vmatmul.mubr.msk.f32.gmra.mxu0 %vm1867_vm15, %v9533_v42  ;;  %2150 = vmatmul.mubr.f32.gmra.mxu1 %v9524_v21  ;;  %v9547_v14 = vmul.f32 %v8220_v53, %v9506_v15  ;;  %v1399_v16 = vsel %vm1394_vm3, %v1396_v52, %v1398_v30  ;;  %v11815_v30 = vunpack.i.h.bf16 %v9552_v25  ;;  %v9588_v15 = vpop.permute.xlu0 %8104 }
 0x5f6   :  { %v9549_v6 = vpop.eup %8223  ;;  %7570 = vmatprep.mubr.msk.f32.mxu0 %vm8438_vm0, %v11786_v49  ;;  %v9557_v61 = vmul.f32 %v8222_v11, %v9479_v8  ;;  %v11813_v11 = vunpack.i.h.bf16 %v9528_v2 }
 0x5f7   :  { %2328 = vrot.lane.b32.xlu0 %v1570_v37, %s8445_s9  ;;  %v1397_v37 = vsel %vm1394_vm3, %v1395_v58, %v1396_v52  ;;  %v11732_v52 = vunpack.i.l.bf16 %v9588_v15 }
 0x5f8   :  { %2154 = vmatprep.mubr.f32.mxu1 %v9557_v61  ;;  %2360 = vrot.lane.b32.xlu1 %v1586_v36, %s8445_s9  ;;  %v1569_v53 = vmul.f32 %v11813_v11, %v1401_v18  ;;  %v11814_v36 = vunpack.i.l.bf16 %v9528_v2  ;;  %v11731_v18 = vunpack.i.h.bf16 %v9572_v24  ;;  %v1568_v11 = vmul.f32 %v11815_v30, %v1399_v16  ;;  %v9602_v50 = vpop.permute.xlu1 %8109 }
 0x5f9   :  { %7571 = vmatmul.mubr.msk.f32.gmra.mxu0 %vm1867_vm15, %v9549_v6  ;;  %2155 = vmatmul.mubr.f32.gmra.mxu1 %v9547_v14  ;;  %11817 = vst [vmem:[#allocation33_spill] sm:$0xff] %v9602_v50 }
 0x5fa   :  { %2470 = vmatprep.mubr.f32.mxu1 %v9289_v57  ;;  %v1585_v8 = vmul.f32 %v11814_v36, %v1399_v16  ;;  %7577 = vmatprep.mubr.msk.f32.mxu0 %vm8438_vm0, %v11786_v49  ;;  %v11735_v57 = vunpack.i.l.bf16 %v9572_v24  ;;  %v11816_v36 = vunpack.i.l.bf16 %v9552_v25  ;;  %v1421_v16 = vsel %vm1394_vm3, %v8806_v51, %v1395_v58 }
 0x5fb   :  { %2326 = vrot.lane.b32.xlu0 %v1569_v53, %s8445_s9  ;;  %v1567_v53 = vmul.f32 %v11731_v18, %v1397_v37  ;;  %v1582_v58 = vmul.f32 %v11732_v52, %v8802_v47 }
 0x5fc   :  { %2358 = vrot.lane.b32.xlu1 %v1585_v8, %s8445_s9  ;;  %v1584_v2 = vmul.f32 %v11816_v36, %v1397_v37  ;;  %v11730_v8 = vunpack.i.h.bf16 %v9588_v15  ;;  %v1583_v30 = vmul.f32 %v11735_v57, %v1421_v16  ;;  %v9609_v37 = vpop.permute.xlu0 %8114  ;;  %v8148_v36 = vpack.i.bf16 %v9073_v46, %v9073_v46 }
 0x5ff   :  { %2324 = vrot.lane.b32.xlu0 %v1568_v11, %s8445_s9  ;;  %v11734_v11 = vunpack.i.l.bf16 %v9602_v50 }
 0x600   :  { %2356 = vrot.lane.b32.xlu1 %v1584_v2, %s8445_s9  ;;  %v1566_v2 = vmul.f32 %v11730_v8, %v1421_v16  ;;  %v9620_v16 = vpop.permute.xlu1 %8119  ;;  %v9632_v18 = vpop.permute.xlu0 %8124 }
 0x601   :  { %v1581_v8 = vmul.f32 %v11734_v11, %v8798_v44 }
 0x603   :  { %2322 = vrot.lane.b32.xlu0 %v1567_v53, %s8445_s9  ;;  %v11733_v53 = vunpack.i.l.bf16 %v9609_v37 }
 0x604   :  { %2354 = vrot.lane.b32.xlu1 %v1583_v30, %s8445_s9  ;;  %v11736_v30 = vunpack.i.h.bf16 %v9602_v50  ;;  %v9644_v11 = vpop.permute.xlu1 %8129 }
 0x605   :  { %v1580_v46 = vmul.f32 %v11733_v53, %v8794_v10  ;;  %v11742_v53 = vunpack.i.h.bf16 %v9620_v16 }
 0x606   :  { %v1565_v52 = vmul.f32 %v11736_v30, %v8802_v47  ;;  %v11744_v30 = vunpack.i.h.bf16 %v9632_v18 }
 0x607   :  { %2320 = vrot.lane.b32.xlu0 %v1566_v2, %s8445_s9  ;;  %v11737_v2 = vunpack.i.l.bf16 %v9620_v16  ;;  %v1563_v50 = vmul.f32 %v11742_v53, %v8794_v10 }
 0x608   :  { %2352 = vrot.lane.b32.xlu1 %v1582_v58, %s8445_s9  ;;  %v11740_v58 = vunpack.i.h.bf16 %v9609_v37 }
 0x60a   :  { %v1564_v57 = vmul.f32 %v11740_v58, %v8798_v44  ;;  %v9668_v58 = vpop.permute.xlu1 %8139 }
 0x60b   :  { %8149 = vrot.lane.b32.xlu0 %v8148_v36, %s8445_s9  ;;  %v11741_v36 = vunpack.i.l.bf16 %v9632_v18  ;;  %v11753_v10 = vunpack.i.l.bf16 %v9668_v58 }
 0x60c   :  { %2350 = vrot.lane.b32.xlu1 %v1581_v8, %s8445_s9  ;;  %v1579_v8 = vmul.f32 %v11737_v2, %v8790_v35  ;;  %v9656_v2 = vpop.permute.xlu0 %8134 }
 0x60f   :  { %2348 = vrot.lane.b32.xlu0 %v1580_v46, %s8445_s9  ;;  %v1578_v46 = vmul.f32 %v11741_v36, %v8786_v31  ;;  %v1562_v36 = vmul.f32 %v11744_v30, %v8790_v35  ;;  %v1410_v35 = vrot.slane %v8806_v51, 4  ;;  %v11747_v30 = vunpack.i.h.bf16 %v9668_v58 }
 0x610   :  { %2318 = vrot.lane.b32.xlu1 %v1565_v52, %s8445_s9  ;;  %v11743_v52 = vunpack.i.l.bf16 %v9644_v11  ;;  %v9680_v53 = vpop.permute.xlu0 %8144 }
 0x612   :  { %v1577_v44 = vmul.f32 %v11743_v52, %v8782_v26 }
 0x613   :  { %2346 = vrot.lane.b32.xlu0 %v1579_v8, %s8445_s9  ;;  %v11746_v8 = vunpack.i.h.bf16 %v9644_v11 }
 0x614   :  { %2316 = vrot.lane.b32.xlu1 %v1564_v57, %s8445_s9  ;;  %v11745_v57 = vunpack.i.l.bf16 %v9656_v2 }
 0x615   :  { %v1561_v52 = vmul.f32 %v11746_v8, %v8786_v31  ;;  %v11818_v31 = vrot.slane %v8802_v47, 4  ;;  %v1559_v8 = vmul.f32 %v11747_v30, %v8778_v22 }
 0x617   :  { %2344 = vrot.lane.b32.xlu0 %v1578_v46, %s8445_s9  ;;  %v11750_v46 = vunpack.i.h.bf16 %v9656_v2  ;;  %v1411_v51 = vsel %vm1394_vm3, %v11818_v31, %v1410_v35 }
 0x618   :  { %2314 = vrot.lane.b32.xlu1 %v1563_v50, %s8445_s9  ;;  %v1576_v50 = vmul.f32 %v11745_v57, %v8778_v22 }
 0x619   :  { %v1560_v57 = vmul.f32 %v11750_v46, %v8782_v26 }
 0x61b   :  { %2342 = vrot.lane.b32.xlu0 %v1577_v44, %s8445_s9  ;;  %v11752_v44 = vunpack.i.l.bf16 %v9680_v53 }
 0x61c   :  { %2312 = vrot.lane.b32.xlu1 %v1562_v36, %s8445_s9  ;;  %v1575_v36 = vmul.f32 %v11753_v10, %v8774_v20 }
 0x61f   :  { %2340 = vrot.lane.b32.xlu0 %v1576_v50, %s8445_s9  ;;  %v11748_v50 = vunpack.i.h.bf16 %v9680_v53 }
 0x620   :  { %2310 = vrot.lane.b32.xlu1 %v1561_v52, %s8445_s9  ;;  %v1574_v52 = vmul.f32 %v11752_v44, %v1411_v51 }
 0x621   :  { %v1558_v26 = vmul.f32 %v11748_v50, %v8774_v20 }
 0x623   :  { %2338 = vrot.lane.b32.xlu0 %v1575_v36, %s8445_s9 }
 0x624   :  { %2308 = vrot.lane.b32.xlu1 %v1560_v57, %s8445_s9 }
 0x627   :  { %2336 = vrot.lane.b32.xlu0 %v1574_v52, %s8445_s9 }
 0x628   :  { %2306 = vrot.lane.b32.xlu1 %v1559_v8, %s8445_s9 }
 0x62c   :  { %2304 = vrot.lane.b32.xlu1 %v1558_v26, %s8445_s9 }
 0x65d   :  { %v2335_v47 = vpop.permute.xlu0 %2334  ;;  %v2367_v57 = vpop.permute.xlu1 %2366 }
 0x65e   :  { %7052 = vmatprep.subr.mxu1 %v2367_v57 }
 0x65f   :  { %7053 = vmatpush3.msra.mxu1 %v2335_v47 }
 0x661   :  { %v2333_v35 = vpop.permute.xlu0 %2332 }
 0x662   :  { %v2365_v36 = vpop.permute.xlu1 %2364 }
 0x663   :  { %7054 = vmatprep.subr.mxu1 %v2365_v36 }
 0x664   :  { %7055 = vmatpush3.msra.mxu1 %v2333_v35 }
 0x665   :  { %v2331_v31 = vpop.permute.xlu0 %2330 }
 0x666   :  { %v2363_v22 = vpop.permute.xlu1 %2362 }
 0x667   :  { %7056 = vmatprep.subr.mxu1 %v2363_v22 }
 0x668   :  { %7057 = vmatpush3.msra.mxu1 %v2331_v31 }
 0x669   :  { %v2329_v52 = vpop.permute.xlu0 %2328 }
 0x66a   :  { %v2361_v8 = vpop.permute.xlu1 %2360 }
 0x66b   :  { %7058 = vmatprep.subr.mxu1 %v2361_v8 }
 0x66c   :  { %7059 = vmatpush3.msra.mxu1 %v2329_v52 }
 0x66d   :  { %v2327_v30 = vpop.permute.xlu0 %2326 }
 0x66e   :  { %v2359_v20 = vpop.permute.xlu1 %2358 }
 0x66f   :  { %7060 = vmatprep.subr.mxu1 %v2359_v20 }
 0x670   :  { %7061 = vmatpush3.msra.mxu1 %v2327_v30 }
 0x671   :  { %v2325_v26 = vpop.permute.xlu0 %2324 }
 0x672   :  { %v2357_v50 = vpop.permute.xlu1 %2356 }
 0x673   :  { %7062 = vmatprep.subr.mxu1 %v2357_v50 }
 0x674   :  { %7063 = vmatpush3.msra.mxu1 %v2325_v26 }
 0x675   :  { %v2323_v47 = vpop.permute.xlu0 %2322 }
 0x676   :  { %v2355_v57 = vpop.permute.xlu1 %2354 }
 0x677   :  { %7064 = vmatprep.subr.mxu1 %v2355_v57 }
 0x678   :  { %7065 = vmatpush3.msra.mxu1 %v2323_v47 }
 0x679   :  { %v2321_v35 = vpop.permute.xlu0 %2320 }
 0x67a   :  { %v2353_v36 = vpop.permute.xlu1 %2352 }
 0x67b   :  { %7066 = vmatprep.subr.mxu1 %v2353_v36 }
 0x67c   :  { %7067 = vmatpush3.msra.mxu1 %v2321_v35 }
 0x67d   :  { %v9713_v31 = vpop.permute.xlu0 %8149 }
 0x67e   :  { %v11749_v22 = vunpack.i.h.bf16 %v9713_v31  ;;  %v11751_v52 = vunpack.i.l.bf16 %v9713_v31  ;;  %v2351_v8 = vpop.permute.xlu1 %2350 }
 0x67f   :  { %7068 = vmatprep.subr.mxu1 %v2351_v8 }
 0x680   :  { %v1591_v30 = vmul.f32 %v11751_v52, %v1411_v51  ;;  %v1590_v50 = vmul.f32 %v11749_v22, %v9405_v62 }
 0x681   :  { %v2349_v20 = vpop.permute.xlu0 %2348 }
 0x682   :  { %v2319_v26 = vpop.permute.xlu1 %2318  ;;  %2370 = vrot.lane.b32.xlu0 %v1591_v30, %s8445_s9  ;;  %2368 = vrot.lane.b32.xlu1 %v1590_v50, %s8445_s9 }
 0x683   :  { %7069 = vmatpush3.msra.mxu1 %v2319_v26 }
 0x684   :  { %7070 = vmatprep.subr.mxu1 %v2349_v20 }
 0x685   :  { %v2347_v47 = vpop.permute.xlu0 %2346 }
 0x686   :  { %v2317_v57 = vpop.permute.xlu1 %2316 }
 0x687   :  { %7071 = vmatpush3.msra.mxu1 %v2317_v57 }
 0x688   :  { %7072 = vmatprep.subr.mxu1 %v2347_v47 }
 0x689   :  { %v2345_v35 = vpop.permute.xlu0 %2344 }
 0x68a   :  { %v2315_v36 = vpop.permute.xlu1 %2314 }
 0x68b   :  { %7073 = vmatpush3.msra.mxu1 %v2315_v36 }
 0x68c   :  { %7074 = vmatprep.subr.mxu1 %v2345_v35 }
 0x68d   :  { %v2343_v51 = vpop.permute.xlu0 %2342 }
 0x68e   :  { %v2313_v8 = vpop.permute.xlu1 %2312 }
 0x68f   :  { %7075 = vmatpush3.msra.mxu1 %v2313_v8 }
 0x690   :  { %7076 = vmatprep.subr.mxu1 %v2343_v51 }
 0x691   :  { %v2341_v62 = vpop.permute.xlu0 %2340 }
 0x692   :  { %v2311_v22 = vpop.permute.xlu1 %2310 }
 0x693   :  { %7077 = vmatpush3.msra.mxu1 %v2311_v22  ;;  %v9727_v22 = vsel %vm809_vm12, 1.0, %v11786_v49 }
 0x694   :  { %7078 = vmatprep.subr.mxu1 %v2341_v62  ;;  %11819 = vst [vmem:[#allocation34_spill] sm:$0xff] %v9727_v22 }
 0x695   :  { %v2339_v30 = vpop.permute.xlu0 %2338 }
 0x696   :  { %v2309_v50 = vpop.permute.xlu1 %2308 }
 0x697   :  { %7079 = vmatpush3.msra.mxu1 %v2309_v50 }
 0x698   :  { %v2226_v20 = vpop.f32.mrf.mxu0  ;;  %v7014_v26 = vpop.f32.mrf.mxu1  ;;  %7080 = vmatprep.subr.mxu1 %v2339_v30 }
 0x699   :  { %v2337_v47 = vpop.permute.xlu0 %2336 }
 0x69a   :  { %v7548_v57 = vpop.f32.mrf.mxu0  ;;  %v2307_v46 = vpop.permute.xlu1 %2306 }
 0x69b   :  { %v7015_v52 = vpop.f32.mrf.mxu1  ;;  %7081 = vmatpush3.msra.mxu1 %v2307_v46 }
 0x69c   :  { %7082 = vmatprep.subr.mxu1 %v2337_v47 }
 0x69d   :  { %v2231_v35 = vpop.f32.mrf.mxu0  ;;  %v7017_v8 = vpop.f32.mrf.mxu1 }
 0x69e   :  { %v2305_v51 = vpop.permute.xlu1 %2304 }
 0x69f   :  { %v7551_v36 = vpop.f32.mrf.mxu0  ;;  %7083 = vmatpush3.msra.mxu1 %v2305_v51  ;;  %v7018_v17 = vpop.f32.mrf.mxu1 }
 0x6a0   :  { %2471 = vmatmul.mubr.f32.vlgmr.msra.gmra.mxu1 %v9284_v9  ;;  %7604 = vmatprep.subr.mxu1 %v11786_v49 }
 0x6a1   :  { %v2236_v62 = vpop.f32.mrf.mxu0  ;;  %2475 = vmatprep.mubr.f32.mxu1 %v9318_v45  ;;  %7605 = vmatpush3.msk.msra.mxu1 %vm1394_vm3, %v9727_v22  ;;  %v7020_v50 = vpop.f32.mrf.mxu1 }
 0x6a2   :  { %7668 = vmatprep.subr.mxu1 %v11786_v49 }
 0x6a3   :  { %v7554_v29 = vpop.f32.mrf.mxu0  ;;  %v7021_v45 = vpop.f32.mrf.mxu1 }
 0x6a4   :  { %2476 = vmatmul.mubr.f32.gmra.mxu1 %v9306_v39 }
 0x6a5   :  { %v2241_v46 = vpop.f32.mrf.mxu0  ;;  %2480 = vmatprep.mubr.f32.mxu1 %v9336_v0  ;;  %v7023_v51 = vpop.f32.mrf.mxu1 }
 0x6a7   :  { %v7557_v30 = vpop.f32.mrf.mxu0  ;;  %v7024_v0 = vpop.f32.mrf.mxu1 }
 0x6a8   :  { %2481 = vmatmul.mubr.f32.gmra.mxu1 %v9331_v55 }
 0x6a9   :  { %v2246_v57 = vpop.f32.mrf.mxu0  ;;  %2485 = vmatprep.mubr.f32.mxu1 %v9372_v12  ;;  %v7026_v12 = vpop.f32.mrf.mxu1 }
 0x6ab   :  { %v7560_v9 = vpop.f32.mrf.mxu0 }
 0x6ac   :  { %2486 = vmatmul.mubr.f32.gmra.mxu1 %v9361_v63 }
 0x6ad   :  { %v2251_v47 = vpop.f32.mrf.mxu0  ;;  %2490 = vmatprep.mubr.f32.mxu1 %v9410_v34  ;;  %v7027_v34 = vpop.f32.mrf.mxu1 }
 0x6af   :  { %v7563_v36 = vpop.f32.mrf.mxu0 }
 0x6b0   :  { %2491 = vmatmul.mubr.f32.gmra.mxu1 %v9393_v54  ;;  %v7016_v54 = vadd.f32 %v7015_v52, %v7014_v26  ;;  %v7028_v26 = vadd.f32 %v7027_v34, %v7026_v12 }
 0x6b1   :  { %v2256_v29 = vpop.f32.mrf.mxu0  ;;  %2495 = vmatprep.mubr.f32.mxu1 %v9448_v7  ;;  %v7029_v7 = vpop.f32.mrf.mxu1 }
 0x6b3   :  { %v7566_v39 = vpop.f32.mrf.mxu0  ;;  %v7030_v36 = vpop.f32.mrf.mxu1 }
 0x6b4   :  { %2496 = vmatmul.mubr.f32.gmra.mxu1 %v9435_v23  ;;  %v2227_v23 = vadd.f32 %v7016_v54, %v2226_v20 }
 0x6b5   :  { %v2261_v30 = vpop.f32.mrf.mxu0  ;;  %2500 = vmatprep.mubr.f32.mxu1 %v9488_v5  ;;  %v7019_v5 = vadd.f32 %v7018_v17, %v7017_v8  ;;  %v7031_v17 = vadd.f32 %v7030_v36, %v7029_v7 }
 0x6b7   :  { %v7569_v55 = vpop.f32.mrf.mxu0 }
 0x6b8   :  { %2501 = vmatmul.mubr.f32.gmra.mxu1 %v9491_v19  ;;  %v2232_v19 = vadd.f32 %v7019_v5, %v2231_v35  ;;  %v2247_v35 = vadd.f32 %v7028_v26, %v2246_v57 }
 0x6b9   :  { %v2266_v9 = vpop.f32.mrf.mxu0  ;;  %2505 = vmatprep.mubr.f32.mxu1 %v9521_v1  ;;  %v7022_v1 = vadd.f32 %v7021_v45, %v7020_v50 }
 0x6bb   :  { %v7572_v63 = vpop.f32.mrf.mxu0 }
 0x6bc   :  { %2506 = vmatmul.mubr.f32.gmra.mxu1 %v9524_v21  ;;  %v7032_v21 = vpop.f32.mrf.mxu1 }
 0x6bd   :  { %2510 = vmatprep.mubr.f32.mxu1 %v9557_v61  ;;  %v2237_v61 = vadd.f32 %v7022_v1, %v2236_v62  ;;  %v2252_v62 = vadd.f32 %v7031_v17, %v2251_v47 }
 0x6be   :  { %v7033_v52 = vpop.f32.mrf.mxu1 }
 0x6bf   :  { %v7034_v45 = vadd.f32 %v7033_v52, %v7032_v21 }
 0x6c0   :  { %2511 = vmatmul.mubr.f32.gmra.mxu1 %v9547_v14  ;;  %v7025_v14 = vadd.f32 %v7024_v0, %v7023_v51  ;;  %v7035_v8 = vpop.f32.mrf.mxu1 }
 0x6c1   :  { %7606 = vmatprep.mubr.msk.f32.mxu1 %vm8438_vm0, %v11786_v49 }
 0x6c2   :  { %v2242_v20 = vadd.f32 %v7025_v14, %v2241_v46  ;;  %v7036_v50 = vpop.f32.mrf.mxu1  ;;  %v2257_v46 = vadd.f32 %v7034_v45, %v2256_v29 }
 0x6c3   :  { %v7037_v39 = vadd.f32 %v7036_v50, %v7035_v8 }
 0x6c4   :  { %7607 = vmatmul.mubr.msk.f32.vlgmr.msra.gmra.mxu1 %vm2626_vm13, %v2227_v23  ;;  %v7038_v51 = vpop.f32.mrf.mxu1 }
 0x6c5   :  { %7609 = vmatprep.mubr.msk.f32.mxu1 %vm8438_vm0, %v11786_v49  ;;  %v2262_v57 = vadd.f32 %v7037_v39, %v2261_v30 }
 0x6c6   :  { %v7039_v0 = vpop.f32.mrf.mxu1 }
 0x6c7   :  { %v7040_v55 = vadd.f32 %v7039_v0, %v7038_v51 }
 0x6c8   :  { %7610 = vmatmul.mubr.msk.f32.gmra.mxu1 %vm2626_vm13, %v2232_v19 }
 0x6c9   :  { %7612 = vmatprep.mubr.msk.f32.mxu1 %vm8438_vm0, %v11786_v49  ;;  %v2267_v47 = vadd.f32 %v7040_v55, %v2266_v9 }
 0x6cc   :  { %7613 = vmatmul.mubr.msk.f32.gmra.mxu1 %vm2626_vm13, %v2237_v61 }
 0x6cd   :  { %7615 = vmatprep.mubr.msk.f32.mxu1 %vm8438_vm0, %v11786_v49 }
 0x6d0   :  { %7616 = vmatmul.mubr.msk.f32.gmra.mxu1 %vm2626_vm13, %v2242_v20 }
 0x6d1   :  { %7618 = vmatprep.mubr.msk.f32.mxu1 %vm8438_vm0, %v11786_v49 }
 0x6d4   :  { %7619 = vmatmul.mubr.msk.f32.gmra.mxu1 %vm2626_vm13, %v2247_v35 }
 0x6d5   :  { %7621 = vmatprep.mubr.msk.f32.mxu1 %vm8438_vm0, %v11786_v49 }
 0x6d8   :  { %7622 = vmatmul.mubr.msk.f32.gmra.mxu1 %vm2626_vm13, %v2252_v62 }
 0x6d9   :  { %7624 = vmatprep.mubr.msk.f32.mxu1 %vm8438_vm0, %v11786_v49 }
 0x6dc   :  { %7625 = vmatmul.mubr.msk.f32.gmra.mxu1 %vm2626_vm13, %v2257_v46 }
 0x6dd   :  { %7627 = vmatprep.mubr.msk.f32.mxu1 %vm8438_vm0, %v11786_v49 }
 0x6e0   :  { %7628 = vmatmul.mubr.msk.f32.gmra.mxu1 %vm2626_vm13, %v2262_v57 }
 0x6e1   :  { %7630 = vmatprep.mubr.msk.f32.mxu1 %vm8438_vm0, %v11786_v49 }
 0x6e4   :  { %7631 = vmatmul.mubr.msk.f32.gmra.mxu1 %vm2626_vm13, %v2267_v47 }
 0x6e5   :  { %7676 = vmatprep.mubr.msk.f32.mxu1 %vm8438_vm0, %v11786_v49 }
 0x6f4   :  { %v2371_v29 = vpop.permute.xlu0 %2370  ;;  %v2369_v12 = vpop.permute.xlu1 %2368 }
 0x6f5   :  { %7574 = vmatpush3.msra.mxu0 %v2371_v29 }
 0x6f6   :  { %7575 = vmatprep.subr.mxu0 %v11786_v49 }
 0x6f7   :  { %7576 = vmatpush3.msra.mxu0 %v2369_v12 }
 0x6f8   :  { %7578 = vmatmul.mubr.msk.f32.vlgmr.msra.gmra.mxu0 %vm1867_vm15, %v9292_v59  ;;  %7633 = vmatprep.subr.mxu0 %v11786_v49  ;;  %v970_v59 = vld [vmem:[%s11673_s1 + $0x210] sm:$0xff] }
 0x6f9   :  { %7580 = vmatprep.mubr.msk.f32.mxu0 %vm8438_vm0, %v11786_v49 }
 0x6fc   :  { %7581 = vmatmul.mubr.msk.f32.gmra.mxu0 %vm1867_vm15, %v9327_v27  ;;  %v969_v27 = vld [vmem:[%s11673_s1 + $0x200] sm:$0xff] }
 0x6fd   :  { %7583 = vmatprep.mubr.msk.f32.mxu0 %vm8438_vm0, %v11786_v49 }
 0x700   :  { %7584 = vmatmul.mubr.msk.f32.gmra.mxu0 %vm1867_vm15, %v9357_v3 }
 0x701   :  { %7586 = vmatprep.mubr.msk.f32.mxu0 %vm8438_vm0, %v11786_v49 }
 0x704   :  { %7587 = vmatmul.mubr.msk.f32.gmra.mxu0 %vm1867_vm15, %v9378_v4 }
 0x705   :  { %7589 = vmatprep.mubr.msk.f32.mxu0 %vm8438_vm0, %v11786_v49 }
 0x708   :  { %7590 = vmatmul.mubr.msk.f32.gmra.mxu0 %vm1867_vm15, %v9415_v60 }
 0x709   :  { %7592 = vmatprep.mubr.msk.f32.mxu0 %vm8438_vm0, %v11786_v49 }
 0x70c   :  { %7593 = vmatmul.mubr.msk.f32.gmra.mxu0 %vm1867_vm15, %v9460_v32  ;;  %v971_v32 = vld [vmem:[%s11673_s1 + $0x220] sm:$0xff] }
 0x70d   :  { %7595 = vmatprep.mubr.msk.f32.mxu0 %vm8438_vm0, %v11786_v49  ;;  %7634 = vmatpush3.msra.mxu0 %v971_v32 }
 0x70e   :  { %7635 = vmatprep.subr.mxu0 %v11786_v49 }
 0x70f   :  { %7636 = vmatpush3.msra.mxu0 %v970_v59 }
 0x710   :  { %7596 = vmatmul.mubr.msk.f32.gmra.mxu0 %vm1867_vm15, %v9501_v41  ;;  %7637 = vmatprep.subr.mxu0 %v11786_v49 }
 0x711   :  { %7598 = vmatprep.mubr.msk.f32.mxu0 %vm8438_vm0, %v11786_v49  ;;  %7638 = vmatpush3.msra.mxu0 %v969_v27 }
 0x712   :  { %7639 = vmatprep.subr.mxu0 %v11786_v49 }
 0x714   :  { %7599 = vmatmul.mubr.msk.f32.gmra.mxu0 %vm1867_vm15, %v9533_v42 }
 0x715   :  { %7601 = vmatprep.mubr.msk.f32.mxu0 %vm8438_vm0, %v11786_v49 }
 0x718   :  { %7602 = vmatmul.mubr.msk.f32.gmra.mxu0 %vm1867_vm15, %v9549_v6  ;;  %v968_v6 = vld [vmem:[%s11673_s1 + $0x1f0] sm:$0xff] }
 0x719   :  { %7641 = vmatprep.mubr.msk.f32.mxu0 %vm8438_vm0, %v11786_v49  ;;  %7640 = vmatpush3.msra.mxu0 %v968_v6 }
 0x71a   :  { %7703 = vmatprep.subr.mxu0 %v11786_v49 }
 0x760   :  { %v7084_v42 = vpop.f32.mrf.mxu1 }
 0x762   :  { %v7085_v3 = vpop.f32.mrf.mxu1 }
 0x763   :  { %v7086_v12 = vadd.f32 %v7085_v3, %v7084_v42 }
 0x764   :  { %v7087_v4 = vpop.f32.mrf.mxu1 }
 0x766   :  { %v7088_v60 = vpop.f32.mrf.mxu1 }
 0x768   :  { %v7090_v41 = vpop.f32.mrf.mxu1 }
 0x76a   :  { %v7091_v30 = vpop.f32.mrf.mxu1 }
 0x76c   :  { %v7093_v9 = vpop.f32.mrf.mxu1 }
 0x76e   :  { %v7094_v63 = vpop.f32.mrf.mxu1 }
 0x770   :  { %v9833_v34 = vpop.f32.mrf.mxu1 }
 0x772   :  { %v9835_v54 = vpop.f32.mrf.mxu1 }
 0x774   :  { %v9837_v7 = vpop.f32.mrf.mxu1 }
 0x776   :  { %v9839_v23 = vpop.f32.mrf.mxu1 }
 0x778   :  { %v9841_v5 = vpop.f32.mrf.mxu1 }
 0x77a   :  { %v9843_v36 = vpop.f32.mrf.mxu1 }
 0x77c   :  { %v9845_v19 = vpop.f32.mrf.mxu1 }
 0x77e   :  { %v9847_v1 = vpop.f32.mrf.mxu1 }
 0x780   :  { %v9849_v21 = vpop.f32.mrf.mxu1 }
 0x782   :  { %v9851_v61 = vpop.f32.mrf.mxu1 }
 0x784   :  { %v2723_v14 = vpop.f32.mrf.mxu1 }
 0x785   :  { %8225 = vrcp.f32 %v2723_v14  ;;  %v7092_v14 = vadd.f32 %v7091_v30, %v7090_v41  ;;  %v7098_v30 = vadd.f32 %v9835_v54, %v9833_v34 }
 0x786   :  { %v7608_v52 = vpop.f32.mrf.mxu1 }
 0x787   :  { %v7089_v52 = vadd.f32 %v7088_v60, %v7087_v4  ;;  %v7095_v60 = vadd.f32 %v7094_v63, %v7093_v9 }
 0x788   :  { %v2728_v20 = vpop.f32.mrf.mxu1 }
 0x789   :  { %8227 = vrcp.f32 %v2728_v20 }
 0x78a   :  { %v7611_v26 = vpop.f32.mrf.mxu1 }
 0x78c   :  { %v2733_v8 = vpop.f32.mrf.mxu1 }
 0x78d   :  { %8229 = vrcp.f32 %v2733_v8 }
 0x78e   :  { %v7614_v35 = vpop.f32.mrf.mxu1 }
 0x790   :  { %v2738_v17 = vpop.f32.mrf.mxu1 }
 0x791   :  { %8231 = vrcp.f32 %v2738_v17 }
 0x792   :  { %v7617_v50 = vpop.f32.mrf.mxu1  ;;  %v8226_v27 = vpop.eup %8225 }
 0x794   :  { %v2743_v62 = vpop.f32.mrf.mxu1 }
 0x795   :  { %8233 = vrcp.f32 %v2743_v62 }
 0x796   :  { %v7620_v45 = vpop.f32.mrf.mxu1 }
 0x797   :  { %v8228_v45 = vpop.eup %8227 }
 0x798   :  { %v2748_v51 = vpop.f32.mrf.mxu1 }
 0x799   :  { %8235 = vrcp.f32 %v2748_v51 }
 0x79a   :  { %v7623_v46 = vpop.f32.mrf.mxu1  ;;  %v8230_v8 = vpop.eup %8229 }
 0x79c   :  { %v2753_v39 = vpop.f32.mrf.mxu1 }
 0x79d   :  { %8237 = vrcp.f32 %v2753_v39  ;;  %v7101_v39 = vadd.f32 %v9839_v23, %v9837_v7 }
 0x79e   :  { %v7626_v0 = vpop.f32.mrf.mxu1 }
 0x7a0   :  { %v2758_v57 = vpop.f32.mrf.mxu1 }
 0x7a1   :  { %8239 = vrcp.f32 %v2758_v57  ;;  %v7104_v57 = vadd.f32 %v9843_v36, %v9841_v5  ;;  %v7110_v36 = vadd.f32 %v9851_v61, %v9849_v21  ;;  %v960_v21 = vld [vmem:[%s11673_s1 + $0x1a4] ss:$0 sm:$0xff] }
 0x7a2   :  { %v7629_v55 = vpop.f32.mrf.mxu1 }
 0x7a3   :  { %v8232_v55 = vpop.eup %8231 }
 0x7a4   :  { %v2763_v47 = vpop.f32.mrf.mxu1  ;;  %v8234_v9 = vpop.eup %8233 }
 0x7a5   :  { %8241 = vrcp.f32 %v2763_v47  ;;  %v7107_v47 = vadd.f32 %v9847_v1, %v9845_v19 }
 0x7a6   :  { %v7632_v29 = vpop.f32.mrf.mxu1  ;;  %v8236_v34 = vpop.eup %8235 }
 0x7aa   :  { %v8238_v7 = vpop.eup %8237 }
 0x7b8   :  { %v2582_v32 = vpop.f32.mrf.mxu0 }
 0x7b9   :  { %v2583_v59 = vadd.f32 %v7086_v12, %v2582_v32 }
 0x7ba   :  { %v7579_v6 = vpop.f32.mrf.mxu0 }
 0x7bb   :  { %v2776_v26 = vmul.f32 %v8226_v27, %v2583_v59 }
 0x7bc   :  { %v2587_v35 = vpop.f32.mrf.mxu0 }
 0x7bd   :  { %v2588_v50 = vadd.f32 %v7089_v52, %v2587_v35  ;;  %7642 = vmatmul.mubr.msk.f32.vlgmr.msra.gmra.mxu0 %vm984_vm1, %v2776_v26 }
 0x7be   :  { %v7582_v46 = vpop.f32.mrf.mxu0  ;;  %7644 = vmatprep.mubr.msk.f32.mxu0 %vm8438_vm0, %v11786_v49 }
 0x7bf   :  { %v2777_v20 = vmul.f32 %v8228_v45, %v2588_v50  ;;  %v8240_v46 = vpop.eup %8239 }
 0x7c0   :  { %v2592_v42 = vpop.f32.mrf.mxu0 }
 0x7c1   :  { %v2593_v3 = vadd.f32 %v7092_v14, %v2592_v42  ;;  %7645 = vmatmul.mubr.msk.f32.gmra.mxu0 %vm984_vm1, %v2777_v20 }
 0x7c2   :  { %v7585_v4 = vpop.f32.mrf.mxu0  ;;  %7647 = vmatprep.mubr.msk.f32.mxu0 %vm8438_vm0, %v11786_v49 }
 0x7c3   :  { %v2778_v17 = vmul.f32 %v8230_v8, %v2593_v3  ;;  %v8242_v3 = vpop.eup %8241 }
 0x7c4   :  { %v2597_v62 = vpop.f32.mrf.mxu0 }
 0x7c5   :  { %v2598_v0 = vadd.f32 %v7095_v60, %v2597_v62  ;;  %7648 = vmatmul.mubr.msk.f32.gmra.mxu0 %vm984_vm1, %v2778_v17 }
 0x7c6   :  { %v7588_v41 = vpop.f32.mrf.mxu0  ;;  %7650 = vmatprep.mubr.msk.f32.mxu0 %vm8438_vm0, %v11786_v49 }
 0x7c7   :  { %v2779_v51 = vmul.f32 %v8232_v55, %v2598_v0 }
 0x7c8   :  { %v2602_v29 = vpop.f32.mrf.mxu0 }
 0x7c9   :  { %v2603_v12 = vadd.f32 %v7098_v30, %v2602_v29  ;;  %7651 = vmatmul.mubr.msk.f32.gmra.mxu0 %vm984_vm1, %v2779_v51 }
 0x7ca   :  { %v7591_v63 = vpop.f32.mrf.mxu0  ;;  %7653 = vmatprep.mubr.msk.f32.mxu0 %vm8438_vm0, %v11786_v49 }
 0x7cb   :  { %v2780_v32 = vmul.f32 %v8234_v9, %v2603_v12 }
 0x7cc   :  { %v2607_v59 = vpop.f32.mrf.mxu0 }
 0x7cd   :  { %v2608_v27 = vadd.f32 %v7101_v39, %v2607_v59  ;;  %7654 = vmatmul.mubr.msk.f32.gmra.mxu0 %vm984_vm1, %v2780_v32 }
 0x7ce   :  { %v7594_v54 = vpop.f32.mrf.mxu0  ;;  %7656 = vmatprep.mubr.msk.f32.mxu0 %vm8438_vm0, %v11786_v49 }
 0x7cf   :  { %v2781_v6 = vmul.f32 %v8236_v34, %v2608_v27 }
 0x7d0   :  { %v2612_v52 = vpop.f32.mrf.mxu0 }
 0x7d1   :  { %v2613_v26 = vadd.f32 %v7104_v57, %v2612_v52  ;;  %7657 = vmatmul.mubr.msk.f32.gmra.mxu0 %vm984_vm1, %v2781_v6  ;;  %v11820_v6 = vld [vmem:[#allocation2_spill] sm:$0xff] }
 0x7d2   :  { %v7597_v23 = vpop.f32.mrf.mxu0  ;;  %7659 = vmatprep.mubr.msk.f32.mxu0 %vm8438_vm0, %v11786_v49 }
 0x7d3   :  { %v2782_v35 = vmul.f32 %v8238_v7, %v2613_v26 }
 0x7d4   :  { %v2617_v50 = vpop.f32.mrf.mxu0 }
 0x7d5   :  { %v2618_v45 = vadd.f32 %v7107_v47, %v2617_v50  ;;  %7660 = vmatmul.mubr.msk.f32.gmra.mxu0 %vm984_vm1, %v2782_v35  ;;  %v11821_v47 = vld [vmem:[#allocation3_spill] sm:$0xff] }
 0x7d6   :  { %v7600_v5 = vpop.f32.mrf.mxu0  ;;  %7662 = vmatprep.mubr.msk.f32.mxu0 %vm8438_vm0, %v11786_v49 }
 0x7d7   :  { %v2783_v14 = vmul.f32 %v8240_v46, %v2618_v45  ;;  %v11822_v5 = vld [vmem:[#allocation4_spill] sm:$0xff] }
 0x7d8   :  { %v2622_v20 = vpop.f32.mrf.mxu0 }
 0x7d9   :  { %v2623_v42 = vadd.f32 %v7110_v36, %v2622_v20  ;;  %7663 = vmatmul.mubr.msk.f32.gmra.mxu0 %vm984_vm1, %v2783_v14 }
 0x7da   :  { %v7603_v19 = vpop.f32.mrf.mxu0  ;;  %7665 = vmatprep.mubr.msk.f32.mxu0 %vm8438_vm0, %v11786_v49 }
 0x7db   :  { %v2784_v1 = vmul.f32 %v8242_v3, %v2623_v42  ;;  %v11823_v19 = vld [vmem:[#allocation5_spill] sm:$0xff] }
 0x7dd   :  { %7666 = vmatmul.mubr.msk.f32.gmra.mxu0 %vm984_vm1, %v2784_v1 }
 0x7de   :  { %7719 = vmatprep.mubr.msk.f32.mxu0 %vm8438_vm0, %v11786_v49 }
 0x87d   :  { %v2878_v61 = vpop.f32.mrf.mxu0 }
 0x87e   :  { %v2922_v8 = vadd.f32 %v2878_v61, %v8579_v28 }
 0x87f   :  { %v7643_v4 = vpop.f32.mrf.mxu0 }
 0x880   :  { %v9894_v60 = vadd.f32 %v2922_v8, %v960_v21 }
 0x881   :  { %v2883_v17 = vpop.f32.mrf.mxu0 }
 0x882   :  { %v2923_v62 = vadd.f32 %v2883_v17, %v8586_v33  ;;  %v2940_v0 = vsel %vm984_vm1, %v9894_v60, 0.0 }
 0x883   :  { %2941 = vadd.xlane.f32.xlu0 %v2940_v0  ;;  %v7646_v55 = vpop.f32.mrf.mxu0 }
 0x884   :  { %v9899_v41 = vadd.f32 %v2923_v62, %v960_v21 }
 0x885   :  { %v2888_v30 = vpop.f32.mrf.mxu0 }
 0x886   :  { %v2924_v51 = vadd.f32 %v2888_v30, %v8593_v38  ;;  %v2943_v29 = vsel %vm984_vm1, %v9899_v41, 0.0 }
 0x887   :  { %2944 = vadd.xlane.f32.xlu1 %v2943_v29  ;;  %v7649_v28 = vpop.f32.mrf.mxu0 }
 0x888   :  { %v9904_v12 = vadd.f32 %v2924_v51, %v960_v21 }
 0x889   :  { %v2893_v9 = vpop.f32.mrf.mxu0 }
 0x88a   :  { %v2925_v33 = vadd.f32 %v2893_v9, %v8600_v43  ;;  %v2946_v63 = vsel %vm984_vm1, %v9904_v12, 0.0 }
 0x88b   :  { %2947 = vadd.xlane.f32.xlu0 %v2946_v63  ;;  %v7652_v39 = vpop.f32.mrf.mxu0 }
 0x88c   :  { %v9909_v32 = vadd.f32 %v2925_v33, %v960_v21 }
 0x88d   :  { %v2898_v59 = vpop.f32.mrf.mxu0 }
 0x88e   :  { %v2926_v38 = vadd.f32 %v2898_v59, %v8607_v48  ;;  %v2949_v27 = vsel %vm984_vm1, %v9909_v32, 0.0 }
 0x88f   :  { %2950 = vadd.xlane.f32.xlu0 %v2949_v27  ;;  %v7655_v34 = vpop.f32.mrf.mxu0 }
 0x890   :  { %v9914_v54 = vadd.f32 %v2926_v38, %v960_v21 }
 0x891   :  { %v2903_v57 = vpop.f32.mrf.mxu0 }
 0x892   :  { %v2927_v43 = vadd.f32 %v2903_v57, %v11820_v6  ;;  %v2952_v52 = vsel %vm984_vm1, %v9914_v54, 0.0 }
 0x893   :  { %2953 = vadd.xlane.f32.xlu0 %v2952_v52  ;;  %v7658_v26 = vpop.f32.mrf.mxu0 }
 0x894   :  { %v9919_v7 = vadd.f32 %v2927_v43, %v960_v21 }
 0x895   :  { %v2908_v23 = vpop.f32.mrf.mxu0 }
 0x896   :  { %v2928_v48 = vadd.f32 %v2908_v23, %v11821_v47  ;;  %v2955_v35 = vsel %vm984_vm1, %v9919_v7, 0.0 }
 0x897   :  { %2956 = vadd.xlane.f32.xlu1 %v2955_v35  ;;  %v7661_v50 = vpop.f32.mrf.mxu0 }
 0x898   :  { %v9924_v45 = vadd.f32 %v2928_v48, %v960_v21 }
 0x899   :  { %v2913_v46 = vpop.f32.mrf.mxu0 }
 0x89a   :  { %v2929_v36 = vadd.f32 %v2913_v46, %v11822_v5  ;;  %v2958_v14 = vsel %vm984_vm1, %v9924_v45, 0.0 }
 0x89b   :  { %2959 = vadd.xlane.f32.xlu0 %v2958_v14  ;;  %v7664_v20 = vpop.f32.mrf.mxu0 }
 0x89c   :  { %v9929_v42 = vadd.f32 %v2929_v36, %v960_v21 }
 0x89d   :  { %v2918_v3 = vpop.f32.mrf.mxu0 }
 0x89e   :  { %v2930_v1 = vadd.f32 %v2918_v3, %v11823_v19  ;;  %v2961_v61 = vsel %vm984_vm1, %v9929_v42, 0.0 }
 0x89f   :  { %2962 = vadd.xlane.f32.xlu1 %v2961_v61  ;;  %v7667_v8 = vpop.f32.mrf.mxu0 }
 0x8a0   :  { %v9934_v4 = vadd.f32 %v2930_v1, %v960_v21 }
 0x8a2   :  { %v2964_v17 = vsel %vm1009_vm2, %v9934_v4, 0.0 }
 0x8a3   :  { %2965 = vadd.xlane.f32.xlu0 %v2964_v17 }
 0x90c   :  { %v2942_v62 = vpop.xlane.xlu0 %2941 }
 0x90d   :  { %v2967_v0 = vmul.f32 0.03125, %v2942_v62 }
 0x90f   :  { %v9939_v55 = vsub.f32 %v9894_v60, %v2967_v0 }
 0x910   :  { %v2945_v30 = vpop.xlane.xlu1 %2944 }
 0x911   :  { %v2968_v51 = vmul.f32 0.03125, %v2945_v30  ;;  %v2985_v29 = vmul.f32 %v9939_v55, %v9939_v55 }
 0x913   :  { %v9944_v28 = vsub.f32 %v9899_v41, %v2968_v51  ;;  %v2994_v21 = vsel %vm984_vm1, %v2985_v29, 0.0 }
 0x914   :  { %v2948_v9 = vpop.xlane.xlu0 %2947  ;;  %2995 = vadd.xlane.f32.xlu1 %v2994_v21 }
 0x915   :  { %v2969_v33 = vmul.f32 0.03125, %v2948_v9  ;;  %v2986_v63 = vmul.f32 %v9944_v28, %v9944_v28 }
 0x917   :  { %v9950_v39 = vsub.f32 %v9904_v12, %v2969_v33  ;;  %v2997_v59 = vsel %vm984_vm1, %v2986_v63, 0.0  ;;  %v975_v33 = vld [vmem:[%s11673_s1 + $0x260] sm:$0xff]  ;;  %v974_v63 = vld [vmem:[%s11673_s1 + $0x250] sm:$0xff] }
 0x918   :  { %v2951_v38 = vpop.xlane.xlu0 %2950  ;;  %2998 = vadd.xlane.f32.xlu0 %v2997_v59  ;;  %7669 = vmatpush3.msra.mxu1 %v975_v33 }
 0x919   :  { %v2970_v27 = vmul.f32 0.03125, %v2951_v38  ;;  %v2987_v34 = vmul.f32 %v9950_v39, %v9950_v39  ;;  %7670 = vmatprep.subr.mxu1 %v11786_v49  ;;  %v973_v38 = vld [vmem:[%s11673_s1 + $0x240] sm:$0xff] }
 0x91a   :  { %7671 = vmatpush3.msra.mxu1 %v974_v63 }
 0x91b   :  { %v9956_v57 = vsub.f32 %v9909_v32, %v2970_v27  ;;  %v3000_v6 = vsel %vm984_vm1, %v2987_v34, 0.0  ;;  %7672 = vmatprep.subr.mxu1 %v11786_v49  ;;  %v972_v27 = vld [vmem:[%s11673_s1 + $0x230] sm:$0xff] }
 0x91c   :  { %v2954_v43 = vpop.xlane.xlu0 %2953  ;;  %3001 = vadd.xlane.f32.xlu1 %v3000_v6  ;;  %7673 = vmatpush3.msra.mxu1 %v973_v38 }
 0x91d   :  { %v2971_v52 = vmul.f32 0.03125, %v2954_v43  ;;  %v2988_v26 = vmul.f32 %v9956_v57, %v9956_v57  ;;  %7674 = vmatprep.subr.mxu1 %v11786_v49 }
 0x91e   :  { %7675 = vmatpush3.msra.mxu1 %v972_v27 }
 0x91f   :  { %v9962_v23 = vsub.f32 %v9914_v54, %v2971_v52  ;;  %v3003_v47 = vsel %vm984_vm1, %v2988_v26, 0.0  ;;  %7746 = vmatprep.subr.mxu1 %v11786_v49 }
 0x920   :  { %v2957_v48 = vpop.xlane.xlu1 %2956  ;;  %3004 = vadd.xlane.f32.xlu0 %v3003_v47 }
 0x921   :  { %v2972_v35 = vmul.f32 0.03125, %v2957_v48  ;;  %v2989_v50 = vmul.f32 %v9962_v23, %v9962_v23 }
 0x923   :  { %v9968_v46 = vsub.f32 %v9919_v7, %v2972_v35  ;;  %v3006_v5 = vsel %vm984_vm1, %v2989_v50, 0.0 }
 0x924   :  { %v2960_v36 = vpop.xlane.xlu0 %2959  ;;  %3007 = vadd.xlane.f32.xlu1 %v3006_v5 }
 0x925   :  { %v2973_v14 = vmul.f32 0.03125, %v2960_v36  ;;  %v2990_v20 = vmul.f32 %v9968_v46, %v9968_v46 }
 0x927   :  { %v9974_v3 = vsub.f32 %v9924_v45, %v2973_v14  ;;  %v3009_v19 = vsel %vm984_vm1, %v2990_v20, 0.0 }
 0x928   :  { %v2963_v1 = vpop.xlane.xlu1 %2962  ;;  %3010 = vadd.xlane.f32.xlu0 %v3009_v19 }
 0x929   :  { %v2974_v61 = vmul.f32 0.03125, %v2963_v1  ;;  %v2991_v8 = vmul.f32 %v9974_v3, %v9974_v3 }
 0x92b   :  { %v9980_v17 = vsub.f32 %v9929_v42, %v2974_v61  ;;  %v3012_v62 = vsel %vm984_vm1, %v2991_v8, 0.0  ;;  %v10011_v61 = vld [vmem:[%s11673_s1 + $0x1a2] ss:$0 sm:$0xff] }
 0x92c   :  { %3013 = vadd.xlane.f32.xlu1 %v3012_v62  ;;  %v2966_v0 = vpop.xlane.xlu0 %2965 }
 0x92d   :  { %v2975_v30 = vmul.f32 0.03125, %v2966_v0  ;;  %v2992_v51 = vmul.f32 %v9980_v17, %v9980_v17 }
 0x92f   :  { %v9986_v29 = vsub.f32 %v9934_v4, %v2975_v30  ;;  %v3015_v21 = vsel %vm984_vm1, %v2992_v51, 0.0  ;;  %v10017_v30 = vld [vmem:[%s11673_s1 + $0x1a3] ss:$0 sm:$0xff] }
 0x930   :  { %3016 = vadd.xlane.f32.xlu0 %v3015_v21 }
 0x931   :  { %v2993_v9 = vmul.f32 %v9986_v29, %v9986_v29 }
 0x933   :  { %v3018_v59 = vsel %vm1009_vm2, %v2993_v9, 0.0 }
 0x934   :  { %3019 = vadd.xlane.f32.xlu1 %v3018_v59 }
 0x99d   :  { %v2996_v34 = vpop.xlane.xlu1 %2995 }
 0x99e   :  { %v3021_v6 = vmul.f32 0.03125, %v2996_v34 }
 0x9a0   :  { %v3030_v43 = vadd.f32 1e-06, %v3021_v6 }
 0x9a1   :  { %v2999_v52 = vpop.xlane.xlu0 %2998 }
 0x9a2   :  { %8243 = vrsqrt.f32 %v3030_v43  ;;  %v3022_v26 = vmul.f32 0.03125, %v2999_v52 }
 0x9a4   :  { %v3031_v47 = vadd.f32 1e-06, %v3022_v26 }
 0x9a5   :  { %v3002_v48 = vpop.xlane.xlu1 %3001 }
 0x9a6   :  { %8245 = vrsqrt.f32 %v3031_v47  ;;  %v3023_v35 = vmul.f32 0.03125, %v3002_v48 }
 0x9a8   :  { %v3032_v50 = vadd.f32 1e-06, %v3023_v35 }
 0x9a9   :  { %v3005_v5 = vpop.xlane.xlu0 %3004 }
 0x9aa   :  { %8247 = vrsqrt.f32 %v3032_v50  ;;  %v3024_v36 = vmul.f32 0.03125, %v3005_v5 }
 0x9ac   :  { %v3033_v14 = vadd.f32 1e-06, %v3024_v36 }
 0x9ad   :  { %v3008_v20 = vpop.xlane.xlu1 %3007 }
 0x9ae   :  { %8249 = vrsqrt.f32 %v3033_v14  ;;  %v3025_v19 = vmul.f32 0.03125, %v3008_v20 }
 0x9af   :  { %v8244_v1 = vpop.eup %8243 }
 0x9b0   :  { %v3048_v8 = vmul.f32 %v8244_v1, %v9939_v55  ;;  %v3034_v62 = vadd.f32 1e-06, %v3025_v19 }
 0x9b1   :  { %v3011_v0 = vpop.xlane.xlu0 %3010 }
 0x9b2   :  { %v3057_v51 = vmul.f32 %v3048_v8, %v10011_v61  ;;  %8251 = vrsqrt.f32 %v3034_v62  ;;  %v3026_v21 = vmul.f32 0.03125, %v3011_v0 }
 0x9b3   :  { %v8246_v9 = vpop.eup %8245 }
 0x9b4   :  { %v3035_v33 = vadd.f32 1e-06, %v3026_v21  ;;  %v3066_v63 = vadd.f32 %v3057_v51, %v10017_v30  ;;  %v3049_v59 = vmul.f32 %v8246_v9, %v9944_v28 }
 0x9b5   :  { %v3014_v38 = vpop.xlane.xlu1 %3013 }
 0x9b6   :  { %8253 = vrsqrt.f32 %v3035_v33  ;;  %v3027_v55 = vmul.f32 0.03125, %v3014_v38  ;;  %7677 = vmatmul.mubr.msk.f32.vlgmr.msra.gmra.mxu1 %vm984_vm1, %v3066_v63  ;;  %v3058_v27 = vmul.f32 %v3049_v59, %v10011_v61 }
 0x9b7   :  { %v8248_v34 = vpop.eup %8247  ;;  %7679 = vmatprep.mubr.msk.f32.mxu1 %vm8438_vm0, %v11786_v49 }
 0x9b8   :  { %v3036_v6 = vadd.f32 1e-06, %v3027_v55  ;;  %v3067_v43 = vadd.f32 %v3058_v27, %v10017_v30  ;;  %v3050_v52 = vmul.f32 %v8248_v34, %v9950_v39 }
 0x9b9   :  { %v3017_v26 = vpop.xlane.xlu0 %3016 }
 0x9ba   :  { %8255 = vrsqrt.f32 %v3036_v6  ;;  %v3028_v47 = vmul.f32 0.03125, %v3017_v26  ;;  %7680 = vmatmul.mubr.msk.f32.gmra.mxu1 %vm984_vm1, %v3067_v43  ;;  %v3059_v28 = vmul.f32 %v3050_v52, %v10011_v61  ;;  %v983_v43 = vld [vmem:[%s11673_s1 + $0x2e0] sm:$0xff]  ;;  %v978_v26 = vld [vmem:[%s11673_s1 + $0x290] sm:$0xff] }
 0x9bb   :  { %v8250_v48 = vpop.eup %8249  ;;  %7682 = vmatprep.mubr.msk.f32.mxu1 %vm8438_vm0, %v11786_v49  ;;  %7704 = vmatpush3.msra.mxu0 %v983_v43  ;;  %v979_v52 = vld [vmem:[%s11673_s1 + $0x2a0] sm:$0xff] }
 0x9bc   :  { %v3037_v35 = vadd.f32 1e-06, %v3028_v47  ;;  %v3068_v50 = vadd.f32 %v3059_v28, %v10017_v30  ;;  %v3051_v5 = vmul.f32 %v8250_v48, %v9956_v57  ;;  %7705 = vmatprep.subr.mxu0 %v11786_v49  ;;  %v977_v47 = vld [vmem:[%s11673_s1 + $0x280] sm:$0xff]  ;;  %v976_v28 = vld [vmem:[%s11673_s1 + $0x270] sm:$0xff] }
 0x9bd   :  { %v3020_v36 = vpop.xlane.xlu1 %3019  ;;  %v10106_v48 = vld [vmem:[%s11673_s1 + $0x1a7] ss:$0 sm:$0xff] }
 0x9be   :  { %8257 = vrsqrt.f32 %v3037_v35  ;;  %v3029_v14 = vmul.f32 0.03125, %v3020_v36  ;;  %7683 = vmatmul.mubr.msk.f32.gmra.mxu1 %vm984_vm1, %v3068_v50  ;;  %v3060_v39 = vmul.f32 %v3051_v5, %v10011_v61 }
 0x9bf   :  { %v8252_v20 = vpop.eup %8251  ;;  %7685 = vmatprep.mubr.msk.f32.mxu1 %vm8438_vm0, %v11786_v49 }
 0x9c0   :  { %v3038_v19 = vadd.f32 1e-06, %v3029_v14  ;;  %v3069_v1 = vadd.f32 %v3060_v39, %v10017_v30  ;;  %v3052_v8 = vmul.f32 %v8252_v20, %v9962_v23 }
 0x9c2   :  { %8259 = vrsqrt.f32 %v3038_v19  ;;  %7686 = vmatmul.mubr.msk.f32.gmra.mxu1 %vm984_vm1, %v3069_v1  ;;  %v3061_v57 = vmul.f32 %v3052_v8, %v10011_v61 }
 0x9c3   :  { %v8254_v62 = vpop.eup %8253  ;;  %7688 = vmatprep.mubr.msk.f32.mxu1 %vm8438_vm0, %v11786_v49 }
 0x9c4   :  { %v3070_v0 = vadd.f32 %v3061_v57, %v10017_v30  ;;  %v3053_v51 = vmul.f32 %v8254_v62, %v9968_v46 }
 0x9c6   :  { %7689 = vmatmul.mubr.msk.f32.gmra.mxu1 %vm984_vm1, %v3070_v0  ;;  %v3062_v21 = vmul.f32 %v3053_v51, %v10011_v61 }
 0x9c7   :  { %v8256_v9 = vpop.eup %8255  ;;  %7691 = vmatprep.mubr.msk.f32.mxu1 %vm8438_vm0, %v11786_v49 }
 0x9c8   :  { %v3071_v23 = vadd.f32 %v3062_v21, %v10017_v30  ;;  %v3054_v33 = vmul.f32 %v8256_v9, %v9974_v3 }
 0x9ca   :  { %7692 = vmatmul.mubr.msk.f32.gmra.mxu1 %vm984_vm1, %v3071_v23  ;;  %v3063_v63 = vmul.f32 %v3054_v33, %v10011_v61 }
 0x9cb   :  { %v8258_v59 = vpop.eup %8257  ;;  %7694 = vmatprep.mubr.msk.f32.mxu1 %vm8438_vm0, %v11786_v49 }
 0x9cc   :  { %v3072_v46 = vadd.f32 %v3063_v63, %v10017_v30  ;;  %v3055_v38 = vmul.f32 %v8258_v59, %v9980_v17 }
 0x9ce   :  { %7695 = vmatmul.mubr.msk.f32.gmra.mxu1 %vm984_vm1, %v3072_v46  ;;  %v3064_v55 = vmul.f32 %v3055_v38, %v10011_v61 }
 0x9cf   :  { %v8260_v27 = vpop.eup %8259  ;;  %7697 = vmatprep.mubr.msk.f32.mxu1 %vm8438_vm0, %v11786_v49 }
 0x9d0   :  { %v3073_v3 = vadd.f32 %v3064_v55, %v10017_v30  ;;  %v3056_v34 = vmul.f32 %v8260_v27, %v9986_v29  ;;  %v982_v29 = vld [vmem:[%s11673_s1 + $0x2d0] sm:$0xff] }
 0x9d1   :  { %7706 = vmatpush3.msra.mxu0 %v982_v29 }
 0x9d2   :  { %7698 = vmatmul.mubr.msk.f32.gmra.mxu1 %vm984_vm1, %v3073_v3  ;;  %v3065_v6 = vmul.f32 %v3056_v34, %v10011_v61  ;;  %7707 = vmatprep.subr.mxu0 %v11786_v49  ;;  %v981_v61 = vld [vmem:[%s11673_s1 + $0x2c0] sm:$0xff] }
 0x9d3   :  { %7700 = vmatprep.mubr.msk.f32.mxu1 %vm8438_vm0, %v11786_v49  ;;  %7708 = vmatpush3.msra.mxu0 %v981_v61 }
 0x9d4   :  { %v3074_v17 = vadd.f32 %v3065_v6, %v10017_v30  ;;  %7709 = vmatprep.subr.mxu0 %v11786_v49  ;;  %v980_v30 = vld [vmem:[%s11673_s1 + $0x2b0] sm:$0xff] }
 0x9d5   :  { %7710 = vmatpush3.msra.mxu0 %v980_v30 }
 0x9d6   :  { %7701 = vmatmul.mubr.msk.f32.gmra.mxu1 %vm984_vm1, %v3074_v17  ;;  %7711 = vmatprep.subr.mxu0 %v11786_v49 }
 0x9d7   :  { %7754 = vmatprep.mubr.msk.f32.mxu1 %vm8438_vm0, %v11786_v49  ;;  %7712 = vmatpush3.msra.mxu0 %v979_v52 }
 0x9d8   :  { %7713 = vmatprep.subr.mxu0 %v11786_v49 }
 0x9d9   :  { %7714 = vmatpush3.msra.mxu0 %v978_v26 }
 0x9da   :  { %7715 = vmatprep.subr.mxu0 %v11786_v49 }
 0x9db   :  { %7716 = vmatpush3.msra.mxu0 %v977_v47 }
 0x9dc   :  { %7717 = vmatprep.subr.mxu0 %v11786_v49 }
 0x9dd   :  { %7718 = vmatpush3.msra.mxu0 %v976_v28 }
 0xa76   :  { %v3168_v35 = vpop.f32.mrf.mxu1 }
 0xa77   :  { %v3169_v50 = vadd.f32 %v3168_v35, %v10106_v48 }
 0xa78   :  { %v7678_v5 = vpop.f32.mrf.mxu1 }
 0xa79   :  { %v3221_v36 = vmul.f32 0.044715, %v3169_v50 }
 0xa7a   :  { %v3173_v14 = vpop.f32.mrf.mxu1 }
 0xa7b   :  { %v3230_v39 = vmul.f32 %v3221_v36, %v3169_v50  ;;  %v3174_v20 = vadd.f32 %v3173_v14, %v10106_v48 }
 0xa7c   :  { %v7681_v19 = vpop.f32.mrf.mxu1 }
 0xa7d   :  { %v3239_v1 = vmul.f32 %v3230_v39, %v3169_v50  ;;  %v3222_v8 = vmul.f32 0.044715, %v3174_v20 }
 0xa7e   :  { %v3178_v57 = vpop.f32.mrf.mxu1 }
 0xa7f   :  { %v3248_v62 = vadd.f32 %v3239_v1, %v3169_v50  ;;  %v3231_v0 = vmul.f32 %v3222_v8, %v3174_v20  ;;  %v10111_v51 = vadd.f32 %v3178_v57, %v10106_v48 }
 0xa80   :  { %v7684_v21 = vpop.f32.mrf.mxu1 }
 0xa81   :  { %v3257_v9 = vmul.f32 0.7978846, %v3248_v62  ;;  %v3240_v23 = vmul.f32 %v3231_v0, %v3174_v20  ;;  %v3223_v33 = vmul.f32 0.044715, %v10111_v51  ;;  %v3212_v21 = vmul.f32 0.5, %v3169_v50 }
 0xa82   :  { %v3183_v63 = vpop.f32.mrf.mxu1 }
 0xa83   :  { %8261 = vtanh.f32 %v3257_v9  ;;  %v3249_v59 = vadd.f32 %v3240_v23, %v3174_v20  ;;  %v3232_v46 = vmul.f32 %v3223_v33, %v10111_v51  ;;  %v10116_v38 = vadd.f32 %v3183_v63, %v10106_v48 }
 0xa84   :  { %v7687_v55 = vpop.f32.mrf.mxu1 }
 0xa85   :  { %v3241_v27 = vmul.f32 %v3232_v46, %v10111_v51  ;;  %v3224_v3 = vmul.f32 0.044715, %v10116_v38  ;;  %v3258_v34 = vmul.f32 0.7978846, %v3249_v59 }
 0xa86   :  { %v3188_v6 = vpop.f32.mrf.mxu1 }
 0xa87   :  { %v3250_v17 = vadd.f32 %v3241_v27, %v10111_v51  ;;  %v3233_v43 = vmul.f32 %v3224_v3, %v10116_v38  ;;  %v10123_v29 = vadd.f32 %v3188_v6, %v10106_v48  ;;  %8263 = vtanh.f32 %v3258_v34 }
 0xa88   :  { %v7690_v61 = vpop.f32.mrf.mxu1 }
 0xa89   :  { %v3242_v30 = vmul.f32 %v3233_v43, %v10116_v38  ;;  %v3225_v52 = vmul.f32 0.044715, %v10123_v29  ;;  %v3259_v26 = vmul.f32 0.7978846, %v3250_v17  ;;  %v3213_v43 = vmul.f32 0.5, %v3174_v20 }
 0xa8a   :  { %v3193_v47 = vpop.f32.mrf.mxu1 }
 0xa8b   :  { %v3251_v28 = vadd.f32 %v3242_v30, %v10116_v38  ;;  %v3234_v35 = vmul.f32 %v3225_v52, %v10123_v29  ;;  %v10130_v5 = vadd.f32 %v3193_v47, %v10106_v48  ;;  %8265 = vtanh.f32 %v3259_v26 }
 0xa8c   :  { %v7693_v36 = vpop.f32.mrf.mxu1 }
 0xa8d   :  { %v3243_v14 = vmul.f32 %v3234_v35, %v10123_v29  ;;  %v3226_v39 = vmul.f32 0.044715, %v10130_v5  ;;  %v3260_v19 = vmul.f32 0.7978846, %v3251_v28 }
 0xa8e   :  { %v3198_v1 = vpop.f32.mrf.mxu1 }
 0xa8f   :  { %v3252_v8 = vadd.f32 %v3243_v14, %v10123_v29  ;;  %v3235_v57 = vmul.f32 %v3226_v39, %v10130_v5  ;;  %v10137_v62 = vadd.f32 %v3198_v1, %v10106_v48  ;;  %8267 = vtanh.f32 %v3260_v19 }
 0xa90   :  { %v8262_v0 = vpop.eup %8261  ;;  %v7696_v9 = vpop.f32.mrf.mxu1  ;;  %v3214_v39 = vmul.f32 0.5, %v10111_v51  ;;  %v3215_v51 = vmul.f32 0.5, %v10116_v38 }
 0xa91   :  { %v3275_v23 = vadd.f32 1.0, %v8262_v0  ;;  %v3244_v33 = vmul.f32 %v3235_v57, %v10130_v5  ;;  %v3227_v63 = vmul.f32 0.044715, %v10137_v62  ;;  %v3261_v59 = vmul.f32 0.7978846, %v3252_v8 }
 0xa92   :  { %v3203_v46 = vpop.f32.mrf.mxu1 }
 0xa93   :  { %v3284_v55 = vmul.f32 %v3275_v23, %v3212_v21  ;;  %v3253_v27 = vadd.f32 %v3244_v33, %v10130_v5  ;;  %v3236_v3 = vmul.f32 %v3227_v63, %v10137_v62  ;;  %v3204_v34 = vadd.f32 %v3203_v46, %v10106_v48 }
 0xa94   :  { %v8264_v6 = vpop.eup %8263  ;;  %v7699_v17 = vpop.f32.mrf.mxu1  ;;  %8269 = vtanh.f32 %v3261_v59 }
 0xa95   :  { %v3245_v50 = vmul.f32 %v3236_v3, %v10137_v62  ;;  %v3228_v61 = vmul.f32 0.044715, %v3204_v34  ;;  %7720 = vmatmul.mubr.msk.f32.vlgmr.msra.gmra.mxu0 %vm3293_vm11, %v3284_v55  ;;  %v3276_v30 = vadd.f32 1.0, %v8264_v6  ;;  %v3262_v52 = vmul.f32 0.7978846, %v3253_v27 }
 0xa96   :  { %v3208_v26 = vpop.f32.mrf.mxu1  ;;  %7722 = vmatprep.mubr.msk.f32.mxu0 %vm8438_vm0, %v11786_v49  ;;  %v3216_v3 = vmul.f32 0.5, %v10123_v29 }
 0xa97   :  { %v3254_v47 = vadd.f32 %v3245_v50, %v10137_v62  ;;  %v3237_v28 = vmul.f32 %v3228_v61, %v3204_v34  ;;  %v3209_v35 = vadd.f32 %v3208_v26, %v10106_v48  ;;  %v3285_v36 = vmul.f32 %v3276_v30, %v3213_v43 }
 0xa98   :  { %v8266_v14 = vpop.eup %8265  ;;  %v7702_v20 = vpop.f32.mrf.mxu1  ;;  %8271 = vtanh.f32 %v3262_v52  ;;  %v3217_v43 = vmul.f32 0.5, %v10130_v5  ;;  %v3218_v52 = vmul.f32 0.5, %v10137_v62 }
 0xa99   :  { %v3246_v19 = vmul.f32 %v3237_v28, %v3204_v34  ;;  %v3229_v1 = vmul.f32 0.044715, %v3209_v35  ;;  %7723 = vmatmul.mubr.msk.f32.gmra.mxu0 %vm3293_vm11, %v3285_v36  ;;  %v3277_v8 = vadd.f32 1.0, %v8266_v14  ;;  %v3263_v57 = vmul.f32 0.7978846, %v3254_v47 }
 0xa9a   :  { %7725 = vmatprep.mubr.msk.f32.mxu0 %vm8438_vm0, %v11786_v49  ;;  %v3219_v28 = vmul.f32 0.5, %v3204_v34  ;;  %v3220_v20 = vmul.f32 0.5, %v3209_v35 }
 0xa9b   :  { %v3255_v0 = vadd.f32 %v3246_v19, %v3204_v34  ;;  %v3238_v21 = vmul.f32 %v3229_v1, %v3209_v35  ;;  %v3286_v9 = vmul.f32 %v3277_v8, %v3214_v39  ;;  %8273 = vtanh.f32 %v3263_v57  ;;  %v961_v34 = vld [vmem:[%s11673_s1 + $0x1a5] ss:$0 sm:$0xff] }
 0xa9c   :  { %v8268_v48 = vpop.eup %8267 }
 0xa9d   :  { %v3247_v23 = vmul.f32 %v3238_v21, %v3209_v35  ;;  %7726 = vmatmul.mubr.msk.f32.gmra.mxu0 %vm3293_vm11, %v3286_v9  ;;  %v3278_v33 = vadd.f32 1.0, %v8268_v48  ;;  %v3264_v63 = vmul.f32 0.7978846, %v3255_v0 }
 0xa9e   :  { %7728 = vmatprep.mubr.msk.f32.mxu0 %vm8438_vm0, %v11786_v49 }
 0xa9f   :  { %v3256_v59 = vadd.f32 %v3247_v23, %v3209_v35  ;;  %v3287_v46 = vmul.f32 %v3278_v33, %v3215_v51  ;;  %8275 = vtanh.f32 %v3264_v63 }
 0xaa1   :  { %v8270_v55 = vpop.eup %8269  ;;  %7729 = vmatmul.mubr.msk.f32.gmra.mxu0 %vm3293_vm11, %v3287_v46  ;;  %v3265_v27 = vmul.f32 0.7978846, %v3256_v59 }
 0xaa2   :  { %7731 = vmatprep.mubr.msk.f32.mxu0 %vm8438_vm0, %v11786_v49  ;;  %v3279_v6 = vadd.f32 1.0, %v8270_v55 }
 0xaa3   :  { %8277 = vtanh.f32 %v3265_v27 }
 0xaa4   :  { %v3288_v38 = vmul.f32 %v3279_v6, %v3216_v3 }
 0xaa5   :  { %v8272_v17 = vpop.eup %8271 }
 0xaa6   :  { %7732 = vmatmul.mubr.msk.f32.gmra.mxu0 %vm3293_vm11, %v3288_v38  ;;  %v3280_v50 = vadd.f32 1.0, %v8272_v17 }
 0xaa7   :  { %7734 = vmatprep.mubr.msk.f32.mxu0 %vm8438_vm0, %v11786_v49 }
 0xaa8   :  { %v8274_v61 = vpop.eup %8273  ;;  %v3289_v30 = vmul.f32 %v3280_v50, %v3217_v43 }
 0xaa9   :  { %v3281_v26 = vadd.f32 1.0, %v8274_v61 }
 0xaaa   :  { %7735 = vmatmul.mubr.msk.f32.gmra.mxu0 %vm3293_vm11, %v3289_v30 }
 0xaab   :  { %7737 = vmatprep.mubr.msk.f32.mxu0 %vm8438_vm0, %v11786_v49  ;;  %v3290_v29 = vmul.f32 %v3281_v26, %v3218_v52 }
 0xaac   :  { %v8276_v47 = vpop.eup %8275 }
 0xaad   :  { %v3282_v36 = vadd.f32 1.0, %v8276_v47 }
 0xaae   :  { %7738 = vmatmul.mubr.msk.f32.gmra.mxu0 %vm3293_vm11, %v3290_v29 }
 0xaaf   :  { %7740 = vmatprep.mubr.msk.f32.mxu0 %vm8438_vm0, %v11786_v49  ;;  %v3291_v5 = vmul.f32 %v3282_v36, %v3219_v28 }
 0xab0   :  { %v8278_v14 = vpop.eup %8277 }
 0xab1   :  { %v3283_v39 = vadd.f32 1.0, %v8278_v14 }
 0xab2   :  { %7741 = vmatmul.mubr.msk.f32.gmra.mxu0 %vm3293_vm11, %v3291_v5 }
 0xab3   :  { %7743 = vmatprep.mubr.msk.f32.mxu0 %vm8438_vm0, %v11786_v49  ;;  %v3292_v62 = vmul.f32 %v3283_v39, %v3220_v20 }
 0xab6   :  { %7744 = vmatmul.mubr.msk.f32.gmra.mxu0 %vm3293_vm11, %v3292_v62 }
 0xab7   :  { %4024 = vmatprep.mubr.f32.mxu0 %v11786_v49 }
 0xb55   :  { %v3387_v19 = vpop.f32.mrf.mxu0 }
 0xb56   :  { %v3431_v1 = vadd.f32 %v3387_v19, %v9894_v60 }
 0xb57   :  { %v7721_v8 = vpop.f32.mrf.mxu0 }
 0xb58   :  { %v10182_v35 = vadd.f32 %v3431_v1, %v961_v34 }
 0xb59   :  { %v3392_v57 = vpop.f32.mrf.mxu0 }
 0xb5a   :  { %11824 = vst [vmem:[#allocation2_spill] sm:$0xff] %v10182_v35  ;;  %v3432_v0 = vadd.f32 %v3392_v57, %v9899_v41  ;;  %v3477_v21 = vsel %vm984_vm1, %v10182_v35, 0.0 }
 0xb5b   :  { %3478 = vadd.xlane.f32.xlu0 %v3477_v21  ;;  %v7724_v9 = vpop.f32.mrf.mxu0 }
 0xb5c   :  { %v10187_v48 = vadd.f32 %v3432_v0, %v961_v34 }
 0xb5d   :  { %v3397_v23 = vpop.f32.mrf.mxu0 }
 0xb5e   :  { %11825 = vst [vmem:[#allocation3_spill] sm:$0xff] %v10187_v48  ;;  %v3433_v51 = vadd.f32 %v3397_v23, %v9904_v12  ;;  %v3480_v33 = vsel %vm984_vm1, %v10187_v48, 0.0 }
 0xb5f   :  { %3481 = vadd.xlane.f32.xlu1 %v3480_v33  ;;  %v7727_v60 = vpop.f32.mrf.mxu0 }
 0xb60   :  { %v10192_v63 = vadd.f32 %v3433_v51, %v961_v34 }
 0xb61   :  { %v3402_v59 = vpop.f32.mrf.mxu0 }
 0xb62   :  { %11826 = vst [vmem:[#allocation4_spill] sm:$0xff] %v10192_v63  ;;  %v3434_v41 = vadd.f32 %v3402_v59, %v9909_v32  ;;  %v3483_v46 = vsel %vm984_vm1, %v10192_v63, 0.0 }
 0xb63   :  { %3484 = vadd.xlane.f32.xlu0 %v3483_v46  ;;  %v7730_v55 = vpop.f32.mrf.mxu0 }
 0xb64   :  { %v10197_v27 = vadd.f32 %v3434_v41, %v961_v34 }
 0xb66   :  { %11827 = vst [vmem:[#allocation5_spill] sm:$0xff] %v10197_v27  ;;  %v3407_v3 = vpop.f32.mrf.mxu0  ;;  %v3486_v12 = vsel %vm984_vm1, %v10197_v27, 0.0 }
 0xb67   :  { %v3435_v6 = vadd.f32 %v3407_v3, %v9914_v54  ;;  %3487 = vadd.xlane.f32.xlu1 %v3486_v12 }
 0xb68   :  { %v7733_v38 = vpop.f32.mrf.mxu0 }
 0xb69   :  { %v10202_v17 = vadd.f32 %v3435_v6, %v961_v34 }
 0xb6a   :  { %v3412_v43 = vpop.f32.mrf.mxu0 }
 0xb6b   :  { %11828 = vst [vmem:[#allocation35_spill] sm:$0xff] %v10202_v17  ;;  %v3436_v32 = vadd.f32 %v3412_v43, %v9919_v7  ;;  %v3489_v50 = vsel %vm984_vm1, %v10202_v17, 0.0 }
 0xb6c   :  { %3490 = vadd.xlane.f32.xlu0 %v3489_v50  ;;  %v7736_v61 = vpop.f32.mrf.mxu0 }
 0xb6d   :  { %v10207_v30 = vadd.f32 %v3436_v32, %v961_v34 }
 0xb6e   :  { %v3417_v52 = vpop.f32.mrf.mxu0 }
 0xb6f   :  { %11829 = vst [vmem:[#allocation36_spill] sm:$0xff] %v10207_v30  ;;  %v3437_v26 = vadd.f32 %v3417_v52, %v9924_v45  ;;  %v3492_v54 = vsel %vm984_vm1, %v10207_v30, 0.0 }
 0xb70   :  { %3493 = vadd.xlane.f32.xlu1 %v3492_v54  ;;  %v7739_v29 = vpop.f32.mrf.mxu0 }
 0xb71   :  { %v10212_v47 = vadd.f32 %v3437_v26, %v961_v34 }
 0xb72   :  { %v3422_v28 = vpop.f32.mrf.mxu0 }
 0xb73   :  { %11830 = vst [vmem:[#allocation37_spill] sm:$0xff] %v10212_v47  ;;  %v3438_v7 = vadd.f32 %v3422_v28, %v9929_v42  ;;  %v3495_v36 = vsel %vm984_vm1, %v10212_v47, 0.0 }
 0xb74   :  { %3496 = vadd.xlane.f32.xlu0 %v3495_v36  ;;  %v7742_v5 = vpop.f32.mrf.mxu0 }
 0xb75   :  { %v10217_v14 = vadd.f32 %v3438_v7, %v961_v34 }
 0xb76   :  { %v3427_v20 = vpop.f32.mrf.mxu0 }
 0xb77   :  { %11831 = vst [vmem:[#allocation38_spill] sm:$0xff] %v10217_v14  ;;  %v3439_v45 = vadd.f32 %v3427_v20, %v9934_v4  ;;  %v3498_v39 = vsel %vm984_vm1, %v10217_v14, 0.0 }
 0xb78   :  { %3499 = vadd.xlane.f32.xlu1 %v3498_v39  ;;  %v7745_v62 = vpop.f32.mrf.mxu0 }
 0xb79   :  { %v10222_v19 = vadd.f32 %v3439_v45, %v961_v34 }
 0xb7b   :  { %11832 = vst [vmem:[#allocation39_spill] sm:$0xff] %v10222_v19  ;;  %v3501_v42 = vsel %vm1009_vm2, %v10222_v19, 0.0 }
 0xb7c   :  { %3502 = vadd.xlane.f32.xlu0 %v3501_v42 }
 0xbe4   :  { %v3479_v1 = vpop.xlane.xlu0 %3478 }
 0xbe5   :  { %v3504_v8 = vmul.f32 0.03125, %v3479_v1 }
 0xbe7   :  { %v10227_v57 = vsub.f32 %v10182_v35, %v3504_v8 }
 0xbe8   :  { %v3482_v0 = vpop.xlane.xlu1 %3481 }
 0xbe9   :  { %v3505_v21 = vmul.f32 0.03125, %v3482_v0  ;;  %v3522_v4 = vmul.f32 %v10227_v57, %v10227_v57 }
 0xbeb   :  { %v10232_v9 = vsub.f32 %v10187_v48, %v3505_v21  ;;  %v3531_v34 = vsel %vm984_vm1, %v3522_v4, 0.0 }
 0xbec   :  { %v3485_v23 = vpop.xlane.xlu0 %3484  ;;  %3532 = vadd.xlane.f32.xlu1 %v3531_v34 }
 0xbed   :  { %v3506_v51 = vmul.f32 0.03125, %v3485_v23  ;;  %v3523_v33 = vmul.f32 %v10232_v9, %v10232_v9 }
 0xbef   :  { %v10238_v60 = vsub.f32 %v10192_v63, %v3506_v51  ;;  %v3534_v59 = vsel %vm984_vm1, %v3523_v33, 0.0  ;;  %v3460_v51 = vld [vmem:[%s11673_s1 + $0x330] sm:$0xff]  ;;  %v3459_v33 = vld [vmem:[%s11673_s1 + $0x320] sm:$0xff] }
 0xbf0   :  { %v3488_v41 = vpop.xlane.xlu1 %3487  ;;  %3535 = vadd.xlane.f32.xlu0 %v3534_v59  ;;  %7747 = vmatpush3.msra.mxu1 %v3460_v51 }
 0xbf1   :  { %v3507_v46 = vmul.f32 0.03125, %v3488_v41  ;;  %v3524_v55 = vmul.f32 %v10238_v60, %v10238_v60  ;;  %7748 = vmatprep.subr.mxu1 %v11786_v49  ;;  %v3458_v41 = vld [vmem:[%s11673_s1 + $0x310] sm:$0xff] }
 0xbf2   :  { %7749 = vmatpush3.msra.mxu1 %v3459_v33 }
 0xbf3   :  { %v10244_v3 = vsub.f32 %v10197_v27, %v3507_v46  ;;  %v3537_v12 = vsel %vm984_vm1, %v3524_v55, 0.0  ;;  %7750 = vmatprep.subr.mxu1 %v11786_v49  ;;  %v3457_v46 = vld [vmem:[%s11673_s1 + $0x300] sm:$0xff] }
 0xbf4   :  { %3538 = vadd.xlane.f32.xlu1 %v3537_v12  ;;  %7751 = vmatpush3.msra.mxu1 %v3458_v41 }
 0xbf5   :  { %v3491_v6 = vpop.xlane.xlu0 %3490  ;;  %v3525_v38 = vmul.f32 %v10244_v3, %v10244_v3  ;;  %7752 = vmatprep.subr.mxu1 %v11786_v49 }
 0xbf6   :  { %v3508_v43 = vmul.f32 0.03125, %v3491_v6  ;;  %7753 = vmatpush3.msra.mxu1 %v3457_v46 }
 0xbf7   :  { %v3540_v32 = vsel %vm984_vm1, %v3525_v38, 0.0  ;;  %7781 = vmatprep.subr.mxu1 %v11786_v49 }
 0xbf8   :  { %v10251_v50 = vsub.f32 %v10202_v17, %v3508_v43  ;;  %3541 = vadd.xlane.f32.xlu0 %v3540_v32 }
 0xbf9   :  { %v3494_v61 = vpop.xlane.xlu1 %3493 }
 0xbfa   :  { %v3509_v52 = vmul.f32 0.03125, %v3494_v61  ;;  %v3526_v26 = vmul.f32 %v10251_v50, %v10251_v50 }
 0xbfc   :  { %v10256_v54 = vsub.f32 %v10207_v30, %v3509_v52  ;;  %v3543_v29 = vsel %vm984_vm1, %v3526_v26, 0.0 }
 0xbfd   :  { %v3497_v28 = vpop.xlane.xlu0 %3496  ;;  %3544 = vadd.xlane.f32.xlu1 %v3543_v29 }
 0xbfe   :  { %v3510_v7 = vmul.f32 0.03125, %v3497_v28  ;;  %v3527_v36 = vmul.f32 %v10256_v54, %v10256_v54 }
 0xc00   :  { %v10262_v5 = vsub.f32 %v10212_v47, %v3510_v7  ;;  %v3546_v20 = vsel %vm984_vm1, %v3527_v36, 0.0 }
 0xc01   :  { %v3500_v45 = vpop.xlane.xlu1 %3499  ;;  %3547 = vadd.xlane.f32.xlu0 %v3546_v20 }
 0xc02   :  { %v3511_v39 = vmul.f32 0.03125, %v3500_v45  ;;  %v3528_v62 = vmul.f32 %v10262_v5, %v10262_v5  ;;  %v10299_v45 = vld [vmem:[%s11673_s1 + $0x2f0] ss:$0 sm:$0xff] }
 0xc04   :  { %v10268_v42 = vsub.f32 %v10217_v14, %v3511_v39  ;;  %v3549_v1 = vsel %vm984_vm1, %v3528_v62, 0.0 }
 0xc05   :  { %3550 = vadd.xlane.f32.xlu1 %v3549_v1  ;;  %v3503_v8 = vpop.xlane.xlu0 %3502 }
 0xc06   :  { %v3512_v0 = vmul.f32 0.03125, %v3503_v8  ;;  %v3529_v21 = vmul.f32 %v10268_v42, %v10268_v42  ;;  %v10305_v8 = vld [vmem:[%s11673_s1 + $0x2f1] ss:$0 sm:$0xff] }
 0xc08   :  { %v10274_v4 = vsub.f32 %v10222_v19, %v3512_v0  ;;  %v3552_v34 = vsel %vm984_vm1, %v3529_v21, 0.0 }
 0xc09   :  { %3553 = vadd.xlane.f32.xlu0 %v3552_v34 }
 0xc0a   :  { %v3530_v23 = vmul.f32 %v10274_v4, %v10274_v4 }
 0xc0c   :  { %v3555_v59 = vsel %vm1009_vm2, %v3530_v23, 0.0 }
 0xc0d   :  { %3556 = vadd.xlane.f32.xlu1 %v3555_v59 }
 0xc75   :  { %v3533_v55 = vpop.xlane.xlu1 %3532 }
 0xc76   :  { %v3558_v12 = vmul.f32 0.03125, %v3533_v55 }
 0xc78   :  { %v3567_v6 = vadd.f32 1e-06, %v3558_v12 }
 0xc79   :  { %v3536_v38 = vpop.xlane.xlu0 %3535 }
 0xc7a   :  { %8279 = vrsqrt.f32 %v3567_v6  ;;  %v3559_v43 = vmul.f32 0.03125, %v3536_v38 }
 0xc7c   :  { %v3568_v32 = vadd.f32 1e-06, %v3559_v43 }
 0xc7d   :  { %v3539_v61 = vpop.xlane.xlu1 %3538 }
 0xc7e   :  { %8281 = vrsqrt.f32 %v3568_v32  ;;  %v3560_v52 = vmul.f32 0.03125, %v3539_v61 }
 0xc80   :  { %v3569_v26 = vadd.f32 1e-06, %v3560_v52 }
 0xc81   :  { %v3542_v29 = vpop.xlane.xlu0 %3541 }
 0xc82   :  { %8283 = vrsqrt.f32 %v3569_v26  ;;  %v3561_v28 = vmul.f32 0.03125, %v3542_v29 }
 0xc84   :  { %v3570_v7 = vadd.f32 1e-06, %v3561_v28 }
 0xc86   :  { %8285 = vrsqrt.f32 %v3570_v7  ;;  %v3545_v36 = vpop.xlane.xlu1 %3544 }
 0xc87   :  { %v8280_v20 = vpop.eup %8279  ;;  %v3562_v39 = vmul.f32 0.03125, %v3545_v36 }
 0xc88   :  { %v3585_v62 = vmul.f32 %v8280_v20, %v10227_v57 }
 0xc89   :  { %v3571_v1 = vadd.f32 1e-06, %v3562_v39 }
 0xc8a   :  { %v3594_v0 = vmul.f32 %v3585_v62, %v10299_v45  ;;  %v3548_v21 = vpop.xlane.xlu0 %3547 }
 0xc8b   :  { %v8282_v34 = vpop.eup %8281  ;;  %8287 = vrsqrt.f32 %v3571_v1  ;;  %v3563_v23 = vmul.f32 0.03125, %v3548_v21 }
 0xc8c   :  { %v3603_v51 = vadd.f32 %v3594_v0, %v10305_v8  ;;  %v3586_v33 = vmul.f32 %v8282_v34, %v10232_v9 }
 0xc8d   :  { %v3572_v59 = vadd.f32 1e-06, %v3563_v23 }
 0xc8e   :  { %v3551_v41 = vpop.xlane.xlu1 %3550  ;;  %7755 = vmatmul.mubr.msk.f32.vlgmr.msra.gmra.mxu1 %vm984_vm1, %v3603_v51  ;;  %v3595_v57 = vmul.f32 %v3586_v33, %v10299_v45 }
 0xc8f   :  { %v8284_v46 = vpop.eup %8283  ;;  %8289 = vrsqrt.f32 %v3572_v59  ;;  %v3564_v55 = vmul.f32 0.03125, %v3551_v41  ;;  %7757 = vmatprep.mubr.msk.f32.mxu1 %vm8438_vm0, %v11786_v49 }
 0xc90   :  { %v3604_v12 = vadd.f32 %v3595_v57, %v10305_v8  ;;  %v3587_v6 = vmul.f32 %v8284_v46, %v10238_v60 }
 0xc91   :  { %v3573_v38 = vadd.f32 1e-06, %v3564_v55 }
 0xc92   :  { %v3554_v43 = vpop.xlane.xlu0 %3553  ;;  %7758 = vmatmul.mubr.msk.f32.gmra.mxu1 %vm984_vm1, %v3604_v12  ;;  %v3596_v9 = vmul.f32 %v3587_v6, %v10299_v45  ;;  %v3455_v6 = vld [vmem:[%s11673_s1 + $0x2f6] ss:$0 sm:$0xff] }
 0xc93   :  { %v8286_v32 = vpop.eup %8285  ;;  %8291 = vrsqrt.f32 %v3573_v38  ;;  %v3565_v61 = vmul.f32 0.03125, %v3554_v43  ;;  %7760 = vmatprep.mubr.msk.f32.mxu1 %vm8438_vm0, %v11786_v49 }
 0xc94   :  { %v3605_v52 = vadd.f32 %v3596_v9, %v10305_v8  ;;  %v3588_v26 = vmul.f32 %v8286_v32, %v10244_v3 }
 0xc95   :  { %v3574_v29 = vadd.f32 1e-06, %v3565_v61 }
 0xc96   :  { %v3557_v28 = vpop.xlane.xlu1 %3556  ;;  %7761 = vmatmul.mubr.msk.f32.gmra.mxu1 %vm984_vm1, %v3605_v52  ;;  %v3597_v60 = vmul.f32 %v3588_v26, %v10299_v45 }
 0xc97   :  { %8293 = vrsqrt.f32 %v3574_v29  ;;  %v3566_v7 = vmul.f32 0.03125, %v3557_v28  ;;  %7763 = vmatprep.mubr.msk.f32.mxu1 %vm8438_vm0, %v11786_v49 }
 0xc98   :  { %v8288_v36 = vpop.eup %8287  ;;  %v3606_v20 = vadd.f32 %v3597_v60, %v10305_v8 }
 0xc99   :  { %v3575_v39 = vadd.f32 1e-06, %v3566_v7  ;;  %v3589_v62 = vmul.f32 %v8288_v36, %v10251_v50 }
 0xc9a   :  { %7764 = vmatmul.mubr.msk.f32.gmra.mxu1 %vm984_vm1, %v3606_v20 }
 0xc9b   :  { %8295 = vrsqrt.f32 %v3575_v39  ;;  %7766 = vmatprep.mubr.msk.f32.mxu1 %vm8438_vm0, %v11786_v49  ;;  %v3598_v3 = vmul.f32 %v3589_v62, %v10299_v45 }
 0xc9c   :  { %v8290_v1 = vpop.eup %8289 }
 0xc9d   :  { %v3607_v0 = vadd.f32 %v3598_v3, %v10305_v8  ;;  %v3590_v21 = vmul.f32 %v8290_v1, %v10256_v54 }
 0xc9f   :  { %7767 = vmatmul.mubr.msk.f32.gmra.mxu1 %vm984_vm1, %v3607_v0  ;;  %v3599_v34 = vmul.f32 %v3590_v21, %v10299_v45 }
 0xca0   :  { %v8292_v23 = vpop.eup %8291  ;;  %7769 = vmatprep.mubr.msk.f32.mxu1 %vm8438_vm0, %v11786_v49 }
 0xca1   :  { %v3608_v50 = vadd.f32 %v3599_v34, %v10305_v8  ;;  %v3591_v51 = vmul.f32 %v8292_v23, %v10262_v5 }
 0xca3   :  { %7770 = vmatmul.mubr.msk.f32.gmra.mxu1 %vm984_vm1, %v3608_v50  ;;  %v3600_v33 = vmul.f32 %v3591_v51, %v10299_v45 }
 0xca4   :  { %v8294_v59 = vpop.eup %8293  ;;  %7772 = vmatprep.mubr.msk.f32.mxu1 %vm8438_vm0, %v11786_v49 }
 0xca5   :  { %v3609_v54 = vadd.f32 %v3600_v33, %v10305_v8  ;;  %v3592_v41 = vmul.f32 %v8294_v59, %v10268_v42 }
 0xca7   :  { %7773 = vmatmul.mubr.msk.f32.gmra.mxu1 %vm984_vm1, %v3609_v54  ;;  %v3601_v57 = vmul.f32 %v3592_v41, %v10299_v45 }
 0xca8   :  { %v8296_v46 = vpop.eup %8295  ;;  %7775 = vmatprep.mubr.msk.f32.mxu1 %vm8438_vm0, %v11786_v49 }
 0xca9   :  { %v3610_v5 = vadd.f32 %v3601_v57, %v10305_v8  ;;  %v3593_v55 = vmul.f32 %v8296_v46, %v10274_v4 }
 0xcab   :  { %7776 = vmatmul.mubr.msk.f32.gmra.mxu1 %vm984_vm1, %v3610_v5  ;;  %v3602_v12 = vmul.f32 %v3593_v55, %v10299_v45 }
 0xcac   :  { %7778 = vmatprep.mubr.msk.f32.mxu1 %vm8438_vm0, %v11786_v49 }
 0xcad   :  { %v3611_v42 = vadd.f32 %v3602_v12, %v10305_v8 }
 0xcaf   :  { %7779 = vmatmul.mubr.msk.f32.gmra.mxu1 %vm984_vm1, %v3611_v42 }
 0xcb0   :  { %7789 = vmatprep.mubr.msk.f32.mxu1 %vm8438_vm0, %v11786_v49 }
 0xd4e   :  { %v3705_v38 = vpop.f32.mrf.mxu1 }
 0xd4f   :  { %v10363_v4 = vadd.f32 %v3705_v38, %v3455_v6 }
 0xd50   :  { %v7756_v43 = vpop.f32.mrf.mxu1 }
 0xd51   :  { %3758 = vrot.lane.b32.xlu0 %v10363_v4, %s8439_s6 }
 0xd52   :  { %v3710_v45 = vpop.f32.mrf.mxu1 }
 0xd53   :  { %v10367_v9 = vadd.f32 %v3710_v45, %v3455_v6 }
 0xd54   :  { %v7759_v8 = vpop.f32.mrf.mxu1 }
 0xd55   :  { %3760 = vrot.lane.b32.xlu1 %v10367_v9, %s8439_s6 }
 0xd56   :  { %v3715_v32 = vpop.f32.mrf.mxu1 }
 0xd57   :  { %v10371_v61 = vadd.f32 %v3715_v32, %v3455_v6 }
 0xd58   :  { %v7762_v52 = vpop.f32.mrf.mxu1 }
 0xd59   :  { %3762 = vrot.lane.b32.xlu1 %v10371_v61, %s8439_s6 }
 0xd5a   :  { %v3720_v26 = vpop.f32.mrf.mxu1 }
 0xd5b   :  { %v10375_v29 = vadd.f32 %v3720_v26, %v3455_v6 }
 0xd5c   :  { %v7765_v28 = vpop.f32.mrf.mxu1 }
 0xd5d   :  { %3764 = vrot.lane.b32.xlu1 %v10375_v29, %s8439_s6 }
 0xd5f   :  { %v3725_v60 = vpop.f32.mrf.mxu1 }
 0xd60   :  { %v10379_v7 = vadd.f32 %v3725_v60, %v3455_v6 }
 0xd61   :  { %v7768_v36 = vpop.f32.mrf.mxu1 }
 0xd62   :  { %3766 = vrot.lane.b32.xlu0 %v10379_v7, %s8439_s6  ;;  %v3888_v47 = vrot.slane %v10379_v7, 4 }
 0xd63   :  { %v3730_v20 = vpop.f32.mrf.mxu1 }
 0xd64   :  { %v10383_v39 = vadd.f32 %v3730_v20, %v3455_v6 }
 0xd65   :  { %v7771_v62 = vpop.f32.mrf.mxu1 }
 0xd66   :  { %3768 = vrot.lane.b32.xlu1 %v10383_v39, %s8439_s6 }
 0xd67   :  { %v3735_v3 = vpop.f32.mrf.mxu1 }
 0xd68   :  { %v10387_v1 = vadd.f32 %v3735_v3, %v3455_v6 }
 0xd69   :  { %v7774_v0 = vpop.f32.mrf.mxu1 }
 0xd6a   :  { %3770 = vrot.lane.b32.xlu0 %v10387_v1, %s8439_s6 }
 0xd6b   :  { %v3740_v21 = vpop.f32.mrf.mxu1 }
 0xd6c   :  { %v10391_v34 = vadd.f32 %v3740_v21, %v3455_v6 }
 0xd6d   :  { %v7777_v23 = vpop.f32.mrf.mxu1 }
 0xd6e   :  { %3772 = vrot.lane.b32.xlu1 %v10391_v34, %s8439_s6 }
 0xd6f   :  { %v3745_v50 = vpop.f32.mrf.mxu1 }
 0xd70   :  { %v10395_v51 = vadd.f32 %v3745_v50, %v3455_v6 }
 0xd71   :  { %v7780_v33 = vpop.f32.mrf.mxu1 }
 0xd72   :  { %3774 = vrot.lane.b32.xlu0 %v10395_v51, %s8439_s6 }
 0xdc3   :  { %v3759_v59 = vpop.permute.xlu0 %3758 }
 0xdc4   :  { %3785 = vxpose.xlu1.b32.start [1/9] (short) (narrow) %v3759_v59, 32 }
 0xdc7   :  { %v3761_v54 = vpop.permute.xlu1 %3760 }
 0xdc8   :  { %3786 = vxpose.xlu1.b32.cont [2/9] (short) (narrow) %v3761_v54, 32 }
 0xdcb   :  { %v3763_v41 = vpop.permute.xlu1 %3762 }
 0xdcc   :  { %3787 = vxpose.xlu1.b32.cont [3/9] (short) (narrow) %v3763_v41, 32 }
 0xdcf   :  { %v3765_v57 = vpop.permute.xlu1 %3764 }
 0xdd0   :  { %3788 = vxpose.xlu1.b32.cont [4/9] (short) (narrow) %v3765_v57, 32  ;;  %v11833_v57 = vld [vmem:[#allocation7_spill] sm:$0xff] }
 0xdd4   :  { %v3767_v46 = vpop.permute.xlu0 %3766 }
 0xdd5   :  { %3789 = vxpose.xlu1.b32.cont [5/9] (short) (narrow) %v3767_v46, 32 }
 0xdd8   :  { %v3769_v5 = vpop.permute.xlu1 %3768 }
 0xdd9   :  { %3790 = vxpose.xlu1.b32.cont [6/9] (short) (narrow) %v3769_v5, 32 }
 0xddc   :  { %v3771_v55 = vpop.permute.xlu0 %3770 }
 0xddd   :  { %3791 = vxpose.xlu1.b32.cont [7/9] (short) (narrow) %v3771_v55, 32 }
 0xde0   :  { %v3773_v12 = vpop.permute.xlu1 %3772 }
 0xde1   :  { %3792 = vxpose.xlu1.b32.cont [8/9] (short) (narrow) %v3773_v12, 32 }
 0xde4   :  { %v3775_v42 = vpop.permute.xlu0 %3774 }
 0xde5   :  { %3793 = vxpose.xlu1.b32.end [9/9] (short) (narrow) %v3775_v42, 32 }
 0xe41   :  { %v3801_v6 = vpop.trf.xlu1 }
 0xe42   :  { %3821 = vrot.lane.b32.xlu0 %v3801_v6, %s8440_s0 }
 0xe45   :  { %v3802_v38 = vpop.trf.xlu1 }
 0xe46   :  { %3823 = vrot.lane.b32.xlu0 %v3802_v38, %s8440_s0 }
 0xe49   :  { %v3803_v43 = vpop.trf.xlu1 }
 0xe4a   :  { %3835 = vrot.lane.b32.xlu0 %v3802_v38, %s8441_s7 }
 0xe4d   :  { %v3804_v45 = vpop.trf.xlu1 }
 0xe4e   :  { %3847 = vrot.lane.b32.xlu0 %v3802_v38, %s8442_s8 }
 0xe52   :  { %3825 = vrot.lane.b32.xlu0 %v3803_v43, %s8440_s0 }
 0xe56   :  { %3837 = vrot.lane.b32.xlu0 %v3803_v43, %s8441_s7 }
 0xe5a   :  { %3849 = vrot.lane.b32.xlu0 %v3803_v43, %s8442_s8 }
 0xe5e   :  { %3827 = vrot.lane.b32.xlu0 %v3804_v45, %s8440_s0 }
 0xe62   :  { %3839 = vrot.lane.b32.xlu0 %v3804_v45, %s8441_s7 }
 0xe66   :  { %3851 = vrot.lane.b32.xlu0 %v3804_v45, %s8442_s8 }
 0xe6a   :  { %3833 = vrot.lane.b32.xlu0 %v3801_v6, %s8441_s7 }
 0xe6e   :  { %3845 = vrot.lane.b32.xlu0 %v3801_v6, %s8442_s8 }
 0xeb4   :  { %v3822_v8 = vpop.permute.xlu0 %3821 }
 0xeb8   :  { %v3824_v32 = vpop.permute.xlu0 %3823 }
 0xeb9   :  { %v3858_v42 = vsel %vm1367_vm7, %v3802_v38, %v3824_v32 }
 0xebc   :  { %v3836_v52 = vpop.permute.xlu0 %3835 }
 0xebd   :  { %v3862_v54 = vsel %vm1372_vm8, %v3824_v32, %v3836_v52 }
 0xec0   :  { %v3848_v26 = vpop.permute.xlu0 %3847 }
 0xec1   :  { %v3866_v5 = vsel %vm1377_vm9, %v3862_v54, %v3848_v26  ;;  %v3874_v55 = vmul.f32 0.0, %v3848_v26  ;;  %v11850_v54 = vld [vmem:[#allocation14_spill] sm:$0xff] }
 0xec4   :  { %v3826_v28 = vpop.permute.xlu0 %3825 }
 0xec5   :  { %v3859_v41 = vsel %vm1367_vm7, %v3803_v43, %v3826_v28  ;;  %v11835_v43 = vld [vmem:[#allocation9_spill] sm:$0xff] }
 0xec6   :  { %v3875_v52 = vmul.f32 0.0, %v3859_v41 }
 0xec8   :  { %v3838_v60 = vpop.permute.xlu0 %3837 }
 0xec9   :  { %v3863_v3 = vsel %vm1372_vm8, %v3826_v28, %v3838_v60  ;;  %v11834_v60 = vld [vmem:[#allocation8_spill] sm:$0xff]  ;;  %v3873_v28 = vmul.f32 %v11835_v43, %v3866_v5 }
 0xecc   :  { %v3850_v36 = vpop.permute.xlu0 %3849 }
 0xecd   :  { %v3867_v50 = vsel %vm1377_vm9, %v3863_v3, %v3850_v36  ;;  %v3877_v33 = vmul.f32 0.0, %v3850_v36 }
 0xece   :  { %v3876_v36 = vmul.f32 %v11834_v60, %v3867_v50  ;;  %v11838_v50 = vld [vmem:[#allocation12_spill] sm:$0xff] }
 0xed0   :  { %v3828_v20 = vpop.permute.xlu0 %3827 }
 0xed1   :  { %v3860_v0 = vsel %vm1367_vm7, %v3804_v45, %v3828_v20 }
 0xed2   :  { %v3878_v12 = vmul.f32 0.0, %v3860_v0 }
 0xed4   :  { %v3840_v62 = vpop.permute.xlu0 %3839 }
 0xed5   :  { %v3864_v21 = vsel %vm1372_vm8, %v3828_v20, %v3840_v62  ;;  %v11836_v20 = vld [vmem:[#allocation10_spill] sm:$0xff]  ;;  %v3857_v62 = vsel %vm1367_vm7, %v3801_v6, %v3822_v8  ;;  %v11839_v6 = vmov 1.0  }
 0xed6   :  { %v3872_v26 = vmul.f32 %v11836_v20, %v3858_v42 }
 0xed8   :  { %v3852_v23 = vpop.permute.xlu0 %3851 }
 0xed9   :  { %v3868_v59 = vsel %vm1377_vm9, %v3864_v21, %v3852_v23  ;;  %7782 = vmatpush3.msra.mxu1 %v3852_v23  ;;  %v11837_v21 = vld [vmem:[#allocation11_spill] sm:$0xff] }
 0xeda   :  { %7783 = vmatprep.subr.mxu1 %v11786_v49  ;;  %v3879_v46 = vmul.f32 %v11833_v57, %v3868_v59  ;;  %v11847_v59 = vld [vmem:[#allocation13_spill] sm:$0xff] }
 0xedb   :  { %7784 = vmatpush3.msra.mxu1 %v3877_v33  ;;  %v3869_v33 = vmul.f32 %v11838_v50, %v3857_v62 }
 0xedc   :  { %3984 = vmatprep.subr.mxu0 %v3879_v46  ;;  %7785 = vmatprep.subr.mxu1 %v11786_v49  ;;  %v3834_v45 = vpop.permute.xlu0 %3833 }
 0xedd   :  { %3985 = vmatpush1.msra.mxu0 %v3878_v12  ;;  %7786 = vmatpush3.msra.mxu1 %v3874_v55  ;;  %v3861_v38 = vsel %vm1372_vm8, %v3822_v8, %v3834_v45  ;;  %v11840_v8 = vld [vmem:[#allocation6_spill] sm:$0xff] }
 0xede   :  { %3986 = vmatprep.subr.mxu0 %v3876_v36  ;;  %7787 = vmatprep.subr.mxu1 %v11786_v49  ;;  %vm11841_vm7 = vcmp.eq.s32.totalorder %v11840_v8, 3  ;;  %vm11848_vm4 = vcmp.eq.s32.totalorder %v11847_v59, %v11840_v8  ;;  %vm11849_vm12 = vcmp.eq.s32.totalorder %v11840_v8, 2 }
 0xedf   :  { %3987 = vmatpush1.msra.mxu0 %v3875_v52  ;;  %vm11842_vm8 = vmmov %vm11841_vm7 }
 0xee0   :  { %3988 = vmatprep.subr.mxu0 %v3873_v28  ;;  %v3846_v32 = vpop.permute.xlu0 %3845  ;;  %vm11844_vm5 = vmmov %vm11841_vm7 }
 0xee1   :  { %v3865_v3 = vsel %vm1377_vm9, %v3861_v38, %v3846_v32  ;;  %v3871_v0 = vmul.f32 0.0, %v3846_v32  ;;  %3989 = vmatpush1.msra.mxu0 %v3872_v26  ;;  %vm11843_vm9 = vmmov %vm11841_vm7 }
 0xee2   :  { %v3870_v23 = vmul.f32 %v11837_v21, %v3865_v3  ;;  %vm11845_vm6 = vmmov %vm11844_vm5 }
 0xee3   :  { %7788 = vmatpush3.msra.mxu1 %v3871_v0  ;;  %vm11846_vm10 = vmmov %vm11844_vm5 }
 0xee4   :  { %3990 = vmatprep.subr.mxu0 %v3870_v23  ;;  %7790 = vmatmul.mubr.msk.f32.vlgmr.msra.gmra.mxu1 %vm984_vm1, %v10363_v4 }
 0xee5   :  { %3991 = vmatpush1.msra.mxu0 %v3869_v33  ;;  %7792 = vmatprep.mubr.msk.f32.mxu1 %vm8438_vm0, %v11786_v49 }
 0xee6   :  { %6809 = vmatmul.mubr.msk.f32.vlgmr.msra.gmra.mxu0 %vm984_vm1, %v10363_v4  ;;  %7201 = vmatprep.subr.msk.mxu0 %vm11841_vm7, %v11839_v6  ;;  %vm11851_vm7 = vcmp.eq.s32.totalorder %v11850_v54, %v11840_v8 }
 0xee7   :  { %4030 = vmatprep.mubr.f32.mxu0 %v11786_v49  ;;  %7202 = vmatpush3.msk.msra.mxu0 %vm6625_vm14, %v11839_v6 }
 0xee8   :  { %7793 = vmatmul.mubr.msk.f32.gmra.mxu1 %vm984_vm1, %v10367_v9  ;;  %7203 = vmatprep.subr.msk.mxu0 %vm11842_vm8, %v11839_v6  ;;  %vm11852_vm8 = vmmov %vm11849_vm12 }
 0xee9   :  { %7795 = vmatprep.mubr.msk.f32.mxu1 %vm8438_vm0, %v11786_v49  ;;  %7204 = vmatpush3.msk.msra.mxu0 %vm6625_vm14, %v11839_v6 }
 0xeea   :  { %6810 = vmatmul.mubr.msk.f32.gmra.mxu0 %vm984_vm1, %v10367_v9  ;;  %7205 = vmatprep.subr.msk.mxu0 %vm11843_vm9, %v11839_v6  ;;  %vm11853_vm9 = vcmp.eq.s32.totalorder %v11840_v8, 0 }
 0xeeb   :  { %4036 = vmatprep.mubr.f32.mxu0 %v11786_v49  ;;  %7206 = vmatpush3.msk.msra.mxu0 %vm6625_vm14, %v11839_v6 }
 0xeec   :  { %7796 = vmatmul.mubr.msk.f32.gmra.mxu1 %vm984_vm1, %v10371_v61  ;;  %7207 = vmatprep.subr.msk.mxu0 %vm11844_vm5, %v11839_v6  ;;  %vm11854_vm5 = vmmov %vm11852_vm8 }
 0xeed   :  { %7798 = vmatprep.mubr.msk.f32.mxu1 %vm8438_vm0, %v11786_v49  ;;  %7208 = vmatpush3.msk.msra.mxu0 %vm6625_vm14, %v11839_v6 }
 0xeee   :  { %6811 = vmatmul.mubr.msk.f32.gmra.mxu0 %vm984_vm1, %v10371_v61  ;;  %7209 = vmatprep.subr.msk.mxu0 %vm11845_vm6, %v11839_v6  ;;  %vm11855_vm6 = vmmov %vm11853_vm9 }
 0xeef   :  { %4042 = vmatprep.mubr.f32.mxu0 %v11786_v49  ;;  %7210 = vmatpush3.msk.msra.mxu0 %vm6625_vm14, %v11839_v6 }
 0xef0   :  { %7799 = vmatmul.mubr.msk.f32.gmra.mxu1 %vm984_vm1, %v10375_v29  ;;  %7211 = vmatprep.subr.msk.mxu0 %vm11846_vm10, %v11839_v6  ;;  %vm11856_vm10 = vmmov %vm11854_vm5 }
 0xef1   :  { %7801 = vmatprep.mubr.msk.f32.mxu1 %vm8438_vm0, %v11786_v49  ;;  %7212 = vmatpush3.msk.msra.mxu0 %vm6625_vm14, %v11839_v6 }
 0xef2   :  { %6812 = vmatmul.mubr.msk.f32.gmra.mxu0 %vm984_vm1, %v10375_v29  ;;  %7213 = vmatprep.subr.msk.mxu0 %vm11848_vm4, %v11839_v6  ;;  %vm11857_vm4 = vmmov %vm11855_vm6 }
 0xef3   :  { %4048 = vmatprep.mubr.f32.mxu0 %v11786_v49  ;;  %7214 = vmatpush3.msk.msra.mxu0 %vm6625_vm14, %v11839_v6 }
 0xef4   :  { %7802 = vmatmul.mubr.msk.f32.gmra.mxu1 %vm984_vm1, %v10379_v7  ;;  %7215 = vmatprep.subr.msk.mxu0 %vm11849_vm12, %v11839_v6  ;;  %vm11858_vm12 = vmmov %vm11854_vm5 }
 0xef5   :  { %7804 = vmatprep.mubr.msk.f32.mxu1 %vm8438_vm0, %v11786_v49  ;;  %7216 = vmatpush3.msk.msra.mxu0 %vm11851_vm7, %v11839_v6  ;;  %vm11859_vm7 = vmmov %vm11857_vm4 }
 0xef6   :  { %6813 = vmatmul.mubr.msk.f32.gmra.mxu0 %vm984_vm1, %v10379_v7  ;;  %7217 = vmatprep.subr.msk.mxu0 %vm11852_vm8, %v11839_v6  ;;  %vm11860_vm8 = vmmov %vm11854_vm5 }
 0xef7   :  { %4054 = vmatprep.mubr.f32.mxu0 %v11786_v49  ;;  %7218 = vmatpush3.msk.msra.mxu0 %vm11853_vm9, %v11839_v6  ;;  %vm11861_vm9 = vmmov %vm11857_vm4 }
 0xef8   :  { %7805 = vmatmul.mubr.msk.f32.gmra.mxu1 %vm984_vm1, %v10383_v39  ;;  %7219 = vmatprep.subr.msk.mxu0 %vm11854_vm5, %v11839_v6 }
 0xef9   :  { %7807 = vmatprep.mubr.msk.f32.mxu1 %vm8438_vm0, %v11786_v49  ;;  %7220 = vmatpush3.msk.msra.mxu0 %vm11855_vm6, %v11839_v6  ;;  %vm11862_vm6 = vmmov %vm11857_vm4 }
 0xefa   :  { %6814 = vmatmul.mubr.msk.f32.gmra.mxu0 %vm984_vm1, %v10383_v39  ;;  %7221 = vmatprep.subr.msk.mxu0 %vm11856_vm10, %v11839_v6  ;;  %vm11863_vm10 = vmmov %vm11854_vm5 }
 0xefb   :  { %4060 = vmatprep.mubr.f32.mxu0 %v11786_v49  ;;  %7222 = vmatpush3.msk.msra.mxu0 %vm11857_vm4, %v11839_v6 }
 0xefc   :  { %7808 = vmatmul.mubr.msk.f32.gmra.mxu1 %vm984_vm1, %v10387_v1  ;;  %7223 = vmatprep.subr.msk.mxu0 %vm11858_vm12, %v11839_v6  ;;  %vm11864_vm12 = vcmp.eq.s32.totalorder %v11840_v8, 3 }
 0xefd   :  { %7810 = vmatprep.mubr.msk.f32.mxu1 %vm8438_vm0, %v11786_v49  ;;  %7224 = vmatpush3.msk.msra.mxu0 %vm11859_vm7, %v11839_v6  ;;  %vm11865_vm7 = vmmov %vm11864_vm12 }
 0xefe   :  { %6815 = vmatmul.mubr.msk.f32.gmra.mxu0 %vm984_vm1, %v10387_v1  ;;  %7225 = vmatprep.subr.msk.mxu0 %vm11860_vm8, %v11839_v6  ;;  %vm11866_vm8 = vmmov %vm11857_vm4 }
 0xeff   :  { %4066 = vmatprep.mubr.f32.mxu0 %v11786_v49  ;;  %7226 = vmatpush3.msk.msra.mxu0 %vm11861_vm9, %v11839_v6  ;;  %vm6152_vm9 = vcmask 254976  }
 0xf00   :  { %7811 = vmatmul.mubr.msk.f32.gmra.mxu1 %vm984_vm1, %v10391_v34  ;;  %7227 = vmatprep.subr.msk.mxu0 %vm11854_vm5, %v11839_v6 }
 0xf01   :  { %7813 = vmatprep.mubr.msk.f32.mxu1 %vm8438_vm0, %v11786_v49  ;;  %7228 = vmatpush3.msk.msra.mxu0 %vm11862_vm6, %v11839_v6 }
 0xf02   :  { %6816 = vmatmul.mubr.msk.f32.gmra.mxu0 %vm984_vm1, %v10391_v34  ;;  %7816 = vmatprep.subr.mxu1 %v11786_v49 }
 0xf03   :  { %4072 = vmatprep.mubr.f32.mxu0 %v11786_v49  ;;  %7229 = vmatprep.subr.msk.mxu0 %vm11863_vm10, %v11839_v6 }
 0xf04   :  { %7814 = vmatmul.mubr.msk.f32.gmra.mxu1 %vm984_vm1, %v10395_v51  ;;  %7230 = vmatpush3.msk.msra.mxu0 %vm11857_vm4, %v11839_v6 }
 0xf05   :  { %7817 = vmatpush3.msk.msra.mxu1 %vm11864_vm12, %v11839_v6  ;;  %7231 = vmatprep.subr.msk.mxu0 %vm6625_vm14, %v11839_v6  ;;  %vm11878_vm14 = vcmask 125952  }
 0xf06   :  { %6817 = vmatmul.mubr.msk.f32.gmra.mxu0 %vm984_vm1, %v10395_v51  ;;  %7818 = vmatprep.subr.mxu1 %v11786_v49 }
 0xf07   :  { %7819 = vmatpush3.msk.msra.mxu1 %vm11865_vm7, %v11839_v6  ;;  %7820 = vmatprep.mubr.msk.f32.mxu1 %vm8438_vm0, %v11786_v49 }
 0xf08   :  { %7232 = vmatpush3.msk.msra.mxu0 %vm11866_vm8, %v11839_v6  ;;  %7847 = vmatprep.subr.mxu1 %v11786_v49 }
 0xfa4   :  { %v4145_v41 = vpop.f32.mrf.mxu1 }
 0xfa5   :  { %v10601_v5 = vmul.f32 0.35355338, %v4145_v41 }
 0xfa6   :  { %v4026_v57 = vpop.f32.mrf.mxu0  ;;  %v7791_v46 = vpop.f32.mrf.mxu1 }
 0xfa7   :  { %v10603_v42 = vmul.f32 0.35355338, %v4026_v57  ;;  %v4217_v43 = vsel %vm1867_vm15, %v10601_v5, -inf }
 0xfa8   :  { %v4028_v55 = vpop.f32.mrf.mxu0  ;;  %v4150_v12 = vpop.f32.mrf.mxu1 }
 0xfa9   :  { %v10605_v45 = vmul.f32 0.35355338, %v4028_v55  ;;  %v10611_v28 = vmul.f32 0.35355338, %v4150_v12 }
 0xfaa   :  { %v4032_v60 = vpop.f32.mrf.mxu0  ;;  %v7794_v36 = vpop.f32.mrf.mxu1 }
 0xfab   :  { %v4216_v52 = vmax.f32 %v10603_v42, %v10605_v45  ;;  %v10613_v62 = vmul.f32 0.35355338, %v4032_v60  ;;  %v4222_v23 = vsel %vm1867_vm15, %v10611_v28, -inf }
 0xfac   :  { %v4034_v20 = vpop.f32.mrf.mxu0  ;;  %v4155_v26 = vpop.f32.mrf.mxu1 }
 0xfad   :  { %v10615_v38 = vmul.f32 0.35355338, %v4034_v20  ;;  %v4218_v32 = vmax.f32 %v4216_v52, %v4217_v43  ;;  %v10621_v50 = vmul.f32 0.35355338, %v4155_v26 }
 0xfae   :  { %v4038_v3 = vpop.f32.mrf.mxu0  ;;  %v7797_v0 = vpop.f32.mrf.mxu1 }
 0xfaf   :  { %v4221_v21 = vmax.f32 %v10613_v62, %v10615_v38  ;;  %4219 = vmax.xlane.f32.xlu0 %v4218_v32  ;;  %v10623_v8 = vmul.f32 0.35355338, %v4038_v3  ;;  %v4227_v55 = vsel %vm1867_vm15, %v10621_v50, -inf }
 0xfb0   :  { %v4040_v33 = vpop.f32.mrf.mxu0  ;;  %v4160_v6 = vpop.f32.mrf.mxu1 }
 0xfb1   :  { %v10625_v59 = vmul.f32 0.35355338, %v4040_v33  ;;  %v4223_v54 = vmax.f32 %v4221_v21, %v4222_v23  ;;  %v10631_v12 = vmul.f32 0.35355338, %v4160_v6 }
 0xfb2   :  { %v4044_v41 = vpop.f32.mrf.mxu0  ;;  %v7800_v57 = vpop.f32.mrf.mxu1 }
 0xfb3   :  { %v4226_v46 = vmax.f32 %v10623_v8, %v10625_v59  ;;  %4224 = vmax.xlane.f32.xlu1 %v4223_v54  ;;  %v10633_v52 = vmul.f32 0.35355338, %v4044_v41  ;;  %v4232_v0 = vsel %vm1867_vm15, %v10631_v12, -inf }
 0xfb4   :  { %v4046_v60 = vpop.f32.mrf.mxu0  ;;  %v4165_v36 = vpop.f32.mrf.mxu1 }
 0xfb5   :  { %v10635_v43 = vmul.f32 0.35355338, %v4046_v60  ;;  %v4228_v20 = vmax.f32 %v4226_v46, %v4227_v55  ;;  %v10641_v21 = vmul.f32 0.35355338, %v4165_v36  ;;  %v11759_v60 = vrot.slane %v10391_v34, 4 }
 0xfb6   :  { %v4050_v26 = vpop.f32.mrf.mxu0  ;;  %v7803_v32 = vpop.f32.mrf.mxu1 }
 0xfb7   :  { %v4231_v3 = vmax.f32 %v10633_v52, %v10635_v43  ;;  %4229 = vmax.xlane.f32.xlu0 %v4228_v20  ;;  %v10643_v6 = vmul.f32 0.35355338, %v4050_v26  ;;  %v4237_v20 = vsel %vm1867_vm15, %v10641_v21, -inf }
 0xfb8   :  { %v4052_v23 = vpop.f32.mrf.mxu0  ;;  %v4170_v33 = vpop.f32.mrf.mxu1 }
 0xfb9   :  { %v10645_v54 = vmul.f32 0.35355338, %v4052_v23  ;;  %v4233_v41 = vmax.f32 %v4231_v3, %v4232_v0  ;;  %v10652_v36 = vmul.f32 0.35355338, %v4170_v33  ;;  %v11760_v0 = vrot.slane %v10387_v1, 4 }
 0xfba   :  { %v4056_v57 = vpop.f32.mrf.mxu0  ;;  %v7806_v46 = vpop.f32.mrf.mxu1 }
 0xfbb   :  { %v4236_v55 = vmax.f32 %v10643_v6, %v10645_v54  ;;  %4234 = vmax.xlane.f32.xlu0 %v4233_v41  ;;  %v10654_v26 = vmul.f32 0.35355338, %v4056_v57  ;;  %v10666_v33 = vsel %vm1394_vm3, %v11760_v0, %v11759_v60  ;;  %v11868_v60 = vunpack.i.h.bf16 %v9417_v40 }
 0xfbc   :  { %v4058_v32 = vpop.f32.mrf.mxu0  ;;  %v4175_v44 = vpop.f32.mrf.mxu1 }
 0xfbd   :  { %v10656_v23 = vmul.f32 0.35355338, %v4058_v32  ;;  %v4238_v3 = vmax.f32 %v4236_v55, %v4237_v20  ;;  %v4242_v55 = vsel %vm1867_vm15, %v10652_v36, -inf  ;;  %v10671_v20 = vmul.f32 0.35355338, %v4175_v44 }
 0xfbe   :  { %v4062_v46 = vpop.f32.mrf.mxu0  ;;  %v7809_v10 = vpop.f32.mrf.mxu1  ;;  %v3923_v0 = vmul.f32 %v11868_v60, %v10666_v33  ;;  %v11869_v44 = vrot.slane %v10383_v39, 4 }
 0xfbf   :  { %v4241_v41 = vmax.f32 %v10654_v26, %v10656_v23  ;;  %4239 = vmax.xlane.f32.xlu0 %v4238_v3  ;;  %11867 = vst [vmem:[#allocation7_spill] sm:$0xff] %v10671_v20  ;;  %v10673_v19 = vmul.f32 0.35355338, %v4062_v46 }
 0xfc0   :  { %v4064_v32 = vpop.f32.mrf.mxu0  ;;  %v4180_v10 = vpop.f32.mrf.mxu1  ;;  %v3891_v46 = vsel %vm1394_vm3, %v3888_v47, %v11869_v44  ;;  %v11873_v44 = vunpack.i.l.bf16 %v9389_v56 }
 0xfc1   :  { %v10675_v14 = vmul.f32 0.35355338, %v4064_v32  ;;  %v4243_v3 = vmax.f32 %v4241_v41, %v4242_v55  ;;  %v4247_v32 = vsel %vm1867_vm15, %v10671_v20, -inf  ;;  %v10688_v41 = vmul.f32 0.35355338, %v4180_v10 }
 0xfc2   :  { %v4068_v30 = vpop.f32.mrf.mxu0  ;;  %v7812_v17 = vpop.f32.mrf.mxu1  ;;  %v3938_v22 = vmul.f32 %v11873_v44, %v3891_v46  ;;  %v3884_v44 = vrot.slane %v10371_v61, 4 }
 0xfc3   :  { %v4246_v57 = vmax.f32 %v10673_v19, %v10675_v14  ;;  %4244 = vmax.xlane.f32.xlu0 %v4243_v3  ;;  %11870 = vst [vmem:[#allocation8_spill] sm:$0xff] %v10688_v41  ;;  %v10691_v27 = vmul.f32 0.35355338, %v4068_v30  ;;  %v3886_v3 = vrot.slane %v10375_v29, 4  ;;  %v4252_v30 = vsel %vm1867_vm15, %v10688_v41, -inf }
 0xfc4   :  { %v4185_v55 = vpop.f32.mrf.mxu1  ;;  %4682 = vrot.lane.b32.xlu1 %v3923_v0, %s8445_s9  ;;  %v4070_v17 = vpop.f32.mrf.mxu0 }
 0xfc5   :  { %11871 = vst [vmem:[#allocation9_spill] sm:$0xff] %v10691_v27  ;;  %v10693_v60 = vmul.f32 0.35355338, %v4070_v17  ;;  %v4248_v63 = vmax.f32 %v4246_v57, %v4247_v32  ;;  %v3889_v0 = vsel %vm1394_vm3, %v3886_v3, %v3888_v47  ;;  %v10706_v32 = vmul.f32 0.35355338, %v4185_v55 }
 0xfc6   :  { %v4074_v48 = vpop.f32.mrf.mxu0  ;;  %v7815_v35 = vpop.f32.mrf.mxu1 }
 0xfc7   :  { %11872 = vst [vmem:[#allocation10_spill] sm:$0xff] %v10693_v60  ;;  %v4251_v10 = vmax.f32 %v10691_v27, %v10693_v60  ;;  %v10700_v20 = vmul.f32 0.35355338, %v4074_v48  ;;  %4249 = vmax.xlane.f32.xlu0 %v4248_v63  ;;  %11875 = vst [vmem:[#allocation12_spill] sm:$0xff] %v10706_v32  ;;  %v11877_v60 = vunpack.i.l.bf16 %v9443_v13  ;;  %v4259_v55 = vsel %vm11878_vm14, %v10706_v32, -inf }
 0xfc8   :  { %4712 = vrot.lane.b32.xlu1 %v3938_v22, %s8445_s9  ;;  %v4076_v57 = vpop.f32.mrf.mxu0  ;;  %v3887_v22 = vsel %vm1394_vm3, %v3884_v44, %v3886_v3  ;;  %v11881_v3 = vld [vmem:[#allocation32_spill] sm:$0xff]  ;;  %v11883_v32 = vunpack.i.l.bf16 %v9552_v25 }
 0xfc9   :  { %11874 = vst [vmem:[#allocation11_spill] sm:$0xff] %v10700_v20  ;;  %v10708_v35 = vmul.f32 0.35355338, %v4076_v57  ;;  %v4253_v17 = vmax.f32 %v4251_v10, %v4252_v30  ;;  %v3937_v48 = vmul.f32 %v11877_v60, %v3889_v0  ;;  %v4256_v63 = vsel %vm1394_vm3, %v10700_v20, -inf  ;;  %v11879_v30 = vld [vmem:[#allocation30_spill] sm:$0xff] }
 0xfca   :  { %v3882_v10 = vrot.slane %v10367_v9, 4  ;;  %v11880_v57 = vunpack.i.l.bf16 %v11879_v30 }
 0xfcb   :  { %11876 = vst [vmem:[#allocation6_spill] sm:$0xff] %v10708_v35  ;;  %v4257_v47 = vsel %vm1394_vm3, %v10708_v35, -inf  ;;  %4254 = vmax.xlane.f32.xlu0 %v4253_v17  ;;  %v3881_v17 = vrot.slane %v10363_v4, 4 }
 0xfcc   :  { %v4258_v41 = vmax.f32 %v4256_v63, %v4257_v47  ;;  %4710 = vrot.lane.b32.xlu1 %v3937_v48, %s8445_s9  ;;  %v3936_v60 = vmul.f32 %v11880_v57, %v3887_v22  ;;  %v3885_v20 = vsel %vm1394_vm3, %v3882_v10, %v3884_v44  ;;  %v11882_v63 = vunpack.i.l.bf16 %v11881_v3 }
 0xfcd   :  { %v3883_v48 = vsel %vm1394_vm3, %v3881_v17, %v3882_v10  ;;  %v11884_v44 = vunpack.i.l.bf16 %v9572_v24  ;;  %v11886_v10 = vrot.slane %v10387_v1, 4 }
 0xfce   :  { %v4260_v27 = vmax.f32 %v4258_v41, %v4259_v55  ;;  %v3935_v47 = vmul.f32 %v11882_v63, %v3885_v20  ;;  %v3934_v35 = vmul.f32 %v11883_v32, %v3883_v48  ;;  %v3907_v41 = vsel %vm1394_vm3, %v10395_v51, %v3881_v17  ;;  %v11888_v17 = vld [vmem:[#allocation33_spill] sm:$0xff] }
 0xfcf   :  { %v11885_v55 = vunpack.i.l.bf16 %v9588_v15  ;;  %v11887_v32 = vrot.slane %v10383_v39, 4 }
 0xfd0   :  { %4708 = vrot.lane.b32.xlu1 %v3936_v60, %s8445_s9  ;;  %4261 = vmax.xlane.f32.xlu0 %v4260_v27  ;;  %v3933_v27 = vmul.f32 %v11884_v44, %v3907_v41 }
 0xfd1   :  { %v3932_v57 = vmul.f32 %v11885_v55, %v10391_v34  ;;  %v3893_v60 = vsel %vm1394_vm3, %v11887_v32, %v11886_v10  ;;  %v11893_v32 = vunpack.i.l.bf16 %v9620_v16 }
 0xfd4   :  { %4706 = vrot.lane.b32.xlu1 %v3935_v47, %s8445_s9  ;;  %v11890_v47 = vunpack.i.l.bf16 %v9417_v40  ;;  %v11894_v40 = vunpack.i.h.bf16 %v9443_v13  ;;  %v11898_v13 = vunpack.i.h.bf16 %v11881_v3 }
 0xfd6   :  { %v3939_v44 = vmul.f32 %v11890_v47, %v3893_v60  ;;  %v11895_v47 = vunpack.i.l.bf16 %v9632_v18 }
 0xfd8   :  { %4704 = vrot.lane.b32.xlu1 %v3934_v35, %s8445_s9  ;;  %v11889_v35 = vunpack.i.l.bf16 %v11888_v17 }
 0xfda   :  { %v3931_v63 = vmul.f32 %v11889_v35, %v10387_v1  ;;  %v3929_v35 = vmul.f32 %v11893_v32, %v10379_v7 }
 0xfdc   :  { %4702 = vrot.lane.b32.xlu1 %v3933_v27, %s8445_s9  ;;  %v11891_v27 = vunpack.i.l.bf16 %v9609_v37 }
 0xfde   :  { %v3930_v55 = vmul.f32 %v11891_v27, %v10383_v39  ;;  %v11897_v27 = vunpack.i.l.bf16 %v9644_v11 }
 0xfe0   :  { %4700 = vrot.lane.b32.xlu1 %v3932_v57, %s8445_s9  ;;  %v11892_v57 = vunpack.i.h.bf16 %v9389_v56  ;;  %v11896_v56 = vunpack.i.h.bf16 %v11879_v30  ;;  %v3896_v30 = vrot.slane %v10395_v51, 4 }
 0xfe2   :  { %v3922_v10 = vmul.f32 %v11892_v57, %v3893_v60  ;;  %v3920_v60 = vmul.f32 %v11896_v56, %v3889_v0  ;;  %v11899_v57 = vunpack.i.l.bf16 %v9656_v2  ;;  %v11900_v0 = vunpack.i.h.bf16 %v9552_v25 }
 0xfe3   :  { %v11904_v25 = vunpack.i.l.bf16 %v9680_v53  ;;  %v11906_v56 = vunpack.i.l.bf16 %v9713_v31 }
 0xfe4   :  { %4698 = vrot.lane.b32.xlu1 %v3931_v63, %s8445_s9  ;;  %v3921_v63 = vmul.f32 %v11894_v40, %v3891_v46  ;;  %v3919_v46 = vmul.f32 %v11898_v13, %v3887_v22  ;;  %v3918_v32 = vmul.f32 %v11900_v0, %v3885_v20  ;;  %v11902_v22 = vrot.slane %v10391_v34, 4 }
 0xfe5   :  { %v11910_v13 = vunpack.i.h.bf16 %v9632_v18  ;;  %v11914_v18 = vunpack.i.h.bf16 %v9680_v53 }
 0xfe6   :  { %4714 = vrot.lane.b32.xlu0 %v3939_v44, %s8445_s9  ;;  %v3928_v44 = vmul.f32 %v11895_v47, %v10375_v29  ;;  %v3897_v40 = vsel %vm1394_vm3, %v11902_v22, %v3896_v30  ;;  %v11905_v47 = vunpack.i.h.bf16 %v9588_v15  ;;  %v11909_v15 = vunpack.i.h.bf16 %v9620_v16 }
 0xfe7   :  { %v3924_v20 = vmul.f32 %v11904_v25, %v3897_v40  ;;  %v11913_v16 = vunpack.i.h.bf16 %v9668_v58 }
 0xfe8   :  { %4696 = vrot.lane.b32.xlu1 %v3930_v55, %s8445_s9  ;;  %v3927_v55 = vmul.f32 %v11897_v27, %v10371_v61  ;;  %v11908_v27 = vunpack.i.h.bf16 %v9609_v37  ;;  %v11912_v37 = vunpack.i.h.bf16 %v9656_v2 }
 0xfea   :  { %4680 = vrot.lane.b32.xlu0 %v3922_v10, %s8445_s9  ;;  %v3926_v10 = vmul.f32 %v11899_v57, %v10367_v9 }
 0xfec   :  { %4694 = vrot.lane.b32.xlu1 %v3929_v35, %s8445_s9  ;;  %v11901_v35 = vunpack.i.l.bf16 %v9668_v58 }
 0xfee   :  { %4678 = vrot.lane.b32.xlu0 %v3921_v63, %s8445_s9  ;;  %v3925_v3 = vmul.f32 %v11901_v35, %v10363_v4  ;;  %v11903_v63 = vunpack.i.h.bf16 %v9572_v24  ;;  %v11907_v24 = vunpack.i.h.bf16 %v11888_v17 }
 0xff0   :  { %4692 = vrot.lane.b32.xlu1 %v3928_v44, %s8445_s9  ;;  %v3917_v51 = vmul.f32 %v11903_v63, %v3883_v48  ;;  %v3916_v44 = vmul.f32 %v11905_v47, %v3907_v41  ;;  %v3915_v48 = vmul.f32 %v11907_v24, %v10391_v34  ;;  %v3913_v41 = vmul.f32 %v11909_v15, %v10383_v39 }
 0xff1   :  { %v11911_v34 = vunpack.i.h.bf16 %v9644_v11  ;;  %v3909_v39 = vmul.f32 %v11913_v16, %v10367_v9  ;;  %v11915_v11 = vunpack.i.h.bf16 %v9713_v31 }
 0xff2   :  { %4676 = vrot.lane.b32.xlu0 %v3920_v60, %s8445_s9  ;;  %v3941_v60 = vmul.f32 %v11906_v56, %v3897_v40 }
 0xff3   :  { %v3911_v17 = vmul.f32 %v11911_v34, %v10375_v29  ;;  %v3940_v29 = vmul.f32 %v11915_v11, %v10666_v33  ;;  %v11917_v34 = vld [vmem:[#allocation16_spill] sm:$0xff] }
 0xff4   :  { %4690 = vrot.lane.b32.xlu1 %v3927_v55, %s8445_s9  ;;  %v3914_v55 = vmul.f32 %v11908_v27, %v10387_v1  ;;  %v3910_v1 = vmul.f32 %v11912_v37, %v10371_v61 }
 0xff6   :  { %4674 = vrot.lane.b32.xlu0 %v3919_v46, %s8445_s9  ;;  %v3912_v46 = vmul.f32 %v11910_v13, %v10379_v7  ;;  %v3908_v7 = vmul.f32 %v11914_v18, %v10363_v4  ;;  %v11916_v13 = vld [vmem:[#allocation15_spill] sm:$0xff] }
 0xff8   :  { %4688 = vrot.lane.b32.xlu1 %v3926_v10, %s8445_s9 }
 0xffa   :  { %4672 = vrot.lane.b32.xlu0 %v3918_v32, %s8445_s9 }
 0xffc   :  { %4686 = vrot.lane.b32.xlu1 %v3925_v3, %s8445_s9 }
 0xffe   :  { %4670 = vrot.lane.b32.xlu0 %v3917_v51, %s8445_s9 }
0x1000   :  { %4684 = vrot.lane.b32.xlu1 %v3924_v20, %s8445_s9 }
0x1002   :  { %4668 = vrot.lane.b32.xlu0 %v3916_v44, %s8445_s9 }
0x1004   :  { %4718 = vrot.lane.b32.xlu1 %v3941_v60, %s8445_s9 }
0x1006   :  { %4666 = vrot.lane.b32.xlu0 %v3915_v48, %s8445_s9 }
0x100a   :  { %4664 = vrot.lane.b32.xlu0 %v3914_v55, %s8445_s9 }
0x100e   :  { %4662 = vrot.lane.b32.xlu0 %v3913_v41, %s8445_s9 }
0x1012   :  { %4660 = vrot.lane.b32.xlu0 %v3912_v46, %s8445_s9 }
0x1016   :  { %4658 = vrot.lane.b32.xlu0 %v3911_v17, %s8445_s9 }
0x101a   :  { %4656 = vrot.lane.b32.xlu0 %v3910_v1, %s8445_s9 }
0x101e   :  { %4654 = vrot.lane.b32.xlu0 %v3909_v39, %s8445_s9 }
0x1022   :  { %4652 = vrot.lane.b32.xlu0 %v3908_v7, %s8445_s9 }
0x1026   :  { %4716 = vrot.lane.b32.xlu0 %v3940_v29, %s8445_s9 }
0x1038   :  { %v4220_v2 = vpop.xlane.xlu0 %4219 }
0x1039   :  { %v4263_v61 = vsub.f32 %v10603_v42, %v4220_v2  ;;  %v4264_v58 = vsub.f32 %v10605_v45, %v4220_v2  ;;  %v4265_v9 = vsub.f32 %v10601_v5, %v4220_v2 }
0x103b   :  { %v4290_v57 = vmul.f32 1.442695, %v4263_v61  ;;  %v4292_v10 = vmul.f32 1.442695, %v4264_v58  ;;  %v4294_v30 = vmul.f32 1.442695, %v4265_v9 }
0x103c   :  { %v4225_v53 = vpop.xlane.xlu1 %4224 }
0x103d   :  { %8297 = vpow2.f32 %v4290_v57  ;;  %v4266_v4 = vsub.f32 %v10613_v62, %v4225_v53  ;;  %v4267_v0 = vsub.f32 %v10615_v38, %v4225_v53  ;;  %v4268_v31 = vsub.f32 %v10611_v28, %v4225_v53  ;;  %v11918_v57 = vld [vmem:[#allocation7_spill] sm:$0xff] }
0x103e   :  { %8299 = vpow2.f32 %v4292_v10 }
0x103f   :  { %8301 = vpow2.f32 %v4294_v30  ;;  %v4296_v33 = vmul.f32 1.442695, %v4266_v4  ;;  %v4298_v32 = vmul.f32 1.442695, %v4267_v0  ;;  %v4300_v42 = vmul.f32 1.442695, %v4268_v31 }
0x1040   :  { %v10852_v35 = vpop.permute.xlu1 %4682  ;;  %v4230_v45 = vpop.xlane.xlu0 %4229  ;;  %v11919_v0 = vld [vmem:[#allocation18_spill] sm:$0xff] }
0x1041   :  { %8303 = vpow2.f32 %v4296_v33  ;;  %v4269_v5 = vsub.f32 %v10623_v8, %v4230_v45  ;;  %v4270_v3 = vsub.f32 %v10625_v59, %v4230_v45  ;;  %v4271_v22 = vsub.f32 %v10621_v50, %v4230_v45 }
0x1042   :  { %8305 = vpow2.f32 %v4298_v32 }
0x1043   :  { %8307 = vpow2.f32 %v4300_v42  ;;  %v4302_v62 = vmul.f32 1.442695, %v4269_v5  ;;  %v4304_v38 = vmul.f32 1.442695, %v4270_v3  ;;  %v4306_v28 = vmul.f32 1.442695, %v4271_v22 }
0x1044   :  { %v10857_v40 = vpop.permute.xlu1 %4712  ;;  %v4235_v63 = vpop.xlane.xlu0 %4234  ;;  %v11920_v42 = vld [vmem:[#allocation17_spill] sm:$0xff] }
0x1045   :  { %8309 = vpow2.f32 %v4302_v62  ;;  %v4272_v51 = vsub.f32 %v10633_v52, %v4235_v63  ;;  %v4273_v25 = vsub.f32 %v10635_v43, %v4235_v63  ;;  %v4274_v20 = vsub.f32 %v10631_v12, %v4235_v63  ;;  %v11921_v3 = vld [vmem:[#allocation9_spill] sm:$0xff]  ;;  %v11922_v62 = vld [vmem:[#allocation10_spill] sm:$0xff]  ;;  %v11923_v63 = vld [vmem:[#allocation8_spill] sm:$0xff] }
0x1046   :  { %8311 = vpow2.f32 %v4304_v38 }
0x1047   :  { %8313 = vpow2.f32 %v4306_v28  ;;  %v4308_v8 = vmul.f32 1.442695, %v4272_v51  ;;  %v4310_v59 = vmul.f32 1.442695, %v4273_v25  ;;  %v4312_v50 = vmul.f32 1.442695, %v4274_v20 }
0x1048   :  { %v10862_v47 = vpop.permute.xlu1 %4710  ;;  %v4240_v44 = vpop.xlane.xlu0 %4239 }
0x1049   :  { %8315 = vpow2.f32 %v4308_v8  ;;  %v4275_v56 = vsub.f32 %v10643_v6, %v4240_v44  ;;  %v4276_v60 = vsub.f32 %v10645_v54, %v4240_v44  ;;  %v4277_v24 = vsub.f32 %v10641_v21, %v4240_v44 }
0x104a   :  { %v8298_v52 = vpop.eup %8297  ;;  %8317 = vpow2.f32 %v4310_v59  ;;  %v11924_v59 = vld [vmem:[#allocation20_spill] sm:$0xff] }
0x104b   :  { %v8300_v43 = vpop.eup %8299  ;;  %8319 = vpow2.f32 %v4312_v50  ;;  %v4314_v12 = vmul.f32 1.442695, %v4275_v56  ;;  %v4316_v48 = vmul.f32 1.442695, %v4276_v60  ;;  %v4318_v27 = vmul.f32 1.442695, %v4277_v24 }
0x104c   :  { %v8302_v55 = vpop.eup %8301  ;;  %v10867_v15 = vpop.permute.xlu1 %4708  ;;  %v10870_v46 = vmul.f32 %v8300_v43, %v11916_v13  ;;  %v10873_v6 = vmul.f32 %v8298_v52, %v11917_v34  ;;  %v11925_v60 = vld [vmem:[#allocation19_spill] sm:$0xff] }
0x104d   :  { %v4245_v41 = vpop.xlane.xlu0 %4244  ;;  %v10875_v54 = vmul.f32 0.0, %v8302_v55  ;;  %8321 = vpow2.f32 %v4314_v12 }
0x104e   :  { %v4278_v21 = vsub.f32 %v10654_v26, %v4245_v41  ;;  %v4279_v17 = vsub.f32 %v10656_v23, %v4245_v41  ;;  %v8304_v37 = vpop.eup %8303  ;;  %8323 = vpow2.f32 %v4316_v48  ;;  %v4280_v1 = vsub.f32 %v10652_v36, %v4245_v41  ;;  %4462 = vmatprep.mubr.f32.mxu0 %v10870_v46  ;;  %v11927_v41 = vld [vmem:[#allocation6_spill] sm:$0xff] }
0x104f   :  { %v8306_v16 = vpop.eup %8305  ;;  %8325 = vpow2.f32 %v4318_v27  ;;  %7821 = vmatmul.mubr.msk.f32.vlgmr.msra.gmra.mxu1 %vm1867_vm15, %v10875_v54  ;;  %4463 = vmatmul.mubr.f32.vlgmr.msra.gmra.mxu0 %v10873_v6  ;;  %v10885_v7 = vmul.f32 %v8304_v37, %v11917_v34  ;;  %v11926_v27 = vld [vmem:[#allocation11_spill] sm:$0xff]  ;;  %v11928_v34 = vld [vmem:[#allocation12_spill] sm:$0xff] }
0x1050   :  { %v4320_v39 = vmul.f32 1.442695, %v4278_v21  ;;  %v4322_v18 = vmul.f32 1.442695, %v4279_v17  ;;  %v8308_v26 = vpop.eup %8307  ;;  %v4324_v23 = vmul.f32 1.442695, %v4280_v1  ;;  %7823 = vmatprep.mubr.msk.f32.mxu1 %vm8438_vm0, %v11786_v49  ;;  %v10889_v36 = vpop.permute.xlu1 %4706  ;;  %v10892_v29 = vmul.f32 %v8306_v16, %v11916_v13 }
0x1051   :  { %v4250_v11 = vpop.xlane.xlu0 %4249  ;;  %v10894_v2 = vmul.f32 0.0, %v8308_v26  ;;  %v11929_v37 = vld [vmem:[#allocation23_spill] sm:$0xff] }
0x1052   :  { %8327 = vpow2.f32 %v4320_v39  ;;  %v4281_v61 = vsub.f32 %v10673_v19, %v4250_v11  ;;  %v4282_v58 = vsub.f32 %v10675_v14, %v4250_v11  ;;  %v8310_v9 = vpop.eup %8309  ;;  %v4283_v10 = vsub.f32 %v11918_v57, %v4250_v11  ;;  %4467 = vmatprep.mubr.f32.mxu0 %v10892_v29  ;;  %v11930_v11 = vld [vmem:[#allocation21_spill] sm:$0xff] }
0x1053   :  { %8329 = vpow2.f32 %v4322_v18  ;;  %v8312_v30 = vpop.eup %8311  ;;  %7824 = vmatmul.mubr.msk.f32.gmra.mxu1 %vm1867_vm15, %v10894_v2  ;;  %4468 = vmatmul.mubr.f32.gmra.mxu0 %v10885_v7  ;;  %v10904_v31 = vmul.f32 %v8310_v9, %v11919_v0 }
0x1054   :  { %8331 = vpow2.f32 %v4324_v23  ;;  %v4326_v53 = vmul.f32 1.442695, %v4281_v61  ;;  %v4328_v4 = vmul.f32 1.442695, %v4282_v58  ;;  %v8314_v19 = vpop.eup %8313  ;;  %v4330_v14 = vmul.f32 1.442695, %v4283_v10  ;;  %7826 = vmatprep.mubr.msk.f32.mxu1 %vm8438_vm0, %v11786_v49  ;;  %v10908_v33 = vpop.permute.xlu1 %4704 }
0x1055   :  { %v4255_v32 = vpop.xlane.xlu0 %4254  ;;  %v10911_v45 = vmul.f32 %v8312_v30, %v11920_v42  ;;  %v10913_v5 = vmul.f32 0.0, %v8314_v19  ;;  %v11931_v58 = vld [vmem:[#allocation22_spill] sm:$0xff] }
0x1056   :  { %8333 = vpow2.f32 %v4326_v53  ;;  %v4284_v22 = vsub.f32 %v11921_v3, %v4255_v32  ;;  %v4285_v38 = vsub.f32 %v11922_v62, %v4255_v32  ;;  %v8316_v28 = vpop.eup %8315  ;;  %v4286_v51 = vsub.f32 %v11923_v63, %v4255_v32  ;;  %v11932_v53 = vld [vmem:[#allocation25_spill] sm:$0xff] }
0x1057   :  { %8335 = vpow2.f32 %v4328_v4  ;;  %4472 = vmatprep.mubr.f32.mxu0 %v10911_v45  ;;  %v8318_v25 = vpop.eup %8317  ;;  %7827 = vmatmul.mubr.msk.f32.gmra.mxu1 %vm1867_vm15, %v10913_v5  ;;  %v10923_v50 = vmul.f32 %v8316_v28, %v11924_v59 }
0x1058   :  { %8337 = vpow2.f32 %v4330_v14  ;;  %v4332_v20 = vmul.f32 1.442695, %v4284_v22  ;;  %v4334_v8 = vmul.f32 1.442695, %v4285_v38  ;;  %4473 = vmatmul.mubr.f32.gmra.mxu0 %v10904_v31  ;;  %v8320_v44 = vpop.eup %8319  ;;  %v10925_v56 = vpop.permute.xlu1 %4702  ;;  %7829 = vmatprep.mubr.msk.f32.mxu1 %vm8438_vm0, %v11786_v49  ;;  %v10930_v24 = vmul.f32 %v8318_v25, %v11925_v60  ;;  %v11933_v14 = vld [vmem:[#allocation24_spill] sm:$0xff] }
0x1059   :  { %v10932_v52 = vmul.f32 0.0, %v8320_v44  ;;  %v4336_v43 = vmul.f32 1.442695, %v4286_v51  ;;  %v4262_v12 = vpop.xlane.xlu0 %4261  ;;  %v11936_v25 = vld [vmem:[#allocation28_spill] sm:$0xff] }
0x105a   :  { %8339 = vpow2.f32 %v4332_v20  ;;  %v8322_v48 = vpop.eup %8321  ;;  %4477 = vmatprep.mubr.f32.mxu0 %v10930_v24  ;;  %v4287_v55 = vsub.f32 %v11926_v27, %v4262_v12  ;;  %v4288_v13 = vsub.f32 %v11927_v41, %v4262_v12  ;;  %v4289_v21 = vsub.f32 %v11928_v34, %v4262_v12  ;;  %v11938_v12 = vld [vmem:[#allocation29_spill] sm:$0xff] }
0x105b   :  { %8341 = vpow2.f32 %v4334_v8  ;;  %v8324_v17 = vpop.eup %8323  ;;  %7830 = vmatmul.mubr.msk.f32.gmra.mxu1 %vm1867_vm15, %v10932_v52  ;;  %v10942_v1 = vmul.f32 %v8322_v48, %v11929_v37 }
0x105c   :  { %4478 = vmatmul.mubr.f32.gmra.mxu0 %v10923_v50  ;;  %v8326_v16 = vpop.eup %8325  ;;  %v4338_v39 = vmul.f32 1.442695, %v4287_v55  ;;  %v4340_v18 = vmul.f32 1.442695, %v4288_v13  ;;  %v4342_v26 = vmul.f32 1.442695, %v4289_v21  ;;  %v10944_v23 = vpop.permute.xlu1 %4700  ;;  %7832 = vmatprep.mubr.msk.f32.mxu1 %vm8438_vm0, %v11786_v49  ;;  %v10949_v61 = vmul.f32 %v8324_v17, %v11930_v11 }
0x105d   :  { %8343 = vpow2.f32 %v4336_v43  ;;  %v10952_v9 = vmul.f32 %v8326_v16, %v11931_v58  ;;  %v4715_v57 = vpop.permute.xlu0 %4714 }
0x105e   :  { %8345 = vpow2.f32 %v4338_v39  ;;  %4482 = vmatprep.mubr.f32.mxu0 %v10949_v61  ;;  %7271 = vmatprep.subr.mxu0 %v4715_v57 }
0x105f   :  { %v8328_v10 = vpop.eup %8327  ;;  %8347 = vpow2.f32 %v4340_v18  ;;  %7833 = vmatmul.mubr.msk.f32.gmra.mxu1 %vm1867_vm15, %v10952_v9  ;;  %7272 = vmatpush3.msra.mxu0 %v10852_v35  ;;  %v11934_v35 = vld [vmem:[#allocation27_spill] sm:$0xff] }
0x1060   :  { %v8330_v30 = vpop.eup %8329  ;;  %4483 = vmatmul.mubr.f32.gmra.mxu0 %v10942_v1  ;;  %v10959_v4 = vmul.f32 %v8328_v10, %v11932_v53  ;;  %8349 = vpow2.f32 %v4342_v26  ;;  %v10962_v19 = vpop.permute.xlu1 %4698  ;;  %7835 = vmatprep.mubr.msk.f32.mxu1 %vm8438_vm0, %v11786_v49 }
0x1061   :  { %v8332_v0 = vpop.eup %8331  ;;  %v10967_v32 = vmul.f32 %v8330_v30, %v11933_v14  ;;  %7273 = vmatprep.subr.mxu0 %v10857_v40  ;;  %v4681_v3 = vpop.permute.xlu0 %4680  ;;  %v11935_v40 = vld [vmem:[#allocation26_spill] sm:$0xff] }
0x1062   :  { %v10969_v42 = vmul.f32 0.0, %v8332_v0  ;;  %7274 = vmatpush3.msra.mxu0 %v4681_v3 }
0x1063   :  { %v8334_v22 = vpop.eup %8333  ;;  %4487 = vmatprep.mubr.f32.mxu0 %v10967_v32  ;;  %7275 = vmatprep.subr.mxu0 %v10862_v47  ;;  %v11937_v47 = vld [vmem:[#allocation31_spill] sm:$0xff] }
0x1064   :  { %v8336_v62 = vpop.eup %8335  ;;  %7836 = vmatmul.mubr.msk.f32.gmra.mxu1 %vm1867_vm15, %v10969_v42  ;;  %4488 = vmatmul.mubr.f32.gmra.mxu0 %v10959_v4  ;;  %v10977_v38 = vmul.f32 %v8334_v22, %v11934_v35  ;;  %v4697_v63 = vpop.permute.xlu1 %4696 }
0x1065   :  { %v8338_v28 = vpop.eup %8337  ;;  %7838 = vmatprep.mubr.msk.f32.mxu1 %vm8438_vm0, %v11786_v49  ;;  %v10983_v51 = vmul.f32 %v8336_v62, %v11935_v40  ;;  %v4679_v8 = vpop.permute.xlu0 %4678 }
0x1066   :  { %v10986_v20 = vmul.f32 %v8338_v28, %v11936_v25  ;;  %7276 = vmatpush3.msra.mxu0 %v4679_v8 }
0x1067   :  { %v8340_v59 = vpop.eup %8339  ;;  %4492 = vmatprep.mubr.f32.mxu0 %v10983_v51  ;;  %7277 = vmatprep.subr.mxu0 %v10867_v15 }
0x1068   :  { %v8342_v44 = vpop.eup %8341  ;;  %7839 = vmatmul.mubr.msk.f32.gmra.mxu1 %vm1867_vm15, %v10986_v20  ;;  %4493 = vmatmul.mubr.f32.gmra.mxu0 %v10977_v38  ;;  %v10993_v60 = vmul.f32 %v8340_v59, %v11937_v47  ;;  %v4695_v43 = vpop.permute.xlu1 %4694 }
0x1069   :  { %7841 = vmatprep.mubr.msk.f32.mxu1 %vm8438_vm0, %v11786_v49  ;;  %v10999_v48 = vmul.f32 %v8342_v44, %v11938_v12  ;;  %v4677_v27 = vpop.permute.xlu0 %4676 }
0x106a   :  { %v11001_v55 = vpop.eup %8343  ;;  %7278 = vmatpush3.msra.mxu0 %v4677_v27 }
0x106b   :  { %4497 = vmatprep.mubr.f32.mxu0 %v10999_v48  ;;  %v8346_v41 = vpop.eup %8345  ;;  %7279 = vmatprep.subr.mxu0 %v10889_v36 }
0x106c   :  { %7842 = vmatmul.mubr.msk.f32.gmra.mxu1 %vm1867_vm15, %v11001_v55  ;;  %4498 = vmatmul.mubr.f32.gmra.mxu0 %v10993_v60  ;;  %v8348_v15 = vpop.eup %8347  ;;  %v4693_v13 = vpop.permute.xlu1 %4692  ;;  %v11011_v34 = vmul.f32 %v8346_v41, %v11937_v47 }
0x106d   :  { %7844 = vmatprep.mubr.msk.f32.mxu1 %vm8438_vm0, %v11786_v49  ;;  %v11013_v21 = vpop.eup %8349  ;;  %v4675_v17 = vpop.permute.xlu0 %4674  ;;  %v11016_v37 = vmul.f32 %v8348_v15, %v11938_v12 }
0x106e   :  { %7280 = vmatpush3.msra.mxu0 %v4675_v17 }
0x106f   :  { %4502 = vmatprep.mubr.f32.mxu0 %v11016_v37  ;;  %7281 = vmatprep.subr.mxu0 %v10908_v33 }
0x1070   :  { %7845 = vmatmul.mubr.msk.f32.gmra.mxu1 %vm1867_vm15, %v11013_v21  ;;  %4503 = vmatmul.mubr.f32.gmra.mxu0 %v11011_v34  ;;  %v4691_v36 = vpop.permute.xlu1 %4690 }
0x1071   :  { %4818 = vmatprep.mubr.f32.mxu0 %v10870_v46  ;;  %v4673_v16 = vpop.permute.xlu0 %4672  ;;  %7851 = vmatprep.mubr.msk.f32.mxu1 %vm8438_vm0, %v11786_v49 }
0x1072   :  { %7282 = vmatpush3.msra.mxu0 %v4673_v16 }
0x1073   :  { %7283 = vmatprep.subr.mxu0 %v10925_v56 }
0x1074   :  { %v4689_v39 = vpop.permute.xlu1 %4688 }
0x1075   :  { %v4671_v18 = vpop.permute.xlu0 %4670 }
0x1076   :  { %7284 = vmatpush3.msra.mxu0 %v4671_v18 }
0x1077   :  { %7285 = vmatprep.subr.mxu0 %v10944_v23 }
0x1078   :  { %v4687_v26 = vpop.permute.xlu1 %4686 }
0x1079   :  { %v4669_v11 = vpop.permute.xlu0 %4668 }
0x107a   :  { %7286 = vmatpush3.msra.mxu0 %v4669_v11 }
0x107b   :  { %7287 = vmatprep.subr.mxu0 %v10962_v19  ;;  %v11939_v19 = vld [vmem:[#allocation34_spill] sm:$0xff] }
0x107c   :  { %v4685_v33 = vpop.permute.xlu1 %4684 }
0x107d   :  { %v4667_v58 = vpop.permute.xlu0 %4666 }
0x107e   :  { %7288 = vmatpush3.msra.mxu0 %v4667_v58 }
0x107f   :  { %7289 = vmatprep.subr.mxu0 %v4697_v63 }
0x1080   :  { %v4719_v46 = vpop.permute.xlu1 %4718 }
0x1081   :  { %7848 = vmatpush3.msra.mxu1 %v4719_v46  ;;  %v4665_v57 = vpop.permute.xlu0 %4664 }
0x1082   :  { %7290 = vmatpush3.msra.mxu0 %v4665_v57  ;;  %7849 = vmatprep.subr.mxu1 %v11786_v49 }
0x1083   :  { %7291 = vmatprep.subr.mxu0 %v4695_v43 }
0x1085   :  { %v4663_v56 = vpop.permute.xlu0 %4662 }
0x1086   :  { %7292 = vmatpush3.msra.mxu0 %v4663_v56 }
0x1087   :  { %7293 = vmatprep.subr.mxu0 %v4693_v13 }
0x1089   :  { %v4661_v23 = vpop.permute.xlu0 %4660 }
0x108a   :  { %7294 = vmatpush3.msra.mxu0 %v4661_v23  ;;  %v3464_v23 = vld [vmem:[%s11673_s1 + $0x370] sm:$0xff] }
0x108b   :  { %7295 = vmatprep.subr.mxu0 %v4691_v36 }
0x108d   :  { %v4659_v10 = vpop.permute.xlu0 %4658 }
0x108e   :  { %7296 = vmatpush3.msra.mxu0 %v4659_v10 }
0x108f   :  { %7297 = vmatprep.subr.mxu0 %v4689_v39 }
0x1091   :  { %v4657_v30 = vpop.permute.xlu0 %4656 }
0x1092   :  { %7298 = vmatpush3.msra.mxu0 %v4657_v30  ;;  %v3463_v30 = vld [vmem:[%s11673_s1 + $0x360] sm:$0xff] }
0x1093   :  { %7299 = vmatprep.subr.mxu0 %v4687_v26 }
0x1095   :  { %v4655_v53 = vpop.permute.xlu0 %4654 }
0x1096   :  { %7300 = vmatpush3.msra.mxu0 %v4655_v53 }
0x1097   :  { %7301 = vmatprep.subr.mxu0 %v4685_v33 }
0x1099   :  { %v4653_v0 = vpop.permute.xlu0 %4652 }
0x109a   :  { %7302 = vmatpush3.msra.mxu0 %v4653_v0  ;;  %v3462_v0 = vld [vmem:[%s11673_s1 + $0x350] sm:$0xff] }
0x109b   :  { %4819 = vmatmul.mubr.f32.vlgmr.msra.gmra.mxu0 %v10873_v6  ;;  %7878 = vmatprep.subr.mxu0 %v11786_v49 }
0x109c   :  { %4823 = vmatprep.mubr.f32.mxu0 %v10892_v29  ;;  %7879 = vmatpush3.msk.msra.mxu0 %vm1394_vm3, %v11939_v19  ;;  %vm5975_vm3 = vcmask 1044480  }
0x109d   :  { %v4717_v14 = vpop.permute.xlu0 %4716  ;;  %7942 = vmatprep.subr.mxu0 %v11786_v49 }
0x109e   :  { %7850 = vmatpush3.msra.mxu1 %v4717_v14  ;;  %v3461_v14 = vld [vmem:[%s11673_s1 + $0x340] sm:$0xff] }
0x109f   :  { %4824 = vmatmul.mubr.f32.gmra.mxu0 %v10885_v7  ;;  %7852 = vmatmul.mubr.msk.f32.vlgmr.msra.gmra.mxu1 %vm1867_vm15, %v10875_v54 }
0x10a0   :  { %4828 = vmatprep.mubr.f32.mxu0 %v10911_v45  ;;  %7854 = vmatprep.mubr.msk.f32.mxu1 %vm8438_vm0, %v11786_v49 }
0x10a1   :  { %7907 = vmatprep.subr.mxu1 %v11786_v49 }
0x10a2   :  { %7908 = vmatpush3.msra.mxu1 %v3464_v23 }
0x10a3   :  { %4829 = vmatmul.mubr.f32.gmra.mxu0 %v10904_v31  ;;  %7855 = vmatmul.mubr.msk.f32.gmra.mxu1 %vm1867_vm15, %v10894_v2 }
0x10a4   :  { %4833 = vmatprep.mubr.f32.mxu0 %v10930_v24  ;;  %7857 = vmatprep.mubr.msk.f32.mxu1 %vm8438_vm0, %v11786_v49 }
0x10a5   :  { %7909 = vmatprep.subr.mxu1 %v11786_v49 }
0x10a6   :  { %7910 = vmatpush3.msra.mxu1 %v3463_v30 }
0x10a7   :  { %4834 = vmatmul.mubr.f32.gmra.mxu0 %v10923_v50  ;;  %7858 = vmatmul.mubr.msk.f32.gmra.mxu1 %vm1867_vm15, %v10913_v5 }
0x10a8   :  { %4838 = vmatprep.mubr.f32.mxu0 %v10949_v61  ;;  %7860 = vmatprep.mubr.msk.f32.mxu1 %vm8438_vm0, %v11786_v49 }
0x10a9   :  { %7911 = vmatprep.subr.mxu1 %v11786_v49 }
0x10aa   :  { %7912 = vmatpush3.msra.mxu1 %v3462_v0 }
0x10ab   :  { %4839 = vmatmul.mubr.f32.gmra.mxu0 %v10942_v1  ;;  %7861 = vmatmul.mubr.msk.f32.gmra.mxu1 %vm1867_vm15, %v10932_v52 }
0x10ac   :  { %4843 = vmatprep.mubr.f32.mxu0 %v10967_v32  ;;  %7863 = vmatprep.mubr.msk.f32.mxu1 %vm8438_vm0, %v11786_v49 }
0x10ad   :  { %7913 = vmatprep.subr.mxu1 %v11786_v49 }
0x10ae   :  { %7914 = vmatpush3.msra.mxu1 %v3461_v14 }
0x10af   :  { %4844 = vmatmul.mubr.f32.gmra.mxu0 %v10959_v4  ;;  %7864 = vmatmul.mubr.msk.f32.gmra.mxu1 %vm1867_vm15, %v10952_v9 }
0x10b0   :  { %4848 = vmatprep.mubr.f32.mxu0 %v10983_v51  ;;  %7866 = vmatprep.mubr.msk.f32.mxu1 %vm8438_vm0, %v11786_v49 }
0x10b1   :  { %7977 = vmatprep.subr.mxu1 %v11786_v49 }
0x10b3   :  { %4849 = vmatmul.mubr.f32.gmra.mxu0 %v10977_v38  ;;  %7867 = vmatmul.mubr.msk.f32.gmra.mxu1 %vm1867_vm15, %v10969_v42 }
0x10b4   :  { %4853 = vmatprep.mubr.f32.mxu0 %v10999_v48  ;;  %7869 = vmatprep.mubr.msk.f32.mxu1 %vm8438_vm0, %v11786_v49 }
0x10b7   :  { %4854 = vmatmul.mubr.f32.gmra.mxu0 %v10993_v60  ;;  %7870 = vmatmul.mubr.msk.f32.gmra.mxu1 %vm1867_vm15, %v10986_v20 }
0x10b8   :  { %4858 = vmatprep.mubr.f32.mxu0 %v11016_v37  ;;  %7872 = vmatprep.mubr.msk.f32.mxu1 %vm8438_vm0, %v11786_v49 }
0x10bb   :  { %4859 = vmatmul.mubr.f32.gmra.mxu0 %v11011_v34  ;;  %7873 = vmatmul.mubr.msk.f32.gmra.mxu1 %vm1867_vm15, %v11001_v55 }
0x10bc   :  { %7875 = vmatprep.mubr.msk.f32.mxu1 %vm8438_vm0, %v11786_v49  ;;  %7880 = vmatprep.mubr.msk.f32.mxu0 %vm8438_vm0, %v11786_v49 }
0x10bf   :  { %7876 = vmatmul.mubr.msk.f32.gmra.mxu1 %vm1867_vm15, %v11013_v21 }
0x10c0   :  { %7915 = vmatprep.mubr.msk.f32.mxu1 %vm8438_vm0, %v11786_v49 }
0x110f   :  { %v4574_v6 = vpop.f32.mrf.mxu1  ;;  %v7233_v54 = vpop.f32.mrf.mxu0 }
0x1111   :  { %v7822_v7 = vpop.f32.mrf.mxu1  ;;  %v7234_v29 = vpop.f32.mrf.mxu0 }
0x1112   :  { %v7235_v2 = vadd.f32 %v7234_v29, %v7233_v54 }
0x1113   :  { %v4579_v31 = vpop.f32.mrf.mxu1  ;;  %v7236_v45 = vpop.f32.mrf.mxu0 }
0x1114   :  { %v4575_v5 = vadd.f32 %v7235_v2, %v4574_v6 }
0x1115   :  { %v7825_v50 = vpop.f32.mrf.mxu1  ;;  %v7237_v24 = vpop.f32.mrf.mxu0 }
0x1116   :  { %v7238_v52 = vadd.f32 %v7237_v24, %v7236_v45  ;;  %7881 = vmatmul.mubr.msk.f32.vlgmr.msra.gmra.mxu0 %vm2626_vm13, %v4575_v5 }
0x1117   :  { %v4584_v1 = vpop.f32.mrf.mxu1  ;;  %7883 = vmatprep.mubr.msk.f32.mxu0 %vm8438_vm0, %v11786_v49 }
0x1118   :  { %v7239_v61 = vpop.f32.mrf.mxu0  ;;  %v4580_v9 = vadd.f32 %v7238_v52, %v4579_v31 }
0x1119   :  { %v7828_v4 = vpop.f32.mrf.mxu1 }
0x111a   :  { %v7240_v32 = vpop.f32.mrf.mxu0  ;;  %7884 = vmatmul.mubr.msk.f32.gmra.mxu0 %vm2626_vm13, %v4580_v9 }
0x111b   :  { %v7241_v42 = vadd.f32 %v7240_v32, %v7239_v61  ;;  %v4589_v3 = vpop.f32.mrf.mxu1  ;;  %7886 = vmatprep.mubr.msk.f32.mxu0 %vm8438_vm0, %v11786_v49 }
0x111c   :  { %v7242_v22 = vpop.f32.mrf.mxu0 }
0x111d   :  { %v4585_v62 = vadd.f32 %v7241_v42, %v4584_v1  ;;  %v7831_v35 = vpop.f32.mrf.mxu1 }
0x111e   :  { %v7243_v38 = vpop.f32.mrf.mxu0 }
0x111f   :  { %v7244_v28 = vadd.f32 %v7243_v38, %v7242_v22  ;;  %7887 = vmatmul.mubr.msk.f32.gmra.mxu0 %vm2626_vm13, %v4585_v62  ;;  %v4594_v63 = vpop.f32.mrf.mxu1 }
0x1120   :  { %v7245_v40 = vpop.f32.mrf.mxu0  ;;  %7889 = vmatprep.mubr.msk.f32.mxu0 %vm8438_vm0, %v11786_v49 }
0x1121   :  { %v4590_v51 = vadd.f32 %v7244_v28, %v4589_v3  ;;  %v7834_v25 = vpop.f32.mrf.mxu1 }
0x1122   :  { %v7246_v20 = vpop.f32.mrf.mxu0 }
0x1123   :  { %v7247_v8 = vadd.f32 %v7246_v20, %v7245_v40  ;;  %7890 = vmatmul.mubr.msk.f32.gmra.mxu0 %vm2626_vm13, %v4590_v51 }
0x1124   :  { %v4599_v59 = vpop.f32.mrf.mxu1  ;;  %v7248_v44 = vpop.f32.mrf.mxu0  ;;  %7892 = vmatprep.mubr.msk.f32.mxu0 %vm8438_vm0, %v11786_v49 }
0x1125   :  { %v4595_v47 = vadd.f32 %v7247_v8, %v4594_v63 }
0x1126   :  { %v7837_v60 = vpop.f32.mrf.mxu1  ;;  %v7249_v43 = vpop.f32.mrf.mxu0 }
0x1127   :  { %v7250_v12 = vadd.f32 %v7249_v43, %v7248_v44  ;;  %7893 = vmatmul.mubr.msk.f32.gmra.mxu0 %vm2626_vm13, %v4595_v47 }
0x1128   :  { %v4604_v48 = vpop.f32.mrf.mxu1  ;;  %v7251_v27 = vpop.f32.mrf.mxu0  ;;  %7895 = vmatprep.mubr.msk.f32.mxu0 %vm8438_vm0, %v11786_v49 }
0x1129   :  { %v4600_v55 = vadd.f32 %v7250_v12, %v4599_v59 }
0x112a   :  { %v7840_v41 = vpop.f32.mrf.mxu1  ;;  %v7252_v15 = vpop.f32.mrf.mxu0 }
0x112b   :  { %v7253_v13 = vadd.f32 %v7252_v15, %v7251_v27  ;;  %7896 = vmatmul.mubr.msk.f32.gmra.mxu0 %vm2626_vm13, %v4600_v55 }
0x112c   :  { %v4609_v34 = vpop.f32.mrf.mxu1  ;;  %v7254_v21 = vpop.f32.mrf.mxu0  ;;  %7898 = vmatprep.mubr.msk.f32.mxu0 %vm8438_vm0, %v11786_v49 }
0x112d   :  { %v4605_v17 = vadd.f32 %v7253_v13, %v4604_v48 }
0x112e   :  { %v7843_v37 = vpop.f32.mrf.mxu1  ;;  %v7255_v36 = vpop.f32.mrf.mxu0 }
0x112f   :  { %v7256_v16 = vadd.f32 %v7255_v36, %v7254_v21  ;;  %7899 = vmatmul.mubr.msk.f32.gmra.mxu0 %vm2626_vm13, %v4605_v17 }
0x1130   :  { %v4614_v39 = vpop.f32.mrf.mxu1  ;;  %7901 = vmatprep.mubr.msk.f32.mxu0 %vm8438_vm0, %v11786_v49  ;;  %v7257_v26 = vpop.f32.mrf.mxu0 }
0x1131   :  { %v4610_v18 = vadd.f32 %v7256_v16, %v4609_v34 }
0x1132   :  { %v7846_v11 = vpop.f32.mrf.mxu1  ;;  %v7258_v33 = vpop.f32.mrf.mxu0 }
0x1133   :  { %7902 = vmatmul.mubr.msk.f32.gmra.mxu0 %vm2626_vm13, %v4610_v18  ;;  %v7259_v58 = vadd.f32 %v7258_v33, %v7257_v26 }
0x1134   :  { %7904 = vmatprep.mubr.msk.f32.mxu0 %vm8438_vm0, %v11786_v49 }
0x1135   :  { %v4615_v46 = vadd.f32 %v7259_v58, %v4614_v39 }
0x1137   :  { %7905 = vmatmul.mubr.msk.f32.gmra.mxu0 %vm2626_vm13, %v4615_v46  ;;  %vm5944_vm13 = vcmask 1045504  }
0x1138   :  { %7950 = vmatprep.mubr.msk.f32.mxu0 %vm8438_vm0, %v11786_v49 }
0x115b   :  { %v7303_v9 = vpop.f32.mrf.mxu0 }
0x115d   :  { %v7304_v4 = vpop.f32.mrf.mxu0 }
0x115e   :  { %v7305_v27 = vadd.f32 %v7304_v4, %v7303_v9 }
0x115f   :  { %v4930_v57 = vpop.f32.mrf.mxu1  ;;  %v7306_v32 = vpop.f32.mrf.mxu0 }
0x1160   :  { %v4931_v15 = vadd.f32 %v7305_v27, %v4930_v57 }
0x1161   :  { %v7853_v56 = vpop.f32.mrf.mxu1  ;;  %v7307_v42 = vpop.f32.mrf.mxu0 }
0x1162   :  { %v7308_v13 = vadd.f32 %v7307_v42, %v7306_v32 }
0x1163   :  { %v11120_v10 = vpop.f32.mrf.mxu1  ;;  %v7309_v3 = vpop.f32.mrf.mxu0 }
0x1164   :  { %v4936_v36 = vadd.f32 %v7308_v13, %v11120_v10 }
0x1165   :  { %v7856_v53 = vpop.f32.mrf.mxu1  ;;  %v7310_v22 = vpop.f32.mrf.mxu0 }
0x1166   :  { %v7311_v16 = vadd.f32 %v7310_v22, %v7309_v3 }
0x1167   :  { %v11130_v19 = vpop.f32.mrf.mxu1  ;;  %v7312_v62 = vpop.f32.mrf.mxu0 }
0x1168   :  { %v4941_v33 = vadd.f32 %v7311_v16, %v11130_v19 }
0x1169   :  { %v7859_v6 = vpop.f32.mrf.mxu1  ;;  %v7313_v35 = vpop.f32.mrf.mxu0 }
0x116a   :  { %v7314_v58 = vadd.f32 %v7313_v35, %v7312_v62 }
0x116b   :  { %v11137_v54 = vpop.f32.mrf.mxu1  ;;  %v7315_v38 = vpop.f32.mrf.mxu0 }
0x116c   :  { %v4946_v10 = vadd.f32 %v7314_v58, %v11137_v54 }
0x116d   :  { %v7862_v7 = vpop.f32.mrf.mxu1  ;;  %v7316_v28 = vpop.f32.mrf.mxu0 }
0x116e   :  { %v7317_v30 = vadd.f32 %v7316_v28, %v7315_v38 }
0x116f   :  { %v11139_v29 = vpop.f32.mrf.mxu1  ;;  %v7318_v63 = vpop.f32.mrf.mxu0 }
0x1170   :  { %v4951_v6 = vadd.f32 %v7317_v30, %v11139_v29 }
0x1171   :  { %v7865_v2 = vpop.f32.mrf.mxu1  ;;  %v7319_v40 = vpop.f32.mrf.mxu0 }
0x1172   :  { %v7320_v7 = vadd.f32 %v7319_v40, %v7318_v63 }
0x1173   :  { %v11141_v31 = vpop.f32.mrf.mxu1  ;;  %v7321_v51 = vpop.f32.mrf.mxu0 }
0x1175   :  { %v7868_v45 = vpop.f32.mrf.mxu1  ;;  %v7322_v25 = vpop.f32.mrf.mxu0 }
0x1177   :  { %v11143_v5 = vpop.f32.mrf.mxu1  ;;  %v11149_v20 = vpop.f32.mrf.mxu0 }
0x1179   :  { %v7871_v50 = vpop.f32.mrf.mxu1  ;;  %v11151_v8 = vpop.f32.mrf.mxu0 }
0x117a   :  { %v4956_v50 = vadd.f32 %v7320_v7, %v11141_v31  ;;  %v7326_v42 = vadd.f32 %v11151_v8, %v11149_v20 }
0x117b   :  { %v11145_v24 = vpop.f32.mrf.mxu1  ;;  %v11153_v59 = vpop.f32.mrf.mxu0 }
0x117c   :  { %v4966_v22 = vadd.f32 %v7326_v42, %v11145_v24  ;;  %v3453_v24 = vld [vmem:[%s11673_s1 + $0x2f4] ss:$0 sm:$0xff] }
0x117d   :  { %v7874_v52 = vpop.f32.mrf.mxu1  ;;  %v11155_v44 = vpop.f32.mrf.mxu0 }
0x117e   :  { %v7323_v52 = vadd.f32 %v7322_v25, %v7321_v51  ;;  %v7329_v35 = vadd.f32 %v11155_v44, %v11153_v59  ;;  %v11940_v51 = vld [vmem:[#allocation2_spill] sm:$0xff]  ;;  %v11941_v59 = vld [vmem:[#allocation3_spill] sm:$0xff] }
0x117f   :  { %v11147_v1 = vpop.f32.mrf.mxu1 }
0x1180   :  { %v4961_v32 = vadd.f32 %v7323_v52, %v11143_v5  ;;  %v4971_v38 = vadd.f32 %v7329_v35, %v11147_v1 }
0x1181   :  { %v7877_v61 = vpop.f32.mrf.mxu1 }
0x11d6   :  { %v5067_v47 = vpop.f32.mrf.mxu0 }
0x11d7   :  { %8351 = vrcp.f32 %v5067_v47 }
0x11d8   :  { %v7882_v60 = vpop.f32.mrf.mxu0 }
0x11da   :  { %v5072_v43 = vpop.f32.mrf.mxu0 }
0x11db   :  { %8353 = vrcp.f32 %v5072_v43 }
0x11dc   :  { %v7885_v12 = vpop.f32.mrf.mxu0 }
0x11df   :  { %v5077_v48 = vpop.f32.mrf.mxu0 }
0x11e0   :  { %8355 = vrcp.f32 %v5077_v48  ;;  %v11942_v48 = vld [vmem:[#allocation4_spill] sm:$0xff] }
0x11e1   :  { %v7888_v55 = vpop.f32.mrf.mxu0 }
0x11e3   :  { %v5082_v41 = vpop.f32.mrf.mxu0 }
0x11e4   :  { %8357 = vrcp.f32 %v5082_v41  ;;  %v8352_v34 = vpop.eup %8351 }
0x11e5   :  { %v7891_v21 = vpop.f32.mrf.mxu0  ;;  %v5120_v17 = vmul.f32 %v8352_v34, %v4931_v15  ;;  %v11943_v34 = vld [vmem:[#allocation5_spill] sm:$0xff] }
0x11e7   :  { %v5087_v37 = vpop.f32.mrf.mxu0  ;;  %7916 = vmatmul.mubr.msk.f32.vlgmr.msra.gmra.mxu1 %vm984_vm1, %v5120_v17 }
0x11e8   :  { %8359 = vrcp.f32 %v5087_v37  ;;  %v8354_v39 = vpop.eup %8353  ;;  %7918 = vmatprep.mubr.msk.f32.mxu1 %vm8438_vm0, %v11786_v49 }
0x11e9   :  { %v7894_v18 = vpop.f32.mrf.mxu0  ;;  %v5121_v26 = vmul.f32 %v8354_v39, %v4936_v36  ;;  %v11944_v39 = vld [vmem:[#allocation35_spill] sm:$0xff] }
0x11eb   :  { %v5092_v11 = vpop.f32.mrf.mxu0  ;;  %7919 = vmatmul.mubr.msk.f32.gmra.mxu1 %vm984_vm1, %v5121_v26 }
0x11ec   :  { %8361 = vrcp.f32 %v5092_v11  ;;  %7921 = vmatprep.mubr.msk.f32.mxu1 %vm8438_vm0, %v11786_v49 }
0x11ed   :  { %v8356_v46 = vpop.eup %8355  ;;  %v7897_v57 = vpop.f32.mrf.mxu0 }
0x11ee   :  { %v5122_v56 = vmul.f32 %v8356_v46, %v4941_v33  ;;  %v11945_v46 = vld [vmem:[#allocation36_spill] sm:$0xff] }
0x11ef   :  { %v5097_v23 = vpop.f32.mrf.mxu0 }
0x11f0   :  { %8363 = vrcp.f32 %v5097_v23  ;;  %7922 = vmatmul.mubr.msk.f32.gmra.mxu1 %vm984_vm1, %v5122_v56 }
0x11f1   :  { %v8358_v53 = vpop.eup %8357  ;;  %v7900_v0 = vpop.f32.mrf.mxu0  ;;  %7924 = vmatprep.mubr.msk.f32.mxu1 %vm8438_vm0, %v11786_v49 }
0x11f2   :  { %v5123_v19 = vmul.f32 %v8358_v53, %v4946_v10  ;;  %v11946_v53 = vld [vmem:[#allocation37_spill] sm:$0xff] }
0x11f3   :  { %v5102_v14 = vpop.f32.mrf.mxu0 }
0x11f4   :  { %8365 = vrcp.f32 %v5102_v14  ;;  %7925 = vmatmul.mubr.msk.f32.gmra.mxu1 %vm984_vm1, %v5123_v19 }
0x11f5   :  { %v8360_v2 = vpop.eup %8359  ;;  %v7903_v45 = vpop.f32.mrf.mxu0  ;;  %7927 = vmatprep.mubr.msk.f32.mxu1 %vm8438_vm0, %v11786_v49 }
0x11f6   :  { %v5124_v54 = vmul.f32 %v8360_v2, %v4951_v6  ;;  %v11947_v2 = vld [vmem:[#allocation38_spill] sm:$0xff] }
0x11f7   :  { %v5107_v61 = vpop.f32.mrf.mxu0 }
0x11f8   :  { %7928 = vmatmul.mubr.msk.f32.gmra.mxu1 %vm984_vm1, %v5124_v54  ;;  %8367 = vrcp.f32 %v5107_v61 }
0x11f9   :  { %v8362_v9 = vpop.eup %8361  ;;  %7930 = vmatprep.mubr.msk.f32.mxu1 %vm8438_vm0, %v11786_v49  ;;  %v7906_v29 = vpop.f32.mrf.mxu0 }
0x11fa   :  { %v5125_v4 = vmul.f32 %v8362_v9, %v4956_v50  ;;  %v11948_v29 = vld [vmem:[#allocation39_spill] sm:$0xff] }
0x11fc   :  { %7931 = vmatmul.mubr.msk.f32.gmra.mxu1 %vm984_vm1, %v5125_v4 }
0x11fd   :  { %v8364_v3 = vpop.eup %8363  ;;  %7933 = vmatprep.mubr.msk.f32.mxu1 %vm8438_vm0, %v11786_v49 }
0x11fe   :  { %v5126_v31 = vmul.f32 %v8364_v3, %v4961_v32 }
0x1200   :  { %7934 = vmatmul.mubr.msk.f32.gmra.mxu1 %vm984_vm1, %v5126_v31 }
0x1201   :  { %v8366_v62 = vpop.eup %8365  ;;  %7936 = vmatprep.mubr.msk.f32.mxu1 %vm8438_vm0, %v11786_v49 }
0x1202   :  { %v5127_v5 = vmul.f32 %v8366_v62, %v4966_v22 }
0x1204   :  { %7937 = vmatmul.mubr.msk.f32.gmra.mxu1 %vm984_vm1, %v5127_v5 }
0x1205   :  { %7939 = vmatprep.mubr.msk.f32.mxu1 %vm8438_vm0, %v11786_v49  ;;  %v8368_v28 = vpop.eup %8367 }
0x1206   :  { %v5128_v63 = vmul.f32 %v8368_v28, %v4971_v38 }
0x1208   :  { %7940 = vmatmul.mubr.msk.f32.gmra.mxu1 %vm984_vm1, %v5128_v63 }
0x1209   :  { %7993 = vmatprep.mubr.msk.f32.mxu1 %vm8438_vm0, %v11786_v49 }
0x12a7   :  { %v5222_v40 = vpop.f32.mrf.mxu1 }
0x12a8   :  { %v5266_v25 = vadd.f32 %v5222_v40, %v11940_v51 }
0x12a9   :  { %v7917_v20 = vpop.f32.mrf.mxu1 }
0x12aa   :  { %v11200_v8 = vadd.f32 %v5266_v25, %v3453_v24 }
0x12ab   :  { %v5227_v1 = vpop.f32.mrf.mxu1 }
0x12ac   :  { %v5267_v44 = vadd.f32 %v5227_v1, %v11941_v59  ;;  %v5284_v47 = vsel %vm984_vm1, %v11200_v8, 0.0 }
0x12ad   :  { %5285 = vadd.xlane.f32.xlu1 %v5284_v47  ;;  %v7920_v60 = vpop.f32.mrf.mxu1 }
0x12ae   :  { %v11205_v43 = vadd.f32 %v5267_v44, %v3453_v24 }
0x12b0   :  { %v5232_v12 = vpop.f32.mrf.mxu1  ;;  %v5287_v55 = vsel %vm984_vm1, %v11205_v43, 0.0 }
0x12b1   :  { %v5268_v27 = vadd.f32 %v5232_v12, %v11942_v48  ;;  %5288 = vadd.xlane.f32.xlu0 %v5287_v55 }
0x12b2   :  { %v7923_v41 = vpop.f32.mrf.mxu1 }
0x12b3   :  { %v11210_v15 = vadd.f32 %v5268_v27, %v3453_v24 }
0x12b4   :  { %v5237_v13 = vpop.f32.mrf.mxu1 }
0x12b5   :  { %v5269_v21 = vadd.f32 %v5237_v13, %v11943_v34  ;;  %v5290_v17 = vsel %vm984_vm1, %v11210_v15, 0.0 }
0x12b6   :  { %5291 = vadd.xlane.f32.xlu0 %v5290_v17  ;;  %v7926_v37 = vpop.f32.mrf.mxu1 }
0x12b7   :  { %v11215_v36 = vadd.f32 %v5269_v21, %v3453_v24 }
0x12b8   :  { %v5242_v16 = vpop.f32.mrf.mxu1 }
0x12b9   :  { %v5270_v18 = vadd.f32 %v5242_v16, %v11944_v39  ;;  %v5293_v26 = vsel %vm984_vm1, %v11215_v36, 0.0 }
0x12ba   :  { %5294 = vadd.xlane.f32.xlu0 %v5293_v26  ;;  %v7929_v11 = vpop.f32.mrf.mxu1 }
0x12bb   :  { %v11220_v33 = vadd.f32 %v5270_v18, %v3453_v24 }
0x12bc   :  { %v5247_v58 = vpop.f32.mrf.mxu1 }
0x12bd   :  { %v5271_v57 = vadd.f32 %v5247_v58, %v11945_v46  ;;  %v5296_v56 = vsel %vm984_vm1, %v11220_v33, 0.0 }
0x12be   :  { %5297 = vadd.xlane.f32.xlu1 %v5296_v56  ;;  %v7932_v23 = vpop.f32.mrf.mxu1 }
0x12bf   :  { %v11225_v10 = vadd.f32 %v5271_v57, %v3453_v24 }
0x12c0   :  { %v5252_v30 = vpop.f32.mrf.mxu1 }
0x12c1   :  { %v5272_v0 = vadd.f32 %v5252_v30, %v11946_v53  ;;  %v5299_v19 = vsel %vm984_vm1, %v11225_v10, 0.0 }
0x12c2   :  { %5300 = vadd.xlane.f32.xlu0 %v5299_v19  ;;  %v7935_v14 = vpop.f32.mrf.mxu1 }
0x12c3   :  { %v11230_v6 = vadd.f32 %v5272_v0, %v3453_v24 }
0x12c4   :  { %v5257_v7 = vpop.f32.mrf.mxu1 }
0x12c5   :  { %v5273_v45 = vadd.f32 %v5257_v7, %v11947_v2  ;;  %v5302_v54 = vsel %vm984_vm1, %v11230_v6, 0.0  ;;  %v3468_v7 = vld [vmem:[%s11673_s1 + $0x3b0] sm:$0xff] }
0x12c6   :  { %5303 = vadd.xlane.f32.xlu1 %v5302_v54  ;;  %v7938_v50 = vpop.f32.mrf.mxu1  ;;  %7943 = vmatpush3.msra.mxu0 %v3468_v7 }
0x12c7   :  { %v11235_v52 = vadd.f32 %v5273_v45, %v3453_v24  ;;  %7944 = vmatprep.subr.mxu0 %v11786_v49  ;;  %v3467_v45 = vld [vmem:[%s11673_s1 + $0x3a0] sm:$0xff]  ;;  %v3466_v50 = vld [vmem:[%s11673_s1 + $0x390] sm:$0xff] }
0x12c8   :  { %v5262_v61 = vpop.f32.mrf.mxu1  ;;  %7945 = vmatpush3.msra.mxu0 %v3467_v45 }
0x12c9   :  { %v5305_v9 = vsel %vm984_vm1, %v11235_v52, 0.0  ;;  %v5274_v4 = vadd.f32 %v5262_v61, %v11948_v29  ;;  %7946 = vmatprep.subr.mxu0 %v11786_v49  ;;  %v3465_v61 = vld [vmem:[%s11673_s1 + $0x380] sm:$0xff] }
0x12ca   :  { %5306 = vadd.xlane.f32.xlu0 %v5305_v9  ;;  %v7941_v32 = vpop.f32.mrf.mxu1  ;;  %7947 = vmatpush3.msra.mxu0 %v3466_v50 }
0x12cb   :  { %v11240_v42 = vadd.f32 %v5274_v4, %v3453_v24  ;;  %7948 = vmatprep.subr.mxu0 %v11786_v49 }
0x12cc   :  { %7949 = vmatpush3.msra.mxu0 %v3465_v61 }
0x12cd   :  { %v5308_v3 = vsel %vm1009_vm2, %v11240_v42, 0.0 }
0x12ce   :  { %5309 = vadd.xlane.f32.xlu1 %v5308_v3 }
0x1336   :  { %v5286_v31 = vpop.xlane.xlu1 %5285 }
0x1337   :  { %v5311_v22 = vmul.f32 0.03125, %v5286_v31 }
0x1339   :  { %v11245_v62 = vsub.f32 %v11200_v8, %v5311_v22 }
0x133a   :  { %v5289_v35 = vpop.xlane.xlu0 %5288 }
0x133b   :  { %v5312_v5 = vmul.f32 0.03125, %v5289_v35  ;;  %v5329_v38 = vmul.f32 %v11245_v62, %v11245_v62 }
0x133d   :  { %v11250_v28 = vsub.f32 %v11205_v43, %v5312_v5  ;;  %v5338_v63 = vsel %vm984_vm1, %v5329_v38, 0.0 }
0x133e   :  { %5339 = vadd.xlane.f32.xlu0 %v5338_v63 }
0x133f   :  { %v5292_v24 = vpop.xlane.xlu0 %5291  ;;  %v5330_v51 = vmul.f32 %v11250_v28, %v11250_v28 }
0x1340   :  { %v5313_v40 = vmul.f32 0.03125, %v5292_v24 }
0x1341   :  { %v5341_v20 = vsel %vm984_vm1, %v5330_v51, 0.0 }
0x1342   :  { %v11256_v25 = vsub.f32 %v11210_v15, %v5313_v40  ;;  %5342 = vadd.xlane.f32.xlu1 %v5341_v20 }
0x1343   :  { %v5295_v1 = vpop.xlane.xlu0 %5294 }
0x1344   :  { %v5314_v59 = vmul.f32 0.03125, %v5295_v1  ;;  %v5331_v44 = vmul.f32 %v11256_v25, %v11256_v25  ;;  %v11316_v1 = vld [vmem:[%s11673_s1 + $0x2f2] ss:$0 sm:$0xff] }
0x1346   :  { %v11262_v47 = vsub.f32 %v11215_v36, %v5314_v59  ;;  %v5344_v60 = vsel %vm984_vm1, %v5331_v44, 0.0 }
0x1347   :  { %v5298_v12 = vpop.xlane.xlu1 %5297  ;;  %5345 = vadd.xlane.f32.xlu0 %v5344_v60  ;;  %v11322_v60 = vld [vmem:[%s11673_s1 + $0x2f3] ss:$0 sm:$0xff] }
0x1348   :  { %v5315_v48 = vmul.f32 0.03125, %v5298_v12  ;;  %v5332_v27 = vmul.f32 %v11262_v47, %v11262_v47 }
0x134a   :  { %v11268_v55 = vsub.f32 %v11220_v33, %v5315_v48  ;;  %v5347_v41 = vsel %vm984_vm1, %v5332_v27, 0.0 }
0x134b   :  { %v5301_v13 = vpop.xlane.xlu0 %5300  ;;  %5348 = vadd.xlane.f32.xlu1 %v5347_v41 }
0x134c   :  { %v5316_v34 = vmul.f32 0.03125, %v5301_v13  ;;  %v5333_v21 = vmul.f32 %v11268_v55, %v11268_v55 }
0x134e   :  { %v11274_v17 = vsub.f32 %v11225_v10, %v5316_v34  ;;  %v5350_v37 = vsel %vm984_vm1, %v5333_v21, 0.0 }
0x134f   :  { %v5304_v16 = vpop.xlane.xlu1 %5303  ;;  %5351 = vadd.xlane.f32.xlu0 %v5350_v37 }
0x1350   :  { %v5317_v39 = vmul.f32 0.03125, %v5304_v16  ;;  %v5334_v18 = vmul.f32 %v11274_v17, %v11274_v17 }
0x1352   :  { %v11280_v26 = vsub.f32 %v11230_v6, %v5317_v39  ;;  %v5353_v11 = vsel %vm984_vm1, %v5334_v18, 0.0 }
0x1353   :  { %v5307_v58 = vpop.xlane.xlu0 %5306  ;;  %5354 = vadd.xlane.f32.xlu1 %v5353_v11 }
0x1354   :  { %v5318_v46 = vmul.f32 0.03125, %v5307_v58  ;;  %v5335_v57 = vmul.f32 %v11280_v26, %v11280_v26 }
0x1356   :  { %v11286_v56 = vsub.f32 %v11235_v52, %v5318_v46  ;;  %v5356_v23 = vsel %vm984_vm1, %v5335_v57, 0.0 }
0x1357   :  { %5357 = vadd.xlane.f32.xlu0 %v5356_v23  ;;  %v5310_v30 = vpop.xlane.xlu1 %5309 }
0x1358   :  { %v5336_v53 = vmul.f32 %v11286_v56, %v11286_v56  ;;  %v5319_v0 = vmul.f32 0.03125, %v5310_v30 }
0x135a   :  { %v5359_v19 = vsel %vm984_vm1, %v5336_v53, 0.0  ;;  %v11293_v14 = vsub.f32 %v11240_v42, %v5319_v0 }
0x135b   :  { %5360 = vadd.xlane.f32.xlu1 %v5359_v19 }
0x135c   :  { %v5337_v2 = vmul.f32 %v11293_v14, %v11293_v14 }
0x135e   :  { %v5362_v54 = vsel %vm1009_vm2, %v5337_v2, 0.0 }
0x135f   :  { %5363 = vadd.xlane.f32.xlu0 %v5362_v54 }
0x13c7   :  { %v5340_v9 = vpop.xlane.xlu0 %5339 }
0x13c8   :  { %v5365_v29 = vmul.f32 0.03125, %v5340_v9 }
0x13ca   :  { %v5374_v4 = vadd.f32 1e-06, %v5365_v29 }
0x13cb   :  { %v5343_v32 = vpop.xlane.xlu1 %5342 }
0x13cc   :  { %8369 = vrsqrt.f32 %v5374_v4  ;;  %v5366_v3 = vmul.f32 0.03125, %v5343_v32 }
0x13ce   :  { %v5375_v31 = vadd.f32 1e-06, %v5366_v3 }
0x13d0   :  { %v5346_v22 = vpop.xlane.xlu0 %5345  ;;  %8371 = vrsqrt.f32 %v5375_v31 }
0x13d1   :  { %v5367_v35 = vmul.f32 0.03125, %v5346_v22 }
0x13d3   :  { %v5376_v5 = vadd.f32 1e-06, %v5367_v35 }
0x13d4   :  { %v5349_v38 = vpop.xlane.xlu1 %5348 }
0x13d5   :  { %8373 = vrsqrt.f32 %v5376_v5  ;;  %v5368_v63 = vmul.f32 0.03125, %v5349_v38 }
0x13d7   :  { %v5377_v24 = vadd.f32 1e-06, %v5368_v63 }
0x13d8   :  { %v5352_v40 = vpop.xlane.xlu0 %5351 }
0x13d9   :  { %8375 = vrsqrt.f32 %v5377_v24  ;;  %v5369_v51 = vmul.f32 0.03125, %v5352_v40  ;;  %v8370_v20 = vpop.eup %8369  ;;  %v3476_v40 = vld [vmem:[%s11673_s1 + $0x430] sm:$0xff] }
0x13da   :  { %v5392_v59 = vmul.f32 %v8370_v20, %v11245_v62  ;;  %7978 = vmatpush3.msra.mxu1 %v3476_v40  ;;  %v3473_v20 = vld [vmem:[%s11673_s1 + $0x400] sm:$0xff] }
0x13db   :  { %v5378_v44 = vadd.f32 1e-06, %v5369_v51  ;;  %7979 = vmatprep.subr.mxu1 %v11786_v49  ;;  %v3474_v51 = vld [vmem:[%s11673_s1 + $0x410] sm:$0xff] }
0x13dc   :  { %v5355_v12 = vpop.xlane.xlu1 %5354  ;;  %v5401_v48 = vmul.f32 %v5392_v59, %v11316_v1  ;;  %v3471_v59 = vld [vmem:[%s11673_s1 + $0x3e0] sm:$0xff] }
0x13dd   :  { %8377 = vrsqrt.f32 %v5378_v44  ;;  %v5370_v27 = vmul.f32 0.03125, %v5355_v12  ;;  %v8372_v41 = vpop.eup %8371  ;;  %v3470_v44 = vld [vmem:[%s11673_s1 + $0x3d0] sm:$0xff] }
0x13de   :  { %v5410_v13 = vadd.f32 %v5401_v48, %v11322_v60  ;;  %v5393_v34 = vmul.f32 %v8372_v41, %v11250_v28  ;;  %v11410_v12 = vld [vmem:[%s11673_s1 + $0x2f7] ss:$0 sm:$0xff] }
0x13df   :  { %v5379_v21 = vadd.f32 1e-06, %v5370_v27 }
0x13e0   :  { %v5358_v37 = vpop.xlane.xlu0 %5357  ;;  %7951 = vmatmul.mubr.msk.f32.vlgmr.msra.gmra.mxu0 %vm984_vm1, %v5410_v13  ;;  %v5402_v16 = vmul.f32 %v5393_v34, %v11316_v1 }
0x13e1   :  { %8379 = vrsqrt.f32 %v5379_v21  ;;  %v5371_v62 = vmul.f32 0.03125, %v5358_v37  ;;  %7953 = vmatprep.mubr.msk.f32.mxu0 %vm8438_vm0, %v11786_v49 }
0x13e2   :  { %v8374_v39 = vpop.eup %8373  ;;  %v5411_v58 = vadd.f32 %v5402_v16, %v11322_v60 }
0x13e3   :  { %v5394_v18 = vmul.f32 %v8374_v39, %v11256_v25  ;;  %v5380_v11 = vadd.f32 1e-06, %v5371_v62 }
0x13e4   :  { %v5361_v46 = vpop.xlane.xlu1 %5360  ;;  %7954 = vmatmul.mubr.msk.f32.gmra.mxu0 %vm984_vm1, %v5411_v58 }
0x13e5   :  { %8381 = vrsqrt.f32 %v5380_v11  ;;  %v5372_v28 = vmul.f32 0.03125, %v5361_v46  ;;  %v5403_v57 = vmul.f32 %v5394_v18, %v11316_v1  ;;  %7956 = vmatprep.mubr.msk.f32.mxu0 %vm8438_vm0, %v11786_v49 }
0x13e6   :  { %v8376_v23 = vpop.eup %8375 }
0x13e7   :  { %v5395_v30 = vmul.f32 %v8376_v23, %v11262_v47  ;;  %v5381_v53 = vadd.f32 1e-06, %v5372_v28  ;;  %v5412_v0 = vadd.f32 %v5403_v57, %v11322_v60 }
0x13e8   :  { %v5364_v25 = vpop.xlane.xlu0 %5363 }
0x13e9   :  { %8383 = vrsqrt.f32 %v5381_v53  ;;  %7957 = vmatmul.mubr.msk.f32.gmra.mxu0 %vm984_vm1, %v5412_v0  ;;  %v5404_v19 = vmul.f32 %v5395_v30, %v11316_v1  ;;  %v5373_v2 = vmul.f32 0.03125, %v5364_v25 }
0x13ea   :  { %v8378_v7 = vpop.eup %8377  ;;  %7959 = vmatprep.mubr.msk.f32.mxu0 %vm8438_vm0, %v11786_v49 }
0x13eb   :  { %v5396_v45 = vmul.f32 %v8378_v7, %v11268_v55  ;;  %v5413_v54 = vadd.f32 %v5404_v19, %v11322_v60  ;;  %v5382_v50 = vadd.f32 1e-06, %v5373_v2 }
0x13ed   :  { %7960 = vmatmul.mubr.msk.f32.gmra.mxu0 %vm984_vm1, %v5413_v54  ;;  %v5405_v47 = vmul.f32 %v5396_v45, %v11316_v1  ;;  %8385 = vrsqrt.f32 %v5382_v50 }
0x13ee   :  { %v8380_v61 = vpop.eup %8379  ;;  %7962 = vmatprep.mubr.msk.f32.mxu0 %vm8438_vm0, %v11786_v49 }
0x13ef   :  { %v5397_v9 = vmul.f32 %v8380_v61, %v11274_v17  ;;  %v5414_v29 = vadd.f32 %v5405_v47, %v11322_v60 }
0x13f1   :  { %7963 = vmatmul.mubr.msk.f32.gmra.mxu0 %vm984_vm1, %v5414_v29  ;;  %v5406_v55 = vmul.f32 %v5397_v9, %v11316_v1 }
0x13f2   :  { %v8382_v4 = vpop.eup %8381  ;;  %7965 = vmatprep.mubr.msk.f32.mxu0 %vm8438_vm0, %v11786_v49 }
0x13f3   :  { %v5398_v32 = vmul.f32 %v8382_v4, %v11280_v26  ;;  %v5415_v3 = vadd.f32 %v5406_v55, %v11322_v60 }
0x13f5   :  { %7966 = vmatmul.mubr.msk.f32.gmra.mxu0 %vm984_vm1, %v5415_v3  ;;  %v5407_v31 = vmul.f32 %v5398_v32, %v11316_v1 }
0x13f6   :  { %v8384_v22 = vpop.eup %8383  ;;  %7968 = vmatprep.mubr.msk.f32.mxu0 %vm8438_vm0, %v11786_v49 }
0x13f7   :  { %v5399_v17 = vmul.f32 %v8384_v22, %v11286_v56  ;;  %v5416_v35 = vadd.f32 %v5407_v31, %v11322_v60 }
0x13f9   :  { %7969 = vmatmul.mubr.msk.f32.gmra.mxu0 %vm984_vm1, %v5416_v35  ;;  %v5408_v5 = vmul.f32 %v5399_v17, %v11316_v1 }
0x13fa   :  { %7971 = vmatprep.mubr.msk.f32.mxu0 %vm8438_vm0, %v11786_v49  ;;  %v8386_v26 = vpop.eup %8385 }
0x13fb   :  { %v5417_v38 = vadd.f32 %v5408_v5, %v11322_v60  ;;  %v5400_v63 = vmul.f32 %v8386_v26, %v11293_v14  ;;  %v3475_v14 = vld [vmem:[%s11673_s1 + $0x420] sm:$0xff] }
0x13fc   :  { %7980 = vmatpush3.msra.mxu1 %v3475_v14 }
0x13fd   :  { %7972 = vmatmul.mubr.msk.f32.gmra.mxu0 %vm984_vm1, %v5417_v38  ;;  %v5409_v56 = vmul.f32 %v5400_v63, %v11316_v1  ;;  %7981 = vmatprep.subr.mxu1 %v11786_v49  ;;  %v3472_v1 = vld [vmem:[%s11673_s1 + $0x3f0] sm:$0xff] }
0x13fe   :  { %7974 = vmatprep.mubr.msk.f32.mxu0 %vm8438_vm0, %v11786_v49  ;;  %7982 = vmatpush3.msra.mxu1 %v3474_v51 }
0x13ff   :  { %v5418_v24 = vadd.f32 %v5409_v56, %v11322_v60  ;;  %7983 = vmatprep.subr.mxu1 %v11786_v49  ;;  %v3469_v60 = vld [vmem:[%s11673_s1 + $0x3c0] sm:$0xff] }
0x1400   :  { %7984 = vmatpush3.msra.mxu1 %v3473_v20 }
0x1401   :  { %7975 = vmatmul.mubr.msk.f32.gmra.mxu0 %vm984_vm1, %v5418_v24  ;;  %7985 = vmatprep.subr.mxu1 %v11786_v49 }
0x1402   :  { %7986 = vmatpush3.msra.mxu1 %v3472_v1 }
0x1403   :  { %7987 = vmatprep.subr.mxu1 %v11786_v49 }
0x1404   :  { %7988 = vmatpush3.msra.mxu1 %v3471_v59 }
0x1405   :  { %7989 = vmatprep.subr.mxu1 %v11786_v49 }
0x1406   :  { %7990 = vmatpush3.msra.mxu1 %v3470_v44 }
0x1407   :  { %7991 = vmatprep.subr.mxu1 %v11786_v49 }
0x1408   :  { %7992 = vmatpush3.msra.mxu1 %v3469_v60 }
0x1409   :  { %8045 = vmatprep.subr.mxu1 %v11786_v49 }
0x14a0   :  { %v5512_v48 = vpop.f32.mrf.mxu0 }
0x14a1   :  { %v5513_v27 = vadd.f32 %v5512_v48, %v11410_v12 }
0x14a2   :  { %v7952_v41 = vpop.f32.mrf.mxu0 }
0x14a3   :  { %v5565_v13 = vmul.f32 0.044715, %v5513_v27  ;;  %v5556_v20 = vmul.f32 0.5, %v5513_v27 }
0x14a4   :  { %v5517_v34 = vpop.f32.mrf.mxu0 }
0x14a5   :  { %v5574_v21 = vmul.f32 %v5565_v13, %v5513_v27  ;;  %v5518_v37 = vadd.f32 %v5517_v34, %v11410_v12 }
0x14a6   :  { %v7955_v62 = vpop.f32.mrf.mxu0 }
0x14a7   :  { %v5583_v16 = vmul.f32 %v5574_v21, %v5513_v27  ;;  %v5566_v39 = vmul.f32 0.044715, %v5518_v37 }
0x14a9   :  { %v5522_v18 = vpop.f32.mrf.mxu0  ;;  %v5592_v11 = vadd.f32 %v5583_v16, %v5513_v27  ;;  %v5575_v58 = vmul.f32 %v5566_v39, %v5518_v37  ;;  %v5557_v39 = vmul.f32 0.5, %v5518_v37 }
0x14aa   :  { %v11415_v46 = vadd.f32 %v5522_v18, %v11410_v12 }
0x14ab   :  { %v7958_v28 = vpop.f32.mrf.mxu0  ;;  %v5601_v57 = vmul.f32 0.7978846, %v5592_v11  ;;  %v5584_v23 = vmul.f32 %v5575_v58, %v5518_v37 }
0x14ac   :  { %v5567_v30 = vmul.f32 0.044715, %v11415_v46 }
0x14ad   :  { %v5527_v53 = vpop.f32.mrf.mxu0  ;;  %8387 = vtanh.f32 %v5601_v57  ;;  %v5593_v0 = vadd.f32 %v5584_v23, %v5518_v37  ;;  %v5558_v37 = vmul.f32 0.5, %v11415_v46 }
0x14ae   :  { %v5576_v25 = vmul.f32 %v5567_v30, %v11415_v46  ;;  %v11420_v19 = vadd.f32 %v5527_v53, %v11410_v12 }
0x14af   :  { %v7961_v7 = vpop.f32.mrf.mxu0  ;;  %v5602_v2 = vmul.f32 0.7978846, %v5593_v0 }
0x14b0   :  { %v5585_v45 = vmul.f32 %v5576_v25, %v11415_v46  ;;  %v5568_v54 = vmul.f32 0.044715, %v11420_v19 }
0x14b1   :  { %v5532_v50 = vpop.f32.mrf.mxu0  ;;  %8389 = vtanh.f32 %v5602_v2 }
0x14b2   :  { %v5594_v47 = vadd.f32 %v5585_v45, %v11415_v46  ;;  %v5577_v61 = vmul.f32 %v5568_v54, %v11420_v19  ;;  %v11427_v9 = vadd.f32 %v5532_v50, %v11410_v12 }
0x14b3   :  { %v7964_v29 = vpop.f32.mrf.mxu0 }
0x14b4   :  { %v5603_v55 = vmul.f32 0.7978846, %v5594_v47  ;;  %v5586_v4 = vmul.f32 %v5577_v61, %v11420_v19  ;;  %v5569_v32 = vmul.f32 0.044715, %v11427_v9 }
0x14b5   :  { %v5537_v3 = vpop.f32.mrf.mxu0 }
0x14b6   :  { %8391 = vtanh.f32 %v5603_v55  ;;  %v5595_v31 = vadd.f32 %v5586_v4, %v11420_v19  ;;  %v5578_v22 = vmul.f32 %v5569_v32, %v11427_v9  ;;  %v11434_v17 = vadd.f32 %v5537_v3, %v11410_v12 }
0x14b7   :  { %v7967_v35 = vpop.f32.mrf.mxu0  ;;  %v5559_v55 = vmul.f32 0.5, %v11420_v19 }
0x14b8   :  { %v5604_v5 = vmul.f32 0.7978846, %v5595_v31  ;;  %v5587_v26 = vmul.f32 %v5578_v22, %v11427_v9  ;;  %v5570_v38 = vmul.f32 0.044715, %v11434_v17  ;;  %v5560_v22 = vmul.f32 0.5, %v11427_v9 }
0x14b9   :  { %v5542_v63 = vpop.f32.mrf.mxu0 }
0x14ba   :  { %8393 = vtanh.f32 %v5604_v5  ;;  %v5596_v56 = vadd.f32 %v5587_v26, %v11427_v9  ;;  %v5579_v24 = vmul.f32 %v5570_v38, %v11434_v17  ;;  %v11441_v40 = vadd.f32 %v5542_v63, %v11410_v12  ;;  %v8388_v14 = vpop.eup %8387 }
0x14bb   :  { %v7970_v51 = vpop.f32.mrf.mxu0  ;;  %v5619_v1 = vadd.f32 1.0, %v8388_v14  ;;  %v5561_v38 = vmul.f32 0.5, %v11434_v17 }
0x14bc   :  { %v5605_v59 = vmul.f32 0.7978846, %v5596_v56  ;;  %v5588_v44 = vmul.f32 %v5579_v24, %v11434_v17  ;;  %v5571_v60 = vmul.f32 0.044715, %v11441_v40  ;;  %v5562_v24 = vmul.f32 0.5, %v11441_v40 }
0x14bd   :  { %v5547_v48 = vpop.f32.mrf.mxu0  ;;  %v5628_v41 = vmul.f32 %v5619_v1, %v5556_v20 }
0x14be   :  { %8395 = vtanh.f32 %v5605_v59  ;;  %v5597_v13 = vadd.f32 %v5588_v44, %v11434_v17  ;;  %v5548_v34 = vadd.f32 %v5547_v48, %v11410_v12  ;;  %v8390_v21 = vpop.eup %8389  ;;  %v5580_v62 = vmul.f32 %v5571_v60, %v11441_v40 }
0x14bf   :  { %v7973_v16 = vpop.f32.mrf.mxu0  ;;  %7994 = vmatmul.mubr.msk.f32.vlgmr.msra.gmra.mxu1 %vm3293_vm11, %v5628_v41  ;;  %v5620_v11 = vadd.f32 1.0, %v8390_v21 }
0x14c0   :  { %v5606_v18 = vmul.f32 0.7978846, %v5597_v13  ;;  %v5572_v27 = vmul.f32 0.044715, %v5548_v34  ;;  %v5589_v58 = vmul.f32 %v5580_v62, %v11441_v40  ;;  %7996 = vmatprep.mubr.msk.f32.mxu1 %vm8438_vm0, %v11786_v49  ;;  %v5563_v1 = vmul.f32 0.5, %v5548_v34 }
0x14c1   :  { %v5552_v57 = vpop.f32.mrf.mxu0  ;;  %v5629_v23 = vmul.f32 %v5620_v11, %v5557_v39  ;;  %v3454_v39 = vld [vmem:[%s11673_s1 + $0x2f5] ss:$0 sm:$0xff] }
0x14c2   :  { %8397 = vtanh.f32 %v5606_v18  ;;  %v5581_v28 = vmul.f32 %v5572_v27, %v5548_v34  ;;  %v5598_v53 = vadd.f32 %v5589_v58, %v11441_v40  ;;  %v5553_v0 = vadd.f32 %v5552_v57, %v11410_v12 }
0x14c3   :  { %v8392_v30 = vpop.eup %8391  ;;  %v7976_v7 = vpop.f32.mrf.mxu0  ;;  %7997 = vmatmul.mubr.msk.f32.gmra.mxu1 %vm3293_vm11, %v5629_v23 }
0x14c4   :  { %v5590_v25 = vmul.f32 %v5581_v28, %v5548_v34  ;;  %v5621_v2 = vadd.f32 1.0, %v8392_v30  ;;  %v5607_v45 = vmul.f32 0.7978846, %v5598_v53  ;;  %v5573_v54 = vmul.f32 0.044715, %v5553_v0  ;;  %7999 = vmatprep.mubr.msk.f32.mxu1 %vm8438_vm0, %v11786_v49 }
0x14c5   :  { %v5564_v60 = vmul.f32 0.5, %v5553_v0 }
0x14c6   :  { %v5599_v50 = vadd.f32 %v5590_v25, %v5548_v34  ;;  %v5630_v47 = vmul.f32 %v5621_v2, %v5558_v37  ;;  %8399 = vtanh.f32 %v5607_v45  ;;  %v5582_v29 = vmul.f32 %v5573_v54, %v5553_v0 }
0x14c7   :  { %v8394_v61 = vpop.eup %8393 }
0x14c8   :  { %v5608_v12 = vmul.f32 0.7978846, %v5599_v50  ;;  %8000 = vmatmul.mubr.msk.f32.gmra.mxu1 %vm3293_vm11, %v5630_v47  ;;  %v5622_v46 = vadd.f32 1.0, %v8394_v61  ;;  %v5591_v4 = vmul.f32 %v5582_v29, %v5553_v0 }
0x14c9   :  { %8002 = vmatprep.mubr.msk.f32.mxu1 %vm8438_vm0, %v11786_v49 }
0x14ca   :  { %8401 = vtanh.f32 %v5608_v12  ;;  %v5631_v32 = vmul.f32 %v5622_v46, %v5559_v55  ;;  %v5600_v31 = vadd.f32 %v5591_v4, %v5553_v0 }
0x14cb   :  { %v8396_v3 = vpop.eup %8395 }
0x14cc   :  { %8003 = vmatmul.mubr.msk.f32.gmra.mxu1 %vm3293_vm11, %v5631_v32  ;;  %v5623_v35 = vadd.f32 1.0, %v8396_v3  ;;  %v5609_v5 = vmul.f32 0.7978846, %v5600_v31 }
0x14cd   :  { %8005 = vmatprep.mubr.msk.f32.mxu1 %vm8438_vm0, %v11786_v49 }
0x14ce   :  { %v5632_v19 = vmul.f32 %v5623_v35, %v5560_v22  ;;  %8403 = vtanh.f32 %v5609_v5 }
0x14cf   :  { %v8398_v26 = vpop.eup %8397 }
0x14d0   :  { %8006 = vmatmul.mubr.msk.f32.gmra.mxu1 %vm3293_vm11, %v5632_v19  ;;  %v5624_v63 = vadd.f32 1.0, %v8398_v26 }
0x14d1   :  { %8008 = vmatprep.mubr.msk.f32.mxu1 %vm8438_vm0, %v11786_v49 }
0x14d2   :  { %v5633_v56 = vmul.f32 %v5624_v63, %v5561_v38 }
0x14d3   :  { %v8400_v9 = vpop.eup %8399 }
0x14d4   :  { %8009 = vmatmul.mubr.msk.f32.gmra.mxu1 %vm3293_vm11, %v5633_v56  ;;  %v5625_v14 = vadd.f32 1.0, %v8400_v9 }
0x14d5   :  { %8011 = vmatprep.mubr.msk.f32.mxu1 %vm8438_vm0, %v11786_v49 }
0x14d6   :  { %v5634_v20 = vmul.f32 %v5625_v14, %v5562_v24 }
0x14d7   :  { %v8402_v51 = vpop.eup %8401 }
0x14d8   :  { %v5626_v17 = vadd.f32 1.0, %v8402_v51  ;;  %8012 = vmatmul.mubr.msk.f32.gmra.mxu1 %vm3293_vm11, %v5634_v20 }
0x14d9   :  { %8014 = vmatprep.mubr.msk.f32.mxu1 %vm8438_vm0, %v11786_v49 }
0x14da   :  { %v5635_v59 = vmul.f32 %v5626_v17, %v5563_v1 }
0x14db   :  { %v8404_v44 = vpop.eup %8403 }
0x14dc   :  { %8015 = vmatmul.mubr.msk.f32.gmra.mxu1 %vm3293_vm11, %v5635_v59  ;;  %v5627_v48 = vadd.f32 1.0, %v8404_v44 }
0x14dd   :  { %8017 = vmatprep.mubr.msk.f32.mxu1 %vm8438_vm0, %v11786_v49 }
0x14de   :  { %v5636_v40 = vmul.f32 %v5627_v48, %v5564_v60 }
0x14e0   :  { %8018 = vmatmul.mubr.msk.f32.gmra.mxu1 %vm3293_vm11, %v5636_v40  ;;  %vm5993_vm11 = vcmask 1040384  }
0x14e1   :  { %8049 = vmatprep.mubr.msk.f32.mxu1 %vm8438_vm0, %v11786_v49 }
0x157f   :  { %v5730_v41 = vpop.f32.mrf.mxu1 }
0x1580   :  { %v5774_v47 = vadd.f32 %v5730_v41, %v11200_v8 }
0x1581   :  { %v7995_v13 = vpop.f32.mrf.mxu1 }
0x1582   :  { %v5783_v46 = vadd.f32 %v5774_v47, %v3454_v39 }
0x1583   :  { %v5735_v34 = vpop.f32.mrf.mxu1 }
0x1584   :  { %v5775_v32 = vadd.f32 %v5735_v34, %v11205_v43  ;;  %v5798_v5 = vsel %vm984_vm1, %v5783_v46, 0.0 }
0x1585   :  { %v7998_v21 = vpop.f32.mrf.mxu1 }
0x1586   :  { %v5784_v35 = vadd.f32 %v5775_v32, %v3454_v39 }
0x1588   :  { %v5740_v62 = vpop.f32.mrf.mxu1  ;;  %v5801_v43 = vsel %vm984_vm1, %v5784_v35, 0.0 }
0x1589   :  { %v5776_v16 = vadd.f32 %v5740_v62, %v11210_v15 }
0x158a   :  { %v8001_v18 = vpop.f32.mrf.mxu1 }
0x158b   :  { %v5785_v27 = vadd.f32 %v5776_v16, %v3454_v39 }
0x158c   :  { %v5745_v11 = vpop.f32.mrf.mxu1 }
0x158d   :  { %v5777_v58 = vadd.f32 %v5745_v11, %v11215_v36  ;;  %v5804_v28 = vsel %vm984_vm1, %v5785_v27, 0.0 }
0x158e   :  { %5805 = vadd.xlane.f32.xlu1 %v5804_v28  ;;  %v8004_v57 = vpop.f32.mrf.mxu1 }
0x158f   :  { %v5786_v23 = vadd.f32 %v5777_v58, %v3454_v39 }
0x1590   :  { %v5750_v30 = vpop.f32.mrf.mxu1 }
0x1591   :  { %v5778_v53 = vadd.f32 %v5750_v30, %v11220_v33  ;;  %v5807_v0 = vsel %vm984_vm1, %v5786_v23, 0.0 }
0x1592   :  { %5808 = vadd.xlane.f32.xlu0 %v5807_v0  ;;  %v8007_v15 = vpop.f32.mrf.mxu1 }
0x1593   :  { %v5787_v37 = vadd.f32 %v5778_v53, %v3454_v39 }
0x1594   :  { %v5755_v25 = vpop.f32.mrf.mxu1 }
0x1595   :  { %v5810_v7 = vsel %vm984_vm1, %v5787_v37, 0.0  ;;  %v5779_v3 = vadd.f32 %v5755_v25, %v11225_v10 }
0x1596   :  { %5811 = vadd.xlane.f32.xlu1 %v5810_v7  ;;  %v8010_v2 = vpop.f32.mrf.mxu1 }
0x1598   :  { %v5760_v45 = vpop.f32.mrf.mxu1 }
0x1599   :  { %v5780_v36 = vadd.f32 %v5760_v45, %v11230_v6 }
0x159a   :  { %v8013_v54 = vpop.f32.mrf.mxu1 }
0x159b   :  { %v5789_v50 = vadd.f32 %v5780_v36, %v3454_v39 }
0x159c   :  { %v5765_v61 = vpop.f32.mrf.mxu1 }
0x159d   :  { %v5781_v33 = vadd.f32 %v5765_v61, %v11235_v52  ;;  %v5816_v29 = vsel %vm984_vm1, %v5789_v50, 0.0  ;;  %v5788_v52 = vadd.f32 %v5779_v3, %v3454_v39 }
0x159e   :  { %5817 = vadd.xlane.f32.xlu0 %v5816_v29  ;;  %v8016_v55 = vpop.f32.mrf.mxu1 }
0x159f   :  { %v5790_v12 = vadd.f32 %v5781_v33, %v3454_v39  ;;  %v5813_v26 = vsel %vm984_vm1, %v5788_v52, 0.0 }
0x15a0   :  { %v5770_v4 = vpop.f32.mrf.mxu1 }
0x15a1   :  { %v5782_v6 = vadd.f32 %v5770_v4, %v11240_v42  ;;  %v5819_v31 = vsel %vm984_vm1, %v5790_v12, 0.0 }
0x15a2   :  { %5820 = vadd.xlane.f32.xlu1 %v5819_v31  ;;  %v8019_v8 = vpop.f32.mrf.mxu1 }
0x15a3   :  { %v5791_v22 = vadd.f32 %v5782_v6, %v3454_v39 }
0x15a5   :  { %v5822_v19 = vsel %vm1009_vm2, %v5791_v22, 0.0 }
0x15a6   :  { %5799 = vadd.xlane.f32.xlu1 %v5798_v5  ;;  %5823 = vadd.xlane.f32.xlu0 %v5822_v19 }
0x15aa   :  { %5814 = vadd.xlane.f32.xlu1 %v5813_v26  ;;  %5802 = vadd.xlane.f32.xlu0 %v5801_v43 }
0x1617   :  { %v5806_v10 = vpop.xlane.xlu1 %5805 }
0x1618   :  { %v5827_v42 = vmul.f32 0.03125, %v5806_v10  ;;  %v11554_v10 = vld [vmem:[%s11673_s1 + $0x190] ss:$0 sm:$0xff] }
0x161a   :  { %v11504_v38 = vsub.f32 %v5785_v27, %v5827_v42 }
0x161b   :  { %v5809_v63 = vpop.xlane.xlu0 %5808 }
0x161c   :  { %v5828_v56 = vmul.f32 0.03125, %v5809_v63  ;;  %v5845_v9 = vmul.f32 %v11504_v38, %v11504_v38 }
0x161e   :  { %v11508_v24 = vsub.f32 %v5786_v23, %v5828_v56  ;;  %v5858_v14 = vsel %vm984_vm1, %v5845_v9, 0.0 }
0x161f   :  { %v5812_v51 = vpop.xlane.xlu1 %5811  ;;  %5859 = vadd.xlane.f32.xlu0 %v5858_v14 }
0x1620   :  { %v5829_v20 = vmul.f32 0.03125, %v5812_v51  ;;  %v5846_v1 = vmul.f32 %v11508_v24, %v11508_v24 }
0x1622   :  { %v11513_v17 = vsub.f32 %v5787_v37, %v5829_v20  ;;  %v5861_v59 = vsel %vm984_vm1, %v5846_v1, 0.0 }
0x1623   :  { %5862 = vadd.xlane.f32.xlu1 %v5861_v59 }
0x1624   :  { %v5847_v44 = vmul.f32 %v11513_v17, %v11513_v17 }
0x1626   :  { %v5864_v60 = vsel %vm984_vm1, %v5847_v44, 0.0 }
0x1627   :  { %5865 = vadd.xlane.f32.xlu0 %v5864_v60  ;;  %v5818_v48 = vpop.xlane.xlu0 %5817 }
0x1628   :  { %v5831_v40 = vmul.f32 0.03125, %v5818_v48 }
0x162a   :  { %v11519_v41 = vsub.f32 %v5789_v50, %v5831_v40 }
0x162b   :  { %v5821_v13 = vpop.xlane.xlu1 %5820 }
0x162c   :  { %v5832_v34 = vmul.f32 0.03125, %v5821_v13  ;;  %v5849_v21 = vmul.f32 %v11519_v41, %v11519_v41 }
0x162e   :  { %v11523_v62 = vsub.f32 %v5790_v12, %v5832_v34  ;;  %v5870_v16 = vsel %vm984_vm1, %v5849_v21, 0.0 }
0x162f   :  { %5871 = vadd.xlane.f32.xlu1 %v5870_v16  ;;  %v5800_v39 = vpop.xlane.xlu1 %5799  ;;  %v5824_v18 = vpop.xlane.xlu0 %5823 }
0x1630   :  { %v5825_v27 = vmul.f32 0.03125, %v5800_v39  ;;  %v5833_v11 = vmul.f32 0.03125, %v5824_v18  ;;  %v5850_v58 = vmul.f32 %v11523_v62, %v11523_v62 }
0x1632   :  { %v11528_v28 = vsub.f32 %v5783_v46, %v5825_v27  ;;  %v11530_v57 = vsub.f32 %v5791_v22, %v5833_v11  ;;  %v5873_v23 = vsel %vm984_vm1, %v5850_v58, 0.0 }
0x1633   :  { %v5815_v30 = vpop.xlane.xlu1 %5814  ;;  %5874 = vadd.xlane.f32.xlu0 %v5873_v23  ;;  %v5803_v53 = vpop.xlane.xlu0 %5802 }
0x1634   :  { %v5830_v0 = vmul.f32 0.03125, %v5815_v30  ;;  %v5826_v15 = vmul.f32 0.03125, %v5803_v53  ;;  %v5843_v37 = vmul.f32 %v11528_v28, %v11528_v28  ;;  %v5851_v25 = vmul.f32 %v11530_v57, %v11530_v57 }
0x1636   :  { %v11537_v7 = vsub.f32 %v5788_v52, %v5830_v0  ;;  %v11539_v2 = vsub.f32 %v5784_v35, %v5826_v15  ;;  %v5852_v45 = vsel %vm984_vm1, %v5843_v37, 0.0  ;;  %v5876_v36 = vsel %vm1009_vm2, %v5851_v25, 0.0 }
0x1637   :  { %5853 = vadd.xlane.f32.xlu0 %v5852_v45  ;;  %5877 = vadd.xlane.f32.xlu1 %v5876_v36  ;;  %vm5954_vm2 = vcmask 1046528  }
0x1638   :  { %v5848_v54 = vmul.f32 %v11537_v7, %v11537_v7  ;;  %v5844_v50 = vmul.f32 %v11539_v2, %v11539_v2 }
0x163a   :  { %v5867_v47 = vsel %vm984_vm1, %v5848_v54, 0.0  ;;  %v5855_v61 = vsel %vm984_vm1, %v5844_v50, 0.0 }
0x163b   :  { %5868 = vadd.xlane.f32.xlu0 %v5867_v47  ;;  %5856 = vadd.xlane.f32.xlu1 %v5855_v61 }
0x16a8   :  { %v5860_v33 = vpop.xlane.xlu0 %5859 }
0x16a9   :  { %v5881_v29 = vmul.f32 0.03125, %v5860_v33 }
0x16ab   :  { %v5890_v55 = vadd.f32 1e-06, %v5881_v29 }
0x16ac   :  { %v5863_v12 = vpop.xlane.xlu1 %5862 }
0x16ad   :  { %v5882_v46 = vmul.f32 0.03125, %v5863_v12  ;;  %8405 = vrsqrt.f32 %v5890_v55 }
0x16af   :  { %v5891_v4 = vadd.f32 1e-06, %v5882_v46 }
0x16b0   :  { %v5866_v32 = vpop.xlane.xlu0 %5865 }
0x16b1   :  { %8407 = vrsqrt.f32 %v5891_v4  ;;  %v5883_v3 = vmul.f32 0.03125, %v5866_v32 }
0x16b3   :  { %v5892_v6 = vadd.f32 1e-06, %v5883_v3 }
0x16b5   :  { %8409 = vrsqrt.f32 %v5892_v6 }
0x16b8   :  { %v5872_v31 = vpop.xlane.xlu1 %5871 }
0x16b9   :  { %v5885_v8 = vmul.f32 0.03125, %v5872_v31 }
0x16ba   :  { %v8406_v22 = vpop.eup %8405 }
0x16bb   :  { %v5894_v35 = vadd.f32 1e-06, %v5885_v8  ;;  %v5908_v26 = vmul.f32 %v8406_v22, %v11504_v38 }
0x16bc   :  { %v5875_v52 = vpop.xlane.xlu0 %5874 }
0x16bd   :  { %8411 = vrsqrt.f32 %v5894_v35  ;;  %v5886_v19 = vmul.f32 0.03125, %v5875_v52  ;;  %v5917_v1 = vmul.f32 %v5908_v26, %v11554_v10 }
0x16be   :  { %v8408_v5 = vpop.eup %8407 }
0x16bf   :  { %v5909_v43 = vmul.f32 %v8408_v5, %v11508_v24  ;;  %v5895_v42 = vadd.f32 1e-06, %v5886_v19  ;;  %v5793_v24 = vld [vmem:[%s11673_s1 + $0x191] ss:$0 sm:$0xff] }
0x16c0   :  { %v5854_v56 = vpop.xlane.xlu0 %5853  ;;  %v5878_v9 = vpop.xlane.xlu1 %5877  ;;  %v5926_v16 = vadd.f32 %v5917_v1, %v5793_v24 }
0x16c1   :  { %v5918_v63 = vmul.f32 %v5909_v43, %v11554_v10  ;;  %8413 = vrsqrt.f32 %v5895_v42  ;;  %v5879_v51 = vmul.f32 0.03125, %v5854_v56  ;;  %v5887_v20 = vmul.f32 0.03125, %v5878_v9 }
0x16c2   :  { %v8410_v14 = vpop.eup %8409  ;;  %v5955_v23 = vrot.slane %v5926_v16, 1 }
0x16c3   :  { %v5910_v38 = vmul.f32 %v8410_v14, %v11513_v17  ;;  %v5888_v59 = vadd.f32 1e-06, %v5879_v51  ;;  %v5896_v44 = vadd.f32 1e-06, %v5887_v20  ;;  %v5927_v60 = vadd.f32 %v5918_v63, %v5793_v24 }
0x16c4   :  { %v5869_v48 = vpop.xlane.xlu0 %5868  ;;  %v5857_v40 = vpop.xlane.xlu1 %5856 }
0x16c5   :  { %v5919_v13 = vmul.f32 %v5910_v38, %v11554_v10  ;;  %8415 = vrsqrt.f32 %v5888_v59  ;;  %v5884_v34 = vmul.f32 0.03125, %v5869_v48  ;;  %v5880_v21 = vmul.f32 0.03125, %v5857_v40 }
0x16c6   :  { %8417 = vrsqrt.f32 %v5896_v44  ;;  %v5956_v17 = vrot.slane %v5927_v60, 1 }
0x16c7   :  { %v5928_v39 = vadd.f32 %v5919_v13, %v5793_v24  ;;  %v5893_v18 = vadd.f32 1e-06, %v5884_v34  ;;  %v5889_v27 = vadd.f32 1e-06, %v5880_v21 }
0x16c8   :  { %v5957_v0 = vsel %vm5954_vm2, %v5955_v23, %v5956_v17 }
0x16c9   :  { %v5958_v11 = vrot.slane %v5928_v39, 1  ;;  %8419 = vrsqrt.f32 %v5893_v18  ;;  %v5962_v45 = vsel %vm984_vm1, %v5957_v0, 0.0 }
0x16ca   :  { %v8412_v58 = vpop.eup %8411  ;;  %8421 = vrsqrt.f32 %v5889_v27 }
0x16cb   :  { %v5959_v30 = vsel %vm5954_vm2, %v5956_v17, %v5958_v11  ;;  %v5912_v53 = vmul.f32 %v8412_v58, %v11519_v41 }
0x16cc   :  { %v5963_v15 = vsel %vm984_vm1, %v5959_v30, 0.0 }
0x16cd   :  { %v5921_v36 = vmul.f32 %v5912_v53, %v11554_v10  ;;  %v5964_v54 = vadd.f32 %v5963_v15, %v5962_v45 }
0x16ce   :  { %v8414_v37 = vpop.eup %8413 }
0x16cf   :  { %v5913_v25 = vmul.f32 %v8414_v37, %v11523_v62  ;;  %v5930_v55 = vadd.f32 %v5921_v36, %v5793_v24  ;;  %v5965_v12 = vrot.slane %v5964_v54, 4 }
0x16d1   :  { %v5922_v50 = vmul.f32 %v5913_v25, %v11554_v10  ;;  %v5976_v35 = vrot.slane %v5930_v55, 3  ;;  %v5948_v9 = vrot.slane %v5930_v55, 2 }
0x16d2   :  { %v8416_v47 = vpop.eup %8415 }
0x16d3   :  { %v8418_v61 = vpop.eup %8417  ;;  %v5931_v33 = vadd.f32 %v5922_v50, %v5793_v24  ;;  %v5906_v29 = vmul.f32 %v8416_v47, %v11528_v28  ;;  %v5966_v28 = vadd.f32 %v5965_v12, %v5964_v54 }
0x16d4   :  { %v5914_v41 = vmul.f32 %v8418_v61, %v11530_v57 }
0x16d5   :  { %v5915_v46 = vmul.f32 %v5906_v29, %v11554_v10  ;;  %v5977_v62 = vrot.slane %v5931_v33, 3  ;;  %v5967_v63 = vrot.slane %v5966_v28, 2 }
0x16d6   :  { %v8420_v4 = vpop.eup %8419  ;;  %v5923_v32 = vmul.f32 %v5914_v41, %v11554_v10 }
0x16d7   :  { %v8422_v3 = vpop.eup %8421  ;;  %v5924_v6 = vadd.f32 %v5915_v46, %v5793_v24  ;;  %v5911_v31 = vmul.f32 %v8420_v4, %v11537_v7  ;;  %v5978_v26 = vsel %vm5975_vm3, %v5976_v35, %v5977_v62  ;;  %v5945_v7 = vrot.slane %v5928_v39, 2  ;;  %v5933_v35 = vld [vmem:[%s11673_s1 + $0x440] sm:$0xff] }
0x16d8   :  { %v5932_v8 = vadd.f32 %v5923_v32, %v5793_v24  ;;  %v5907_v22 = vmul.f32 %v8422_v3, %v11539_v2  ;;  %v5983_v14 = vsel %vm984_vm1, %v5978_v26, 0.0  ;;  %v5968_v44 = vadd.f32 %v5967_v63, %v5966_v28 }
0x16d9   :  { %v5995_v57 = vsel %vm984_vm1, %v5924_v6, 0.0  ;;  %v5920_v52 = vmul.f32 %v5911_v31, %v11554_v10  ;;  %v5936_v31 = vld [vmem:[%s11673_s1 + $0x470] sm:$0xff] }
0x16da   :  { %v5979_v5 = vrot.slane %v5932_v8, 3  ;;  %5996 = vadd.xlane.f32.xlu1 %v5995_v57  ;;  %v5916_v19 = vmul.f32 %v5907_v22, %v11554_v10  ;;  %v5969_v40 = vrot.slane %v5968_v44, 1  ;;  %8020 = vmatprep.subr.mxu0 %v5936_v31  ;;  %v5935_v8 = vld [vmem:[%s11673_s1 + $0x460] sm:$0xff]  ;;  %v5934_v22 = vld [vmem:[%s11673_s1 + $0x450] sm:$0xff] }
0x16db   :  { %v5929_v43 = vadd.f32 %v5920_v52, %v5793_v24  ;;  %8021 = vmatpush3.msra.mxu0 %v5936_v31 }
0x16dc   :  { %v5925_v42 = vadd.f32 %v5916_v19, %v5793_v24  ;;  %v5980_v56 = vsel %vm5975_vm3, %v5977_v62, %v5979_v5  ;;  %v5970_v21 = vadd.f32 %v5969_v40, %v5968_v44  ;;  %8022 = vmatprep.subr.mxu0 %v5935_v8 }
0x16dd   :  { %v5946_v2 = vrot.slane %v5929_v43, 2  ;;  %v5984_v51 = vsel %vm984_vm1, %v5980_v56, 0.0  ;;  %8023 = vmatpush3.msra.mxu0 %v5935_v8 }
0x16de   :  { %v5998_v20 = vsel %vm984_vm1, %v5925_v42, 0.0  ;;  %v5985_v1 = vadd.f32 %v5984_v51, %v5983_v14  ;;  %v5972_v18 = vmul.f32 0.0625, %v5970_v21  ;;  %8024 = vmatprep.subr.mxu0 %v5934_v22  ;;  %v5794_v14 = vld [vmem:[%s11673_s1 + $0x192] ss:$0 sm:$0xff] }
0x16df   :  { %5999 = vadd.xlane.f32.xlu0 %v5998_v20  ;;  %v5947_v10 = vsel %vm5944_vm13, %v5945_v7, %v5946_v2  ;;  %v5949_v38 = vsel %vm5944_vm13, %v5946_v2, %v5948_v9  ;;  %8025 = vmatpush3.msra.mxu0 %v5934_v22  ;;  %v5795_v20 = vld [vmem:[%s11673_s1 + $0x193] ss:$0 sm:$0xff] }
0x16e0   :  { %v6001_v59 = vsel %vm984_vm1, %v5947_v10, 0.0  ;;  %v5986_v24 = vrot.slane %v5985_v1, 4  ;;  %v6004_v60 = vsel %vm984_vm1, %v5949_v38, 0.0  ;;  %8026 = vmatprep.subr.mxu0 %v5933_v35 }
0x16e1   :  { %6002 = vadd.xlane.f32.xlu1 %v6001_v59  ;;  %8027 = vmatpush3.msra.mxu0 %v5933_v35 }
0x16e2   :  { %v5987_v48 = vadd.f32 %v5986_v24, %v5985_v1  ;;  %8034 = vmatprep.subr.mxu0 %v11786_v49 }
0x16e3   :  { %6005 = vadd.xlane.f32.xlu0 %v6004_v60 }
0x16e4   :  { %v5988_v13 = vrot.slane %v5987_v48, 2 }
0x16e6   :  { %v5989_v34 = vadd.f32 %v5988_v13, %v5987_v48 }
0x16e8   :  { %v5990_v16 = vrot.slane %v5989_v34, 1 }
0x16ea   :  { %v5991_v39 = vadd.f32 %v5990_v16, %v5989_v34 }
0x16ec   :  { %v5992_v27 = vmul.f32 0.0625, %v5991_v39 }
0x16ee   :  { %v5994_v17 = vsel %vm5993_vm11, %v5972_v18, %v5992_v27  ;;  %v5940_v18 = vld [vmem:[%s11673_s1 + $0x4b0] sm:$0xff] }
0x16ef   :  { %v6153_v11 = vsel %vm6152_vm9, %v5994_v17, 0.0 }
0x16f0   :  { %6154 = vadd.xlane.f32.xlu1 %v6153_v11  ;;  %v5939_v11 = vld [vmem:[%s11673_s1 + $0x4a0] sm:$0xff] }
0x1763   :  { %v5997_v58 = vpop.xlane.xlu1 %5996 }
0x1764   :  { %v6007_v23 = vmul.f32 0.03125, %v5997_v58 }
0x1766   :  { %v6011_v30 = vsub.f32 %v5924_v6, %v6007_v23  ;;  %v5938_v23 = vld [vmem:[%s11673_s1 + $0x490] sm:$0xff] }
0x1768   :  { %v6000_v53 = vpop.xlane.xlu0 %5999  ;;  %v6015_v0 = vmul.f32 %v6011_v30, %v6011_v30 }
0x1769   :  { %v6008_v15 = vmul.f32 0.03125, %v6000_v53 }
0x176a   :  { %v6003_v37 = vpop.xlane.xlu1 %6002  ;;  %v6019_v25 = vsel %vm984_vm1, %v6015_v0, 0.0 }
0x176b   :  { %v6012_v45 = vsub.f32 %v5925_v42, %v6008_v15  ;;  %v6009_v36 = vmul.f32 0.03125, %v6003_v37  ;;  %6020 = vadd.xlane.f32.xlu0 %v6019_v25  ;;  %v5796_v25 = vld [vmem:[%s11673_s1 + $0x194] ss:$0 sm:$0xff] }
0x176c   :  { %v6006_v54 = vpop.xlane.xlu0 %6005 }
0x176d   :  { %v6013_v50 = vsub.f32 %v5947_v10, %v6009_v36  ;;  %v6010_v47 = vmul.f32 0.03125, %v6006_v54  ;;  %v6016_v61 = vmul.f32 %v6012_v45, %v6012_v45 }
0x176f   :  { %v6014_v33 = vsub.f32 %v5949_v38, %v6010_v47  ;;  %v6022_v29 = vsel %vm984_vm1, %v6016_v61, 0.0  ;;  %v6017_v41 = vmul.f32 %v6013_v50, %v6013_v50 }
0x1770   :  { %6023 = vadd.xlane.f32.xlu1 %v6022_v29 }
0x1771   :  { %v6025_v55 = vsel %vm984_vm1, %v6017_v41, 0.0  ;;  %v6018_v12 = vmul.f32 %v6014_v33, %v6014_v33  ;;  %v5797_v41 = vld [vmem:[%s11673_s1 + $0x195] ss:$0 sm:$0xff] }
0x1772   :  { %6026 = vadd.xlane.f32.xlu0 %v6025_v55 }
0x1773   :  { %v6028_v46 = vsel %vm984_vm1, %v6018_v12, 0.0 }
0x1774   :  { %6029 = vadd.xlane.f32.xlu1 %v6028_v46 }
0x1779   :  { %v6155_v4 = vpop.xlane.xlu1 %6154 }
0x177a   :  { %v6156_v62 = vmul.f32 0.03125, %v6155_v4 }
0x177c   :  { %v11591_v32 = vsub.f32 %v5994_v17, %v6156_v62  ;;  %v6407_v62 = vld [vmem:[%s11673_s1 + $0x4d8] sm:$0xff] }
0x177e   :  { %v6158_v3 = vmul.f32 %v11591_v32, %v11591_v32 }
0x1780   :  { %v6159_v6 = vsel %vm6152_vm9, %v6158_v3, 0.0  ;;  %v6405_v3 = vld [vmem:[%s11673_s1 + $0x4c8] sm:$0xff] }
0x1781   :  { %6160 = vadd.xlane.f32.xlu0 %v6159_v6  ;;  %v6404_v6 = vld [vmem:[%s11673_s1 + $0x4c0] sm:$0xff] }
0x17f4   :  { %v6021_v28 = vpop.xlane.xlu0 %6020 }
0x17f5   :  { %v6031_v57 = vmul.f32 0.03125, %v6021_v28 }
0x17f7   :  { %v6035_v52 = vadd.f32 1e-06, %v6031_v57 }
0x17f9   :  { %8423 = vrsqrt.f32 %v6035_v52  ;;  %v6024_v5 = vpop.xlane.xlu1 %6023 }
0x17fa   :  { %v6032_v19 = vmul.f32 0.03125, %v6024_v5 }
0x17fb   :  { %v6027_v26 = vpop.xlane.xlu0 %6026 }
0x17fc   :  { %v6036_v43 = vadd.f32 1e-06, %v6032_v19  ;;  %v6033_v42 = vmul.f32 0.03125, %v6027_v26 }
0x17fd   :  { %v6030_v7 = vpop.xlane.xlu1 %6029 }
0x17fe   :  { %8425 = vrsqrt.f32 %v6036_v43  ;;  %v6037_v63 = vadd.f32 1e-06, %v6033_v42  ;;  %v6034_v56 = vmul.f32 0.03125, %v6030_v7 }
0x1800   :  { %8427 = vrsqrt.f32 %v6037_v63  ;;  %v6038_v2 = vadd.f32 1e-06, %v6034_v56 }
0x1802   :  { %8429 = vrsqrt.f32 %v6038_v2 }
0x1806   :  { %v8424_v9 = vpop.eup %8423 }
0x1807   :  { %v6043_v51 = vmul.f32 %v8424_v9, %v6011_v30  ;;  %v5937_v30 = vld [vmem:[%s11673_s1 + $0x480] sm:$0xff] }
0x1809   :  { %v6047_v1 = vmul.f32 %v6043_v51, %v5794_v14 }
0x180a   :  { %v6161_v10 = vpop.xlane.xlu0 %6160 }
0x180b   :  { %v8426_v38 = vpop.eup %8425  ;;  %v6162_v59 = vmul.f32 0.03125, %v6161_v10  ;;  %v6051_v44 = vadd.f32 %v6047_v1, %v5795_v20 }
0x180c   :  { %v6044_v24 = vmul.f32 %v8426_v38, %v6012_v45 }
0x180d   :  { %v8428_v60 = vpop.eup %8427  ;;  %v6163_v48 = vadd.f32 1e-06, %v6162_v59  ;;  %8028 = vmatprep.mubr.msk.f32.mxu0 %vm984_vm1, %v6051_v44 }
0x180e   :  { %v6048_v40 = vmul.f32 %v6044_v24, %v5794_v14  ;;  %v6045_v13 = vmul.f32 %v8428_v60, %v6013_v50 }
0x180f   :  { %v8430_v34 = vpop.eup %8429  ;;  %8431 = vrsqrt.f32 %v6163_v48 }
0x1810   :  { %v6046_v21 = vmul.f32 %v8430_v34, %v6014_v33  ;;  %v6052_v16 = vadd.f32 %v6048_v40, %v5795_v20  ;;  %v6049_v39 = vmul.f32 %v6045_v13, %v5794_v14 }
0x1812   :  { %8029 = vmatmul.mubr.msk.f32.vlgmr.msra.gmra.mxu0 %vm984_vm1, %v6052_v16  ;;  %v6053_v27 = vadd.f32 %v6049_v39, %v5795_v20  ;;  %v6050_v17 = vmul.f32 %v6046_v21, %v5794_v14 }
0x1813   :  { %8035 = vmatpush3.msra.mxu0 %v5940_v18 }
0x1814   :  { %8031 = vmatprep.mubr.msk.f32.mxu0 %vm984_vm1, %v6053_v27  ;;  %v6054_v58 = vadd.f32 %v6050_v17, %v5795_v20  ;;  %8036 = vmatprep.subr.mxu0 %v11786_v49 }
0x1815   :  { %8037 = vmatpush3.msra.mxu0 %v5939_v11 }
0x1816   :  { %8032 = vmatmul.mubr.msk.f32.gmra.mxu0 %vm984_vm1, %v6054_v58  ;;  %8038 = vmatprep.subr.mxu0 %v11786_v49 }
0x1817   :  { %8039 = vmatpush3.msra.mxu0 %v5938_v23  ;;  %8042 = vmatprep.mubr.msk.f32.mxu0 %vm8438_vm0, %v11786_v49 }
0x1818   :  { %8040 = vmatprep.subr.mxu0 %v11786_v49 }
0x1819   :  { %8041 = vmatpush3.msra.mxu0 %v5937_v30 }
0x181a   :  { %8052 = vmatprep.subr.mxu0 %v11786_v49 }
0x181c   :  { %v8432_v53 = vpop.eup %8431 }
0x181d   :  { %v6165_v0 = vmul.f32 %v8432_v53, %v11591_v32  ;;  %v6406_v32 = vld [vmem:[%s11673_s1 + $0x4d0] sm:$0xff] }
0x181f   :  { %v6166_v15 = vmul.f32 %v6165_v0, %v5794_v14 }
0x1821   :  { %v6167_v37 = vadd.f32 %v6166_v15, %v5795_v20 }
0x1823   :  { %8043 = vmatmul.mubr.msk.f32.vlgmr.msra.gmra.mxu0 %vm984_vm1, %v6167_v37 }
0x1824   :  { %8056 = vmatprep.mubr.msk.f32.mxu0 %vm8438_vm0, %v11786_v49 }
0x18d2   :  { %v8030_v45 = vpop.f32.mrf.mxu0 }
0x18d3   :  { %v6139_v36 = vadd.f32 %v8030_v45, %v5796_v25 }
0x18d4   :  { %v6133_v54 = vpop.f32.mrf.mxu0 }
0x18d5   :  { %8046 = vmatpush3.xpose.msk.msra.mxu1 %vm984_vm1, %v6139_v36  ;;  %v6134_v47 = vadd.f32 %v6133_v54, %v5796_v25 }
0x18d6   :  { %v8033_v50 = vpop.f32.mrf.mxu0  ;;  %8047 = vmatprep.subr.mxu1 %v11786_v49 }
0x18d7   :  { %v6149_v61 = vadd.f32 %v8033_v50, %v5796_v25 }
0x18d8   :  { %v6143_v33 = vpop.f32.mrf.mxu0 }
0x18d9   :  { %8048 = vmatpush3.xpose.msk.msra.mxu1 %vm984_vm1, %v6134_v47  ;;  %8053 = vmatpush3.xpose.msk.msra.mxu0 %vm984_vm1, %v6149_v61  ;;  %v6144_v29 = vadd.f32 %v6143_v33, %v5796_v25 }
0x18da   :  { %8054 = vmatprep.subr.mxu0 %v11786_v49  ;;  %6439 = vmatprep.subr.mxu1 %v6407_v62 }
0x18dd   :  { %8055 = vmatpush3.xpose.msk.msra.mxu0 %vm984_vm1, %v6144_v29 }
0x18e3   :  { %v6237_v55 = vpop.f32.mrf.mxu0 }
0x18e4   :  { %v6238_v12 = vadd.f32 %v6237_v55, %v5797_v41 }
0x18e5   :  { %v8044_v46 = vpop.f32.mrf.mxu0 }
0x18e6   :  { %v6320_v4 = vrot.slane %v6238_v12, 1  ;;  %8050 = vmatmul.mubr.msk.f32.vlgmr.msra.gmra.mxu1 %vm984_vm1, %v6238_v12 }
0x18e7   :  { %6475 = vmatprep.mubr.f32.mxu1 %v11786_v49  ;;  %6440 = vmatpush1.msra.mxu1 %v6406_v32 }
0x18e8   :  { %8057 = vmatmul.mubr.msk.f32.vlgmr.msra.gmra.mxu0 %vm984_vm1, %v6320_v4  ;;  %6441 = vmatprep.subr.mxu1 %v6405_v3 }
0x18e9   :  { %6442 = vmatpush1.msra.mxu1 %v6404_v6 }
0x19a6   :  { %v6316_v49 = vpop.f32.mrf.mxu1 }
0x19a8   :  { %v8051_v31 = vpop.f32.mrf.mxu1  ;;  %v6395_v8 = vpop.f32.mrf.mxu0 }
0x19a9   :  { %v6400_v22 = vrot.slane %v6395_v8, 7 }
0x19aa   :  { %v8058_v35 = vpop.f32.mrf.mxu0 }
0x19ab   :  { %v6402_v28 = vsel %vm5993_vm11, %v6316_v49, %v6400_v22 }
0x19ac   :  { %v6403_v57 = vmul.f32 0.17677669, %v6402_v28 }
0x19ae   :  { %6927 = vmatmul.mubr.msk.f32.vlgmr.msra.gmra.mxu1 %vm1867_vm15, %v6403_v57 }
0x1a6e   :  { %v6477_v52 = vpop.f32.mrf.mxu1 }
0x1a6f   :  { %v6482_v5 = vmul.f32 0.5, %v6477_v52 }
0x1a70   :  { %v6479_v19 = vpop.f32.mrf.mxu1 }
0x1a71   :  { %8433 = vtanh.f32 %v6482_v5  ;;  %v6483_v26 = vmul.f32 0.5, %v6479_v19 }
0x1a73   :  { %8435 = vtanh.f32 %v6483_v26 }
0x1a7e   :  { %v8434_v43 = vpop.eup %8433 }
0x1a7f   :  { %v6486_v42 = vadd.f32 1.0, %v8434_v43 }
0x1a80   :  { %v8436_v7 = vpop.eup %8435 }
0x1a81   :  { %v6487_v63 = vadd.f32 1.0, %v8436_v7  ;;  %v6488_v56 = vmul.f32 0.5, %v6486_v42 }
0x1a83   :  { %v6489_v2 = vmul.f32 0.5, %v6487_v63 }
0x1a85   :  { %v6492_v9 = vcombine.low %v6488_v56, %v6489_v2 }
0x1a87   :  { %6928 = vst.sshfl [vmem:[%s11675_s2] sm:$0x33 pattern:$0x76325410] %v6492_v9 }

</bundles_post_ra>
